<compile_context>
chip_gen: v5e
topology: v5e:2x2
jax: 0.10.0
libtpu: 0.0.40
codegen_flags: <defaults>
</compile_context>

<pallas_src>
import math
import jax
import jax.numpy as jnp
from jax import lax
from jax.experimental import pallas as pl
from jax.experimental.pallas import tpu as pltpu

# Small, module-consistent sizes (reference file uses d_model=512, heads=8, N=6).
D_MODEL = 128
HEADS = 4
D_K = D_MODEL // HEADS
D_FF = 256
N_LAYERS = 2
SEQ = 16
BATCH = 8        # BS = 128 -> full MXU M dimension
VOCAB = 64
EPS = 1e-6
MAX_SEQ_LEN = 200
BS = BATCH * SEQ


# ---------------------------------------------------------------------------
# Kernel
# ---------------------------------------------------------------------------
def _layernorm(x, alpha, bias):
    # NormLayer: alpha * (x - mean) / (std + eps) + bias, torch.std unbiased (/(D-1)).
    d = x.shape[-1]
    mean = jnp.mean(x, axis=-1, keepdims=True)
    xc = x - mean
    var = jnp.sum(xc * xc, axis=-1, keepdims=True) * (1.0 / (d - 1))
    return alpha * xc / (jnp.sqrt(var) + EPS) + bias


def fused_encoder_kernel(src_ref, keyvalid_ref, segr_ref, segc_ref, emb_ref, pe_ref,
                         n1a_ref, n1b_ref, wqkv_ref, bqkv_ref, wo_ref, bo_ref,
                         n2a_ref, n2b_ref, w1_ref, b1_ref, w2_ref, b2_ref,
                         fna_ref, fnb_ref,
                         o_ref, x_scr):
    layer = pl.program_id(0)
    n_layers = pl.num_programs(0)
    bs = src_ref.shape[0]
    vocab, d = emb_ref.shape

    # ---- layer 0: fused embedding lookup (one-hot matmul, exact f32) + PE -------
    @pl.when(layer == 0)
    def _():
        ids = src_ref[...]                                         # (BS, 1) int32
        iota = lax.broadcasted_iota(jnp.int32, (bs, vocab), 1)
        onehot = (iota == ids).astype(jnp.float32)                 # (BS, VOCAB)
        x0 = jnp.dot(onehot, emb_ref[...], preferred_element_type=jnp.float32)
        x_scr[...] = x0 * math.sqrt(d) + pe_ref[...]

    x = x_scr[...]                                                 # (BS, D) f32

    # ---- additive attention bias, built in-kernel (VPU filler, no O(BS^2) DMA) ---
    # -1e9 for masked keys (mask==0) and for cross-batch pairs, 0 otherwise.  f32.
    same_batch = segr_ref[...] == segc_ref[...]                    # (BS,1)==(1,BS) -> (BS,BS)
    key_bias = (keyvalid_ref[...] - 1.0) * 1e9                     # (1, BS)
    bias = jnp.where(same_batch, 0.0, -1e9) + key_bias             # (BS, BS) f32

    # ---- sublayer 1: pre-norm + fused-QKV multi-head attention + residual -------
    x2 = _layernorm(x, n1a_ref[0, 0], n1b_ref[0, 0])
    # 1/sqrt(d_k) is pre-folded into the wq / bq columns of wqkv / bqkv.
    qkv = jnp.dot(x2.astype(jnp.bfloat16), wqkv_ref[0],
                  preferred_element_type=jnp.float32) + bqkv_ref[0, 0]

    houts = []
    for h in range(HEADS):                                         # static unroll
        lo = h * D_K
        qh = qkv[:, lo:lo + D_K].astype(jnp.bfloat16)
        kh = qkv[:, d + lo:d + lo + D_K].astype(jnp.bfloat16)
        vh = qkv[:, 2 * d + lo:2 * d + lo + D_K].astype(jnp.bfloat16)
        # scores over the flattened token axis; cross-batch pairs are masked by `bias`
        scores = lax.dot_general(qh, kh, (((1,), (1,)), ((), ())),
                                 preferred_element_type=jnp.float32)
        scores = scores + bias                                     # f32 bias / max path
        scores = scores - jnp.max(scores, axis=-1, keepdims=True)
        p = jnp.exp(scores)
        p = p * pl.reciprocal(jnp.sum(p, axis=-1, keepdims=True), approx=True)
        houts.append(jnp.dot(p.astype(jnp.bfloat16), vh,
                             preferred_element_type=jnp.float32))  # (BS, D_K) f32

    # concat heads -> one K=128 output-projection push (instead of 4 K=32 pushes)
    attn_c = jnp.concatenate(houts, axis=-1).astype(jnp.bfloat16)  # (BS, D)
    attn = jnp.dot(attn_c, wo_ref[0], preferred_element_type=jnp.float32)
    x = x + attn + bo_ref[0, 0]

    # ---- sublayer 2: pre-norm + feed-forward + residual --------------------------
    x2 = _layernorm(x, n2a_ref[0, 0], n2b_ref[0, 0])
    h1 = jnp.maximum(
        jnp.dot(x2.astype(jnp.bfloat16), w1_ref[0],
                preferred_element_type=jnp.float32) + b1_ref[0, 0], 0.0)
    x = x + jnp.dot(h1.astype(jnp.bfloat16), w2_ref[0],
                    preferred_element_type=jnp.float32) + b2_ref[0, 0]

    # only persist the slab if another layer will consume it
    @pl.when(layer < n_layers - 1)
    def _():
        x_scr[...] = x

    # ---- final NormLayer + single HBM writeback on the last layer ---------------
    @pl.when(layer == n_layers - 1)
    def _():
        o_ref[...] = _layernorm(x, fna_ref[0], fnb_ref[0])


# ---------------------------------------------------------------------------
# Wrapper
# ---------------------------------------------------------------------------
def encoder_forward(src, mask, emb_table, pe, layer_params, final_a, final_b):
    B, S = src.shape
    bs = B * S
    scale = 1.0 / math.sqrt(D_K)

    # Stack per-layer weights along a leading layer axis (indexed by the grid).
    stk = lambda i: jnp.stack([p[i] for p in layer_params], axis=0)
    n1a, n1b = stk(0), stk(1)                                  # (N, 1, D)
    wq, bq = stk(2) * scale, stk(3) * scale                    # fold 1/sqrt(d_k) into q proj
    wk, bk, wv, bv = stk(4), stk(5), stk(6), stk(7)
    wo, bo = stk(8), stk(9)                                    # (N, D, D), (N, 1, D)
    n2a, n2b = stk(10), stk(11)
    w1, b1, w2, b2 = stk(12), stk(13), stk(14), stk(15)

    # MXU weights in bf16; biases / norm params stay f32.
    wqkv = jnp.concatenate([wq, wk, wv], axis=-1).astype(jnp.bfloat16)  # (N, D, 3D)
    bqkv = jnp.concatenate([bq, bk, bv], axis=-1)                       # (N, 1, 3D) f32
    wo_bf = wo.astype(jnp.bfloat16)
    w1_bf = w1.astype(jnp.bfloat16)
    w2_bf = w2.astype(jnp.bfloat16)

    # O(BS) mask/segment inputs; the (BS,BS) additive bias is built in-kernel.
    # TODO(synk): a fully-masked row would softmax over all B*S keys instead of the
    # per-batch S keys; both are degenerate-uniform, not hit by normal masks.
    key_valid = mask[:, 0, :].astype(jnp.float32).reshape(1, bs)        # (1, BS)
    seg = (jnp.arange(bs, dtype=jnp.int32) // S)
    seg_row = seg.reshape(bs, 1)
    seg_col = seg.reshape(1, bs)

    src_flat = src.reshape(bs, 1).astype(jnp.int32)
    pe_bs = jnp.tile(pe[:S], (B, 1)).astype(jnp.float32)                # (BS, D)

    def const_spec(a):
        nd = a.ndim
        return pl.BlockSpec(a.shape, lambda l, _nd=nd: (0,) * _nd)

    def layer_spec(a):
        nd = a.ndim
        return pl.BlockSpec((1,) + a.shape[1:],
                            lambda l, _nd=nd: (l,) + (0,) * (_nd - 1))

    in_specs = [const_spec(src_flat), const_spec(key_valid),
                const_spec(seg_row), const_spec(seg_col),
                const_spec(emb_table), const_spec(pe_bs),
                layer_spec(n1a), layer_spec(n1b),
                layer_spec(wqkv), layer_spec(bqkv),
                layer_spec(wo_bf), layer_spec(bo),
                layer_spec(n2a), layer_spec(n2b),
                layer_spec(w1_bf), layer_spec(b1),
                layer_spec(w2_bf), layer_spec(b2),
                const_spec(final_a), const_spec(final_b)]

    out = pl.pallas_call(
        fused_encoder_kernel,
        out_shape=jax.ShapeDtypeStruct((bs, D_MODEL), jnp.float32),
        grid=(N_LAYERS,),
        in_specs=in_specs,
        out_specs=pl.BlockSpec((bs, D_MODEL), lambda l: (0, 0)),
        scratch_shapes=[pltpu.VMEM((bs, D_MODEL), jnp.float32)],
        compiler_params=pltpu.CompilerParams(dimension_semantics=("arbitrary",)),
    )(src_flat, key_valid, seg_row, seg_col, emb_table, pe_bs,
      n1a, n1b, wqkv, bqkv, wo_bf, bo, n2a, n2b, w1_bf, b1, w2_bf, b2,
      final_a, final_b)
    return out.reshape(B, S, D_MODEL)


def positional_encoding(max_len, d):
    pos = jnp.arange(max_len, dtype=jnp.float32)[:, None]
    div = jnp.exp(jnp.arange(0, d, 2, dtype=jnp.float32) * (-math.log(10000.0) / d))
    pe = jnp.zeros((max_len, d), jnp.float32)
    pe = pe.at[:, 0::2].set(jnp.sin(pos * div))
    pe = pe.at[:, 1::2].set(jnp.cos(pos * div))
    return pe


# ---------------------------------------------------------------------------
# Pure-JAX reference (mirrors the PyTorch module, full f32)
# ---------------------------------------------------------------------------
def _ref_ln(x, a, b):
    mean = x.mean(-1, keepdims=True)
    xc = x - mean
    std = jnp.sqrt(jnp.sum(xc * xc, -1, keepdims=True) / (x.shape[-1] - 1))
    return a * xc / (std + EPS) + b


def _ref_layer(x, mask, p):
    n1a, n1b, wq, bq, wk, bk, wv, bv, wo, bo, n2a, n2b, w1, b1, w2, b2 = p
    B, S, D = x.shape
    x2 = _ref_ln(x, n1a, n1b)

    def split(t):
        return t.reshape(B, S, HEADS, D_K).transpose(0, 2, 1, 3)

    q, k, v = split(x2 @ wq + bq), split(x2 @ wk + bk), split(x2 @ wv + bv)
    scores = jnp.einsum('bhqd,bhkd->bhqk', q, k) / math.sqrt(D_K)
    scores = jnp.where(mask[:, None] == 0, -1e9, scores)
    att = jax.nn.softmax(scores, axis=-1)
    out = jnp.einsum('bhqk,bhkd->bhqd', att, v).transpose(0, 2, 1, 3).reshape(B, S, D)
    x = x + out @ wo + bo
    x2 = _ref_ln(x, n2a, n2b)
    return x + jnp.maximum(x2 @ w1 + b1, 0.0) @ w2 + b2


def ref_forward(src, mask, emb_table, pe, layer_params, final_a, final_b):
    x = emb_table[src] * math.sqrt(D_MODEL) + pe[: src.shape[1]][None]
    for p in layer_params:
        x = _ref_layer(x, mask, p)
    return _ref_ln(x, final_a, final_b)


# ---------------------------------------------------------------------------
# Deterministic parameter init
# ---------------------------------------------------------------------------
def init_layer(key):
    ks = jax.random.split(key, 12)

    def lin(kw, kb, din, dout):
        w = jax.random.normal(kw, (din, dout), jnp.float32) * 0.05
        b = jax.random.normal(kb, (1, dout), jnp.float32) * 0.05
        return w, b

    wq, bq = lin(ks[0], ks[1], D_MODEL, D_MODEL)
    wk, bk = lin(ks[2], ks[3], D_MODEL, D_MODEL)
    wv, bv = lin(ks[4], ks[5], D_MODEL, D_MODEL)
    wo, bo = lin(ks[6], ks[7], D_MODEL, D_MODEL)
    w1, b1 = lin(ks[8], ks[9], D_MODEL, D_FF)
    w2, b2 = lin(ks[10], ks[11], D_FF, D_MODEL)
    n1a = jnp.ones((1, D_MODEL), jnp.float32)
    n1b = jnp.zeros((1, D_MODEL), jnp.float32)
    n2a = jnp.ones((1, D_MODEL), jnp.float32)
    n2b = jnp.zeros((1, D_MODEL), jnp.float32)
    return (n1a, n1b, wq, bq, wk, bk, wv, bv, wo, bo, n2a, n2b, w1, b1, w2, b2)


if __name__ == "__main__":
    key = jax.random.PRNGKey(0)
    k_emb, k_src, *k_layers = jax.random.split(key, 2 + N_LAYERS)

    emb_table = jax.random.normal(k_emb, (VOCAB, D_MODEL), jnp.float32)  # nn.Embedding ~ N(0,1)
    pe = positional_encoding(MAX_SEQ_LEN, D_MODEL)
    layer_params = [init_layer(k) for k in k_layers]
    final_a = jnp.ones((1, D_MODEL), jnp.float32)
    final_b = jnp.zeros((1, D_MODEL), jnp.float32)

    src = jax.random.randint(k_src, (BATCH, SEQ), 0, VOCAB, dtype=jnp.int32)
    # mask shape (B, 1, S): 1 = attend, 0 = masked key (matches mask.unsqueeze(1) in torch).
    mask = jnp.ones((BATCH, 1, SEQ), jnp.int32).at[1, 0, SEQ - 2:].set(0)

    out = encoder_forward(src, mask, emb_table, pe, layer_params, final_a, final_b)
    out = jax.block_until_ready(out)

    ref = ref_forward(src, mask, emb_table, pe, layer_params, final_a, final_b)
    assert out.shape == (BATCH, SEQ, D_MODEL)
    assert jnp.allclose(out, ref, rtol=2e-2, atol=2e-2), "mismatch vs reference"

    # TODO(synk): dropout layers are inference-mode identity (no stochastic masking in-kernel).
    print("KERNEL_OK")
</pallas_src>

<mosaic_0001>
module attributes {stable_mosaic.version = 11 : i64} {
  func.func @fused_encoder_kernel(%arg0: i32, %arg1: memref<128x1xi32, #tpu.memory_space<vmem>>, %arg2: memref<1x128xf32, #tpu.memory_space<vmem>>, %arg3: memref<128x1xi32, #tpu.memory_space<vmem>>, %arg4: memref<1x128xi32, #tpu.memory_space<vmem>>, %arg5: memref<64x128xf32, #tpu.memory_space<vmem>>, %arg6: memref<128x128xf32, #tpu.memory_space<vmem>>, %arg7: memref<1x1x128xf32, #tpu.memory_space<vmem>>, %arg8: memref<1x1x128xf32, #tpu.memory_space<vmem>>, %arg9: memref<1x128x384xbf16, #tpu.memory_space<vmem>>, %arg10: memref<1x1x384xf32, #tpu.memory_space<vmem>>, %arg11: memref<1x128x128xbf16, #tpu.memory_space<vmem>>, %arg12: memref<1x1x128xf32, #tpu.memory_space<vmem>>, %arg13: memref<1x1x128xf32, #tpu.memory_space<vmem>>, %arg14: memref<1x1x128xf32, #tpu.memory_space<vmem>>, %arg15: memref<1x128x256xbf16, #tpu.memory_space<vmem>>, %arg16: memref<1x1x256xf32, #tpu.memory_space<vmem>>, %arg17: memref<1x256x128xbf16, #tpu.memory_space<vmem>>, %arg18: memref<1x1x128xf32, #tpu.memory_space<vmem>>, %arg19: memref<1x128xf32, #tpu.memory_space<vmem>>, %arg20: memref<1x128xf32, #tpu.memory_space<vmem>>, %arg21: memref<128x128xf32, #tpu.memory_space<vmem>>, %arg22: memref<128x128xf32, #tpu.memory_space<vmem>>) attributes {dimension_semantics = [#tpu.dimension_semantics<arbitrary>], iteration_bounds = array<i64: 2>, scalar_prefetch = 0 : i64, scratch_operands = 1 : i64, tpu.core_type = #tpu.core_type<tc>, window_params = [{pipeline_mode = #tpu.pipeline_mode<synchronous>, transform_indices = @transform_0, window_bounds = array<i64: 128, 1>}, {pipeline_mode = #tpu.pipeline_mode<synchronous>, transform_indices = @transform_1, window_bounds = array<i64: 1, 128>}, {pipeline_mode = #tpu.pipeline_mode<synchronous>, transform_indices = @transform_2, window_bounds = array<i64: 128, 1>}, {pipeline_mode = #tpu.pipeline_mode<synchronous>, transform_indices = @transform_3, window_bounds = array<i64: 1, 128>}, {pipeline_mode = #tpu.pipeline_mode<synchronous>, transform_indices = @transform_4, window_bounds = array<i64: 64, 128>}, {pipeline_mode = #tpu.pipeline_mode<synchronous>, transform_indices = @transform_5, window_bounds = array<i64: 128, 128>}, {transform_indices = @transform_6, window_bounds = array<i64: 1, 1, 128>}, {transform_indices = @transform_7, window_bounds = array<i64: 1, 1, 128>}, {transform_indices = @transform_8, window_bounds = array<i64: 1, 128, 384>}, {transform_indices = @transform_9, window_bounds = array<i64: 1, 1, 384>}, {transform_indices = @transform_10, window_bounds = array<i64: 1, 128, 128>}, {transform_indices = @transform_11, window_bounds = array<i64: 1, 1, 128>}, {transform_indices = @transform_12, window_bounds = array<i64: 1, 1, 128>}, {transform_indices = @transform_13, window_bounds = array<i64: 1, 1, 128>}, {transform_indices = @transform_14, window_bounds = array<i64: 1, 128, 256>}, {transform_indices = @transform_15, window_bounds = array<i64: 1, 1, 256>}, {transform_indices = @transform_16, window_bounds = array<i64: 1, 256, 128>}, {transform_indices = @transform_17, window_bounds = array<i64: 1, 1, 128>}, {pipeline_mode = #tpu.pipeline_mode<synchronous>, transform_indices = @transform_18, window_bounds = array<i64: 1, 128>}, {pipeline_mode = #tpu.pipeline_mode<synchronous>, transform_indices = @transform_19, window_bounds = array<i64: 1, 128>}, {pipeline_mode = #tpu.pipeline_mode<synchronous>, transform_indices = @transform_20, window_bounds = array<i64: 128, 128>}]} {
    %c0_i32 = arith.constant 0 : i32
    %0 = arith.cmpi eq, %arg0, %c0_i32 : i32
    %1 = arith.extui %0 : i1 to i32
    %c0_i32_0 = arith.constant 0 : i32
    %2 = arith.cmpi ne, %1, %c0_i32_0 : i32
    scf.if %2 {
      %c0_81 = arith.constant 0 : index
      %c0_82 = arith.constant 0 : index
      %198 = vector.load %arg1[%c0_81, %c0_82] : memref<128x1xi32, #tpu.memory_space<vmem>>, vector<128x1xi32>
      %199 = tpu.iota {dimensions = array<i32: 1>} : vector<128x64xi32>
      %200 = vector.broadcast %198 : vector<128x1xi32> to vector<128x64xi32>
      %201 = arith.cmpi eq, %199, %200 : vector<128x64xi32>
      %202 = arith.extui %201 : vector<128x64xi1> to vector<128x64xi32>
      %203 = arith.sitofp %202 : vector<128x64xi32> to vector<128x64xf32>
      %c0_83 = arith.constant 0 : index
      %c0_84 = arith.constant 0 : index
      %204 = vector.load %arg5[%c0_83, %c0_84] : memref<64x128xf32, #tpu.memory_space<vmem>>, vector<64x128xf32>
      %cst_85 = arith.constant dense<0.000000e+00> : vector<128x128xf32>
      %205 = tpu.matmul %203, %204, %cst_85 {dimension_numbers = #tpu.dot_dimension_numbers<[1], [0], [0], [1], [0, 0, 1, 1], [], []>} : vector<128x64xf32>, vector<64x128xf32>, vector<128x128xf32> -> vector<128x128xf32>
      %cst_86 = arith.constant 11.3137083 : f32
      %206 = vector.broadcast %cst_86 : f32 to vector<128x128xf32>
      %207 = arith.mulf %205, %206 : vector<128x128xf32>
      %c0_87 = arith.constant 0 : index
      %c0_88 = arith.constant 0 : index
      %208 = vector.load %arg6[%c0_87, %c0_88] : memref<128x128xf32, #tpu.memory_space<vmem>>, vector<128x128xf32>
      %209 = arith.addf %207, %208 : vector<128x128xf32>
      %c0_89 = arith.constant 0 : index
      %c0_90 = arith.constant 0 : index
      %210 = vector.load %arg22[%c0_89, %c0_90] : memref<128x128xf32, #tpu.memory_space<vmem>>, vector<128x128xf32>
      tpu.vector_store %arg22[%c0_89, %c0_90], %209 {strides = array<i32>} : memref<128x128xf32, #tpu.memory_space<vmem>>, vector<128x128xf32>,
    } else {
    }
    %c0 = arith.constant 0 : index
    %c0_1 = arith.constant 0 : index
    %3 = vector.load %arg22[%c0, %c0_1] : memref<128x128xf32, #tpu.memory_space<vmem>>, vector<128x128xf32>
    %c0_2 = arith.constant 0 : index
    %c0_3 = arith.constant 0 : index
    %4 = vector.load %arg3[%c0_2, %c0_3] : memref<128x1xi32, #tpu.memory_space<vmem>>, vector<128x1xi32>
    %c0_4 = arith.constant 0 : index
    %c0_5 = arith.constant 0 : index
    %5 = vector.load %arg4[%c0_4, %c0_5] : memref<1x128xi32, #tpu.memory_space<vmem>>, vector<1x128xi32>
    %6 = vector.broadcast %4 : vector<128x1xi32> to vector<128x128xi32>
    %7 = vector.broadcast %5 : vector<1x128xi32> to vector<128x128xi32>
    %8 = arith.cmpi eq, %6, %7 : vector<128x128xi32>
    %c0_6 = arith.constant 0 : index
    %c0_7 = arith.constant 0 : index
    %9 = vector.load %arg2[%c0_6, %c0_7] : memref<1x128xf32, #tpu.memory_space<vmem>>, vector<1x128xf32>
    %cst = arith.constant 1.000000e+00 : f32
    %10 = vector.broadcast %cst : f32 to vector<1x128xf32>
    %11 = arith.subf %9, %10 : vector<1x128xf32>
    %cst_8 = arith.constant 1.000000e+09 : f32
    %12 = vector.broadcast %cst_8 : f32 to vector<1x128xf32>
    %13 = arith.mulf %11, %12 : vector<1x128xf32>
    %cst_9 = arith.constant 0.000000e+00 : f32
    %cst_10 = arith.constant -1.000000e+09 : f32
    %14 = vector.broadcast %cst_9 : f32 to vector<128x128xf32>
    %15 = vector.broadcast %cst_10 : f32 to vector<128x128xf32>
    %16 = arith.select %8, %14, %15 : vector<128x128xi1>, vector<128x128xf32>
    %17 = vector.broadcast %13 : vector<1x128xf32> to vector<128x128xf32>
    %18 = arith.addf %16, %17 : vector<128x128xf32>
    %c0_11 = arith.constant 0 : index
    %c0_12 = arith.constant 0 : index
    %c0_13 = arith.constant 0 : index
    %19 = vector.load %arg7[%c0_11, %c0_12, %c0_13] : memref<1x1x128xf32, #tpu.memory_space<vmem>>, vector<1x1x128xf32>
    %20 = vector.shape_cast %19 : vector<1x1x128xf32> to vector<128xf32>
    %c0_14 = arith.constant 0 : index
    %c0_15 = arith.constant 0 : index
    %c0_16 = arith.constant 0 : index
    %21 = vector.load %arg8[%c0_14, %c0_15, %c0_16] : memref<1x1x128xf32, #tpu.memory_space<vmem>>, vector<1x1x128xf32>
    %22 = vector.shape_cast %21 : vector<1x1x128xf32> to vector<128xf32>
    %cst_17 = arith.constant dense<0.000000e+00> : vector<128xf32>
    %23 = vector.multi_reduction <add>, %3, %cst_17 [1] : vector<128x128xf32> to vector<128xf32>
    %24 = vector.shape_cast %23 : vector<128xf32> to vector<128x1xf32>
    %cst_18 = arith.constant 1.280000e+02 : f32
    %25 = vector.broadcast %cst_18 : f32 to vector<128x1xf32>
    %26 = arith.divf %24, %25 : vector<128x1xf32>
    %27 = vector.broadcast %26 : vector<128x1xf32> to vector<128x128xf32>
    %28 = arith.subf %3, %27 : vector<128x128xf32>
    %29 = arith.mulf %28, %28 : vector<128x128xf32>
    %cst_19 = arith.constant dense<0.000000e+00> : vector<128xf32>
    %30 = vector.multi_reduction <add>, %29, %cst_19 [1] : vector<128x128xf32> to vector<128xf32>
    %31 = vector.shape_cast %30 : vector<128xf32> to vector<128x1xf32>
    %cst_20 = arith.constant 0.00787401571 : f32
    %32 = vector.broadcast %cst_20 : f32 to vector<128x1xf32>
    %33 = arith.mulf %31, %32 : vector<128x1xf32>
    %34 = vector.shape_cast %20 : vector<128xf32> to vector<1x128xf32>
    %35 = vector.broadcast %34 : vector<1x128xf32> to vector<128x128xf32>
    %36 = arith.mulf %35, %28 : vector<128x128xf32>
    %37 = math.sqrt %33 : vector<128x1xf32>
    %cst_21 = arith.constant 9.99999997E-7 : f32
    %38 = vector.broadcast %cst_21 : f32 to vector<128x1xf32>
    %39 = arith.addf %37, %38 : vector<128x1xf32>
    %40 = vector.broadcast %39 : vector<128x1xf32> to vector<128x128xf32>
    %41 = arith.divf %36, %40 : vector<128x128xf32>
    %42 = vector.shape_cast %22 : vector<128xf32> to vector<1x128xf32>
    %43 = vector.broadcast %42 : vector<1x128xf32> to vector<128x128xf32>
    %44 = arith.addf %41, %43 : vector<128x128xf32>
    %45 = arith.truncf %44 : vector<128x128xf32> to vector<128x128xbf16>
    %c0_22 = arith.constant 0 : index
    %c0_23 = arith.constant 0 : index
    %c0_24 = arith.constant 0 : index
    %46 = vector.load %arg9[%c0_22, %c0_23, %c0_24] : memref<1x128x384xbf16, #tpu.memory_space<vmem>>, vector<1x128x384xbf16>
    %47 = vector.shape_cast %46 : vector<1x128x384xbf16> to vector<128x384xbf16>
    %cst_25 = arith.constant dense<0.000000e+00> : vector<128x384xf32>
    %48 = tpu.matmul %45, %47, %cst_25 {dimension_numbers = #tpu.dot_dimension_numbers<[1], [0], [0], [1], [0, 0, 1, 1], [], []>} : vector<128x128xbf16>, vector<128x384xbf16>, vector<128x384xf32> -> vector<128x384xf32>
    %c0_26 = arith.constant 0 : index
    %c0_27 = arith.constant 0 : index
    %c0_28 = arith.constant 0 : index
    %49 = vector.load %arg10[%c0_26, %c0_27, %c0_28] : memref<1x1x384xf32, #tpu.memory_space<vmem>>, vector<1x1x384xf32>
    %50 = vector.shape_cast %49 : vector<1x1x384xf32> to vector<384xf32>
    %51 = vector.shape_cast %50 : vector<384xf32> to vector<1x384xf32>
    %52 = vector.broadcast %51 : vector<1x384xf32> to vector<128x384xf32>
    %53 = arith.addf %48, %52 : vector<128x384xf32>
    %54 = vector.extract_strided_slice %53 {offsets = [0, 0], sizes = [128, 32], strides = [1, 1]} : vector<128x384xf32> to vector<128x32xf32>
    %55 = arith.truncf %54 : vector<128x32xf32> to vector<128x32xbf16>
    %56 = vector.extract_strided_slice %53 {offsets = [0, 128], sizes = [128, 32], strides = [1, 1]} : vector<128x384xf32> to vector<128x32xf32>
    %57 = arith.truncf %56 : vector<128x32xf32> to vector<128x32xbf16>
    %58 = vector.extract_strided_slice %53 {offsets = [0, 256], sizes = [128, 32], strides = [1, 1]} : vector<128x384xf32> to vector<128x32xf32>
    %59 = arith.truncf %58 : vector<128x32xf32> to vector<128x32xbf16>
    %cst_29 = arith.constant dense<0.000000e+00> : vector<128x128xf32>
    %60 = tpu.matmul %55, %57, %cst_29 {dimension_numbers = #tpu.dot_dimension_numbers<[1], [1], [0], [0], [0, 0, 1, 0], [], []>} : vector<128x32xbf16>, vector<128x32xbf16>, vector<128x128xf32> -> vector<128x128xf32>
    %61 = arith.addf %60, %18 : vector<128x128xf32>
    %cst_30 = arith.constant dense<0xFF800000> : vector<128xf32>
    %62 = vector.multi_reduction <maximumf>, %61, %cst_30 [1] : vector<128x128xf32> to vector<128xf32>
    %63 = vector.shape_cast %62 : vector<128xf32> to vector<128x1xf32>
    %64 = vector.broadcast %63 : vector<128x1xf32> to vector<128x128xf32>
    %65 = arith.subf %61, %64 : vector<128x128xf32>
    %66 = math.exp %65 : vector<128x128xf32>
    %cst_31 = arith.constant dense<0.000000e+00> : vector<128xf32>
    %67 = vector.multi_reduction <add>, %66, %cst_31 [1] : vector<128x128xf32> to vector<128xf32>
    %68 = vector.shape_cast %67 : vector<128xf32> to vector<128x1xf32>
    %69 = tpu.reciprocal %68 {approx = true} : vector<128x1xf32> -> vector<128x1xf32>
    %70 = vector.broadcast %69 : vector<128x1xf32> to vector<128x128xf32>
    %71 = arith.mulf %66, %70 : vector<128x128xf32>
    %72 = arith.truncf %71 : vector<128x128xf32> to vector<128x128xbf16>
    %cst_32 = arith.constant dense<0.000000e+00> : vector<128x32xf32>
    %73 = tpu.matmul %72, %59, %cst_32 {dimension_numbers = #tpu.dot_dimension_numbers<[1], [0], [0], [1], [0, 0, 1, 1], [], []>} : vector<128x128xbf16>, vector<128x32xbf16>, vector<128x32xf32> -> vector<128x32xf32>
    %74 = vector.extract_strided_slice %53 {offsets = [0, 32], sizes = [128, 32], strides = [1, 1]} : vector<128x384xf32> to vector<128x32xf32>
    %75 = arith.truncf %74 : vector<128x32xf32> to vector<128x32xbf16>
    %76 = vector.extract_strided_slice %53 {offsets = [0, 160], sizes = [128, 32], strides = [1, 1]} : vector<128x384xf32> to vector<128x32xf32>
    %77 = arith.truncf %76 : vector<128x32xf32> to vector<128x32xbf16>
    %78 = vector.extract_strided_slice %53 {offsets = [0, 288], sizes = [128, 32], strides = [1, 1]} : vector<128x384xf32> to vector<128x32xf32>
    %79 = arith.truncf %78 : vector<128x32xf32> to vector<128x32xbf16>
    %cst_33 = arith.constant dense<0.000000e+00> : vector<128x128xf32>
    %80 = tpu.matmul %75, %77, %cst_33 {dimension_numbers = #tpu.dot_dimension_numbers<[1], [1], [0], [0], [0, 0, 1, 0], [], []>} : vector<128x32xbf16>, vector<128x32xbf16>, vector<128x128xf32> -> vector<128x128xf32>
    %81 = arith.addf %80, %18 : vector<128x128xf32>
    %cst_34 = arith.constant dense<0xFF800000> : vector<128xf32>
    %82 = vector.multi_reduction <maximumf>, %81, %cst_34 [1] : vector<128x128xf32> to vector<128xf32>
    %83 = vector.shape_cast %82 : vector<128xf32> to vector<128x1xf32>
    %84 = vector.broadcast %83 : vector<128x1xf32> to vector<128x128xf32>
    %85 = arith.subf %81, %84 : vector<128x128xf32>
    %86 = math.exp %85 : vector<128x128xf32>
    %cst_35 = arith.constant dense<0.000000e+00> : vector<128xf32>
    %87 = vector.multi_reduction <add>, %86, %cst_35 [1] : vector<128x128xf32> to vector<128xf32>
    %88 = vector.shape_cast %87 : vector<128xf32> to vector<128x1xf32>
    %89 = tpu.reciprocal %88 {approx = true} : vector<128x1xf32> -> vector<128x1xf32>
    %90 = vector.broadcast %89 : vector<128x1xf32> to vector<128x128xf32>
    %91 = arith.mulf %86, %90 : vector<128x128xf32>
    %92 = arith.truncf %91 : vector<128x128xf32> to vector<128x128xbf16>
    %cst_36 = arith.constant dense<0.000000e+00> : vector<128x32xf32>
    %93 = tpu.matmul %92, %79, %cst_36 {dimension_numbers = #tpu.dot_dimension_numbers<[1], [0], [0], [1], [0, 0, 1, 1], [], []>} : vector<128x128xbf16>, vector<128x32xbf16>, vector<128x32xf32> -> vector<128x32xf32>
    %94 = vector.extract_strided_slice %53 {offsets = [0, 64], sizes = [128, 32], strides = [1, 1]} : vector<128x384xf32> to vector<128x32xf32>
    %95 = arith.truncf %94 : vector<128x32xf32> to vector<128x32xbf16>
    %96 = vector.extract_strided_slice %53 {offsets = [0, 192], sizes = [128, 32], strides = [1, 1]} : vector<128x384xf32> to vector<128x32xf32>
    %97 = arith.truncf %96 : vector<128x32xf32> to vector<128x32xbf16>
    %98 = vector.extract_strided_slice %53 {offsets = [0, 320], sizes = [128, 32], strides = [1, 1]} : vector<128x384xf32> to vector<128x32xf32>
    %99 = arith.truncf %98 : vector<128x32xf32> to vector<128x32xbf16>
    %cst_37 = arith.constant dense<0.000000e+00> : vector<128x128xf32>
    %100 = tpu.matmul %95, %97, %cst_37 {dimension_numbers = #tpu.dot_dimension_numbers<[1], [1], [0], [0], [0, 0, 1, 0], [], []>} : vector<128x32xbf16>, vector<128x32xbf16>, vector<128x128xf32> -> vector<128x128xf32>
    %101 = arith.addf %100, %18 : vector<128x128xf32>
    %cst_38 = arith.constant dense<0xFF800000> : vector<128xf32>
    %102 = vector.multi_reduction <maximumf>, %101, %cst_38 [1] : vector<128x128xf32> to vector<128xf32>
    %103 = vector.shape_cast %102 : vector<128xf32> to vector<128x1xf32>
    %104 = vector.broadcast %103 : vector<128x1xf32> to vector<128x128xf32>
    %105 = arith.subf %101, %104 : vector<128x128xf32>
    %106 = math.exp %105 : vector<128x128xf32>
    %cst_39 = arith.constant dense<0.000000e+00> : vector<128xf32>
    %107 = vector.multi_reduction <add>, %106, %cst_39 [1] : vector<128x128xf32> to vector<128xf32>
    %108 = vector.shape_cast %107 : vector<128xf32> to vector<128x1xf32>
    %109 = tpu.reciprocal %108 {approx = true} : vector<128x1xf32> -> vector<128x1xf32>
    %110 = vector.broadcast %109 : vector<128x1xf32> to vector<128x128xf32>
    %111 = arith.mulf %106, %110 : vector<128x128xf32>
    %112 = arith.truncf %111 : vector<128x128xf32> to vector<128x128xbf16>
    %cst_40 = arith.constant dense<0.000000e+00> : vector<128x32xf32>
    %113 = tpu.matmul %112, %99, %cst_40 {dimension_numbers = #tpu.dot_dimension_numbers<[1], [0], [0], [1], [0, 0, 1, 1], [], []>} : vector<128x128xbf16>, vector<128x32xbf16>, vector<128x32xf32> -> vector<128x32xf32>
    %114 = vector.extract_strided_slice %53 {offsets = [0, 96], sizes = [128, 32], strides = [1, 1]} : vector<128x384xf32> to vector<128x32xf32>
    %115 = arith.truncf %114 : vector<128x32xf32> to vector<128x32xbf16>
    %116 = vector.extract_strided_slice %53 {offsets = [0, 224], sizes = [128, 32], strides = [1, 1]} : vector<128x384xf32> to vector<128x32xf32>
    %117 = arith.truncf %116 : vector<128x32xf32> to vector<128x32xbf16>
    %118 = vector.extract_strided_slice %53 {offsets = [0, 352], sizes = [128, 32], strides = [1, 1]} : vector<128x384xf32> to vector<128x32xf32>
    %119 = arith.truncf %118 : vector<128x32xf32> to vector<128x32xbf16>
    %cst_41 = arith.constant dense<0.000000e+00> : vector<128x128xf32>
    %120 = tpu.matmul %115, %117, %cst_41 {dimension_numbers = #tpu.dot_dimension_numbers<[1], [1], [0], [0], [0, 0, 1, 0], [], []>} : vector<128x32xbf16>, vector<128x32xbf16>, vector<128x128xf32> -> vector<128x128xf32>
    %121 = arith.addf %120, %18 : vector<128x128xf32>
    %cst_42 = arith.constant dense<0xFF800000> : vector<128xf32>
    %122 = vector.multi_reduction <maximumf>, %121, %cst_42 [1] : vector<128x128xf32> to vector<128xf32>
    %123 = vector.shape_cast %122 : vector<128xf32> to vector<128x1xf32>
    %124 = vector.broadcast %123 : vector<128x1xf32> to vector<128x128xf32>
    %125 = arith.subf %121, %124 : vector<128x128xf32>
    %126 = math.exp %125 : vector<128x128xf32>
    %cst_43 = arith.constant dense<0.000000e+00> : vector<128xf32>
    %127 = vector.multi_reduction <add>, %126, %cst_43 [1] : vector<128x128xf32> to vector<128xf32>
    %128 = vector.shape_cast %127 : vector<128xf32> to vector<128x1xf32>
    %129 = tpu.reciprocal %128 {approx = true} : vector<128x1xf32> -> vector<128x1xf32>
    %130 = vector.broadcast %129 : vector<128x1xf32> to vector<128x128xf32>
    %131 = arith.mulf %126, %130 : vector<128x128xf32>
    %132 = arith.truncf %131 : vector<128x128xf32> to vector<128x128xbf16>
    %cst_44 = arith.constant dense<0.000000e+00> : vector<128x32xf32>
    %133 = tpu.matmul %132, %119, %cst_44 {dimension_numbers = #tpu.dot_dimension_numbers<[1], [0], [0], [1], [0, 0, 1, 1], [], []>} : vector<128x128xbf16>, vector<128x32xbf16>, vector<128x32xf32> -> vector<128x32xf32>
    %134 = tpu.concatenate %73, %93, %113, %133 in 1 : vector<128x32xf32>, vector<128x32xf32>, vector<128x32xf32>, vector<128x32xf32> -> vector<128x128xf32>
    %135 = arith.truncf %134 : vector<128x128xf32> to vector<128x128xbf16>
    %c0_45 = arith.constant 0 : index
    %c0_46 = arith.constant 0 : index
    %c0_47 = arith.constant 0 : index
    %136 = vector.load %arg11[%c0_45, %c0_46, %c0_47] : memref<1x128x128xbf16, #tpu.memory_space<vmem>>, vector<1x128x128xbf16>
    %137 = vector.shape_cast %136 : vector<1x128x128xbf16> to vector<128x128xbf16>
    %cst_48 = arith.constant dense<0.000000e+00> : vector<128x128xf32>
    %138 = tpu.matmul %135, %137, %cst_48 {dimension_numbers = #tpu.dot_dimension_numbers<[1], [0], [0], [1], [0, 0, 1, 1], [], []>} : vector<128x128xbf16>, vector<128x128xbf16>, vector<128x128xf32> -> vector<128x128xf32>
    %139 = arith.addf %3, %138 : vector<128x128xf32>
    %c0_49 = arith.constant 0 : index
    %c0_50 = arith.constant 0 : index
    %c0_51 = arith.constant 0 : index
    %140 = vector.load %arg12[%c0_49, %c0_50, %c0_51] : memref<1x1x128xf32, #tpu.memory_space<vmem>>, vector<1x1x128xf32>
    %141 = vector.shape_cast %140 : vector<1x1x128xf32> to vector<128xf32>
    %142 = vector.shape_cast %141 : vector<128xf32> to vector<1x128xf32>
    %143 = vector.broadcast %142 : vector<1x128xf32> to vector<128x128xf32>
    %144 = arith.addf %139, %143 : vector<128x128xf32>
    %c0_52 = arith.constant 0 : index
    %c0_53 = arith.constant 0 : index
    %c0_54 = arith.constant 0 : index
    %145 = vector.load %arg13[%c0_52, %c0_53, %c0_54] : memref<1x1x128xf32, #tpu.memory_space<vmem>>, vector<1x1x128xf32>
    %146 = vector.shape_cast %145 : vector<1x1x128xf32> to vector<128xf32>
    %c0_55 = arith.constant 0 : index
    %c0_56 = arith.constant 0 : index
    %c0_57 = arith.constant 0 : index
    %147 = vector.load %arg14[%c0_55, %c0_56, %c0_57] : memref<1x1x128xf32, #tpu.memory_space<vmem>>, vector<1x1x128xf32>
    %148 = vector.shape_cast %147 : vector<1x1x128xf32> to vector<128xf32>
    %cst_58 = arith.constant dense<0.000000e+00> : vector<128xf32>
    %149 = vector.multi_reduction <add>, %144, %cst_58 [1] : vector<128x128xf32> to vector<128xf32>
    %150 = vector.shape_cast %149 : vector<128xf32> to vector<128x1xf32>
    %cst_59 = arith.constant 1.280000e+02 : f32
    %151 = vector.broadcast %cst_59 : f32 to vector<128x1xf32>
    %152 = arith.divf %150, %151 : vector<128x1xf32>
    %153 = vector.broadcast %152 : vector<128x1xf32> to vector<128x128xf32>
    %154 = arith.subf %144, %153 : vector<128x128xf32>
    %155 = arith.mulf %154, %154 : vector<128x128xf32>
    %cst_60 = arith.constant dense<0.000000e+00> : vector<128xf32>
    %156 = vector.multi_reduction <add>, %155, %cst_60 [1] : vector<128x128xf32> to vector<128xf32>
    %157 = vector.shape_cast %156 : vector<128xf32> to vector<128x1xf32>
    %cst_61 = arith.constant 0.00787401571 : f32
    %158 = vector.broadcast %cst_61 : f32 to vector<128x1xf32>
    %159 = arith.mulf %157, %158 : vector<128x1xf32>
    %160 = vector.shape_cast %146 : vector<128xf32> to vector<1x128xf32>
    %161 = vector.broadcast %160 : vector<1x128xf32> to vector<128x128xf32>
    %162 = arith.mulf %161, %154 : vector<128x128xf32>
    %163 = math.sqrt %159 : vector<128x1xf32>
    %cst_62 = arith.constant 9.99999997E-7 : f32
    %164 = vector.broadcast %cst_62 : f32 to vector<128x1xf32>
    %165 = arith.addf %163, %164 : vector<128x1xf32>
    %166 = vector.broadcast %165 : vector<128x1xf32> to vector<128x128xf32>
    %167 = arith.divf %162, %166 : vector<128x128xf32>
    %168 = vector.shape_cast %148 : vector<128xf32> to vector<1x128xf32>
    %169 = vector.broadcast %168 : vector<1x128xf32> to vector<128x128xf32>
    %170 = arith.addf %167, %169 : vector<128x128xf32>
    %171 = arith.truncf %170 : vector<128x128xf32> to vector<128x128xbf16>
    %c0_63 = arith.constant 0 : index
    %c0_64 = arith.constant 0 : index
    %c0_65 = arith.constant 0 : index
    %172 = vector.load %arg15[%c0_63, %c0_64, %c0_65] : memref<1x128x256xbf16, #tpu.memory_space<vmem>>, vector<1x128x256xbf16>
    %173 = vector.shape_cast %172 : vector<1x128x256xbf16> to vector<128x256xbf16>
    %cst_66 = arith.constant dense<0.000000e+00> : vector<128x256xf32>
    %174 = tpu.matmul %171, %173, %cst_66 {dimension_numbers = #tpu.dot_dimension_numbers<[1], [0], [0], [1], [0, 0, 1, 1], [], []>} : vector<128x128xbf16>, vector<128x256xbf16>, vector<128x256xf32> -> vector<128x256xf32>
    %c0_67 = arith.constant 0 : index
    %c0_68 = arith.constant 0 : index
    %c0_69 = arith.constant 0 : index
    %175 = vector.load %arg16[%c0_67, %c0_68, %c0_69] : memref<1x1x256xf32, #tpu.memory_space<vmem>>, vector<1x1x256xf32>
    %176 = vector.shape_cast %175 : vector<1x1x256xf32> to vector<256xf32>
    %177 = vector.shape_cast %176 : vector<256xf32> to vector<1x256xf32>
    %178 = vector.broadcast %177 : vector<1x256xf32> to vector<128x256xf32>
    %179 = arith.addf %174, %178 : vector<128x256xf32>
    %cst_70 = arith.constant 0.000000e+00 : f32
    %180 = vector.broadcast %cst_70 : f32 to vector<128x256xf32>
    %181 = arith.maximumf %179, %180 : vector<128x256xf32>
    %182 = arith.truncf %181 : vector<128x256xf32> to vector<128x256xbf16>
    %c0_71 = arith.constant 0 : index
    %c0_72 = arith.constant 0 : index
    %c0_73 = arith.constant 0 : index
    %183 = vector.load %arg17[%c0_71, %c0_72, %c0_73] : memref<1x256x128xbf16, #tpu.memory_space<vmem>>, vector<1x256x128xbf16>
    %184 = vector.shape_cast %183 : vector<1x256x128xbf16> to vector<256x128xbf16>
    %cst_74 = arith.constant dense<0.000000e+00> : vector<128x128xf32>
    %185 = tpu.matmul %182, %184, %cst_74 {dimension_numbers = #tpu.dot_dimension_numbers<[1], [0], [0], [1], [0, 0, 1, 1], [], []>} : vector<128x256xbf16>, vector<256x128xbf16>, vector<128x128xf32> -> vector<128x128xf32>
    %186 = arith.addf %144, %185 : vector<128x128xf32>
    %c0_75 = arith.constant 0 : index
    %c0_76 = arith.constant 0 : index
    %c0_77 = arith.constant 0 : index
    %187 = vector.load %arg18[%c0_75, %c0_76, %c0_77] : memref<1x1x128xf32, #tpu.memory_space<vmem>>, vector<1x1x128xf32>
    %188 = vector.shape_cast %187 : vector<1x1x128xf32> to vector<128xf32>
    %189 = vector.shape_cast %188 : vector<128xf32> to vector<1x128xf32>
    %190 = vector.broadcast %189 : vector<1x128xf32> to vector<128x128xf32>
    %191 = arith.addf %186, %190 : vector<128x128xf32>
    %c1_i32 = arith.constant 1 : i32
    %192 = arith.cmpi slt, %arg0, %c1_i32 : i32
    %193 = arith.extui %192 : i1 to i32
    %c0_i32_78 = arith.constant 0 : i32
    %194 = arith.cmpi ne, %193, %c0_i32_78 : i32
    scf.if %194 {
      %c0_81 = arith.constant 0 : index
      %c0_82 = arith.constant 0 : index
      %198 = vector.load %arg22[%c0_81, %c0_82] : memref<128x128xf32, #tpu.memory_space<vmem>>, vector<128x128xf32>
      tpu.vector_store %arg22[%c0_81, %c0_82], %191 {strides = array<i32>} : memref<128x128xf32, #tpu.memory_space<vmem>>, vector<128x128xf32>,
    } else {
    }
    %c1_i32_79 = arith.constant 1 : i32
    %195 = arith.cmpi eq, %arg0, %c1_i32_79 : i32
    %196 = arith.extui %195 : i1 to i32
    %c0_i32_80 = arith.constant 0 : i32
    %197 = arith.cmpi ne, %196, %c0_i32_80 : i32
    scf.if %197 {
      %c0_81 = arith.constant 0 : index
      %c0_82 = arith.constant 0 : index
      %198 = vector.load %arg19[%c0_81, %c0_82] : memref<1x128xf32, #tpu.memory_space<vmem>>, vector<1x128xf32>
      %199 = vector.shape_cast %198 : vector<1x128xf32> to vector<128xf32>
      %c0_83 = arith.constant 0 : index
      %c0_84 = arith.constant 0 : index
      %200 = vector.load %arg20[%c0_83, %c0_84] : memref<1x128xf32, #tpu.memory_space<vmem>>, vector<1x128xf32>
      %201 = vector.shape_cast %200 : vector<1x128xf32> to vector<128xf32>
      %cst_85 = arith.constant dense<0.000000e+00> : vector<128xf32>
      %202 = vector.multi_reduction <add>, %191, %cst_85 [1] : vector<128x128xf32> to vector<128xf32>
      %203 = vector.shape_cast %202 : vector<128xf32> to vector<128x1xf32>
      %cst_86 = arith.constant 1.280000e+02 : f32
      %204 = vector.broadcast %cst_86 : f32 to vector<128x1xf32>
      %205 = arith.divf %203, %204 : vector<128x1xf32>
      %206 = vector.broadcast %205 : vector<128x1xf32> to vector<128x128xf32>
      %207 = arith.subf %191, %206 : vector<128x128xf32>
      %208 = arith.mulf %207, %207 : vector<128x128xf32>
      %cst_87 = arith.constant dense<0.000000e+00> : vector<128xf32>
      %209 = vector.multi_reduction <add>, %208, %cst_87 [1] : vector<128x128xf32> to vector<128xf32>
      %210 = vector.shape_cast %209 : vector<128xf32> to vector<128x1xf32>
      %cst_88 = arith.constant 0.00787401571 : f32
      %211 = vector.broadcast %cst_88 : f32 to vector<128x1xf32>
      %212 = arith.mulf %210, %211 : vector<128x1xf32>
      %213 = vector.shape_cast %199 : vector<128xf32> to vector<1x128xf32>
      %214 = vector.broadcast %213 : vector<1x128xf32> to vector<128x128xf32>
      %215 = arith.mulf %214, %207 : vector<128x128xf32>
      %216 = math.sqrt %212 : vector<128x1xf32>
      %cst_89 = arith.constant 9.99999997E-7 : f32
      %217 = vector.broadcast %cst_89 : f32 to vector<128x1xf32>
      %218 = arith.addf %216, %217 : vector<128x1xf32>
      %219 = vector.broadcast %218 : vector<128x1xf32> to vector<128x128xf32>
      %220 = arith.divf %215, %219 : vector<128x128xf32>
      %221 = vector.shape_cast %201 : vector<128xf32> to vector<1x128xf32>
      %222 = vector.broadcast %221 : vector<1x128xf32> to vector<128x128xf32>
      %223 = arith.addf %220, %222 : vector<128x128xf32>
      %c0_90 = arith.constant 0 : index
      %c0_91 = arith.constant 0 : index
      %224 = vector.load %arg21[%c0_90, %c0_91] : memref<128x128xf32, #tpu.memory_space<vmem>>, vector<128x128xf32>
      tpu.vector_store %arg21[%c0_90, %c0_91], %223 {strides = array<i32>} : memref<128x128xf32, #tpu.memory_space<vmem>>, vector<128x128xf32>,
    } else {
    }
    return
  }
  func.func @transform_0(%arg0: i32) -> (i32, i32) {
    %c0_i32 = arith.constant 0 : i32
    %c0_i32_0 = arith.constant 0 : i32
    %c0_i32_1 = arith.constant 0 : i32
    return %c0_i32, %c0_i32_0 : i32, i32
  }
  func.func @transform_1(%arg0: i32) -> (i32, i32) {
    %c0_i32 = arith.constant 0 : i32
    %c0_i32_0 = arith.constant 0 : i32
    %c0_i32_1 = arith.constant 0 : i32
    return %c0_i32, %c0_i32_0 : i32, i32
  }
  func.func @transform_2(%arg0: i32) -> (i32, i32) {
    %c0_i32 = arith.constant 0 : i32
    %c0_i32_0 = arith.constant 0 : i32
    %c0_i32_1 = arith.constant 0 : i32
    return %c0_i32, %c0_i32_0 : i32, i32
  }
  func.func @transform_3(%arg0: i32) -> (i32, i32) {
    %c0_i32 = arith.constant 0 : i32
    %c0_i32_0 = arith.constant 0 : i32
    %c0_i32_1 = arith.constant 0 : i32
    return %c0_i32, %c0_i32_0 : i32, i32
  }
  func.func @transform_4(%arg0: i32) -> (i32, i32) {
    %c0_i32 = arith.constant 0 : i32
    %c0_i32_0 = arith.constant 0 : i32
    %c0_i32_1 = arith.constant 0 : i32
    return %c0_i32, %c0_i32_0 : i32, i32
  }
  func.func @transform_5(%arg0: i32) -> (i32, i32) {
    %c0_i32 = arith.constant 0 : i32
    %c0_i32_0 = arith.constant 0 : i32
    %c0_i32_1 = arith.constant 0 : i32
    return %c0_i32, %c0_i32_0 : i32, i32
  }
  func.func @transform_6(%arg0: i32) -> (i32, i32, i32) {
    %c0_i32 = arith.constant 0 : i32
    %c0_i32_0 = arith.constant 0 : i32
    %c0_i32_1 = arith.constant 0 : i32
    return %arg0, %c0_i32, %c0_i32_0 : i32, i32, i32
  }
  func.func @transform_7(%arg0: i32) -> (i32, i32, i32) {
    %c0_i32 = arith.constant 0 : i32
    %c0_i32_0 = arith.constant 0 : i32
    %c0_i32_1 = arith.constant 0 : i32
    return %arg0, %c0_i32, %c0_i32_0 : i32, i32, i32
  }
  func.func @transform_8(%arg0: i32) -> (i32, i32, i32) {
    %c0_i32 = arith.constant 0 : i32
    %c0_i32_0 = arith.constant 0 : i32
    %c0_i32_1 = arith.constant 0 : i32
    return %arg0, %c0_i32, %c0_i32_0 : i32, i32, i32
  }
  func.func @transform_9(%arg0: i32) -> (i32, i32, i32) {
    %c0_i32 = arith.constant 0 : i32
    %c0_i32_0 = arith.constant 0 : i32
    %c0_i32_1 = arith.constant 0 : i32
    return %arg0, %c0_i32, %c0_i32_0 : i32, i32, i32
  }
  func.func @transform_10(%arg0: i32) -> (i32, i32, i32) {
    %c0_i32 = arith.constant 0 : i32
    %c0_i32_0 = arith.constant 0 : i32
    %c0_i32_1 = arith.constant 0 : i32
    return %arg0, %c0_i32, %c0_i32_0 : i32, i32, i32
  }
  func.func @transform_11(%arg0: i32) -> (i32, i32, i32) {
    %c0_i32 = arith.constant 0 : i32
    %c0_i32_0 = arith.constant 0 : i32
    %c0_i32_1 = arith.constant 0 : i32
    return %arg0, %c0_i32, %c0_i32_0 : i32, i32, i32
  }
  func.func @transform_12(%arg0: i32) -> (i32, i32, i32) {
    %c0_i32 = arith.constant 0 : i32
    %c0_i32_0 = arith.constant 0 : i32
    %c0_i32_1 = arith.constant 0 : i32
    return %arg0, %c0_i32, %c0_i32_0 : i32, i32, i32
  }
  func.func @transform_13(%arg0: i32) -> (i32, i32, i32) {
    %c0_i32 = arith.constant 0 : i32
    %c0_i32_0 = arith.constant 0 : i32
    %c0_i32_1 = arith.constant 0 : i32
    return %arg0, %c0_i32, %c0_i32_0 : i32, i32, i32
  }
  func.func @transform_14(%arg0: i32) -> (i32, i32, i32) {
    %c0_i32 = arith.constant 0 : i32
    %c0_i32_0 = arith.constant 0 : i32
    %c0_i32_1 = arith.constant 0 : i32
    return %arg0, %c0_i32, %c0_i32_0 : i32, i32, i32
  }
  func.func @transform_15(%arg0: i32) -> (i32, i32, i32) {
    %c0_i32 = arith.constant 0 : i32
    %c0_i32_0 = arith.constant 0 : i32
    %c0_i32_1 = arith.constant 0 : i32
    return %arg0, %c0_i32, %c0_i32_0 : i32, i32, i32
  }
  func.func @transform_16(%arg0: i32) -> (i32, i32, i32) {
    %c0_i32 = arith.constant 0 : i32
    %c0_i32_0 = arith.constant 0 : i32
    %c0_i32_1 = arith.constant 0 : i32
    return %arg0, %c0_i32, %c0_i32_0 : i32, i32, i32
  }
  func.func @transform_17(%arg0: i32) -> (i32, i32, i32) {
    %c0_i32 = arith.constant 0 : i32
    %c0_i32_0 = arith.constant 0 : i32
    %c0_i32_1 = arith.constant 0 : i32
    return %arg0, %c0_i32, %c0_i32_0 : i32, i32, i32
  }
  func.func @transform_18(%arg0: i32) -> (i32, i32) {
    %c0_i32 = arith.constant 0 : i32
    %c0_i32_0 = arith.constant 0 : i32
    %c0_i32_1 = arith.constant 0 : i32
    return %c0_i32, %c0_i32_0 : i32, i32
  }
  func.func @transform_19(%arg0: i32) -> (i32, i32) {
    %c0_i32 = arith.constant 0 : i32
    %c0_i32_0 = arith.constant 0 : i32
    %c0_i32_1 = arith.constant 0 : i32
    return %c0_i32, %c0_i32_0 : i32, i32
  }
  func.func @transform_20(%arg0: i32) -> (i32, i32) {
    %c0_i32 = arith.constant 0 : i32
    %c0_i32_0 = arith.constant 0 : i32
    %c0_i32_1 = arith.constant 0 : i32
    return %c0_i32, %c0_i32_0 : i32, i32
  }
}

</mosaic_0001>

<bundles_post_ra>
// kernel: tpu_custom_call.1
= control target key start
LH: loop header
LB: loop body
LE: loop exit
PB: predicated region body
PF: predicated region fallthrough
CT: control target
= control target key end

     0   :  { %s11572_s0 = inlined_call_operand.vmem [shape: s32[128,1], index: 0, kind: input, shape index: {}]   ;;  %s11573_s1 = inlined_call_operand.hbm [shape: f32[1,128], index: 1, kind: input, shape index: {}]   ;;  %s11574_s2 = inlined_call_operand.vmem [shape: s32[128,1], index: 2, kind: input, shape index: {}]   ;;  %s11575_s3 = inlined_call_operand.hbm [shape: s32[1,128], index: 3, kind: input, shape index: {}]   ;;  %s11576_s4 = inlined_call_operand.hbm [shape: f32[64,128], index: 4, kind: input, shape index: {}]   ;;  %s11577_s5 = inlined_call_operand.hbm [shape: f32[128,128], index: 5, kind: input, shape index: {}]   ;;  %s11578_s6 = inlined_call_operand.hbm [shape: f32[2,1,128], index: 6, kind: input, shape index: {}]   ;;  %s11579_s7 = inlined_call_operand.hbm [shape: f32[2,1,128], index: 7, kind: input, shape index: {}]   ;;  %s11580_s8 = inlined_call_operand.hbm [shape: bf16[2,128,384], index: 8, kind: input, shape index: {}]   ;;  %s11581_s9 = inlined_call_operand.vmem [shape: f32[2,1,384], index: 9, kind: input, shape index: {}]   ;;  %s11582_s10 = inlined_call_operand.hbm [shape: bf16[2,128,128], index: 10, kind: input, shape index: {}]   ;;  %s11583_s11 = inlined_call_operand.vmem [shape: f32[2,1,128], index: 11, kind: input, shape index: {}]   ;;  %s11584_s12 = inlined_call_operand.hbm [shape: f32[2,1,128], index: 12, kind: input, shape index: {}]   ;;  %s11585_s13 = inlined_call_operand.hbm [shape: f32[2,1,128], index: 13, kind: input, shape index: {}]   ;;  %s11586_s14 = inlined_call_operand.vmem [shape: bf16[2,128,256], index: 14, kind: input, shape index: {}]   ;;  %s11587_s15 = inlined_call_operand.vmem [shape: f32[2,1,256], index: 15, kind: input, shape index: {}]   ;;  %s11588_s16 = inlined_call_operand.hbm [shape: bf16[2,256,128], index: 16, kind: input, shape index: {}]   ;;  %s11589_s17 = inlined_call_operand.vmem [shape: f32[2,1,128], index: 17, kind: input, shape index: {}]   ;;  %s11590_s18 = inlined_call_operand.vmem [shape: f32[1,128], index: 18, kind: input, shape index: {}]   ;;  %s11591_s19 = inlined_call_operand.vmem [shape: f32[1,128], index: 19, kind: input, shape index: {}]   ;;  %s11592_s20 = inlined_call_operand.hbm [shape: f32[128,128], index: 20, kind: output, shape index: {}]  }
   0x1   :  { %11634 = sst [smem:[#allocation50_spill]] %s11572_s0 }
   0x2   :  { %11635 = sst [smem:[#allocation51_spill]] %s11573_s1 }
   0x3   :  { %11636 = sst [smem:[#allocation52_spill]] %s11574_s2 }
   0x4   :  { %11637 = sst [smem:[#allocation53_spill]] %s11575_s3 }
   0x5   :  { %11638 = sst [smem:[#allocation54_spill]] %s11576_s4 }
   0x6   :  { %11639 = sst [smem:[#allocation55_spill]] %s11577_s5 }
   0x7   :  { %11640 = sst [smem:[#allocation56_spill]] %s11578_s6 }
   0x8   :  { %11641 = sst [smem:[#allocation57_spill]] %s11579_s7 }
   0x9   :  { %11642 = sst [smem:[#allocation58_spill]] %s11580_s8 }
   0xa   :  { %11643 = sst [smem:[#allocation59_spill]] %s11581_s9 }
   0xb   :  { %11644 = sst [smem:[#allocation60_spill]] %s11582_s10 }
   0xc   :  { %11645 = sst [smem:[#allocation61_spill]] %s11583_s11 }
   0xd   :  { %11646 = sst [smem:[#allocation62_spill]] %s11586_s14 }
   0xe   :  { %11647 = sst [smem:[#allocation63_spill]] %s11587_s15 }
   0xf   :  { %11648 = sst [smem:[#allocation64_spill]] %s11589_s17 }
  0x10   :  { %11649 = sst [smem:[#allocation65_spill]] %s11590_s18 }
  0x11   :  { %11650 = sst [smem:[#allocation66_spill]] %s11591_s19 }
  0x12   :  { %11651 = sst [smem:[#allocation67_spill]] %s11592_s20 }
  0x13   :  { %25 = vsyncpa [#allocation4], 0 }
  0x14   :  { %26 = vsyncpa [#allocation7], 0 }
  0x15   :  { %27 = vsyncpa [#allocation10], 0 }
  0x16   :  { %28 = vsyncpa [#allocation5], 0  ;;  %s7956_s1 = smov 0   ;;  %s7958_s22 = smov 0  }
  0x17   :  { %s7960_s23 = smov 0   ;;  %s7962_s24 = smov 0  }
  0x18 LB: > { %11652 = sst [smem:[#allocation24_spill]] %s7824_s23  ;;  %s7975_s2 = sadd.s32 4294967295, %s7828_s24   ;;  %s7828_s24 = sphi %s7962_s24, %s11810_s24   ;;  %s7824_s23 = sphi %s7960_s23, %s11812_s23   ;;  %s7820_s22 = sphi %s7958_s22, %s11814_s22   ;;  %s7816_s1 = sphi %s7956_s1, %s11813_s1  }
  0x19   : > { %s7978_s25 = sadd.s32 1, %s7828_s24   ;;  %s167_s26 = sadd.s32 1, %s7824_s23 }
  0x1a   : > { %11653 = sst [smem:[#allocation25_spill]] %s7978_s25  ;;  %s164_s3 = ssub.s32 %s7828_s24, %s7978_s25 }
  0x1b   : > { %p165_p0 = scmp.eq.s32.totalorder %s164_s3, 0  ;;  %p174_p1 = scmp.ne.s32.totalorder %s7824_s23, %s7820_s22 }
  0x1c   : > { %p175_p2 = scmp.eq.s32.totalorder %s7828_s24, 0  ;;  %p180_p3 = scmp.ne.s32.totalorder %s7820_s22, %s7816_s1 }
  0x1d   : > { %s7988_s27 = scalar_select %p165_p0, %s7824_s23, %s167_s26  }
  0x1e   : > { %p7990_p4 = por %p175_p2, %p174_p1  ;;  %p181_p5 = scmp.eq.s32.totalorder %s7975_s2, 0 }
  0x1f   : > { %11654 = sst [smem:[#allocation26_spill]] %s7988_s27  ;;  %p6228_p6 = scmp.ge.s32.totalorder %s7828_s24, 1 }
  0x20   : > { %p540_p7 = scmp.lt.s32.totalorder %s7828_s24, 3  ;;  %p7999_p8 = por %p181_p5, %p180_p3 }
  0x21   : > { %p6229_p9 = scmp.ne.s32.totalorder %s7975_s2, 0  ;;  %s11659_s21 = sld [smem:[#allocation51_spill]] }
  0x22   : > { %s11656_s4 = scalar_select %p7999_p8, 1, 0 }
  0x23   : > { %p8004_p10 = pnand %p6228_p6, %p540_p7  ;;  %s7830_s3 = smov [#allocation3]  }
  0x24   : > { %11657 = sst [smem:[#allocation27_spill]] %s11656_s4  ;;  %s557_s26 = sshll.u32 %s7830_s3, 4  ;;  %s558_s26 = int_to_ptr.vmem [resolvable:$true] %s557_s26 }
  0x25   : > { %p6716_p11 = pneg %p8004_p10  ;;  %p6755_p13 = scmp.lt.s32.totalorder %s7828_s24, 2 }
  0x26   : > { %s617_s25 = sand.u32 1, %s7828_s24   ;;  %s8022_s20 = sand.u32 1, %s7824_s23  }
  0x27   : > { %s555_s1 = sshll.u32 %s11659_s21, 4  ;;  %p8015_p12 = pnand %p6716_p11, %p181_p5  ;;  %s556_s1 = int_to_ptr.hbm [resolvable:$true] %s555_s1 }
  0x28   : > { %p8026_p0 = pnand %p6755_p13, %p7990_p4  ;;  %s11662_s6 = sld [smem:[#allocation56_spill]] }
  0x29   : > { %6719 = dma.hbm_to_vmem [thread:$0]  (!%p8015_p12), %s556_s1, 16, %s558_s26, [#allocation4]  }
  0x2a   : > { %s620_s18 = scalar_lea.vmem [#allocation11], %s8022_s20  ;;  %s8037_s23 = scalar_lea.sflag [#allocation4], %s617_s25 }
  0x2b   : > { %s627_s17 = sshll.u32 %s620_s18, 4  ;;  %p8041_p2 = pneg %p8026_p0  ;;  %s628_s17 = int_to_ptr.vmem [resolvable:$true] %s627_s17 }
  0x2e   : > { %s623_s3 = scalar_lea.hbm %s11662_s6, %s7828_s24  ;;  %s7457_s18 = scalar_lea.hbm %s11662_s6, 2 }
  0x2f   : > { %s625_s19 = sshll.u32 %s623_s3, 4  ;;  %s626_s19 = int_to_ptr.hbm [resolvable:$true] %s625_s19 }
  0x30   : > { %s7450_s28 = sshra.s32 %s626_s19, 4  ;;  %s7451_s28 = int_to_ptr.hbm [resolvable:$true] %s7450_s28 }
  0x31   : > { %s7452_s15 = scalar_lea.hbm %s7451_s28, 1  ;;  %p7458_p6 = scmp.lt.s32.totalorder %s7451_s28, %s11662_s6 }
  0x32   : > { %p7453_p1 = scmp.ne.s32.totalorder %s7451_s28, %s7452_s15  ;;  %p7459_p7 = scmp.lt.s32.totalorder %s7457_s18, %s7452_s15 }
  0x34   : > { %p7455_p3 = pnand %p8041_p2, %p7453_p1  ;;  %p7460_p11 = por %p7459_p7, %p7458_p6 }
  0x36   : > { %p7456_p4 = pneg %p7455_p3 }
  0x38   : > { %p7461_p13 = pnand %p7460_p11, %p7456_p4 }
  0x3a   : > { %7464 = shalt.err (!%p7461_p13)
}
  0x3b   : > { %6732 = dma.hbm_to_vmem [thread:$0]  (!%p8026_p0), %s626_s19, 16, %s628_s17, %s8037_s23  }
  0x3c   : > { %s11664_s7 = sld [smem:[#allocation57_spill]]  ;;  %s637_s9 = scalar_lea.vmem [#allocation12], %s8022_s20 }
  0x3d   : > { %s644_s11 = sshll.u32 %s637_s9, 4  ;;  %s645_s11 = int_to_ptr.vmem [resolvable:$true] %s644_s11 }
  0x42   : > { %s640_s1 = scalar_lea.hbm %s11664_s7, %s7828_s24  ;;  %s7487_s17 = scalar_lea.hbm %s11664_s7, 2 }
  0x43   : > { %s642_s26 = sshll.u32 %s640_s1, 4  ;;  %s643_s26 = int_to_ptr.hbm [resolvable:$true] %s642_s26 }
  0x44   : > { %s7480_s15 = sshra.s32 %s643_s26, 4  ;;  %s7481_s15 = int_to_ptr.hbm [resolvable:$true] %s7480_s15 }
  0x45   : > { %s7482_s28 = scalar_lea.hbm %s7481_s15, 1  ;;  %p7488_p6 = scmp.lt.s32.totalorder %s7481_s15, %s11664_s7 }
  0x46   : > { %p7483_p1 = scmp.ne.s32.totalorder %s7481_s15, %s7482_s28  ;;  %p7489_p7 = scmp.lt.s32.totalorder %s7487_s17, %s7482_s28 }
  0x48   : > { %p7485_p3 = pnand %p7483_p1, %p8041_p2  ;;  %p7490_p11 = por %p7489_p7, %p7488_p6 }
  0x4a   : > { %p7486_p4 = pneg %p7485_p3 }
  0x4c   : > { %p7491_p13 = pnand %p7490_p11, %p7486_p4 }
  0x4e   : > { %7494 = shalt.err (!%p7491_p13)
}
  0x4f   : > { %6735 = dma.hbm_to_vmem [thread:$0]  (!%p8026_p0), %s643_s26, 16, %s645_s11, %s8037_s23  }
  0x50   : > { %s6678_s9 = smul.u32 192, %s8022_s20  ;;  %s6235_s3 = sshll.u32 %s8022_s20, 6 }
  0x51   : > { %s6679_s21 = smul.u32 192, %s7828_s24  ;;  %s11665_s8 = sld [smem:[#allocation58_spill]] }
  0x52   : > { %s655_s15 = scalar_lea.vmem [#allocation13], %s6678_s9 }
  0x53   : > { %s663_s28 = sshll.u32 %s655_s15, 4  ;;  %s664_s28 = int_to_ptr.vmem [resolvable:$true] %s663_s28 }
  0x57   : > { %s660_s0 = scalar_lea.hbm %s11665_s8, %s6679_s21  ;;  %s7517_s6 = scalar_lea.hbm %s11665_s8, 384 }
  0x58   : > { %s661_s17 = sshll.u32 %s660_s0, 4  ;;  %s662_s17 = int_to_ptr.hbm [resolvable:$true] %s661_s17 }
  0x59   : > { %s7510_s19 = sshra.s32 %s662_s17, 4  ;;  %s7511_s19 = int_to_ptr.hbm [resolvable:$true] %s7510_s19 }
  0x5a   : > { %s7512_s25 = scalar_lea.hbm %s7511_s19, 192  ;;  %p7518_p6 = scmp.lt.s32.totalorder %s7511_s19, %s11665_s8 }
  0x5b   : > { %p7513_p1 = scmp.ne.s32.totalorder %s7511_s19, %s7512_s25  ;;  %p7519_p7 = scmp.lt.s32.totalorder %s7517_s6, %s7512_s25 }
  0x5d   : > { %p7515_p3 = pnand %p7513_p1, %p8041_p2  ;;  %p7520_p11 = por %p7519_p7, %p7518_p6 }
  0x5f   : > { %p7516_p4 = pneg %p7515_p3 }
  0x61   : > { %p7521_p13 = pnand %p7520_p11, %p7516_p4 }
  0x63   : > { %7524 = shalt.err (!%p7521_p13)
}
  0x64   : > { %s7831_s9 = smov 192   ;;  %s7832_s21 = smov 12  }
  0x65   : > { %6738 = dma.hbm_to_vmem [thread:$0]  (!%p8026_p0), %s662_s17, 3072, %s664_s28, %s8037_s23, %s7831_s9, %s7831_s9, %s7832_s21  }
  0x66   : > { %s6579_s1 = sshll.u32 %s7828_s24, 6  ;;  %s684_s18 = scalar_lea.vmem [#allocation14], %s6235_s3 }
  0x67   : > { %s692_s0 = sshll.u32 %s684_s18, 4  ;;  %s11666_s10 = sld [smem:[#allocation60_spill]]  ;;  %s693_s0 = int_to_ptr.vmem [resolvable:$true] %s692_s0 }
  0x6d   : > { %s689_s7 = scalar_lea.hbm %s11666_s10, %s6579_s1  ;;  %s7547_s28 = scalar_lea.hbm %s11666_s10, 128 }
  0x6e   : > { %s690_s6 = sshll.u32 %s689_s7, 4  ;;  %s691_s6 = int_to_ptr.hbm [resolvable:$true] %s690_s6 }
  0x6f   : > { %s7540_s4 = sshra.s32 %s691_s6, 4  ;;  %s7541_s4 = int_to_ptr.hbm [resolvable:$true] %s7540_s4 }
  0x70   : > { %s7542_s19 = scalar_lea.hbm %s7541_s4, 64  ;;  %p7548_p6 = scmp.lt.s32.totalorder %s7541_s4, %s11666_s10 }
  0x71   : > { %p7543_p1 = scmp.ne.s32.totalorder %s7541_s4, %s7542_s19  ;;  %p7549_p7 = scmp.lt.s32.totalorder %s7547_s28, %s7542_s19 }
  0x73   : > { %p7545_p3 = pnand %p7543_p1, %p8041_p2  ;;  %p7550_p11 = por %p7549_p7, %p7548_p6 }
  0x75   : > { %p7546_p4 = pneg %p7545_p3 }
  0x77   : > { %p7551_p13 = pnand %p7550_p11, %p7546_p4 }
  0x79   : > { %7554 = shalt.err (!%p7551_p13)
}
  0x7a   : > { %s11600_s9 = smov 64   ;;  %s11601_s21 = smov 4  }
  0x7b   : > { %6741 = dma.hbm_to_vmem [thread:$0]  (!%p8026_p0), %s691_s6, 1024, %s693_s0, %s8037_s23, %s11600_s9, %s11600_s9, %s11601_s21  }
  0x7c   : > { %s714_s15 = scalar_lea.hbm %s11584_s12, %s7828_s24  ;;  %s711_s7 = scalar_lea.vmem [#allocation15], %s8022_s20 }
  0x7d   : > { %s716_s11 = sshll.u32 %s714_s15, 4  ;;  %s718_s4 = sshll.u32 %s711_s7, 4  ;;  %s717_s11 = int_to_ptr.hbm [resolvable:$true] %s716_s11  ;;  %s719_s4 = int_to_ptr.vmem [resolvable:$true] %s718_s4 }
  0x7e   : > { %s7570_s19 = sshra.s32 %s717_s11, 4  ;;  %s7577_s0 = scalar_lea.hbm %s11584_s12, 2  ;;  %s7571_s19 = int_to_ptr.hbm [resolvable:$true] %s7570_s19 }
  0x7f   : > { %s7572_s25 = scalar_lea.hbm %s7571_s19, 1  ;;  %p7578_p6 = scmp.lt.s32.totalorder %s7571_s19, %s11584_s12 }
  0x80   : > { %p7573_p1 = scmp.ne.s32.totalorder %s7571_s19, %s7572_s25  ;;  %p7579_p7 = scmp.lt.s32.totalorder %s7577_s0, %s7572_s25 }
  0x82   : > { %p7575_p3 = pnand %p7573_p1, %p8041_p2  ;;  %p7580_p11 = por %p7579_p7, %p7578_p6 }
  0x84   : > { %p7576_p4 = pneg %p7575_p3 }
  0x86   : > { %p7581_p13 = pnand %p7580_p11, %p7576_p4 }
  0x88   : > { %7584 = shalt.err (!%p7581_p13)
}
  0x89   : > { %6744 = dma.hbm_to_vmem [thread:$0]  (!%p8026_p0), %s717_s11, 16, %s719_s4, %s8037_s23  }
  0x8a   : > { %s11667_s18 = sld [smem:[#allocation53_spill]]  ;;  %s7835_s7 = smov [#allocation6]  }
  0x8b   : > { %s572_s26 = sshll.u32 %s7835_s7, 4  ;;  %s731_s28 = scalar_lea.hbm %s11585_s13, %s7828_s24  ;;  %s573_s26 = int_to_ptr.vmem [resolvable:$true] %s572_s26 }
  0x8c   : > { %s728_s0 = scalar_lea.vmem [#allocation16], %s8022_s20  ;;  %s733_s3 = sshll.u32 %s731_s28, 4  ;;  %s734_s3 = int_to_ptr.hbm [resolvable:$true] %s733_s3 }
  0x8d   : > { %s735_s6 = sshll.u32 %s728_s0, 4  ;;  %s11668_s17 = sld [smem:[#allocation54_spill]]  ;;  %s736_s6 = int_to_ptr.vmem [resolvable:$true] %s735_s6 }
  0x90   : > { %s570_s15 = sshll.u32 %s11667_s18, 4  ;;  %s7630_s18 = sshra.s32 %s734_s3, 4  ;;  %s571_s15 = int_to_ptr.hbm [resolvable:$true] %s570_s15  ;;  %s7631_s18 = int_to_ptr.hbm [resolvable:$true] %s7630_s18 }
  0x91   : > { %6722 = dma.hbm_to_vmem [thread:$0]  (!%p8015_p12), %s571_s15, 16, %s573_s26, [#allocation7]  }
  0x92   : > { %s7632_s9 = scalar_lea.hbm %s7631_s18, 1  ;;  %s7637_s26 = scalar_lea.hbm %s11585_s13, 2 }
  0x93   : > { %s581_s1 = sshll.u32 %s11668_s17, 4  ;;  %p7633_p1 = scmp.ne.s32.totalorder %s7631_s18, %s7632_s9  ;;  %s582_s1 = int_to_ptr.hbm [resolvable:$true] %s581_s1 }
  0x94   : > { %p7638_p6 = scmp.lt.s32.totalorder %s7631_s18, %s11585_s13  ;;  %p7639_p7 = scmp.lt.s32.totalorder %s7637_s26, %s7632_s9 }
  0x95   : > { %p7635_p3 = pnand %p7633_p1, %p8041_p2 }
  0x96   : > { %p7640_p11 = por %p7639_p7, %p7638_p6 }
  0x97   : > { %p7636_p4 = pneg %p7635_p3 }
  0x99   : > { %p7641_p13 = pnand %p7640_p11, %p7636_p4 }
  0x9b   : > { %7644 = shalt.err (!%p7641_p13)
}
  0x9c   : > { %6747 = dma.hbm_to_vmem [thread:$0]  (!%p8026_p0), %s734_s3, 16, %s736_s6, %s8037_s23  }
  0x9d   : > { %s7836_s28 = smov [#allocation8]   ;;  %s7837_s11 = smov 128  }
  0x9e   : > { %s583_s0 = sshll.u32 %s7836_s28, 4  ;;  %s7838_s4 = smov 8   ;;  %s584_s0 = int_to_ptr.vmem [resolvable:$true] %s583_s0 }
  0x9f   : > { %6725 = dma.hbm_to_vmem [thread:$0]  (!%p8015_p12), %s582_s1, 1024, %s584_s0, [#allocation7], %s7837_s11, %s7837_s11, %s7838_s4  }
  0xa0   : > { %s11669_s5 = sld [smem:[#allocation55_spill]]  ;;  %s7839_s15 = smov [#allocation9]  }
  0xa1   : > { %s597_s7 = sshll.u32 %s7839_s15, 4  ;;  %s6238_s26 = sshll.u32 %s8022_s20, 7  ;;  %s598_s7 = int_to_ptr.vmem [resolvable:$true] %s597_s7 }
  0xa2   : > { %s6580_s6 = sshll.u32 %s7828_s24, 7  ;;  %s761_s28 = scalar_lea.vmem [#allocation17], %s6238_s26 }
  0xa3   : > { %s766_s25 = scalar_lea.hbm %s11588_s16, %s6580_s6  ;;  %s769_s21 = sshll.u32 %s761_s28, 4  ;;  %s770_s21 = int_to_ptr.vmem [resolvable:$true] %s769_s21 }
  0xa4   : > { %s767_s1 = sshll.u32 %s766_s25, 4  ;;  %s7727_s24 = scalar_lea.hbm %s11588_s16, 256  ;;  %s768_s1 = int_to_ptr.hbm [resolvable:$true] %s767_s1 }
  0xa5   : > { %s7720_s0 = sshra.s32 %s768_s1, 4  ;;  %s7721_s0 = int_to_ptr.hbm [resolvable:$true] %s7720_s0 }
  0xa6   : > { %s595_s18 = sshll.u32 %s11669_s5, 4  ;;  %s7722_s9 = scalar_lea.hbm %s7721_s0, 128  ;;  %s596_s18 = int_to_ptr.hbm [resolvable:$true] %s595_s18 }
  0xa7   : > { %6728 = dma.hbm_to_vmem [thread:$0]  (!%p8015_p12), %s596_s18, 2048, %s598_s7, [#allocation10], %s7837_s11, %s7837_s11, %s7838_s4  }
  0xa8   : > { %p7723_p1 = scmp.ne.s32.totalorder %s7721_s0, %s7722_s9  ;;  %p7728_p12 = scmp.lt.s32.totalorder %s7721_s0, %s11588_s16 }
  0xa9   : > { %p7729_p6 = scmp.lt.s32.totalorder %s7727_s24, %s7722_s9 }
  0xaa   : > { %p7725_p3 = pnand %p7723_p1, %p8041_p2 }
  0xab   : > { %p7730_p7 = por %p7729_p6, %p7728_p12 }
  0xac   : > { %p7726_p4 = pneg %p7725_p3 }
  0xae   : > { %p7731_p11 = pnand %p7730_p7, %p7726_p4 }
  0xb0   : > { %7734 = shalt.err (!%p7731_p11)
}
  0xb1   : > { %s11670_s17 = smov 4   ;;  %s11671_s18 = smov 64  }
  0xb2   : > { %6750 = dma.hbm_to_vmem [thread:$0]  (!%p8026_p0), %s768_s1, 2048, %s770_s21, %s8037_s23, %s11671_s18, %s11671_s18, %s11670_s17  }
  0xb3   : > { %787 = sbr.rel (%p8004_p10) target bundleno = 3668 (0xe54), region = 100 }
  0xb8   : > { %7795 = dma.done.wait (%p181_p5), [#allocation4], 16  }
  0xb9   : > { %7797 = vsyncadd (%p181_p5), [#allocation4], 4294967280 }
  0xba   : > { %7799 = dma.done.wait (%p181_p5), [#allocation7], 1040  }
  0xbb   : > { %7801 = vsyncadd (%p181_p5), [#allocation7], 4294966256 }
  0xbc   : > { %7803 = dma.done.wait (%p181_p5), [#allocation10], 2048  }
  0xbd   : > { %7805 = vsyncadd (%p181_p5), [#allocation10], 4294965248  ;;  %s809_s23 = sand.u32 1, %s7975_s2   ;;  %s8189_s29 = sand.u32 1, %s7820_s22  }
  0xbe   : > { %s810_s30 = scalar_lea.sflag [#allocation4], %s809_s23 }
  0xbf   : > { %7807 = dma.done.wait (%p7999_p8), %s810_s30, 6208  }
  0xc0   : > { %7809 = vsyncadd (%p7999_p8), %s810_s30, 4294961088  ;;  %s6680_s15 = smul.u32 192, %s8189_s29  ;;  %s6246_s7 = sshll.u32 %s8189_s29, 6 }
  0xc1   : > { %s6247_s26 = sshll.u32 %s8189_s29, 7  ;;  %p967_p5 = scmp.lt.s32.totalorder %s7975_s2, 1 }
  0xc2   : > { %s11674_s24 = sld [smem:[#allocation59_spill]]  ;;  %s821_s1 = scalar_lea.vmem [#allocation12], %s8189_s29 }
  0xc3   : > { %s8201_s6 = scalar_select %p967_p5, %s7975_s2, 1 }
  0xc4   : > { %s11675_s18 = sld [smem:[#allocation62_spill]]  ;;  %s8230_s10 = scalar_lea.vmem [#allocation13], %s6680_s15 }
  0xc5   : > { %s6681_s3 = smul.u32 3, %s8201_s6  ;;  %s6581_s0 = sshll.u32 %s8201_s6, 7 }
  0xc6   : > { %s6250_s9 = sshll.u32 %s8201_s6, 1  ;;  %s11676_s21 = sld [smem:[#allocation63_spill]] }
  0xc7   : > { %s11677_s25 = sld [smem:[#allocation64_spill]]  ;;  %s8232_s20 = scalar_lea.vmem [#allocation14], %s6246_s7 }
  0xc8   : > { %s8213_s11 = scalar_lea.vmem %s11674_s24, %s6681_s3  ;;  %s850_s3 = scalar_lea.vmem [#allocation15], %s8189_s29 }
  0xc9   : > { %s859_s27 = scalar_lea.vmem [#allocation16], %s8189_s29  ;;  %s8236_s24 = scalar_lea.vmem [#allocation17], %s6247_s26 }
  0xca   : > { %s8218_s14 = scalar_lea.vmem %s11675_s18, %s6581_s0  ;;  %989 = sbr.rel (%p6229_p9) target bundleno = 500 (0x1f4), region = 148 }
  0xcc   : > { %s8223_s5 = scalar_lea.vmem %s11676_s21, %s6250_s9  ;;  %s11678_s21 = sld [smem:[#allocation50_spill]] (!%p6229_p9) }
  0xcd   : > { %s985_s28 = scalar_lea.vmem %s11677_s25, %s8201_s6 }
  0xcf   : > { %v7840_v3 = vmov 0   ;;  %v1111_v17 = vld [vmem:[#allocation8 + $0x38] sm:$0xff]  ;;  %v1110_v18 = vld [vmem:[#allocation8 + $0x30] sm:$0xff]  ;;  %v1109_v19 = vld [vmem:[#allocation8 + $0x28] sm:$0xff]  ;;  %v1006_v26 = vlaneseq  ;;  %vm1112_vm0 = vcmask 523264   ;;  %v7841_v31 = vmov 0.0  }
  0xd0   : > { %6817 = vset.pattern.permute.xlu2 %v7840_v3  ;;  %6816 = vset.pattern.permute.xlu1 %v7840_v3  ;;  %v1108_v20 = vld [vmem:[#allocation8 + $0x20] sm:$0xff]  ;;  %v1107_v21 = vld [vmem:[#allocation8 + $0x18] sm:$0xff]  ;;  %v1106_v22 = vld [vmem:[#allocation8 + $0x10] sm:$0xff] }
  0xd1   : > { %6815 = vset.pattern.permute.xlu0 %v7840_v3  ;;  %6647 = vmatpush.msra.mxu2 %v1111_v17  ;;  %v1105_v23 = vld [vmem:[#allocation8 + $0x8] sm:$0xff]  ;;  %v1104_v24 = vld [vmem:[#allocation8] sm:$0xff]  ;;  %v8288_v27 = vand.u32 127, %v1006_v26 }
  0xd2   : > { %v999_v0 = vld [vmem:[%s11678_s21 + $0x48] sm:$0xff]  ;;  %v998_v1 = vld [vmem:[%s11678_s21 + $0x40] sm:$0xff]  ;;  %v1000_v7 = vld [vmem:[%s11678_s21 + $0x50] sm:$0xff]  ;;  %1169 = vmatpush.msra.mxu0 %v1111_v17  ;;  %6646 = vmatpush.msra.mxu1 %v1111_v17 }
  0xd3   : > { %v990_v2 = vld [vmem:[%s11678_s21] sm:$0xff]  ;;  %1036 = vperm.xlu2 %6817, %v999_v0   ;;  %1033 = vperm.xlu0 %6815, %v998_v1   ;;  %v1003_v4 = vld [vmem:[%s11678_s21 + $0x68] sm:$0xff]  ;;  %v996_v10 = vld [vmem:[%s11678_s21 + $0x30] sm:$0xff] }
  0xd4   : > { %1009 = vperm.xlu1 %6816, %v990_v2   ;;  %v1002_v5 = vld [vmem:[%s11678_s21 + $0x60] sm:$0xff]  ;;  %v991_v8 = vld [vmem:[%s11678_s21 + $0x8] sm:$0xff]  ;;  %v1004_v11 = vld [vmem:[%s11678_s21 + $0x70] sm:$0xff]  ;;  %6648 = vmatpush.msra.mxu3 %v1111_v17 }
  0xd5   : > { %v994_v6 = vld [vmem:[%s11678_s21 + $0x20] sm:$0xff]  ;;  %v995_v9 = vld [vmem:[%s11678_s21 + $0x28] sm:$0xff]  ;;  %v992_v12 = vld [vmem:[%s11678_s21 + $0x10] sm:$0xff]  ;;  %6650 = vmatpush.msra.mxu2 %v1110_v18  ;;  %1170 = vmatpush.msra.mxu0 %v1110_v18 }
  0xd6   : > { %v993_v13 = vld [vmem:[%s11678_s21 + $0x18] sm:$0xff]  ;;  %6649 = vmatpush.msra.mxu1 %v1110_v18  ;;  %6651 = vmatpush.msra.mxu3 %v1110_v18  ;;  %v1242_v61 = vld [vmem:[#allocation9] sm:$0xff]  ;;  %v1247_v17 = vld [vmem:[#allocation9 + $0x28] sm:$0xff] }
  0xd7   : > { %v1001_v14 = vld [vmem:[%s11678_s21 + $0x58] sm:$0xff]  ;;  %6653 = vmatpush.msra.mxu2 %v1109_v19  ;;  %1171 = vmatpush.msra.mxu0 %v1109_v19  ;;  %v1250_v1 = vld [vmem:[#allocation9 + $0x40] sm:$0xff] }
  0xd8   : > { %v1005_v15 = vld [vmem:[%s11678_s21 + $0x78] sm:$0xff]  ;;  %6652 = vmatpush.msra.mxu1 %v1109_v19  ;;  %6654 = vmatpush.msra.mxu3 %v1109_v19 }
  0xd9   : > { %v997_v16 = vld [vmem:[%s11678_s21 + $0x38] sm:$0xff]  ;;  %6656 = vmatpush.msra.mxu2 %v1108_v20  ;;  %1172 = vmatpush.msra.mxu0 %v1108_v20 }
  0xda   : > { %6655 = vmatpush.msra.mxu1 %v1108_v20  ;;  %6657 = vmatpush.msra.mxu3 %v1108_v20 }
  0xdb   : > { %1048 = vperm.xlu2 %6817, %v1003_v4   ;;  %1045 = vperm.xlu0 %6815, %v1002_v5   ;;  %v1246_v4 = vld [vmem:[#allocation9 + $0x20] sm:$0xff] }
  0xdc   : > { %1021 = vperm.xlu1 %6816, %v994_v6   ;;  %6659 = vmatpush.msra.mxu2 %v1107_v21 }
  0xdd   : > { %1173 = vmatpush.msra.mxu0 %v1107_v21  ;;  %6658 = vmatpush.msra.mxu1 %v1107_v21 }
  0xde   : > { %6660 = vmatpush.msra.mxu3 %v1107_v21  ;;  %6662 = vmatpush.msra.mxu2 %v1106_v22 }
  0xdf   : > { %1174 = vmatpush.msra.mxu0 %v1106_v22  ;;  %6661 = vmatpush.msra.mxu1 %v1106_v22 }
  0xe0   : > { %6663 = vmatpush.msra.mxu3 %v1106_v22  ;;  %6665 = vmatpush.msra.mxu2 %v1105_v23 }
  0xe1   : > { %1175 = vmatpush.msra.mxu0 %v1105_v23  ;;  %6664 = vmatpush.msra.mxu1 %v1105_v23 }
  0xe2   : > { %6666 = vmatpush.msra.mxu3 %v1105_v23  ;;  %6668 = vmatpush.msra.mxu2 %v1104_v24 }
  0xe3   : > { %1039 = vperm.xlu2 %6817, %v1000_v7   ;;  %1012 = vperm.xlu0 %6815, %v991_v8  }
  0xe4   : > { %1024 = vperm.xlu1 %6816, %v995_v9   ;;  %1176 = vmatpush.msra.mxu0 %v1104_v24  ;;  %v1251_v9 = vld [vmem:[#allocation9 + $0x48] sm:$0xff] }
  0xe5   : > { %6667 = vmatpush.msra.mxu1 %v1104_v24  ;;  %6669 = vmatpush.msra.mxu3 %v1104_v24 }
  0xeb   : > { %1027 = vperm.xlu2 %6817, %v996_v10   ;;  %1051 = vperm.xlu0 %6815, %v1004_v11  }
  0xec   : > { %1015 = vperm.xlu1 %6816, %v992_v12   ;;  %v1254_v12 = vld [vmem:[#allocation9 + $0x60] sm:$0xff] }
  0xf3   : > { %1018 = vperm.xlu2 %6817, %v993_v13   ;;  %1042 = vperm.xlu0 %6815, %v1001_v14  }
  0xf4   : > { %1054 = vperm.xlu1 %6816, %v1005_v15   ;;  %v1243_v15 = vld [vmem:[#allocation9 + $0x8] sm:$0xff] }
  0xfb   : > { %1030 = vperm.xlu0 %6815, %v997_v16  }
 0x12d   : > { %v1037_v25 = vpop.permute.xlu2 %1036 }
 0x12e   : > { %vm1065_vm3 = vcmp.eq.s32.totalorder %v8288_v27, %v1037_v25  ;;  %v1252_v25 = vld [vmem:[#allocation9 + $0x50] sm:$0xff] }
 0x12f   : > { %v6261_v35 = vsel %vm1065_vm3, 1.0, %v7841_v31 }
 0x135   : > { %v1049_v28 = vpop.permute.xlu2 %1048 }
 0x136   : > { %vm1069_vm6 = vcmp.eq.s32.totalorder %v8288_v27, %v1049_v28 }
 0x137   : > { %v6265_v45 = vsel %vm1069_vm6, 1.0, %v7841_v31 }
 0x13d   : > { %v1040_v34 = vpop.permute.xlu2 %1039 }
 0x13e   : > { %vm1066_vm7 = vcmp.eq.s32.totalorder %v8288_v27, %v1040_v34 }
 0x13f   : > { %v6262_v46 = vsel %vm1066_vm7, 1.0, %v7841_v31 }
 0x145   : > { %v1034_v29 = vpop.permute.xlu0 %1033  ;;  %v1028_v42 = vpop.permute.xlu2 %1027 }
 0x146   : > { %v1010_v30 = vpop.permute.xlu1 %1009  ;;  %vm1064_vm1 = vcmp.eq.s32.totalorder %v8288_v27, %v1034_v29  ;;  %vm1062_vm10 = vcmp.eq.s32.totalorder %v8288_v27, %v1028_v42 }
 0x147   : > { %vm1056_vm2 = vcmp.eq.s32.totalorder %v8288_v27, %v1010_v30  ;;  %v6260_v32 = vsel %vm1064_vm1, 1.0, %v7841_v31  ;;  %v6258_v49 = vsel %vm1062_vm10, 1.0, %v7841_v31 }
 0x148   : > { %v6252_v33 = vsel %vm1056_vm2, 1.0, %v7841_v31  ;;  %6276 = vmatmul.msk.f32.vlgmr.msra.gmra.mxu2 %vm1112_vm0, %v6260_v32 }
 0x149   : > { %6268 = vmatmul.msk.f32.vlgmr.msra.gmra.mxu0 %vm1112_vm0, %v6252_v33  ;;  %v1248_v33 = vld [vmem:[#allocation9 + $0x30] sm:$0xff] }
 0x14d   : > { %v1046_v36 = vpop.permute.xlu0 %1045  ;;  %v1019_v52 = vpop.permute.xlu2 %1018 }
 0x14e   : > { %v1022_v37 = vpop.permute.xlu1 %1021  ;;  %vm1068_vm4 = vcmp.eq.s32.totalorder %v8288_v27, %v1046_v36  ;;  %vm1059_vm13 = vcmp.eq.s32.totalorder %v8288_v27, %v1019_v52  ;;  %v1257_v52 = vld [vmem:[#allocation9 + $0x78] sm:$0xff] }
 0x14f   : > { %vm1060_vm5 = vcmp.eq.s32.totalorder %v8288_v27, %v1022_v37  ;;  %v6264_v38 = vsel %vm1068_vm4, 1.0, %v7841_v31  ;;  %v6255_v55 = vsel %vm1059_vm13, 1.0, %v7841_v31 }
 0x150   : > { %v6256_v39 = vsel %vm1060_vm5, 1.0, %v7841_v31  ;;  %6277 = vmatmul.msk.f32.gmra.mxu2 %vm1112_vm0, %v6261_v35  ;;  %6280 = vmatmul.msk.f32.vlgmr.msra.gmra.mxu3 %vm1112_vm0, %v6264_v38 }
 0x151   : > { %6272 = vmatmul.msk.f32.vlgmr.msra.gmra.mxu1 %vm1112_vm0, %v6256_v39 }
 0x155   : > { %v1013_v40 = vpop.permute.xlu0 %1012 }
 0x156   : > { %v1025_v41 = vpop.permute.xlu1 %1024  ;;  %vm1057_vm8 = vcmp.eq.s32.totalorder %v8288_v27, %v1013_v40 }
 0x157   : > { %vm1061_vm9 = vcmp.eq.s32.totalorder %v8288_v27, %v1025_v41  ;;  %v6253_v43 = vsel %vm1057_vm8, 1.0, %v7841_v31  ;;  %v1256_v41 = vld [vmem:[#allocation9 + $0x70] sm:$0xff] }
 0x158   : > { %v6257_v44 = vsel %vm1061_vm9, 1.0, %v7841_v31  ;;  %6269 = vmatmul.msk.f32.gmra.mxu0 %vm1112_vm0, %v6253_v43  ;;  %6278 = vmatmul.msk.f32.gmra.mxu2 %vm1112_vm0, %v6262_v46 }
 0x159   : > { %6273 = vmatmul.msk.f32.gmra.mxu1 %vm1112_vm0, %v6257_v44  ;;  %6281 = vmatmul.msk.f32.gmra.mxu3 %vm1112_vm0, %v6265_v45  ;;  %v1245_v44 = vld [vmem:[#allocation9 + $0x18] sm:$0xff] }
 0x15d   : > { %v1052_v47 = vpop.permute.xlu0 %1051 }
 0x15e   : > { %v1016_v48 = vpop.permute.xlu1 %1015  ;;  %vm1070_vm11 = vcmp.eq.s32.totalorder %v8288_v27, %v1052_v47 }
 0x15f   : > { %vm1058_vm12 = vcmp.eq.s32.totalorder %v8288_v27, %v1016_v48  ;;  %v6266_v50 = vsel %vm1070_vm11, 1.0, %v7841_v31 }
 0x160   : > { %v6254_v51 = vsel %vm1058_vm12, 1.0, %v7841_v31 }
 0x161   : > { %6270 = vmatmul.msk.f32.gmra.mxu0 %vm1112_vm0, %v6254_v51  ;;  %6274 = vmatmul.msk.f32.gmra.mxu1 %vm1112_vm0, %v6258_v49  ;;  %v1253_v49 = vld [vmem:[#allocation9 + $0x58] sm:$0xff] }
 0x162   : > { %6282 = vmatmul.msk.f32.gmra.mxu3 %vm1112_vm0, %v6266_v50 }
 0x165   : > { %v1043_v53 = vpop.permute.xlu0 %1042 }
 0x166   : > { %v1055_v54 = vpop.permute.xlu1 %1054  ;;  %vm1067_vm14 = vcmp.eq.s32.totalorder %v8288_v27, %v1043_v53 }
 0x167   : > { %vm1071_vm15 = vcmp.eq.s32.totalorder %v8288_v27, %v1055_v54  ;;  %v6263_v56 = vsel %vm1067_vm14, 1.0, %v7841_v31 }
 0x168   : > { %v6267_v57 = vsel %vm1071_vm15, 1.0, %v7841_v31  ;;  %6279 = vmatmul.msk.f32.gmra.mxu2 %vm1112_vm0, %v6263_v56 }
 0x169   : > { %6271 = vmatmul.msk.f32.gmra.mxu0 %vm1112_vm0, %v6255_v55  ;;  %v1249_v55 = vld [vmem:[#allocation9 + $0x38] sm:$0xff] }
 0x16a   : > { %6283 = vmatmul.msk.f32.gmra.mxu3 %vm1112_vm0, %v6267_v57 }
 0x16d   : > { %v1031_v58 = vpop.permute.xlu0 %1030 }
 0x16e   : > { %vm1063_vm1 = vcmp.eq.s32.totalorder %v8288_v27, %v1031_v58  ;;  %v1255_v27 = vld [vmem:[#allocation9 + $0x68] sm:$0xff] }
 0x16f   : > { %v6259_v59 = vsel %vm1063_vm1, 1.0, %v7841_v31  ;;  %v1244_v31 = vld [vmem:[#allocation9 + $0x10] sm:$0xff] }
 0x170   : > { %6275 = vmatmul.msk.f32.gmra.mxu1 %vm1112_vm0, %v6259_v59 }
 0x1c6   : > { %v1178_v60 = vpop.f32.mrf.mxu0 }
 0x1c7   : > { %v1226_v62 = vmul.f32 11.313708, %v1178_v60 }
 0x1c9   : > { %v1258_v63 = vadd.f32 %v1242_v61, %v1226_v62 }
 0x1cb   : > { %1274 = vst [vmem:[#allocation2 + $0x30] sm:$0xff] %v1258_v63  ;;  %v1202_v0 = vpop.f32.mrf.mxu2 }
 0x1cc   : > { %v1234_v2 = vmul.f32 11.313708, %v1202_v0 }
 0x1ce   : > { %v1190_v3 = vpop.f32.mrf.mxu1  ;;  %v1266_v5 = vadd.f32 %v1250_v1, %v1234_v2 }
 0x1cf   : > { %v1230_v6 = vmul.f32 11.313708, %v1190_v3 }
 0x1d0   : > { %1282 = vst [vmem:[#allocation2 + $0x40] sm:$0xff] %v1266_v5 }
 0x1d1   : > { %v1262_v7 = vadd.f32 %v1246_v4, %v1230_v6 }
 0x1d3   : > { %1278 = vst [vmem:[#allocation2 + $0x50] sm:$0xff] %v1262_v7  ;;  %v1205_v8 = vpop.f32.mrf.mxu2  ;;  %v1214_v11 = vpop.f32.mrf.mxu3 }
 0x1d4   : > { %v1235_v10 = vmul.f32 11.313708, %v1205_v8  ;;  %v1238_v13 = vmul.f32 11.313708, %v1214_v11 }
 0x1d5   : > { %v1181_v14 = vpop.f32.mrf.mxu0 }
 0x1d6   : > { %v1193_v16 = vpop.f32.mrf.mxu1  ;;  %v1267_v18 = vadd.f32 %v1251_v9, %v1235_v10  ;;  %v1227_v19 = vmul.f32 11.313708, %v1181_v14  ;;  %v1270_v21 = vadd.f32 %v1254_v12, %v1238_v13 }
 0x1d7   : > { %v1231_v20 = vmul.f32 11.313708, %v1193_v16 }
 0x1d8   : > { %1283 = vst [vmem:[#allocation2 + $0x20] sm:$0xff] %v1267_v18  ;;  %v1259_v22 = vadd.f32 %v1243_v15, %v1227_v19 }
 0x1d9   : > { %v1263_v23 = vadd.f32 %v1247_v17, %v1231_v20  ;;  %1286 = vst [vmem:[#allocation2 + $0x60] sm:$0xff] %v1270_v21 }
 0x1da   : > { %1275 = vst [vmem:[#allocation2] sm:$0xff] %v1259_v22 }
 0x1db   : > { %1279 = vst [vmem:[#allocation2 + $0x68] sm:$0xff] %v1263_v23  ;;  %v1208_v24 = vpop.f32.mrf.mxu2 }
 0x1dc   : > { %v1217_v26 = vpop.f32.mrf.mxu3  ;;  %v1236_v28 = vmul.f32 11.313708, %v1208_v24 }
 0x1dd   : > { %v1239_v29 = vmul.f32 11.313708, %v1217_v26 }
 0x1de   : > { %v1184_v30 = vpop.f32.mrf.mxu0  ;;  %v1196_v32 = vpop.f32.mrf.mxu1  ;;  %v1268_v36 = vadd.f32 %v1252_v25, %v1236_v28 }
 0x1df   : > { %v1228_v34 = vmul.f32 11.313708, %v1184_v30  ;;  %v1232_v35 = vmul.f32 11.313708, %v1196_v32  ;;  %v1271_v37 = vadd.f32 %v1255_v27, %v1239_v29 }
 0x1e0   : > { %1284 = vst [vmem:[#allocation2 + $0x10] sm:$0xff] %v1268_v36 }
 0x1e1   : > { %v1260_v38 = vadd.f32 %v1244_v31, %v1228_v34  ;;  %v1264_v39 = vadd.f32 %v1248_v33, %v1232_v35  ;;  %1287 = vst [vmem:[#allocation2 + $0x70] sm:$0xff] %v1271_v37 }
 0x1e3   : > { %1276 = vst [vmem:[#allocation2 + $0x58] sm:$0xff] %v1260_v38 }
 0x1e4   : > { %1280 = vst [vmem:[#allocation2 + $0x8] sm:$0xff] %v1264_v39 }
 0x1e5   : > { %v1220_v40 = vpop.f32.mrf.mxu3 }
 0x1e6   : > { %v1240_v42 = vmul.f32 11.313708, %v1220_v40  ;;  %v1187_v43 = vpop.f32.mrf.mxu0 }
 0x1e7   : > { %v1229_v45 = vmul.f32 11.313708, %v1187_v43 }
 0x1e8   : > { %v1272_v46 = vadd.f32 %v1256_v41, %v1240_v42 }
 0x1e9   : > { %v1261_v47 = vadd.f32 %v1245_v44, %v1229_v45 }
 0x1ea   : > { %1288 = vst [vmem:[#allocation2 + $0x78] sm:$0xff] %v1272_v46 }
 0x1eb   : > { %1277 = vst [vmem:[#allocation2 + $0x18] sm:$0xff] %v1261_v47  ;;  %v1211_v48 = vpop.f32.mrf.mxu2 }
 0x1ec   : > { %v1237_v50 = vmul.f32 11.313708, %v1211_v48 }
 0x1ed   : > { %v1223_v51 = vpop.f32.mrf.mxu3  ;;  %v1199_v54 = vpop.f32.mrf.mxu1 }
 0x1ee   : > { %v1241_v53 = vmul.f32 11.313708, %v1223_v51  ;;  %v1269_v56 = vadd.f32 %v1253_v49, %v1237_v50  ;;  %v1233_v57 = vmul.f32 11.313708, %v1199_v54 }
 0x1f0   : > { %v1273_v58 = vadd.f32 %v1257_v52, %v1241_v53  ;;  %1285 = vst [vmem:[#allocation2 + $0x38] sm:$0xff] %v1269_v56  ;;  %v1265_v59 = vadd.f32 %v1249_v55, %v1233_v57 }
 0x1f2   : > { %1289 = vst [vmem:[#allocation2 + $0x28] sm:$0xff] %v1273_v58 }
 0x1f3   : > { %1281 = vst [vmem:[#allocation2 + $0x48] sm:$0xff] %v1265_v59 }
 0x1f4 PF: > { %v1292_v60 = vld [vmem:[#allocation2 + $0x58] sm:$0xff]  ;;  %v1290_v61 = vld [vmem:[#allocation2 + $0x30] sm:$0xff]  ;;  %v1291_v0 = vld [vmem:[#allocation2] sm:$0xff]  ;;  %v7842_v3 = vmov 128.0   ;;  %s11687_s18 = sld [smem:[#allocation52_spill]]  ;;  %s7845_s30 = smov 96  }
 0x1f5   : > { %1432 = vadd.xlane.f32.xlu1 %v1292_v60  ;;  %1428 = vadd.xlane.f32.xlu0 %v1290_v61  ;;  %v1294_v62 = vld [vmem:[#allocation2 + $0x50] sm:$0xff]  ;;  %v1293_v63 = vld [vmem:[#allocation2 + $0x18] sm:$0xff]  ;;  %v1295_v1 = vld [vmem:[#allocation2 + $0x68] sm:$0xff]  ;;  %6948 = vrcp.f32 %v7842_v3  ;;  %s7846_s19 = smov 32   ;;  %s11704_s25 = scalar_lea.vmem [#allocation11], %s8189_s29 }
 0x1f6   : > { %1436 = vadd.xlane.f32.xlu2 %v1294_v62  ;;  %v1296_v2 = vld [vmem:[#allocation2 + $0x8] sm:$0xff]  ;;  %v8351_v32 = vld [vmem:[#allocation2 + $0x40] sm:$0xff]  ;;  %v8373_v43 = vld [vmem:[#allocation2 + $0x10] sm:$0xff]  ;;  %s11780_s17 = sld [smem:[#allocation61_spill]]  ;;  %p6573_p8 = scmp.ge.s32.totalorder %s7975_s2, 1 }
 0x1f7   : > { %v8361_v38 = vld [vmem:[#allocation2 + $0x38] sm:$0xff]  ;;  %v8363_v39 = vld [vmem:[#allocation2 + $0x20] sm:$0xff]  ;;  %v8377_v44 = vld [vmem:[#allocation2 + $0x70] sm:$0xff] }
 0x1f8   : > { %v8371_v42 = vld [vmem:[#allocation2 + $0x60] sm:$0xff]  ;;  %v8380_v45 = vld [vmem:[#allocation2 + $0x78] sm:$0xff]  ;;  %v6371_v46 = vld [vmem:[%s8230_s10 + $0xa8] sm:$0xf] }
 0x1f9   : > { %v6604_v47 = vld [vmem:[%s8230_s10 + $0xb0] sm:$0xf0]  ;;  %v6603_v48 = vld [vmem:[%s8230_s10 + $0xac] sm:$0xf]  ;;  %v6373_v50 = vld [vmem:[%s8230_s10 + $0xb4] sm:$0xf0] }
 0x1fa   : > { %v8337_v24 = vld [vmem:[#allocation2 + $0x48] sm:$0xff]  ;;  %v6372_v49 = vor.u32 %v6604_v47, %v6371_v46  ;;  %v6379_v51 = vld [vmem:[%s8230_s10 + $0xb0] sm:$0xf]  ;;  %v6605_v52 = vld [vmem:[%s8230_s10 + $0xb8] sm:$0xf0]  ;;  %v6376_v53 = vor.u32 %v6603_v48, %v6373_v50 }
 0x1fb   : > { %v6949_v4 = vpop.eup %6948  ;;  %v6380_v54 = vor.u32 %v6605_v52, %v6379_v51  ;;  %v6359_v55 = vld [vmem:[%s8230_s10 + $0x90] sm:$0xf]  ;;  %v6601_v56 = vld [vmem:[%s8230_s10 + $0x98] sm:$0xf0]  ;;  %v6600_v57 = vld [vmem:[%s8230_s10 + $0x94] sm:$0xf] }
 0x1fc   : > { %v1461_v5 = vmul.f32 128.0, %v6949_v4  ;;  %vm1465_vm0 = vweird.f32 %v6949_v4  ;;  %2225 = vmatpush.bf16.msra.mxu0 %v6372_v49  ;;  %2274 = vmatpush.bf16.msra.mxu1 %v6376_v53  ;;  %v6360_v58 = vor.u32 %v6601_v56, %v6359_v55  ;;  %v6361_v59 = vld [vmem:[%s8230_s10 + $0x9c] sm:$0xf0]  ;;  %v6598_v3 = vld [vmem:[%s8230_s10 + $0x80] sm:$0xf0]  ;;  %s11781_s8 = scalar_lea.vmem %s11780_s17, %s8201_s6 }
 0x1fd   : > { %1434 = vadd.xlane.f32.xlu1 %v1293_v63  ;;  %1430 = vadd.xlane.f32.xlu0 %v1291_v0  ;;  %v6591_v46 = vld [vmem:[%s8230_s10 + $0x4c] sm:$0xf]  ;;  %v6325_v48 = vld [vmem:[%s8230_s10 + $0x54] sm:$0xf0]  ;;  %v6331_v49 = vld [vmem:[%s8230_s10 + $0x50] sm:$0xf] }
 0x1fe   : > { %1438 = vadd.xlane.f32.xlu2 %v1295_v1  ;;  %v1462_v6 = vsub.f32 1.0, %v1461_v5  ;;  %2323 = vmatpush.bf16.msra.mxu2 %v6380_v54  ;;  %v6349_v5 = vld [vmem:[%s8230_s10 + $0x84] sm:$0xf0]  ;;  %v6328_v52 = vor.u32 %v6591_v46, %v6325_v48  ;;  %v6593_v53 = vld [vmem:[%s8230_s10 + $0x58] sm:$0xf0] }
 0x1ff   : > { %v6332_v55 = vor.u32 %v6593_v53, %v6331_v49  ;;  %v6311_v56 = vld [vmem:[%s8230_s10 + $0x30] sm:$0xf]  ;;  %v6582_v49 = vld [vmem:[%s8230_s10 + $0x4] sm:$0xf] }
 0x200   : > { %v1463_v7 = vmul.f32 %v6949_v4, %v1462_v6  ;;  %2226 = vmatpush.bf16.msra.mxu0 %v6360_v58 }
 0x202   : > { %v1464_v8 = vadd.f32 %v6949_v4, %v1463_v7 }
 0x204   : > { %v8322_v9 = vsel %vm1465_vm0, %v6949_v4, %v1464_v8  ;;  %v6597_v4 = vld [vmem:[%s8230_s10 + $0x7c] sm:$0xf]  ;;  %v6355_v8 = vld [vmem:[%s8230_s10 + $0x80] sm:$0xf] }
 0x205   : > { %11679 = vst [vmem:[#allocation28_spill] sm:$0xff] %v8322_v9  ;;  %v6352_v7 = vor.u32 %v6597_v4, %v6349_v5 }
 0x206   : > { %1440 = vadd.xlane.f32.xlu2 %v1296_v2 }
 0x268   : > { %v1433_v10 = vpop.xlane.xlu1 %1432  ;;  %v1429_v11 = vpop.xlane.xlu0 %1428 }
 0x269   : > { %v1467_v12 = vmul.f32 %v8322_v9, %v1429_v11  ;;  %v1437_v14 = vpop.xlane.xlu2 %1436  ;;  %v1469_v23 = vmul.f32 %v8322_v9, %v1433_v10  ;;  %v6599_v10 = vld [vmem:[%s8230_s10 + $0x88] sm:$0xf0] }
 0x26a   : > { %v1471_v22 = vmul.f32 %v8322_v9, %v1437_v14  ;;  %v6356_v11 = vor.u32 %v6599_v10, %v6355_v8  ;;  %v6595_v14 = vld [vmem:[%s8230_s10 + $0x68] sm:$0xf0] }
 0x26b   : > { %v8325_v13 = vsub.f32 %v1290_v61, %v1467_v12  ;;  %v8346_v29 = vsub.f32 %v1292_v60, %v1469_v23  ;;  %v6367_v60 = vld [vmem:[%s8230_s10 + $0x98] sm:$0xf]  ;;  %v6602_v61 = vld [vmem:[%s8230_s10 + $0xa0] sm:$0xf0]  ;;  %v6335_v12 = vld [vmem:[%s8230_s10 + $0x60] sm:$0xf] }
 0x26c   : > { %v8344_v28 = vsub.f32 %v1294_v62, %v1471_v22 }
 0x26d   : > { %v1499_v15 = vmul.f32 %v8325_v13, %v8325_v13  ;;  %v1501_v33 = vmul.f32 %v8346_v29, %v8346_v29 }
 0x26e   : > { %v1503_v30 = vmul.f32 %v8344_v28, %v8344_v28 }
 0x26f   : > { %1515 = vadd.xlane.f32.xlu0 %v1499_v15  ;;  %v6594_v15 = vld [vmem:[%s8230_s10 + $0x64] sm:$0xf] }
 0x270   : > { %v1435_v16 = vpop.xlane.xlu1 %1434  ;;  %v1431_v17 = vpop.xlane.xlu0 %1430 }
 0x271   : > { %v1470_v18 = vmul.f32 %v8322_v9, %v1435_v16  ;;  %v1468_v19 = vmul.f32 %v8322_v9, %v1431_v17  ;;  %v1439_v27 = vpop.xlane.xlu2 %1438  ;;  %v6336_v16 = vor.u32 %v6595_v14, %v6335_v12  ;;  %v6337_v17 = vld [vmem:[%s8230_s10 + $0x6c] sm:$0xf0] }
 0x272   : > { %v1472_v31 = vmul.f32 %v8322_v9, %v1439_v27 }
 0x273   : > { %v8331_v20 = vsub.f32 %v1293_v63, %v1470_v18  ;;  %v8333_v21 = vsub.f32 %v1291_v0, %v1468_v19  ;;  %v6364_v63 = vor.u32 %v6600_v57, %v6361_v59  ;;  %v6368_v0 = vor.u32 %v6602_v61, %v6367_v60  ;;  %v6343_v18 = vld [vmem:[%s8230_s10 + $0x68] sm:$0xf]  ;;  %v6596_v19 = vld [vmem:[%s8230_s10 + $0x70] sm:$0xf0]  ;;  %v6589_v57 = vld [vmem:[%s8230_s10 + $0x38] sm:$0xf0] }
 0x274   : > { %v8356_v34 = vsub.f32 %v1295_v1, %v1472_v31  ;;  %v6312_v59 = vor.u32 %v6589_v57, %v6311_v56  ;;  %v6588_v60 = vld [vmem:[%s8230_s10 + $0x34] sm:$0xf]  ;;  %v6313_v61 = vld [vmem:[%s8230_s10 + $0x3c] sm:$0xf0]  ;;  %v6295_v57 = vld [vmem:[%s8230_s10 + $0x8] sm:$0xf] }
 0x275   : > { %v1502_v25 = vmul.f32 %v8331_v20, %v8331_v20  ;;  %v1500_v26 = vmul.f32 %v8333_v21, %v8333_v21  ;;  %2275 = vmatpush.bf16.msra.mxu1 %v6364_v63  ;;  %2324 = vmatpush.bf16.msra.mxu2 %v6368_v0 }
 0x276   : > { %v1504_v36 = vmul.f32 %v8356_v34, %v8356_v34 }
 0x277   : > { %1521 = vadd.xlane.f32.xlu2 %v1502_v25  ;;  %1442 = vadd.xlane.f32.xlu0 %v8337_v24  ;;  %v6340_v25 = vor.u32 %v6594_v15, %v6337_v17  ;;  %v6586_v17 = vld [vmem:[%s8230_s10 + $0x20] sm:$0xf0] }
 0x278   : > { %1517 = vadd.xlane.f32.xlu1 %v1500_v26  ;;  %v6344_v26 = vor.u32 %v6596_v19, %v6343_v18  ;;  %v6585_v18 = vld [vmem:[%s8230_s10 + $0x1c] sm:$0xf] }
 0x279   : > { %v1441_v35 = vpop.xlane.xlu2 %1440  ;;  %2276 = vmatpush.bf16.msra.mxu1 %v6352_v7  ;;  %2325 = vmatpush.bf16.msra.mxu2 %v6356_v11 }
 0x27a   : > { %v1473_v37 = vmul.f32 %v8322_v9, %v1441_v35 }
 0x27c   : > { %v8366_v40 = vsub.f32 %v1296_v2, %v1473_v37  ;;  %v6347_v2 = vld [vmem:[%s8230_s10 + $0x78] sm:$0xf]  ;;  %v6323_v37 = vld [vmem:[%s8230_s10 + $0x48] sm:$0xf] }
 0x27d   : > { %v6348_v6 = vor.u32 %v6598_v3, %v6347_v2  ;;  %2277 = vmatpush.bf16.msra.mxu1 %v6340_v25  ;;  %2326 = vmatpush.bf16.msra.mxu2 %v6344_v26  ;;  %v6316_v2 = vor.u32 %v6588_v60, %v6313_v61  ;;  %v6590_v3 = vld [vmem:[%s8230_s10 + $0x40] sm:$0xf0]  ;;  %v6307_v25 = vld [vmem:[%s8230_s10 + $0x20] sm:$0xf]  ;;  %v6587_v26 = vld [vmem:[%s8230_s10 + $0x28] sm:$0xf0] }
 0x27e   : > { %v1505_v41 = vmul.f32 %v8366_v40, %v8366_v40  ;;  %v6308_v48 = vor.u32 %v6587_v26, %v6307_v25 }
 0x27f   : > { %1523 = vadd.xlane.f32.xlu2 %v1503_v30  ;;  %1444 = vadd.xlane.f32.xlu0 %v8351_v32 }
 0x280   : > { %1519 = vadd.xlane.f32.xlu1 %v1501_v33  ;;  %2227 = vmatpush.bf16.msra.mxu0 %v6348_v6 }
 0x281   : > { %2278 = vmatpush.bf16.msra.mxu1 %v6328_v52  ;;  %2327 = vmatpush.bf16.msra.mxu2 %v6332_v55 }
 0x284   : > { %2228 = vmatpush.bf16.msra.mxu0 %v6336_v16  ;;  %v6299_v16 = vld [vmem:[%s8230_s10 + $0x18] sm:$0xf] }
 0x285   : > { %2279 = vmatpush.bf16.msra.mxu1 %v6316_v2 }
 0x287   : > { %1450 = vadd.xlane.f32.xlu2 %v8361_v38  ;;  %1525 = vadd.xlane.f32.xlu0 %v1504_v36 }
 0x288   : > { %1446 = vadd.xlane.f32.xlu1 %v8363_v39 }
 0x28f   : > { %1452 = vadd.xlane.f32.xlu2 %v8371_v42  ;;  %1527 = vadd.xlane.f32.xlu0 %v1505_v41  ;;  %v6592_v41 = vld [vmem:[%s8230_s10 + $0x50] sm:$0xf0] }
 0x290   : > { %1448 = vadd.xlane.f32.xlu1 %v8373_v43  ;;  %v6324_v51 = vor.u32 %v6592_v41, %v6323_v37  ;;  %v6583_v37 = vld [vmem:[%s8230_s10 + $0x8] sm:$0xf0] }
 0x292   : > { %2229 = vmatpush.bf16.msra.mxu0 %v6324_v51  ;;  %v6289_v51 = vld [vmem:[%s8230_s10 + $0xc] sm:$0xf0] }
 0x296   : > { %2230 = vmatpush.bf16.msra.mxu0 %v6312_v59 }
 0x297   : > { %1454 = vadd.xlane.f32.xlu0 %v8377_v44 }
 0x29f   : > { %1456 = vadd.xlane.f32.xlu0 %v8380_v45 }
 0x2e2   : > { %v1516_v62 = vpop.xlane.xlu0 %1515 }
 0x2e3   : > { %v8395_v1 = vmul.f32 0.007874016, %v1516_v62  ;;  %v6319_v62 = vld [vmem:[%s8230_s10 + $0x38] sm:$0xf] }
 0x2e4   : > { %v6320_v7 = vor.u32 %v6590_v3, %v6319_v62 }
 0x2e5   : > { %6950 = vrsqrt.f32 %v8395_v1  ;;  %vm1589_vm2 = vcmp.eq.f32.partialorder %v8395_v1, inf  ;;  %v1592_v41 = vand.u32 2147483648, %v8395_v1  ;;  %vm1591_vm3 = vcmp.eq.f32.partialorder %v8395_v1, 0.0 }
 0x2e6   : > { %2328 = vmatpush.bf16.msra.mxu2 %v6320_v7 }
 0x2ea   : > { %v1522_v22 = vpop.xlane.xlu2 %1521  ;;  %v1443_v23 = vpop.xlane.xlu0 %1442  ;;  %2329 = vmatpush.bf16.msra.mxu2 %v6308_v48 }
 0x2eb   : > { %v6951_v27 = vpop.eup %6950  ;;  %v8410_v30 = vmul.f32 0.007874016, %v1522_v22  ;;  %v1518_v31 = vpop.xlane.xlu1 %1517  ;;  %v1474_v33 = vmul.f32 %v8322_v9, %v1443_v23  ;;  %v6301_v23 = vld [vmem:[%s8230_s10 + $0x24] sm:$0xf0] }
 0x2ec   : > { %v1583_v35 = vmul.f32 %v6951_v27, %v8395_v1  ;;  %v8414_v36 = vmul.f32 0.007874016, %v1518_v31 }
 0x2ed   : > { %6952 = vrsqrt.f32 %v8410_v30  ;;  %v8424_v50 = vsub.f32 %v8337_v24, %v1474_v33  ;;  %v6300_v33 = vor.u32 %v6586_v17, %v6299_v16  ;;  %vm1625_vm6 = vcmp.eq.f32.partialorder %v8410_v30, inf }
 0x2ee   : > { %v1584_v47 = vmul.f32 %v6951_v27, %v1583_v35  ;;  %6954 = vrsqrt.f32 %v8414_v36  ;;  %v6287_v35 = vld [vmem:[%s8230_s10] sm:$0xf]  ;;  %vm1601_vm4 = vcmp.eq.f32.partialorder %v8414_v36, inf  ;;  %vm1603_vm5 = vcmp.eq.f32.partialorder %v8414_v36, 0.0 }
 0x2ef   : > { %v1506_v58 = vmul.f32 %v8424_v50, %v8424_v50  ;;  %2231 = vmatpush.bf16.msra.mxu0 %v6300_v33  ;;  %v6288_v56 = vor.u32 %v6583_v37, %v6287_v35  ;;  %vm1627_vm8 = vcmp.eq.f32.partialorder %v8410_v30, 0.0 }
 0x2f0   : > { %v1585_v54 = vmul.f32 0.5, %v1584_v47  ;;  %v6304_v47 = vor.u32 %v6585_v18, %v6301_v23 }
 0x2f1   : > { %1529 = vadd.xlane.f32.xlu1 %v1506_v58  ;;  %v6584_v58 = vld [vmem:[%s8230_s10 + $0x10] sm:$0xf0]  ;;  %s11680_s10 = scalar_lea.vmem [#allocation11], %s8189_s29 }
 0x2f2   : > { %v1586_v63 = vsub.f32 1.5, %v1585_v54  ;;  %v1524_v24 = vpop.xlane.xlu2 %1523  ;;  %v1445_v0 = vpop.xlane.xlu0 %1444  ;;  %2280 = vmatpush.bf16.msra.mxu1 %v6304_v47 }
 0x2f3   : > { %v8435_v4 = vpop.eup %6952  ;;  %v8437_v5 = vmul.f32 0.007874016, %v1524_v24  ;;  %v1520_v6 = vpop.xlane.xlu1 %1519  ;;  %v1475_v14 = vmul.f32 %v8322_v9, %v1445_v0  ;;  %v6292_v24 = vor.u32 %v6582_v49, %v6289_v51  ;;  %2232 = vmatpush.bf16.msra.mxu0 %v6288_v56 }
 0x2f4   : > { %v6955_v8 = vpop.eup %6954  ;;  %v1587_v10 = vmul.f32 %v6951_v27, %v1586_v63  ;;  %v1619_v11 = vmul.f32 %v8435_v4, %v8410_v30  ;;  %v8441_v12 = vmul.f32 0.007874016, %v1520_v6  ;;  %v6296_v6 = vor.u32 %v6584_v58, %v6295_v57 }
 0x2f5   : > { %v1595_v15 = vmul.f32 %v6955_v8, %v8414_v36  ;;  %6956 = vrsqrt.f32 %v8437_v5  ;;  %v8457_v31 = vsub.f32 %v8351_v32, %v1475_v14  ;;  %vm1637_vm9 = vcmp.eq.f32.partialorder %v8437_v5, inf }
 0x2f6   : > { %v1588_v19 = vmul.f32 %v1587_v10, %v8395_v1  ;;  %v1620_v22 = vmul.f32 %v8435_v4, %v1619_v11  ;;  %6958 = vrsqrt.f32 %v8441_v12  ;;  %2281 = vmatpush.bf16.msra.mxu1 %v6292_v24  ;;  %2330 = vmatpush.bf16.msra.mxu2 %v6296_v6  ;;  %vm1613_vm7 = vcmp.eq.f32.partialorder %v8441_v12, inf }
 0x2f7   : > { %v1596_v27 = vmul.f32 %v6955_v8, %v1595_v15  ;;  %v1507_v54 = vmul.f32 %v8457_v31, %v8457_v31  ;;  %v1604_v15 = vand.u32 2147483648, %v8414_v36  ;;  %vm1615_vm10 = vcmp.eq.f32.partialorder %v8441_v12, 0.0 }
 0x2f8   : > { %v1590_v52 = vsel %vm1589_vm2, %v8395_v1, %v1588_v19  ;;  %v1621_v53 = vmul.f32 0.5, %v1620_v22  ;;  %vm1639_vm11 = vcmp.eq.f32.partialorder %v8437_v5, 0.0 }
 0x2f9   : > { %v1597_v46 = vmul.f32 0.5, %v1596_v27  ;;  %1531 = vadd.xlane.f32.xlu1 %v1507_v54  ;;  %v1593_v11 = vsel %vm1591_vm3, %v1592_v41, %v1590_v52  ;;  %v8492_v27 = vld [vmem:[#allocation2 + $0x28] sm:$0xff] }
 0x2fa   : > { %v1451_v32 = vpop.xlane.xlu2 %1450  ;;  %v1526_v55 = vpop.xlane.xlu0 %1525  ;;  %v1622_v14 = vsub.f32 1.5, %v1621_v53  ;;  %v8487_v22 = vadd.f32 1e-06, %v1593_v11 }
 0x2fb   : > { %v6957_v59 = vpop.eup %6956  ;;  %v1598_v60 = vsub.f32 1.5, %v1597_v46  ;;  %v1478_v61 = vmul.f32 %v8322_v9, %v1451_v32  ;;  %v1447_v62 = vpop.xlane.xlu1 %1446  ;;  %v8470_v63 = vmul.f32 0.007874016, %v1526_v55 }
 0x2fc   : > { %v6959_v0 = vpop.eup %6958  ;;  %v1631_v2 = vmul.f32 %v6957_v59, %v8437_v5  ;;  %v1476_v3 = vmul.f32 %v8322_v9, %v1447_v62  ;;  %v1623_v37 = vmul.f32 %v8435_v4, %v1622_v14  ;;  %vm1795_vm14 = vweird.f32 %v8487_v22 }
 0x2fd   : > { %v1599_v7 = vmul.f32 %v6955_v8, %v1598_v60  ;;  %v1607_v10 = vmul.f32 %v6959_v0, %v8441_v12  ;;  %6960 = vrsqrt.f32 %v8470_v63  ;;  %v8481_v18 = vsub.f32 %v8361_v38, %v1478_v61 }
 0x2fe   : > { %v1632_v16 = vmul.f32 %v6957_v59, %v1631_v2  ;;  %v8484_v8 = vsub.f32 %v8363_v39, %v1476_v3  ;;  %6962 = vrcp.f32 %v8487_v22  ;;  %v1616_v61 = vand.u32 2147483648, %v8441_v12 }
 0x2ff   : > { %v1600_v1 = vmul.f32 %v1599_v7, %v8414_v36  ;;  %v1608_v17 = vmul.f32 %v6959_v0, %v1607_v10  ;;  %v1510_v26 = vmul.f32 %v8481_v18, %v8481_v18  ;;  %v1640_v3 = vand.u32 2147483648, %v8437_v5 }
 0x300   : > { %v1633_v19 = vmul.f32 0.5, %v1632_v16  ;;  %v1508_v38 = vmul.f32 %v8484_v8, %v8484_v8  ;;  %vm1649_vm12 = vcmp.eq.f32.partialorder %v8470_v63, inf  ;;  %vm1651_vm13 = vcmp.eq.f32.partialorder %v8470_v63, 0.0 }
 0x301   : > { %v1602_v23 = vsel %vm1601_vm4, %v8414_v36, %v1600_v1  ;;  %v1609_v25 = vmul.f32 0.5, %v1608_v17  ;;  %1537 = vadd.xlane.f32.xlu0 %v1510_v26  ;;  %1458 = vadd.xlane.f32.xlu1 %v8492_v27  ;;  %v1624_v36 = vmul.f32 %v1623_v37, %v8410_v30  ;;  %v1652_v14 = vand.u32 2147483648, %v8470_v63 }
 0x302   : > { %v1453_v39 = vpop.xlane.xlu2 %1452  ;;  %v8496_v33 = vpop.xlane.xlu0 %1527  ;;  %v1605_v48 = vsel %vm1603_vm5, %v1604_v15, %v1602_v23  ;;  %v1634_v49 = vsub.f32 1.5, %v1633_v19  ;;  %1533 = vadd.xlane.f32.xlu2 %v1508_v38  ;;  %v1801_v19 = vand.u32 2147483648, %v8487_v22  ;;  %v1799_v26 = vand.u32 2147483647, %v8487_v22 }
 0x303   : > { %v6961_v35 = vpop.eup %6960  ;;  %v1610_v41 = vsub.f32 1.5, %v1609_v25  ;;  %v1479_v46 = vmul.f32 %v8322_v9, %v1453_v39  ;;  %v1449_v47 = vpop.xlane.xlu1 %1448  ;;  %v8510_v32 = vadd.f32 1e-06, %v1605_v48  ;;  %v1626_v2 = vsel %vm1625_vm6, %v8410_v30, %v1624_v36 }
 0x304   : > { %v1643_v51 = vmul.f32 %v6961_v35, %v8470_v63  ;;  %v1477_v52 = vmul.f32 %v8322_v9, %v1449_v47  ;;  %v1635_v57 = vmul.f32 %v6957_v59, %v1634_v49  ;;  %v6963_v24 = vpop.eup %6962  ;;  %v1802_v49 = vor.u32 1.1754944e-38, %v1801_v19 }
 0x305   : > { %v1611_v53 = vmul.f32 %v6959_v0, %v1610_v41  ;;  %v8516_v56 = vsub.f32 %v8371_v42, %v1479_v46  ;;  %6964 = vrcp.f32 %v8510_v32  ;;  %v1791_v7 = vmul.f32 %v6963_v24, %v8487_v22 }
 0x306   : > { %v1644_v4 = vmul.f32 %v6961_v35, %v1643_v51  ;;  %v8508_v54 = vsub.f32 %v8373_v43, %v1477_v52  ;;  %v1628_v43 = vand.u32 2147483648, %v8410_v30  ;;  %v1636_v10 = vmul.f32 %v1635_v57, %v8437_v5  ;;  %v8563_v30 = vld [vmem:[%s11680_s10] ss:$0 sm:$0xff] }
 0x307   : > { %v1612_v55 = vmul.f32 %v1611_v53, %v8441_v12  ;;  %v1511_v62 = vmul.f32 %v8516_v56, %v8516_v56  ;;  %v1792_v16 = vsub.f32 1.0, %v1791_v7  ;;  %vm1796_vm15 = vweird.f32 %v6963_v24 }
 0x308   : > { %v1645_v58 = vmul.f32 0.5, %v1644_v4  ;;  %v1509_v60 = vmul.f32 %v8508_v54, %v8508_v54  ;;  %v1629_v23 = vsel %vm1627_vm8, %v1628_v43, %v1626_v2  ;;  %vm1810_vm1 = vweird.f32 %v8510_v32  ;;  %vm1797_vm0 = vmor %vm1795_vm14, %vm1796_vm15 }
 0x309   : > { %v1614_v42 = vsel %vm1613_vm7, %v8441_v12, %v1612_v55  ;;  %1539 = vadd.xlane.f32.xlu1 %v1511_v62  ;;  %v1793_v25 = vmul.f32 %v6963_v24, %v1792_v16  ;;  %v1638_v12 = vsel %vm1637_vm9, %v8437_v5, %v1636_v10  ;;  %v1814_v46 = vand.u32 2147483647, %v8510_v32 }
 0x30a   : > { %v1646_v0 = vsub.f32 1.5, %v1645_v58  ;;  %v1455_v59 = vpop.xlane.xlu0 %1454  ;;  %1535 = vadd.xlane.f32.xlu2 %v1509_v60  ;;  %v1617_v1 = vsel %vm1615_vm10, %v1616_v61, %v1614_v42  ;;  %v1816_v51 = vand.u32 2147483648, %v8510_v32  ;;  %vm1800_vm3 = vcmp.eq.f32.partialorder %v1799_v26, 8.507059e+37 }
 0x30b   : > { %v1480_v6 = vmul.f32 %v8322_v9, %v1455_v59  ;;  %v6965_v38 = vpop.eup %6964  ;;  %v1794_v37 = vadd.f32 %v6963_v24, %v1793_v25  ;;  %v1566_v36 = vmul.f32 %v8563_v30, %v8325_v13  ;;  %v1567_v58 = vmul.f32 %v8563_v30, %v8333_v21  ;;  %v8604_v59 = vld [vmem:[%s821_s1] ss:$0 sm:$0xff] }
 0x30c   : > { %v1647_v11 = vmul.f32 %v6961_v35, %v1646_v0  ;;  %v8559_v35 = vadd.f32 1e-06, %v1629_v23  ;;  %v1806_v41 = vmul.f32 %v6965_v38, %v8510_v32  ;;  %vm1811_vm2 = vweird.f32 %v6965_v38 }
 0x30d   : > { %v8541_v15 = vsub.f32 %v8377_v44, %v1480_v6  ;;  %v8551_v44 = vadd.f32 1e-06, %v1617_v1  ;;  %v1798_v53 = vsel %vm1797_vm0, %v6963_v24, %v1794_v37  ;;  %vm8586_vm4 = vmor %vm1810_vm1, %vm1811_vm2  ;;  %v1817_v43 = vor.u32 1.1754944e-38, %v1816_v51 }
 0x30e   : > { %v1648_v17 = vmul.f32 %v1647_v11, %v8470_v63  ;;  %v1807_v4 = vsub.f32 1.0, %v1806_v41  ;;  %v1803_v22 = vsel %vm1800_vm3, %v1802_v49, %v1798_v53  ;;  %v1641_v61 = vsel %vm1639_vm11, %v1640_v3, %v1638_v12 }
 0x30f   : > { %v1512_v39 = vmul.f32 %v8541_v15, %v8541_v15  ;;  %6966 = vrcp.f32 %v8551_v44  ;;  %vm1815_vm5 = vcmp.eq.f32.partialorder %v1814_v46, 8.507059e+37  ;;  %vm1825_vm6 = vweird.f32 %v8551_v44 }
 0x310   : > { %v1650_v47 = vsel %vm1649_vm12, %v8470_v63, %v1648_v17  ;;  %6968 = vrcp.f32 %v8559_v35  ;;  %v1808_v57 = vmul.f32 %v6965_v38, %v1807_v4  ;;  %v1804_v21 = vmul.f32 %v1803_v22, %v1566_v36 }
 0x311   : > { %v1653_v13 = vsel %vm1651_vm13, %v1652_v14, %v1650_v47  ;;  %v1829_v42 = vand.u32 2147483647, %v8551_v44  ;;  %v1831_v0 = vand.u32 2147483648, %v8551_v44  ;;  %vm1840_vm7 = vweird.f32 %v8559_v35 }
 0x312   : > { %v1457_v48 = vpop.xlane.xlu0 %1456  ;;  %1541 = vadd.xlane.f32.xlu2 %v1512_v39  ;;  %v1809_v24 = vadd.f32 %v6965_v38, %v1808_v57  ;;  %v1778_v2 = vadd.f32 1e-06, %v1641_v61  ;;  %v1779_v3 = vadd.f32 1e-06, %v1653_v13  ;;  %v1844_v14 = vand.u32 2147483647, %v8559_v35 }
 0x313   : > { %v1481_v52 = vmul.f32 %v8322_v9, %v1457_v48  ;;  %v1846_v16 = vand.u32 2147483648, %v8559_v35  ;;  %v2033_v19 = vadd.f32 %v8604_v59, %v1804_v21  ;;  %v1832_v26 = vor.u32 1.1754944e-38, %v1831_v0 }
 0x314   : > { %v1813_v63 = vsel %vm8586_vm4, %v6965_v38, %v1809_v24  ;;  %6970 = vrcp.f32 %v1778_v2  ;;  %vm1830_vm11 = vcmp.eq.f32.partialorder %v1829_v42, 8.507059e+37  ;;  %v1568_v46 = vmul.f32 %v8563_v30, %v8346_v29 }
 0x315   : > { %v8580_v55 = vsub.f32 %v8380_v45, %v1481_v52  ;;  %v6967_v45 = vpop.eup %6966  ;;  %v1818_v6 = vsel %vm1815_vm5, %v1817_v43, %v1813_v63  ;;  %6972 = vrcp.f32 %v1779_v3  ;;  %v1847_v41 = vor.u32 1.1754944e-38, %v1846_v16 }
 0x316   : > { %v1821_v32 = vmul.f32 %v6967_v45, %v8551_v44  ;;  %v6969_v5 = vpop.eup %6968  ;;  %vm1826_vm8 = vweird.f32 %v6967_v45  ;;  %v1819_v11 = vmul.f32 %v1818_v6, %v1567_v58  ;;  %vm1845_vm13 = vcmp.eq.f32.partialorder %v1844_v14, 8.507059e+37 }
 0x317   : > { %v1513_v62 = vmul.f32 %v8580_v55, %v8580_v55  ;;  %v1836_v10 = vmul.f32 %v6969_v5, %v8559_v35  ;;  %vm1841_vm9 = vweird.f32 %v6969_v5  ;;  %vm8614_vm10 = vmor %vm1825_vm6, %vm1826_vm8  ;;  %v1569_v49 = vmul.f32 %v8563_v30, %v8331_v20 }
 0x318   : > { %v1822_v7 = vsub.f32 1.0, %v1821_v32  ;;  %v2034_v23 = vadd.f32 %v8604_v59, %v1819_v11  ;;  %vm8620_vm12 = vmor %vm1840_vm7, %vm1841_vm9  ;;  %vm1855_vm14 = vweird.f32 %v1778_v2  ;;  %v1859_v4 = vand.u32 2147483647, %v1778_v2 }
 0x319   : > { %1543 = vadd.xlane.f32.xlu0 %v1513_v62  ;;  %v1837_v17 = vsub.f32 1.0, %v1836_v10  ;;  %v1861_v22 = vand.u32 2147483648, %v1778_v2  ;;  %v1876_v58 = vand.u32 2147483648, %v1779_v3  ;;  %vm1870_vm1 = vweird.f32 %v1779_v3 }
 0x31a   : > { %v1823_v1 = vmul.f32 %v6967_v45, %v1822_v7  ;;  %v2049_v39 = vpack.c.bf16 %v2034_v23, %v2033_v19  ;;  %v6971_v48 = vpop.eup %6970  ;;  %v1874_v13 = vand.u32 2147483647, %v1779_v3  ;;  %vm1860_vm3 = vcmp.eq.f32.partialorder %v1859_v4, 8.507059e+37  ;;  %v1307_v4 = vld [vmem:[%s11687_s18 + $0x8] sm:$0xff] }
 0x31b   : > { %v1838_v12 = vmul.f32 %v6969_v5, %v1837_v17  ;;  %v6973_v51 = vpop.eup %6972  ;;  %v1851_v29 = vmul.f32 %v6971_v48, %v1778_v2  ;;  %vm1856_vm15 = vweird.f32 %v6971_v48  ;;  %v1862_v24 = vor.u32 1.1754944e-38, %v1861_v22 }
 0x31c   : > { %v1824_v38 = vadd.f32 %v6967_v45, %v1823_v1  ;;  %2233 = vmatmul.bf16.vlgmr.msra.gmra.mxu0 %v2049_v39  ;;  %2282 = vmatmul.bf16.vlgmr.msra.gmra.mxu1 %v2049_v39  ;;  %v1866_v57 = vmul.f32 %v6973_v51, %v1779_v3  ;;  %vm1871_vm0 = vweird.f32 %v6973_v51  ;;  %vm1857_vm2 = vmor %vm1855_vm14, %vm1856_vm15  ;;  %v1877_v0 = vor.u32 1.1754944e-38, %v1876_v58 }
 0x31d   : > { %v1839_v47 = vadd.f32 %v6969_v5, %v1838_v12  ;;  %2331 = vmatmul.bf16.vlgmr.msra.gmra.mxu2 %v2049_v39  ;;  %v1852_v20 = vsub.f32 1.0, %v1851_v29  ;;  %vm1872_vm4 = vmor %vm1870_vm1, %vm1871_vm0  ;;  %vm1875_vm5 = vcmp.eq.f32.partialorder %v1874_v13, 8.507059e+37  ;;  %v1570_v63 = vmul.f32 %v8563_v30, %v8344_v28 }
 0x31e   : > { %v1828_v44 = vsel %vm8614_vm10, %v6967_v45, %v1824_v38  ;;  %v1867_v61 = vsub.f32 1.0, %v1866_v57  ;;  %v1571_v3 = vmul.f32 %v8563_v30, %v8356_v34  ;;  %v1553_v19 = vmul.f32 0.007874016, %v8496_v33 }
 0x31f   : > { %v1833_v35 = vsel %vm1830_vm11, %v1832_v26, %v1828_v44  ;;  %v1843_v53 = vsel %vm8620_vm12, %v6969_v5, %v1839_v47  ;;  %v1853_v62 = vmul.f32 %v6971_v48, %v1852_v20  ;;  %v7843_v22 = vmov 0  }
 0x320   : > { %v1834_v52 = vmul.f32 %v1833_v35, %v1568_v46  ;;  %v1848_v36 = vsel %vm1845_vm13, %v1847_v41, %v1843_v53  ;;  %v1868_v21 = vmul.f32 %v6973_v51, %v1867_v61  ;;  %6974 = vrsqrt.f32 %v1553_v19  ;;  %6819 = vset.pattern.permute.xlu2 %v7843_v22  ;;  %6818 = vset.pattern.permute.xlu0 %v7843_v22 }
 0x321   : > { %v1849_v60 = vmul.f32 %v1848_v36, %v1569_v49  ;;  %v1854_v42 = vadd.f32 %v6971_v48, %v1853_v62  ;;  %vm1661_vm6 = vcmp.eq.f32.partialorder %v1553_v19, inf  ;;  %v1664_v39 = vand.u32 2147483648, %v1553_v19  ;;  %6820 = vset.pattern.permute.xlu1 %v7843_v22 }
 0x322   : > { %v2035_v43 = vadd.f32 %v8604_v59, %v1834_v52  ;;  %v1869_v5 = vadd.f32 %v6973_v51, %v1868_v21  ;;  %vm1663_vm7 = vcmp.eq.f32.partialorder %v1553_v19, 0.0  ;;  %v8703_v22 = vmul.f32 %v8563_v30, %v8457_v31 }
 0x323   : > { %v2036_v45 = vadd.f32 %v8604_v59, %v1849_v60  ;;  %v1858_v6 = vsel %vm1857_vm2, %v6971_v48, %v1854_v42 }
 0x324   : > { %v1863_v7 = vsel %vm1860_vm3, %v1862_v24, %v1858_v6  ;;  %v1873_v10 = vsel %vm1872_vm4, %v6973_v51, %v1869_v5 }
 0x325   : > { %v2050_v32 = vpack.c.bf16 %v2036_v45, %v2035_v43  ;;  %v1864_v2 = vmul.f32 %v1863_v7, %v1570_v63  ;;  %v1878_v11 = vsel %vm1875_vm5, %v1877_v0, %v1873_v10 }
 0x326   : > { %v1879_v14 = vmul.f32 %v1878_v11, %v1571_v3  ;;  %v6975_v28 = vpop.eup %6974  ;;  %v1306_v11 = vld [vmem:[%s11687_s18] sm:$0xff] }
 0x327   : > { %v2037_v16 = vadd.f32 %v8604_v59, %v1864_v2  ;;  %v1655_v23 = vmul.f32 %v6975_v28, %v1553_v19  ;;  %v1311_v2 = vld [vmem:[%s11687_s18 + $0x28] sm:$0xff] }
 0x328   : > { %v2038_v1 = vadd.f32 %v8604_v59, %v1879_v14 }
 0x329   : > { %v1656_v34 = vmul.f32 %v6975_v28, %v1655_v23 }
 0x32a   : > { %v2051_v17 = vpack.c.bf16 %v2038_v1, %v2037_v16  ;;  %1327 = vperm.xlu2 %6819, %v1307_v4  }
 0x32b   : > { %v1657_v25 = vmul.f32 0.5, %v1656_v34 }
 0x32c   : > { %2238 = vmatmul.bf16.gmra.mxu0 %v2050_v32  ;;  %2287 = vmatmul.bf16.gmra.mxu1 %v2050_v32 }
 0x32d   : > { %2336 = vmatmul.bf16.gmra.mxu2 %v2050_v32  ;;  %v1658_v26 = vsub.f32 1.5, %v1657_v25  ;;  %1324 = vperm.xlu0 %6818, %v1306_v11  }
 0x32f   : > { %v1659_v38 = vmul.f32 %v6975_v28, %v1658_v26 }
 0x331   : > { %v1660_v12 = vmul.f32 %v1659_v38, %v1553_v19 }
 0x332   : > { %1339 = vperm.xlu2 %6819, %v1311_v2  }
 0x333   : > { %v1662_v37 = vsel %vm1661_vm6, %v1553_v19, %v1660_v12 }
 0x334   : > { %v1665_v41 = vsel %vm1663_vm7, %v1664_v39, %v1662_v37 }
 0x335   : > { %v1780_v46 = vadd.f32 1e-06, %v1665_v41  ;;  %v1572_v41 = vmul.f32 %v8563_v30, %v8366_v40 }
 0x337   : > { %6976 = vrcp.f32 %v1780_v46  ;;  %vm1885_vm8 = vweird.f32 %v1780_v46  ;;  %v1891_v43 = vand.u32 2147483648, %v1780_v46  ;;  %v1889_v45 = vand.u32 2147483647, %v1780_v46 }
 0x339   : > { %v1892_v6 = vor.u32 1.1754944e-38, %v1891_v43  ;;  %vm1890_vm13 = vcmp.eq.f32.partialorder %v1889_v45, 8.507059e+37 }
 0x33c   : > { %2243 = vmatmul.bf16.gmra.mxu0 %v2051_v17  ;;  %2292 = vmatmul.bf16.gmra.mxu1 %v2051_v17 }
 0x33d   : > { %2341 = vmatmul.bf16.gmra.mxu2 %v2051_v17  ;;  %v6977_v47 = vpop.eup %6976 }
 0x33e   : > { %v1881_v48 = vmul.f32 %v6977_v47, %v1780_v46  ;;  %vm1886_vm9 = vweird.f32 %v6977_v47 }
 0x33f   : > { %vm8655_vm10 = vmor %vm1885_vm8, %vm1886_vm9 }
 0x340   : > { %v1882_v53 = vsub.f32 1.0, %v1881_v48  ;;  %v1309_v48 = vld [vmem:[%s11687_s18 + $0x18] sm:$0xff] }
 0x341   : > { %1333 = vperm.xlu0 %6818, %v1309_v48  }
 0x342   : > { %v1883_v57 = vmul.f32 %v6977_v47, %v1882_v53 }
 0x344   : > { %v1884_v42 = vadd.f32 %v6977_v47, %v1883_v57 }
 0x346   : > { %v1888_v16 = vsel %vm8655_vm10, %v6977_v47, %v1884_v42  ;;  %v1312_v47 = vld [vmem:[%s11687_s18 + $0x30] sm:$0xff] }
 0x347   : > { %v1893_v26 = vsel %vm1890_vm13, %v1892_v6, %v1888_v16  ;;  %1342 = vperm.xlu2 %6819, %v1312_v47   ;;  %v1313_v6 = vld [vmem:[%s11687_s18 + $0x38] sm:$0xff] }
 0x348   : > { %v1894_v40 = vmul.f32 %v1893_v26, %v1572_v41 }
 0x34f   : > { %1345 = vperm.xlu2 %6819, %v1313_v6  }
 0x364   : > { %v1530_v44 = vpop.xlane.xlu1 %1529 }
 0x365   : > { %v1554_v33 = vmul.f32 0.007874016, %v1530_v44 }
 0x367   : > { %6978 = vrsqrt.f32 %v1554_v33  ;;  %vm1673_vm11 = vcmp.eq.f32.partialorder %v1554_v33, inf  ;;  %v1676_v3 = vand.u32 2147483648, %v1554_v33  ;;  %vm1675_vm12 = vcmp.eq.f32.partialorder %v1554_v33, 0.0 }
 0x36c   : > { %v1532_v35 = vpop.xlane.xlu1 %1531 }
 0x36d   : > { %v6979_v49 = vpop.eup %6978  ;;  %v8642_v52 = vmul.f32 0.007874016, %v1532_v35 }
 0x36e   : > { %v1667_v51 = vmul.f32 %v6979_v49, %v1554_v33 }
 0x36f   : > { %6980 = vrsqrt.f32 %v8642_v52  ;;  %vm1685_vm14 = vcmp.eq.f32.partialorder %v8642_v52, inf  ;;  %v1688_v57 = vand.u32 2147483648, %v8642_v52  ;;  %vm1687_vm15 = vcmp.eq.f32.partialorder %v8642_v52, 0.0 }
 0x370   : > { %v1668_v29 = vmul.f32 %v6979_v49, %v1667_v51 }
 0x372   : > { %v1669_v36 = vmul.f32 0.5, %v1668_v29 }
 0x374   : > { %v1670_v58 = vsub.f32 1.5, %v1669_v36  ;;  %v1538_v60 = vpop.xlane.xlu0 %1537  ;;  %v1459_v61 = vpop.xlane.xlu1 %1458  ;;  %v1573_v36 = vmul.f32 %v8563_v30, %v8424_v50 }
 0x375   : > { %v1534_v20 = vpop.xlane.xlu2 %1533  ;;  %v8648_v13 = vmul.f32 0.007874016, %v1538_v60  ;;  %v6981_v62 = vpop.eup %6980  ;;  %v1482_v32 = vmul.f32 %v8322_v9, %v1459_v61 }
 0x376   : > { %v1671_v24 = vmul.f32 %v6979_v49, %v1670_v58  ;;  %v8650_v21 = vmul.f32 0.007874016, %v1534_v20  ;;  %v1679_v0 = vmul.f32 %v6981_v62, %v8642_v52  ;;  %v8709_v20 = vadd.f32 %v8604_v59, %v1894_v40 }
 0x377   : > { %6982 = vrsqrt.f32 %v8648_v13  ;;  %v8661_v10 = vsub.f32 %v8492_v27, %v1482_v32  ;;  %vm1721_vm3 = vcmp.eq.f32.partialorder %v8648_v13, inf  ;;  %vm1723_vm5 = vcmp.eq.f32.partialorder %v8648_v13, 0.0 }
 0x378   : > { %v1672_v63 = vmul.f32 %v1671_v24, %v1554_v33  ;;  %6984 = vrsqrt.f32 %v8650_v21  ;;  %v1680_v7 = vmul.f32 %v6981_v62, %v1679_v0  ;;  %vm1697_vm1 = vcmp.eq.f32.partialorder %v8650_v21, inf }
 0x379   : > { %v1514_v27 = vmul.f32 %v8661_v10, %v8661_v10  ;;  %vm1699_vm0 = vcmp.eq.f32.partialorder %v8650_v21, 0.0  ;;  %v1700_v5 = vand.u32 2147483648, %v8650_v21  ;;  %v1724_v26 = vand.u32 2147483648, %v8648_v13 }
 0x37a   : > { %v1674_v14 = vsel %vm1673_vm11, %v1554_v33, %v1672_v63  ;;  %v1681_v1 = vmul.f32 0.5, %v1680_v7 }
 0x37b   : > { %v1677_v17 = vsel %vm1675_vm12, %v1676_v3, %v1674_v14  ;;  %1545 = vadd.xlane.f32.xlu1 %v1514_v27 }
 0x37c   : > { %v8673_v19 = vadd.f32 1e-06, %v1677_v17  ;;  %v1682_v23 = vsub.f32 1.5, %v1681_v1  ;;  %v1540_v25 = vpop.xlane.xlu1 %1539 }
 0x37d   : > { %v8675_v28 = vpop.eup %6982  ;;  %v1536_v34 = vpop.xlane.xlu2 %1535  ;;  %v8681_v37 = vmul.f32 0.007874016, %v1540_v25 }
 0x37e   : > { %v6985_v38 = vpop.eup %6984  ;;  %v1715_v12 = vmul.f32 %v8675_v28, %v8648_v13  ;;  %v8679_v39 = vmul.f32 0.007874016, %v1536_v34  ;;  %6986 = vrcp.f32 %v8673_v19  ;;  %v1683_v46 = vmul.f32 %v6981_v62, %v1682_v23 }
 0x37f   : > { %v1691_v44 = vmul.f32 %v6985_v38, %v8650_v21  ;;  %v1904_v2 = vand.u32 2147483647, %v8673_v19  ;;  %v1906_v11 = vand.u32 2147483648, %v8673_v19  ;;  %vm1900_vm4 = vweird.f32 %v8673_v19 }
 0x380   : > { %v1716_v33 = vmul.f32 %v8675_v28, %v1715_v12  ;;  %6988 = vrsqrt.f32 %v8679_v39  ;;  %v1684_v49 = vmul.f32 %v1683_v46, %v8642_v52  ;;  %vm1709_vm8 = vcmp.eq.f32.partialorder %v8679_v39, inf }
 0x381   : > { %v1692_v35 = vmul.f32 %v6985_v38, %v1691_v44  ;;  %6990 = vrsqrt.f32 %v8681_v37  ;;  %v1907_v12 = vor.u32 1.1754944e-38, %v1906_v11  ;;  %vm1905_vm7 = vcmp.eq.f32.partialorder %v1904_v2, 8.507059e+37 }
 0x382   : > { %v1717_v51 = vmul.f32 0.5, %v1716_v33  ;;  %v1686_v53 = vsel %vm1685_vm14, %v8642_v52, %v1684_v49  ;;  %v1310_v52 = vld [vmem:[%s11687_s18 + $0x20] sm:$0xff]  ;;  %vm1711_vm9 = vcmp.eq.f32.partialorder %v8679_v39, 0.0  ;;  %v1712_v40 = vand.u32 2147483648, %v8679_v39 }
 0x383   : > { %v1693_v29 = vmul.f32 0.5, %v1692_v35  ;;  %v1689_v62 = vsel %vm1687_vm15, %v1688_v57, %v1686_v53  ;;  %1336 = vperm.xlu0 %6818, %v1310_v52   ;;  %vm1733_vm10 = vcmp.eq.f32.partialorder %v8681_v37, inf  ;;  %vm1735_vm11 = vcmp.eq.f32.partialorder %v8681_v37, 0.0 }
 0x384   : > { %v6987_v4 = vpop.eup %6986  ;;  %v1718_v45 = vsub.f32 1.5, %v1717_v51  ;;  %v8718_v0 = vadd.f32 1e-06, %v1689_v62 }
 0x385   : > { %v1694_v58 = vsub.f32 1.5, %v1693_v29  ;;  %v1542_v60 = vpop.xlane.xlu2 %1541  ;;  %v1896_v43 = vmul.f32 %v6987_v4, %v8673_v19  ;;  %vm1901_vm2 = vweird.f32 %v6987_v4 }
 0x386   : > { %v6989_v61 = vpop.eup %6988  ;;  %v8712_v50 = vmul.f32 0.007874016, %v1542_v60  ;;  %v1719_v27 = vmul.f32 %v8675_v28, %v1718_v45  ;;  %vm1902_vm6 = vmor %vm1900_vm4, %vm1901_vm2  ;;  %v1921_v57 = vand.u32 2147483648, %v8718_v0  ;;  %v1308_v45 = vld [vmem:[%s11687_s18 + $0x10] sm:$0xff]  ;;  %vm1915_vm13 = vweird.f32 %v8718_v0 }
 0x387   : > { %v6991_v31 = vpop.eup %6990  ;;  %v1695_v24 = vmul.f32 %v6985_v38, %v1694_v58  ;;  %v1703_v32 = vmul.f32 %v6989_v61, %v8679_v39  ;;  %v1897_v42 = vsub.f32 1.0, %v1896_v43  ;;  %v1919_v62 = vand.u32 2147483647, %v8718_v0 }
 0x388   : > { %v1727_v63 = vmul.f32 %v6991_v31, %v8681_v37  ;;  %6992 = vrsqrt.f32 %v8712_v50  ;;  %v1720_v33 = vmul.f32 %v1719_v27, %v8648_v13  ;;  %vm1745_vm12 = vcmp.eq.f32.partialorder %v8712_v50, inf }
 0x389   : > { %v1696_v3 = vmul.f32 %v1695_v24, %v8650_v21  ;;  %v1704_v7 = vmul.f32 %v6989_v61, %v1703_v32  ;;  %v1898_v16 = vmul.f32 %v6987_v4, %v1897_v42  ;;  %6994 = vrcp.f32 %v8718_v0 }
 0x38a   : > { %v1728_v14 = vmul.f32 %v6991_v31, %v1727_v63  ;;  %v1748_v27 = vand.u32 2147483648, %v8712_v50  ;;  %vm1920_vm2 = vcmp.eq.f32.partialorder %v1919_v62, 8.507059e+37 }
 0x38b   : > { %v1698_v1 = vsel %vm1697_vm1, %v8650_v21, %v1696_v3  ;;  %v1705_v17 = vmul.f32 0.5, %v1704_v7  ;;  %v1899_v34 = vadd.f32 %v6987_v4, %v1898_v16 }
 0x38c   : > { %v1729_v23 = vmul.f32 0.5, %v1728_v14  ;;  %v1701_v25 = vsel %vm1699_vm0, %v1700_v5, %v1698_v1 }
 0x38d   : > { %v1706_v38 = vsub.f32 1.5, %v1705_v17  ;;  %v1903_v46 = vsel %vm1902_vm6, %v6987_v4, %v1899_v34  ;;  %v8742_v44 = vadd.f32 1e-06, %v1701_v25  ;;  %v8794_v17 = vld [vmem:[%s8213_s11] sm:$0x7]  ;;  %s7844_s11 = smov 64  }
 0x38e   : > { %v6993_v28 = vpop.eup %6992  ;;  %v1730_v41 = vsub.f32 1.5, %v1729_v23  ;;  %v1908_v47 = vsel %vm1905_vm7, %v1907_v12, %v1903_v46 }
 0x38f   : > { %v1707_v19 = vmul.f32 %v6989_v61, %v1706_v38  ;;  %v1739_v21 = vmul.f32 %v6993_v28, %v8712_v50  ;;  %v6995_v48 = vpop.eup %6994  ;;  %v1909_v49 = vmul.f32 %v1908_v47, %v1573_v36  ;;  %6996 = vrcp.f32 %v8742_v44 }
 0x390   : > { %v1911_v53 = vmul.f32 %v6995_v48, %v8718_v0  ;;  %v1731_v29 = vmul.f32 %v6991_v31, %v1730_v41  ;;  %v1722_v36 = vsel %vm1721_vm3, %v8648_v13, %v1720_v33  ;;  %vm1916_vm14 = vweird.f32 %v6995_v48 }
 0x391   : > { %v1708_v35 = vmul.f32 %v1707_v19, %v8679_v39  ;;  %v1740_v51 = vmul.f32 %v6993_v28, %v1739_v21  ;;  %v2040_v4 = vadd.f32 %v8604_v59, %v1909_v49  ;;  %v1725_v5 = vsel %vm1723_vm5, %v1724_v26, %v1722_v36  ;;  %vm8779_vm1 = vmor %vm1915_vm13, %vm1916_vm14 }
 0x392   : > { %v1912_v43 = vsub.f32 1.0, %v1911_v53  ;;  %v1732_v52 = vmul.f32 %v1731_v29, %v8681_v37  ;;  %vm1930_vm15 = vweird.f32 %v8742_v44  ;;  %v1934_v13 = vand.u32 2147483647, %v8742_v44 }
 0x393   : > { %v1710_v58 = vsel %vm1709_vm8, %v8679_v39, %v1708_v35  ;;  %v1741_v60 = vmul.f32 0.5, %v1740_v51  ;;  %v2052_v61 = vpack.c.bf16 %v2040_v4, %v8709_v20  ;;  %v1922_v20 = vor.u32 1.1754944e-38, %v1921_v57 }
 0x394   : > { %v1913_v24 = vmul.f32 %v6995_v48, %v1912_v43  ;;  %v1713_v32 = vsel %vm1711_vm9, %v1712_v40, %v1710_v58  ;;  %1330 = vperm.xlu1 %6820, %v1308_v45   ;;  %v1936_v2 = vand.u32 2147483648, %v8742_v44  ;;  %v8785_v11 = vadd.f32 1e-06, %v1725_v5 }
 0x395   : > { %v1742_v31 = vsub.f32 1.5, %v1741_v60  ;;  %v6997_v42 = vpop.eup %6996  ;;  %2248 = vmatmul.bf16.gmra.mxu0 %v2052_v61  ;;  %2297 = vmatmul.bf16.gmra.mxu1 %v2052_v61  ;;  %v8772_v63 = vadd.f32 1e-06, %v1713_v32  ;;  %v1736_v0 = vand.u32 2147483648, %v8681_v37  ;;  %v1734_v23 = vsel %vm1733_vm10, %v8681_v37, %v1732_v52 }
 0x396   : > { %2346 = vmatmul.bf16.gmra.mxu2 %v2052_v61  ;;  %v1914_v3 = vadd.f32 %v6995_v48, %v1913_v24  ;;  %v1926_v7 = vmul.f32 %v6997_v42, %v8742_v44  ;;  %vm1931_vm0 = vweird.f32 %v6997_v42  ;;  %vm1747_vm3 = vcmp.eq.f32.partialorder %v8712_v50, 0.0 }
 0x397   : > { %v1743_v6 = vmul.f32 %v6993_v28, %v1742_v31  ;;  %6998 = vrcp.f32 %v8772_v63  ;;  %v1949_v26 = vand.u32 2147483647, %v8772_v63  ;;  %vm8807_vm4 = vmor %vm1930_vm15, %vm1931_vm0  ;;  %v1937_v46 = vor.u32 1.1754944e-38, %v1936_v2 }
 0x398   : > { %v1918_v16 = vsel %vm8779_vm1, %v6995_v48, %v1914_v3  ;;  %v1927_v1 = vsub.f32 1.0, %v1926_v7  ;;  %7000 = vrcp.f32 %v8785_v11  ;;  %v1951_v33 = vand.u32 2147483648, %v8772_v63 }
 0x399   : > { %v1744_v14 = vmul.f32 %v1743_v6, %v8712_v50  ;;  %v1923_v34 = vsel %vm1920_vm2, %v1922_v20, %v1918_v16  ;;  %v2234_v12 = vpop.f32.mrf.mxu0  ;;  %v2283_v28 = vpop.f32.mrf.mxu1  ;;  %v1575_v19 = vmul.f32 %v8563_v30, %v8484_v8  ;;  %v8815_v21 = vperm.slane %v8794_v17, 0 }
 0x39a   : > { %v1928_v25 = vmul.f32 %v6997_v42, %v1927_v1  ;;  %vm1935_vm5 = vcmp.eq.f32.partialorder %v1934_v13, 8.507059e+37  ;;  %v8818_v49 = vperm.slane %v8794_v17, 1  ;;  %v1924_v44 = vmul.f32 %v1923_v34, %v8703_v22 }
 0x39b   : > { %v1746_v38 = vsel %vm1745_vm12, %v8712_v50, %v1744_v14  ;;  %vm1945_vm6 = vweird.f32 %v8772_v63  ;;  %v1737_v35 = vsel %vm1735_vm11, %v1736_v0, %v1734_v23  ;;  %vm8827_vm7 = vcmp.eq.f32.partialorder %v1949_v26, 8.507059e+37 }
 0x39c   : > { %v1929_v47 = vadd.f32 %v6997_v42, %v1928_v25  ;;  %v1749_v53 = vsel %vm1747_vm3, %v1748_v27, %v1746_v38  ;;  %v1952_v22 = vor.u32 1.1754944e-38, %v1951_v33  ;;  %vm1960_vm8 = vweird.f32 %v8785_v11 }
 0x39d   : > { %v6999_v48 = vpop.eup %6998  ;;  %v8834_v57 = vadd.f32 1e-06, %v1737_v35  ;;  %v2041_v60 = vadd.f32 %v8604_v59, %v1924_v44  ;;  %v1964_v43 = vand.u32 2147483647, %v8785_v11  ;;  %v8839_v61 = vadd.f32 1e-06, %v1749_v53 }
 0x39e   : > { %v1933_v40 = vsel %vm8807_vm4, %v6997_v42, %v1929_v47  ;;  %v1941_v8 = vmul.f32 %v6999_v48, %v8772_v63  ;;  %v7001_v29 = vpop.eup %7000  ;;  %vm1946_vm9 = vweird.f32 %v6999_v48  ;;  %v1966_v31 = vand.u32 2147483648, %v8785_v11 }
 0x39f   : > { %v1938_v4 = vsel %vm1935_vm5, %v1937_v46, %v1933_v40  ;;  %v1956_v58 = vmul.f32 %v7001_v29, %v8785_v11  ;;  %7002 = vrcp.f32 %v8834_v57  ;;  %v2235_v24 = vadd.f32 %v2234_v12, %v8815_v21  ;;  %vm8848_vm10 = vmor %vm1945_vm6, %vm1946_vm9 }
 0x3a0   : > { %v1939_v37 = vmul.f32 %v1938_v4, %v1575_v19  ;;  %v1942_v36 = vsub.f32 1.0, %v1941_v8  ;;  %v2284_v32 = vadd.f32 %v2283_v28, %v8818_v49  ;;  %vm1961_vm11 = vweird.f32 %v7001_v29 }
 0x3a1   : > { %v1957_v62 = vsub.f32 1.0, %v1956_v58  ;;  %v2236_v42 = vpop.f32.mrf.mxu0  ;;  %v2285_v52 = vpop.f32.mrf.mxu1  ;;  %7004 = vrcp.f32 %v8839_v61  ;;  %v1576_v39 = vmul.f32 %v8563_v30, %v8508_v54  ;;  %vm8865_vm12 = vmor %vm1960_vm8, %vm1961_vm11  ;;  %v1967_v1 = vor.u32 1.1754944e-38, %v1966_v31 }
 0x3a2   : > { %v2042_v50 = vadd.f32 %v8604_v59, %v1939_v37  ;;  %v1943_v45 = vmul.f32 %v6999_v48, %v1942_v36  ;;  %v2237_v5 = vadd.f32 %v2236_v42, %v8815_v21  ;;  %v2286_v6 = vadd.f32 %v2285_v52, %v8818_v49 }
 0x3a3   : > { %v1958_v13 = vmul.f32 %v7001_v29, %v1957_v62  ;;  %vm1965_vm13 = vcmp.eq.f32.partialorder %v1964_v43, 8.507059e+37  ;;  %v1577_v23 = vmul.f32 %v8563_v30, %v8481_v18  ;;  %vm1975_vm14 = vweird.f32 %v8834_v57 }
 0x3a4   : > { %v2053_v3 = vpack.c.bf16 %v2042_v50, %v2041_v60  ;;  %v1944_v7 = vadd.f32 %v6999_v48, %v1943_v45  ;;  %v8857_v2 = vpack.c.bf16 %v2237_v5, %v2235_v24  ;;  %v8859_v63 = vpack.c.bf16 %v2286_v6, %v2284_v32 }
 0x3a5   : > { %v7003_v0 = vpop.eup %7002  ;;  %v1959_v27 = vadd.f32 %v7001_v29, %v1958_v13  ;;  %v1979_v18 = vand.u32 2147483647, %v8834_v57  ;;  %v1981_v38 = vand.u32 2147483648, %v8834_v57  ;;  %vm1990_vm1 = vweird.f32 %v8839_v61 }
 0x3a6   : > { %2253 = vmatmul.bf16.gmra.mxu0 %v2053_v3  ;;  %2302 = vmatmul.bf16.gmra.mxu1 %v2053_v3  ;;  %v1948_v14 = vsel %vm8848_vm10, %v6999_v48, %v1944_v7  ;;  %v1971_v34 = vmul.f32 %v7003_v0, %v8834_v57  ;;  %vm1976_vm15 = vweird.f32 %v7003_v0  ;;  %v1996_v48 = vand.u32 2147483648, %v8839_v61 }
 0x3a7   : > { %2351 = vmatmul.bf16.gmra.mxu2 %v2053_v3  ;;  %v1953_v54 = vsel %vm8827_vm7, %v1952_v22, %v1948_v14  ;;  %3089 = vrot.lane.b32.xlu1 %v8859_v63, %s7844_s11  ;;  %v7005_v25 = vpop.eup %7004  ;;  %v1963_v26 = vsel %vm8865_vm12, %v7001_v29, %v1959_v27  ;;  %v1994_v40 = vand.u32 2147483647, %v8839_v61  ;;  %vm8893_vm2 = vmor %vm1975_vm14, %vm1976_vm15  ;;  %v1982_v53 = vor.u32 1.1754944e-38, %v1981_v38 }
 0x3a8   : > { %2703 = vrot.lane.b32.xlu2 %v8857_v2, %s7845_s30  ;;  %v1954_v11 = vmul.f32 %v1953_v54, %v1576_v39  ;;  %2727 = vrot.lane.b32.xlu0 %v8859_v63, %s7845_s30  ;;  %v1968_v12 = vsel %vm1965_vm13, %v1967_v1, %v1963_v26  ;;  %v1972_v28 = vsub.f32 1.0, %v1971_v34  ;;  %v1986_v41 = vmul.f32 %v7005_v25, %v8839_v61 }
 0x3a9   : > { %v2239_v46 = vpop.f32.mrf.mxu0  ;;  %v2288_v33 = vpop.f32.mrf.mxu1  ;;  %v1969_v19 = vmul.f32 %v1968_v12, %v1577_v23  ;;  %vm1991_vm0 = vweird.f32 %v7005_v25  ;;  %vm1980_vm3 = vcmp.eq.f32.partialorder %v1979_v18, 8.507059e+37  ;;  %v1997_v36 = vor.u32 1.1754944e-38, %v1996_v48 }
 0x3aa   : > { %v2043_v47 = vadd.f32 %v8604_v59, %v1954_v11  ;;  %v1973_v44 = vmul.f32 %v7003_v0, %v1972_v28  ;;  %v1987_v35 = vsub.f32 1.0, %v1986_v41  ;;  %vm8897_vm4 = vmor %vm1990_vm1, %vm1991_vm0  ;;  %v1578_v58 = vmul.f32 %v8563_v30, %v8516_v56  ;;  %v1544_v23 = vpop.xlane.xlu0 %1543  ;;  %v8957_v41 = vpop.f32.mrf.mxu2 }
 0x3ab   : > { %v2044_v8 = vadd.f32 %v8604_v59, %v1969_v19  ;;  %vm1995_vm5 = vcmp.eq.f32.partialorder %v1994_v40, 8.507059e+37  ;;  %v1579_v61 = vmul.f32 %v8563_v30, %v8541_v15  ;;  %v2289_v24 = vadd.f32 %v2288_v33, %v8818_v49 }
 0x3ac   : > { %v1974_v29 = vadd.f32 %v7003_v0, %v1973_v44  ;;  %v1988_v4 = vmul.f32 %v7005_v25, %v1987_v35  ;;  %v2240_v7 = vadd.f32 %v2239_v46, %v8815_v21  ;;  %v1561_v11 = vmul.f32 0.007874016, %v1544_v23 }
 0x3ad   : > { %v2054_v22 = vpack.c.bf16 %v2044_v8, %v2043_v47 }
 0x3ae   : > { %v1978_v57 = vsel %vm8893_vm2, %v7003_v0, %v1974_v29  ;;  %v1989_v60 = vadd.f32 %v7005_v25, %v1988_v4  ;;  %7006 = vrsqrt.f32 %v1561_v11  ;;  %vm1757_vm6 = vcmp.eq.f32.partialorder %v1561_v11, inf }
 0x3af   : > { %3427 = vrot.lane.b32.xlu1 %v8857_v2, %s7846_s19  ;;  %v1983_v43 = vsel %vm1980_vm3, %v1982_v53, %v1978_v57  ;;  %v1760_v46 = vand.u32 2147483648, %v1561_v11  ;;  %vm1759_vm7 = vcmp.eq.f32.partialorder %v1561_v11, 0.0  ;;  %vm2396_vm2 = vcmask 261120  }
 0x3b0   : > { %3073 = vrot.lane.b32.xlu2 %v8857_v2, %s7844_s11  ;;  %3443 = vrot.lane.b32.xlu0 %v8859_v63, %s7846_s19  ;;  %v1984_v56 = vmul.f32 %v1983_v43, %v1578_v58  ;;  %v1993_v50 = vsel %vm8897_vm4, %v7005_v25, %v1989_v60 }
 0x3b1   : > { %v2241_v45 = vpop.f32.mrf.mxu0  ;;  %v2290_v62 = vpop.f32.mrf.mxu1  ;;  %v1998_v31 = vsel %vm1995_vm5, %v1997_v36, %v1993_v50 }
 0x3b2   : > { %v2291_v32 = vadd.f32 %v2290_v62, %v8818_v49  ;;  %v1999_v42 = vmul.f32 %v1998_v31, %v1579_v61  ;;  %v2045_v20 = vadd.f32 %v8604_v59, %v1984_v56  ;;  %v2242_v5 = vadd.f32 %v2241_v45, %v8815_v21  ;;  %v8959_v44 = vpop.f32.mrf.mxu2  ;;  %v8965_v31 = vpop.permute.xlu2 %1327 }
 0x3b4   : > { %v8917_v52 = vpack.c.bf16 %v2291_v32, %v2289_v24  ;;  %v2046_v15 = vadd.f32 %v8604_v59, %v1999_v42  ;;  %v8927_v39 = vpack.c.bf16 %v2242_v5, %v2240_v7  ;;  %v7007_v34 = vpop.eup %7006 }
 0x3b5   : > { %v1751_v25 = vmul.f32 %v7007_v34, %v1561_v11 }
 0x3b6   : > { %2258 = vmatmul.bf16.gmra.mxu0 %v2054_v22  ;;  %2307 = vmatmul.bf16.gmra.mxu1 %v2054_v22  ;;  %v2055_v30 = vpack.c.bf16 %v2046_v15, %v2045_v20 }
 0x3b7   : > { %2356 = vmatmul.bf16.gmra.mxu2 %v2054_v22  ;;  %2729 = vrot.lane.b32.xlu1 %v8917_v52, %s7845_s30  ;;  %v1752_v26 = vmul.f32 %v7007_v34, %v1751_v25 }
 0x3b8   : > { %3445 = vrot.lane.b32.xlu2 %v8917_v52, %s7846_s19 }
 0x3b9   : > { %v2244_v6 = vpop.f32.mrf.mxu0  ;;  %v2293_v3 = vpop.f32.mrf.mxu1  ;;  %v1753_v18 = vmul.f32 0.5, %v1752_v26 }
 0x3ba   : > { %v2245_v14 = vadd.f32 %v2244_v6, %v8815_v21  ;;  %v2294_v16 = vadd.f32 %v2293_v3, %v8818_v49  ;;  %v8961_v4 = vpop.f32.mrf.mxu2  ;;  %v8973_v25 = vpop.permute.xlu2 %1339 }
 0x3bb   : > { %v1754_v38 = vsub.f32 1.5, %v1753_v18  ;;  %11705 = vst [vmem:[#allocation29_spill] sm:$0xff] %v8973_v25 }
 0x3bd   : > { %v1755_v12 = vmul.f32 %v7007_v34, %v1754_v38 }
 0x3bf   : > { %2705 = vrot.lane.b32.xlu1 %v8927_v39, %s7845_s30  ;;  %v1756_v28 = vmul.f32 %v1755_v12, %v1561_v11 }
 0x3c0   : > { %3429 = vrot.lane.b32.xlu2 %v8927_v39, %s7846_s19 }
 0x3c1   : > { %v2246_v59 = vpop.f32.mrf.mxu0  ;;  %v2295_v13 = vpop.f32.mrf.mxu1  ;;  %v1758_v33 = vsel %vm1757_vm6, %v1561_v11, %v1756_v28 }
 0x3c2   : > { %v2247_v1 = vadd.f32 %v2246_v59, %v8815_v21  ;;  %v2296_v0 = vadd.f32 %v2295_v13, %v8818_v49  ;;  %v1761_v48 = vsel %vm1759_vm7, %v1760_v46, %v1758_v33  ;;  %v8963_v50 = vpop.f32.mrf.mxu2 }
 0x3c3   : > { %v1788_v35 = vadd.f32 1e-06, %v1761_v48 }
 0x3c4   : > { %v8937_v54 = vpack.c.bf16 %v2247_v1, %v2245_v14  ;;  %v8939_v27 = vpack.c.bf16 %v2296_v0, %v2294_v16  ;;  %v7334_v1 = vld [vmem:[%s11704_s25] ss:$0 sm:$0xff] }
 0x3c5   : > { %vm2005_vm10 = vweird.f32 %v1788_v35  ;;  %v2011_v62 = vand.u32 2147483648, %v1788_v35  ;;  %v2009_v32 = vand.u32 2147483647, %v1788_v35  ;;  %v1580_v0 = vmul.f32 %v7334_v1, %v8580_v55 }
 0x3c6   : > { %2263 = vmatmul.bf16.gmra.mxu0 %v2055_v30  ;;  %2312 = vmatmul.bf16.gmra.mxu1 %v2055_v30  ;;  %v1581_v34 = vmul.f32 %v7334_v1, %v8661_v10 }
 0x3c7   : > { %2361 = vmatmul.bf16.gmra.mxu2 %v2055_v30  ;;  %3091 = vrot.lane.b32.xlu1 %v8917_v52, %s7844_s11  ;;  %v2012_v15 = vor.u32 1.1754944e-38, %v2011_v62  ;;  %vm2010_vm13 = vcmp.eq.f32.partialorder %v2009_v32, 8.507059e+37 }
 0x3c8   : > { %2731 = vrot.lane.b32.xlu2 %v8939_v27, %s7845_s30  ;;  %2707 = vrot.lane.b32.xlu0 %v8937_v54, %s7845_s30 }
 0x3ca   : > { %v8967_v3 = vpop.f32.mrf.mxu2 }
 0x3cf   : > { %3075 = vrot.lane.b32.xlu1 %v8927_v39, %s7844_s11 }
 0x3d0   : > { %3447 = vrot.lane.b32.xlu2 %v8939_v27, %s7846_s19  ;;  %3093 = vrot.lane.b32.xlu0 %v8939_v27, %s7844_s11 }
 0x3d7   : > { %3431 = vrot.lane.b32.xlu1 %v8937_v54, %s7846_s19 }
 0x3d8   : > { %3077 = vrot.lane.b32.xlu2 %v8937_v54, %s7844_s11 }
 0x3ee   : > { %v1546_v19 = vpop.xlane.xlu1 %1545 }
 0x3ef   : > { %v1562_v47 = vmul.f32 0.007874016, %v1546_v19  ;;  %v7335_v19 = vld [vmem:[%s821_s1] ss:$0 sm:$0xff] }
 0x3f1   : > { %7008 = vrsqrt.f32 %v1562_v47  ;;  %vm1769_vm8 = vcmp.eq.f32.partialorder %v1562_v47, inf  ;;  %v1772_v57 = vand.u32 2147483648, %v1562_v47  ;;  %vm1771_vm9 = vcmp.eq.f32.partialorder %v1562_v47, 0.0 }
 0x3f2   : > { %7010 = vrcp.f32 %v1788_v35 }
 0x3f7   : > { %v7009_v40 = vpop.eup %7008 }
 0x3f8   : > { %v1763_v8 = vmul.f32 %v7009_v40, %v1562_v47  ;;  %v7011_v29 = vpop.eup %7010 }
 0x3f9   : > { %v2001_v36 = vmul.f32 %v7011_v29, %v1788_v35  ;;  %vm2006_vm11 = vweird.f32 %v7011_v29  ;;  %v8979_v35 = vpop.f32.mrf.mxu2 }
 0x3fa   : > { %v1764_v51 = vmul.f32 %v7009_v40, %v1763_v8  ;;  %vm2007_vm12 = vmor %vm2005_vm10, %vm2006_vm11 }
 0x3fb   : > { %v2002_v61 = vsub.f32 1.0, %v2001_v36 }
 0x3fc   : > { %v1765_v53 = vmul.f32 0.5, %v1764_v51 }
 0x3fd   : > { %v2003_v45 = vmul.f32 %v7011_v29, %v2002_v61 }
 0x3fe   : > { %v1766_v22 = vsub.f32 1.5, %v1765_v53 }
 0x3ff   : > { %v2004_v24 = vadd.f32 %v7011_v29, %v2003_v45 }
 0x400   : > { %v1767_v37 = vmul.f32 %v7009_v40, %v1766_v22 }
 0x401   : > { %v2008_v5 = vsel %vm2007_vm12, %v7011_v29, %v2004_v24  ;;  %v8993_v29 = vpop.permute.xlu2 %1342 }
 0x402   : > { %v1768_v58 = vmul.f32 %v1767_v37, %v1562_v47  ;;  %v2013_v16 = vsel %vm2010_vm13, %v2012_v15, %v2008_v5  ;;  %11706 = vst [vmem:[#allocation30_spill] sm:$0xff] %v8993_v29 }
 0x403   : > { %v2014_v26 = vmul.f32 %v2013_v16, %v1580_v0 }
 0x404   : > { %v1770_v60 = vsel %vm1769_vm8, %v1562_v47, %v1768_v58 }
 0x405   : > { %v1773_v43 = vsel %vm1771_vm9, %v1772_v57, %v1770_v60  ;;  %v2047_v47 = vadd.f32 %v7335_v19, %v2014_v26 }
 0x406   : > { %v1789_v56 = vadd.f32 1e-06, %v1773_v43 }
 0x408   : > { %7012 = vrcp.f32 %v1789_v56  ;;  %v2026_v59 = vand.u32 2147483648, %v1789_v56  ;;  %v2024_v14 = vand.u32 2147483647, %v1789_v56  ;;  %vm2020_vm15 = vweird.f32 %v1789_v56 }
 0x409   : > { %v8999_v57 = vpop.permute.xlu2 %1345 }
 0x40a   : > { %v2027_v11 = vor.u32 1.1754944e-38, %v2026_v59  ;;  %vm2025_vm0 = vcmp.eq.f32.partialorder %v2024_v14, 8.507059e+37  ;;  %11707 = vst [vmem:[#allocation31_spill] sm:$0xff] %v8999_v57 }
 0x40e   : > { %v7013_v42 = vpop.eup %7012 }
 0x40f   : > { %v2016_v20 = vmul.f32 %v7013_v42, %v1789_v56  ;;  %vm2021_vm14 = vweird.f32 %v7013_v42 }
 0x410   : > { %vm2022_vm1 = vmor %vm2020_vm15, %vm2021_vm14 }
 0x411   : > { %v2017_v6 = vsub.f32 1.0, %v2016_v20  ;;  %v9015_v20 = vpop.permute.xlu2 %2703 }
 0x412   : > { %v2249_v30 = vpop.f32.mrf.mxu0  ;;  %v2298_v7 = vpop.f32.mrf.mxu1 }
 0x413   : > { %v2018_v13 = vmul.f32 %v7013_v42, %v2017_v6  ;;  %v2250_v46 = vadd.f32 %v2249_v30, %v8815_v21  ;;  %v2299_v10 = vadd.f32 %v2298_v7, %v8818_v49 }
 0x415   : > { %v2019_v23 = vadd.f32 %v7013_v42, %v2018_v13 }
 0x417   : > { %v2023_v18 = vsel %vm2022_vm1, %v7013_v42, %v2019_v23 }
 0x418   : > { %v2028_v38 = vsel %vm2025_vm0, %v2027_v11, %v2023_v18 }
 0x419   : > { %v2029_v12 = vmul.f32 %v2028_v38, %v1581_v34  ;;  %v2347_v36 = vpop.f32.mrf.mxu2  ;;  %v9027_v13 = vpop.permute.xlu2 %3073 }
 0x41a   : > { %v2251_v28 = vpop.f32.mrf.mxu0  ;;  %v2300_v55 = vpop.f32.mrf.mxu1 }
 0x41b   : > { %v2252_v33 = vadd.f32 %v2251_v28, %v8815_v21  ;;  %v2048_v48 = vadd.f32 %v7335_v19, %v2029_v12  ;;  %v2301_v40 = vadd.f32 %v2300_v55, %v8818_v49  ;;  %v1315_v28 = vld [vmem:[%s11687_s18 + $0x48] sm:$0xff]  ;;  %v9056_v55 = vperm.slane %v8794_v17, 2  ;;  %v9060_v19 = vpop.permute.xlu1 %1330 }
 0x41d   : > { %v8983_v8 = vpack.c.bf16 %v2252_v33, %v2250_v46  ;;  %v2056_v51 = vpack.c.bf16 %v2048_v48, %v2047_v47  ;;  %v8985_v53 = vpack.c.bf16 %v2301_v40, %v2299_v10  ;;  %v1316_v46 = vld [vmem:[%s11687_s18 + $0x50] sm:$0xff]  ;;  %v2348_v10 = vadd.f32 %v2347_v36, %v9056_v55  ;;  %v1314_v40 = vld [vmem:[%s11687_s18 + $0x40] sm:$0xff] }
 0x41f   : > { %2709 = vrot.lane.b32.xlu2 %v8983_v8, %s7845_s30  ;;  %2268 = vmatmul.bf16.gmra.mxu0 %v2056_v51 }
 0x420   : > { %3449 = vrot.lane.b32.xlu1 %v8985_v53, %s7846_s19  ;;  %2733 = vrot.lane.b32.xlu0 %v8985_v53, %s7845_s30 }
 0x421   : > { %2317 = vmatmul.bf16.gmra.mxu1 %v2056_v51  ;;  %2366 = vmatmul.bf16.gmra.mxu2 %v2056_v51  ;;  %v2349_v24 = vpop.f32.mrf.mxu2  ;;  %v9043_v34 = vpop.permute.xlu2 %3445 }
 0x422   : > { %v2350_v47 = vadd.f32 %v2349_v24, %v9056_v55  ;;  %v2338_v24 = vadd.f32 %v8961_v4, %v9056_v55  ;;  %v2345_v4 = vadd.f32 %v8979_v35, %v9056_v55 }
 0x423   : > { %v2254_v22 = vpop.f32.mrf.mxu0  ;;  %v2303_v37 = vpop.f32.mrf.mxu1 }
 0x424   : > { %v2255_v60 = vadd.f32 %v2254_v22, %v8815_v21  ;;  %v2304_v56 = vadd.f32 %v2303_v37, %v8818_v49  ;;  %v9069_v51 = vpack.c.bf16 %v2350_v47, %v2348_v10  ;;  %v9076_v37 = vpop.permute.xlu1 %3089 }
 0x426   : > { %11709 = vst [vmem:[#allocation33_spill] sm:$0xff] %v9069_v51 }
 0x427   : > { %3079 = vrot.lane.b32.xlu2 %v8983_v8, %s7844_s11 }
 0x428   : > { %3095 = vrot.lane.b32.xlu0 %v8985_v53, %s7844_s11 }
 0x429   : > { %v9063_v48 = vpop.permute.xlu2 %3429 }
 0x42a   : > { %v2352_v30 = vpop.f32.mrf.mxu2  ;;  %11708 = vst [vmem:[#allocation32_spill] sm:$0xff] %v9063_v48 }
 0x42b   : > { %v2256_v58 = vpop.f32.mrf.mxu0  ;;  %v2305_v61 = vpop.f32.mrf.mxu1 }
 0x42c   : > { %v2257_v43 = vadd.f32 %v2256_v58, %v8815_v21  ;;  %v2306_v45 = vadd.f32 %v2305_v61, %v8818_v49 }
 0x42e   : > { %v9005_v62 = vpack.c.bf16 %v2257_v43, %v2255_v60  ;;  %v9007_v32 = vpack.c.bf16 %v2306_v45, %v2304_v56  ;;  %v1319_v43 = vld [vmem:[%s11687_s18 + $0x68] sm:$0xff]  ;;  %v2340_v56 = vadd.f32 %v8963_v50, %v9056_v55  ;;  %v2353_v45 = vadd.f32 %v2352_v30, %v9056_v55 }
 0x42f   : > { %3433 = vrot.lane.b32.xlu2 %v8983_v8, %s7846_s19  ;;  %v2343_v50 = vadd.f32 %v8967_v3, %v9056_v55 }
 0x430   : > { %3451 = vrot.lane.b32.xlu1 %v9007_v32, %s7846_s19  ;;  %2711 = vrot.lane.b32.xlu0 %v9005_v62, %s7845_s30 }
 0x431   : > { %v9079_v58 = vpop.permute.xlu2 %2731  ;;  %v9117_v30 = vpack.c.bf16 %v2345_v4, %v2343_v50 }
 0x432   : > { %v2354_v16 = vpop.f32.mrf.mxu2 }
 0x433   : > { %v2308_v42 = vpop.f32.mrf.mxu1  ;;  %v2259_v15 = vpop.f32.mrf.mxu0  ;;  %v2355_v61 = vadd.f32 %v2354_v16, %v9056_v55  ;;  %11712 = vst [vmem:[#allocation36_spill] sm:$0xff] %v9117_v30 }
 0x434   : > { %v2309_v6 = vadd.f32 %v2308_v42, %v8818_v49  ;;  %v2260_v23 = vadd.f32 %v2259_v15, %v8815_v21  ;;  %v9096_v42 = vpop.permute.xlu1 %3427 }
 0x435   : > { %11710 = vst [vmem:[#allocation34_spill] sm:$0xff] %v9096_v42  ;;  %v9098_v15 = vpack.c.bf16 %v2355_v61, %v2353_v45 }
 0x437   : > { %2735 = vrot.lane.b32.xlu2 %v9007_v32, %s7845_s30 }
 0x438   : > { %3435 = vrot.lane.b32.xlu1 %v9005_v62, %s7846_s19  ;;  %3081 = vrot.lane.b32.xlu0 %v9005_v62, %s7844_s11 }
 0x43a   : > { %v2357_v18 = vpop.f32.mrf.mxu2 }
 0x43b   : > { %v2310_v5 = vpop.f32.mrf.mxu1  ;;  %v2261_v14 = vpop.f32.mrf.mxu0  ;;  %v2358_v36 = vadd.f32 %v2357_v18, %v9056_v55  ;;  %v2333_v18 = vadd.f32 %v8957_v41, %v9056_v55 }
 0x43c   : > { %v2311_v7 = vadd.f32 %v2310_v5, %v8818_v49  ;;  %v2262_v1 = vadd.f32 %v2261_v14, %v8815_v21  ;;  %v1317_v5 = vld [vmem:[%s11687_s18 + $0x58] sm:$0xff]  ;;  %v9107_v14 = vpop.permute.xlu2 %3447 }
 0x43e   : > { %v9025_v59 = vpack.c.bf16 %v2311_v7, %v2309_v6  ;;  %v9037_v11 = vpack.c.bf16 %v2262_v1, %v2260_v23  ;;  %v9103_v6 = vpack.c.bf16 %v2340_v56, %v2338_v24  ;;  %v9105_v7 = vpop.permute.xlu0 %1324  ;;  %v1318_v1 = vld [vmem:[%s11687_s18 + $0x60] sm:$0xff]  ;;  %v9125_v23 = vpop.permute.xlu1 %2729 }
 0x43f   : > { %3097 = vrot.lane.b32.xlu2 %v9007_v32, %s7844_s11 }
 0x440   : > { %3453 = vrot.lane.b32.xlu0 %v9025_v59, %s7846_s19  ;;  %2737 = vrot.lane.b32.xlu1 %v9025_v59, %s7845_s30  ;;  %11711 = vst [vmem:[#allocation35_spill] sm:$0xff] %v9103_v6 }
 0x442   : > { %v2359_v17 = vpop.f32.mrf.mxu2 }
 0x443   : > { %v2313_v0 = vpop.f32.mrf.mxu1  ;;  %v2360_v22 = vadd.f32 %v2359_v17, %v9056_v55  ;;  %v2264_v47 = vpop.f32.mrf.mxu0 }
 0x444   : > { %v2314_v38 = vadd.f32 %v2313_v0, %v8818_v49  ;;  %v1320_v0 = vld [vmem:[%s11687_s18 + $0x70] sm:$0xff]  ;;  %v9131_v3 = vpop.permute.xlu2 %3077  ;;  %v2265_v24 = vadd.f32 %v2264_v47, %v8815_v21 }
 0x445   : > { %v9081_v60 = vpack.c.bf16 %v2360_v22, %v2358_v36 }
 0x446   : > { %v9129_v35 = vpop.permute.xlu0 %1333 }
 0x447   : > { %3099 = vrot.lane.b32.xlu2 %v9025_v59, %s7844_s11 }
 0x448   : > { %2713 = vrot.lane.b32.xlu1 %v9037_v11, %s7845_s30 }
 0x44a   : > { %v2362_v16 = vpop.f32.mrf.mxu2 }
 0x44b   : > { %v2315_v26 = vpop.f32.mrf.mxu1  ;;  %v2363_v10 = vadd.f32 %v2362_v16, %v9056_v55  ;;  %v2266_v61 = vpop.f32.mrf.mxu0 }
 0x44c   : > { %v2316_v12 = vadd.f32 %v2315_v26, %v8818_v49  ;;  %v2335_v26 = vadd.f32 %v8959_v44, %v9056_v55  ;;  %v2267_v56 = vadd.f32 %v2266_v61, %v8815_v21 }
 0x44e   : > { %v9053_v33 = vpack.c.bf16 %v2316_v12, %v2314_v38  ;;  %v9137_v38 = vpack.c.bf16 %v2335_v26, %v2333_v18  ;;  %v9149_v44 = vpop.permute.xlu0 %1336  ;;  %v9176_v4 = vpack.c.bf16 %v2267_v56, %v2265_v24 }
 0x44f   : > { %1351 = vperm.xlu2 %6819, %v1315_v28   ;;  %v9145_v28 = vpop.permute.xlu1 %2705 }
 0x450   : > { %2739 = vrot.lane.b32.xlu0 %v9053_v33, %s7845_s30  ;;  %1354 = vperm.xlu1 %6820, %v1316_v46   ;;  %11713 = vst [vmem:[#allocation37_spill] sm:$0xff] %v9137_v38 }
 0x452   : > { %v2364_v12 = vpop.f32.mrf.mxu2 }
 0x453   : > { %v2365_v41 = vadd.f32 %v2364_v12, %v9056_v55 }
 0x455   : > { %v2394_v17 = vpack.c.bf16 %v2365_v41, %v2363_v10 }
 0x457   : > { %3437 = vrot.lane.b32.xlu2 %v9037_v11, %s7846_s19  ;;  %v9161_v36 = vpop.permute.xlu1 %3091 }
 0x458   : > { %1348 = vperm.xlu0 %6818, %v1314_v40   ;;  %3006 = vrot.lane.b32.xlu1 %v9069_v51, %s7845_s30  ;;  %v1321_v40 = vld [vmem:[%s11687_s18 + $0x78] sm:$0xff] }
 0x45f   : > { %3010 = vrot.lane.b32.xlu2 %v9081_v60, %s7845_s30 }
 0x460   : > { %3083 = vrot.lane.b32.xlu0 %v9037_v11, %s7844_s11  ;;  %1363 = vperm.xlu1 %6820, %v1319_v43   ;;  %v9163_v43 = vpop.permute.xlu0 %2727 }
 0x467   : > { %3008 = vrot.lane.b32.xlu2 %v9098_v15, %s7845_s30 }
 0x468   : > { %1357 = vperm.xlu0 %6818, %v1317_v5   ;;  %3002 = vrot.lane.b32.xlu1 %v9103_v6, %s7845_s30  ;;  %v9174_v5 = vpop.permute.xlu1 %3075  ;;  %v9178_v50 = vpop.permute.xlu0 %3443 }
 0x46f   : > { %3004 = vrot.lane.b32.xlu2 %v9117_v30, %s7845_s30 }
 0x470   : > { %1360 = vperm.xlu0 %6818, %v1318_v1   ;;  %1366 = vperm.xlu1 %6820, %v1320_v0   ;;  %v9186_v1 = vpop.permute.xlu0 %2707  ;;  %v9188_v0 = vpop.permute.xlu1 %3431 }
 0x471   : > { %11716 = vst [vmem:[#allocation40_spill] sm:$0xff] %v9188_v0 }
 0x477   : > { %3718 = vrot.lane.b32.xlu2 %v9081_v60, %s7846_s19 }
 0x478   : > { %3000 = vrot.lane.b32.xlu0 %v9137_v38, %s7845_s30  ;;  %3101 = vrot.lane.b32.xlu1 %v9053_v33, %s7844_s11  ;;  %v9198_v47 = vpop.permute.xlu0 %3093 }
 0x479   : > { %v9147_v46 = vpop.permute.xlu2 %2709 }
 0x47f   : > { %3716 = vrot.lane.b32.xlu2 %v9098_v15, %s7846_s19 }
 0x480   : > { %1369 = vperm.xlu0 %6818, %v1321_v40   ;;  %3012 = vrot.lane.b32.xlu1 %v2394_v17, %s7845_s30 }
 0x481   : > { %v9159_v22 = vpop.permute.xlu2 %3079 }
 0x482   : > { %11714 = vst [vmem:[#allocation38_spill] sm:$0xff] %v9159_v22 }
 0x487   : > { %3364 = vrot.lane.b32.xlu2 %v9081_v60, %s7844_s11 }
 0x488   : > { %3714 = vrot.lane.b32.xlu0 %v9069_v51, %s7846_s19  ;;  %3366 = vrot.lane.b32.xlu1 %v2394_v17, %s7844_s11 }
 0x489   : > { %v9171_v45 = vpop.permute.xlu2 %3433 }
 0x48a   : > { %11715 = vst [vmem:[#allocation39_spill] sm:$0xff] %v9171_v45 }
 0x48f   : > { %2715 = vrot.lane.b32.xlu2 %v9176_v4, %s7845_s30 }
 0x490   : > { %3362 = vrot.lane.b32.xlu0 %v9098_v15, %s7844_s11 }
 0x491   : > { %v9184_v16 = vpop.permute.xlu2 %2735 }
 0x492   : > { %v9196_v41 = vpop.permute.xlu1 %3449  ;;  %v9208_v0 = vpop.permute.xlu0 %2733 }
 0x497   : > { %3439 = vrot.lane.b32.xlu2 %v9176_v4, %s7846_s19 }
 0x498   : > { %3455 = vrot.lane.b32.xlu0 %v9053_v33, %s7846_s19 }
 0x499   : > { %v9194_v26 = vpop.permute.xlu2 %3097 }
 0x49a   : > { %v9228_v25 = vpop.permute.xlu0 %3095 }
 0x49c   : > { %v2269_v18 = vpop.f32.mrf.mxu0 }
 0x49d   : > { %v2270_v22 = vadd.f32 %v2269_v18, %v8815_v21 }
 0x49e   : > { %v2318_v12 = vpop.f32.mrf.mxu1 }
 0x49f   : > { %v2319_v56 = vadd.f32 %v2318_v12, %v8818_v49 }
 0x4a0   : > { %3085 = vrot.lane.b32.xlu0 %v9176_v4, %s7844_s11 }
 0x4a1   : > { %v9202_v10 = vpop.permute.xlu2 %3099 }
 0x4a2   : > { %v9205_v24 = vpop.permute.xlu1 %3451 }
 0x4a4   : > { %v2367_v40 = vpop.f32.mrf.mxu2  ;;  %v2271_v9 = vpop.f32.mrf.mxu0 }
 0x4a5   : > { %v2272_v57 = vadd.f32 %v2271_v9, %v8815_v21  ;;  %v2440_v21 = vsel %vm2396_vm2, %v9053_v33, 0 }
 0x4a6   : > { %v2320_v61 = vpop.f32.mrf.mxu1 }
 0x4a7   : > { %v2321_v45 = vadd.f32 %v2320_v61, %v8818_v49  ;;  %v2368_v49 = vadd.f32 %v2367_v40, %v9056_v55  ;;  %v2428_v40 = vsel %vm2396_vm2, %v8939_v27, 0 }
 0x4a8   : > { %3720 = vrot.lane.b32.xlu0 %v2394_v17, %s7846_s19 }
 0x4a9   : > { %v2387_v48 = vpack.c.bf16 %v2321_v45, %v2319_v56  ;;  %v9211_v42 = vpop.permute.xlu2 %1351  ;;  %v9220_v45 = vpack.c.bf16 %v2272_v57, %v2270_v22 }
 0x4aa   : > { %11717 = vst [vmem:[#allocation41_spill] sm:$0xff] %v9211_v42  ;;  %v9224_v9 = vpop.permute.xlu1 %3435 }
 0x4ab   : > { %3103 = vrot.lane.b32.xlu1 %v2387_v48, %s7844_s11  ;;  %2741 = vrot.lane.b32.xlu2 %v2387_v48, %s7845_s30  ;;  %v2443_v12 = vsel %vm2396_vm2, %v2387_v48, 0  ;;  %11718 = vst [vmem:[#allocation42_spill] sm:$0xff] %v9224_v9 }
 0x4ac   : > { %v2369_v29 = vpop.f32.mrf.mxu2  ;;  %2445 = vmatpush.bf16.xpose.msra.mxu3 %v2443_v12 }
 0x4ad   : > { %v2370_v61 = vadd.f32 %v2369_v29, %v9056_v55  ;;  %v2437_v55 = vsel %vm2396_vm2, %v9025_v59, 0 }
 0x4af   : > { %v2395_v56 = vpack.c.bf16 %v2370_v61, %v2368_v49 }
 0x4b0   : > { %2717 = vrot.lane.b32.xlu0 %v9220_v45, %s7845_s30 }
 0x4b1   : > { %2646 = vmatpush.bf16.msrb.mxu0 %v2395_v56  ;;  %v9226_v42 = vpop.permute.xlu2 %3437 }
 0x4b2   : > { %11719 = vst [vmem:[#allocation43_spill] sm:$0xff] %v9226_v42  ;;  %v2738_v57 = vpop.permute.xlu1 %2737 }
 0x4b3   : > { %3014 = vrot.lane.b32.xlu1 %v2395_v56, %s7845_s30  ;;  %3457 = vrot.lane.b32.xlu2 %v2387_v48, %s7846_s19  ;;  %v9243_v48 = vpop.permute.xlu0 %2711 }
 0x4b4   : > { %2446 = vmatpush.bf16.xpose.msra.mxu3 %v2440_v21 }
 0x4b5   : > { %2647 = vmatpush.bf16.msrb.mxu0 %v2394_v17 }
 0x4b8   : > { %3087 = vrot.lane.b32.xlu0 %v9220_v45, %s7844_s11 }
 0x4b9   : > { %2648 = vmatpush.bf16.msrb.mxu0 %v9081_v60  ;;  %v9237_v29 = vpop.permute.xlu2 %3010  ;;  %v2434_v60 = vsel %vm2396_vm2, %v9007_v32, 0 }
 0x4ba   : > { %v9252_v17 = vpop.permute.xlu1 %2713 }
 0x4bb   : > { %3441 = vrot.lane.b32.xlu2 %v9220_v45, %s7846_s19  ;;  %v9255_v59 = vpop.permute.xlu0 %3081 }
 0x4bc   : > { %2447 = vmatpush.bf16.xpose.msra.mxu3 %v2437_v55 }
 0x4bd   : > { %2649 = vmatpush.bf16.msrb.mxu0 %v9098_v15  ;;  %v2431_v15 = vsel %vm2396_vm2, %v8985_v53, 0 }
 0x4c1   : > { %2650 = vmatpush.bf16.msrb.mxu0 %v9069_v51  ;;  %v9247_v33 = vpop.permute.xlu2 %3008 }
 0x4c2   : > { %v9264_v32 = vpop.permute.xlu1 %1354 }
 0x4c3   : > { %3722 = vrot.lane.b32.xlu2 %v2395_v56, %s7846_s19  ;;  %v9266_v18 = vpop.permute.xlu0 %3453 }
 0x4c4   : > { %2448 = vmatpush.bf16.xpose.msra.mxu3 %v2434_v60  ;;  %v2422_v60 = vsel %vm2396_vm2, %v8859_v63, 0 }
 0x4c5   : > { %2651 = vmatpush.bf16.msrb.mxu0 %v9117_v30 }
 0x4c9   : > { %2652 = vmatpush.bf16.msrb.mxu0 %v9103_v6  ;;  %v9258_v22 = vpop.permute.xlu2 %3004 }
 0x4ca   : > { %v3007_v61 = vpop.permute.xlu1 %3006 }
 0x4cb   : > { %3368 = vrot.lane.b32.xlu2 %v2395_v56, %s7844_s11  ;;  %v2740_v49 = vpop.permute.xlu0 %2739  ;;  %v2425_v56 = vsel %vm2396_vm2, %v8917_v52, 0 }
 0x4cc   : > { %2449 = vmatpush.bf16.xpose.msra.mxu3 %v2431_v15 }
 0x4cd   : > { %2653 = vmatpush.bf16.msrb.mxu0 %v9137_v38 }
 0x4d1   : > { %v9270_v12 = vpop.permute.xlu2 %3718 }
 0x4d2   : > { %v9278_v55 = vpop.permute.xlu1 %1363 }
 0x4d3   : > { %v9276_v21 = vpop.permute.xlu0 %1348  ;;  %11720 = vst [vmem:[#allocation44_spill] sm:$0xff] %v9278_v55 }
 0x4d4   : > { %2450 = vmatpush.bf16.xpose.msra.mxu3 %v2428_v40 }
 0x4d9   : > { %v9274_v53 = vpop.permute.xlu2 %3716 }
 0x4da   : > { %v3003_v40 = vpop.permute.xlu1 %3002 }
 0x4db   : > { %v9284_v15 = vpop.permute.xlu0 %3083 }
 0x4dc   : > { %2451 = vmatpush.bf16.xpose.msra.mxu3 %v2425_v56 }
 0x4e1   : > { %v3365_v27 = vpop.permute.xlu2 %3364 }
 0x4e2   : > { %v9290_v56 = vpop.permute.xlu1 %1366 }
 0x4e3   : > { %v9288_v52 = vpop.permute.xlu0 %1357  ;;  %11722 = vst [vmem:[#allocation46_spill] sm:$0xff] %v9290_v56  ;;  %v2786_v56 = vsel %vm2396_vm2, %v2740_v49, 0 }
 0x4e4   : > { %2452 = vmatpush.bf16.xpose.msra.mxu3 %v2422_v60  ;;  %11721 = vst [vmem:[#allocation45_spill] sm:$0xff] %v9288_v52 }
 0x4e9   : > { %v9286_v38 = vpop.permute.xlu2 %2715 }
 0x4ea   : > { %v3102_v60 = vpop.permute.xlu1 %3101 }
 0x4eb   : > { %6381 = vmatmul.msk.bf16.vlgmr.msra.gmra.mxu3 %vm2396_vm2, %v8857_v2  ;;  %v9296_v63 = vpop.permute.xlu0 %1360 }
 0x4ec   : > { %11724 = vst [vmem:[#allocation48_spill] sm:$0xff] %v9296_v63  ;;  %v2783_v63 = vsel %vm2396_vm2, %v2738_v57, 0  ;;  %v2777_v57 = vsel %vm2396_vm2, %v9208_v0, 0 }
 0x4f1   : > { %v9294_v6 = vpop.permute.xlu2 %3439 }
 0x4f2   : > { %11723 = vst [vmem:[#allocation47_spill] sm:$0xff] %v9294_v6  ;;  %v3013_v42 = vpop.permute.xlu1 %3012 }
 0x4f3   : > { %v3001_v30 = vpop.permute.xlu0 %3000 }
 0x4fb   : > { %6382 = vmatmul.msk.bf16.gmra.mxu3 %vm2396_vm2, %v8927_v39  ;;  %v9302_v55 = vpop.permute.xlu0 %1369  ;;  %v3367_v39 = vpop.permute.xlu1 %3366 }
 0x4fc   : > { %11725 = vst [vmem:[#allocation49_spill] sm:$0xff] %v9302_v55 }
 0x503   : > { %v3715_v52 = vpop.permute.xlu0 %3714 }
 0x505   : > { %v2742_v51 = vpop.permute.xlu2 %2741 }
 0x506   : > { %v2789_v2 = vsel %vm2396_vm2, %v2742_v51, 0 }
 0x507   : > { %2791 = vmatpush.bf16.xpose.msrb.mxu1 %v2789_v2 }
 0x50b   : > { %6383 = vmatmul.msk.bf16.gmra.mxu3 %vm2396_vm2, %v8937_v54  ;;  %v2780_v54 = vsel %vm2396_vm2, %v9184_v16, 0  ;;  %v2774_v16 = vsel %vm2396_vm2, %v9079_v58, 0 }
 0x50d   : > { %v3458_v9 = vpop.permute.xlu2 %3457 }
 0x50f   : > { %2792 = vmatpush.bf16.xpose.msrb.mxu1 %v2786_v56 }
 0x515   : > { %v9304_v6 = vpop.permute.xlu2 %3441 }
 0x517   : > { %2793 = vmatpush.bf16.xpose.msrb.mxu1 %v2783_v63  ;;  %v3148_v63 = vsel %vm2396_vm2, %v3102_v60, 0 }
 0x51b   : > { %6384 = vmatmul.msk.bf16.gmra.mxu3 %vm2396_vm2, %v8983_v8  ;;  %v3363_v8 = vpop.permute.xlu0 %3362 }
 0x51d   : > { %v3104_v51 = vpop.permute.xlu1 %3103  ;;  %v3723_v2 = vpop.permute.xlu2 %3722 }
 0x51e   : > { %v3151_v49 = vsel %vm2396_vm2, %v3104_v51, 0 }
 0x51f   : > { %2794 = vmatpush.bf16.xpose.msrb.mxu1 %v2780_v54  ;;  %3153 = vmatpush.bf16.xpose.msrb.mxu3 %v3151_v49 }
 0x523   : > { %v3456_v0 = vpop.permute.xlu0 %3455 }
 0x525   : > { %v3015_v56 = vpop.permute.xlu1 %3014  ;;  %v3369_v55 = vpop.permute.xlu2 %3368 }
 0x526   : > { %3024 = vmatpush.bf16.msrb.mxu2 %v3015_v56  ;;  %3378 = vmatpush.bf16.msra.mxu0 %v3369_v55  ;;  %v3145_v55 = vsel %vm2396_vm2, %v9202_v10, 0  ;;  %v2768_v10 = vsel %vm2396_vm2, %v9163_v43, 0  ;;  %v3502_v43 = vsel %vm2396_vm2, %v3456_v0, 0  ;;  %v11728_v56 = vld [vmem:[#allocation38_spill] sm:$0xff] }
 0x527   : > { %2795 = vmatpush.bf16.xpose.msrb.mxu1 %v2777_v57  ;;  %3154 = vmatpush.bf16.xpose.msrb.mxu3 %v3148_v63 }
 0x52a   : > { %3025 = vmatpush.bf16.msrb.mxu2 %v3013_v42  ;;  %3379 = vmatpush.bf16.msra.mxu0 %v3367_v39  ;;  %v2771_v42 = vsel %vm2396_vm2, %v9125_v23, 0  ;;  %v3505_v23 = vsel %vm2396_vm2, %v3458_v9, 0  ;;  %v11726_v39 = vld [vmem:[#allocation29_spill] sm:$0xff] }
 0x52b   : > { %6385 = vmatmul.msk.bf16.gmra.mxu3 %vm2396_vm2, %v9005_v62  ;;  %v3142_v62 = vsel %vm2396_vm2, %v9194_v26, 0  ;;  %v9330_v58 = vpop.permute.xlu0 %3085 }
 0x52e   : > { %3026 = vmatpush.bf16.msrb.mxu2 %v9237_v29  ;;  %3380 = vmatpush.bf16.msra.mxu0 %v3365_v27  ;;  %v3139_v29 = vsel %vm2396_vm2, %v9228_v25, 0  ;;  %v3133_v25 = vsel %vm2396_vm2, %v9161_v36, 0  ;;  %v3493_v36 = vsel %vm2396_vm2, %v9196_v41, 0 }
 0x52f   : > { %2796 = vmatpush.bf16.xpose.msrb.mxu1 %v2774_v16  ;;  %3155 = vmatpush.bf16.xpose.msrb.mxu3 %v3145_v55 }
 0x532   : > { %3027 = vmatpush.bf16.msrb.mxu2 %v9247_v33  ;;  %3381 = vmatpush.bf16.msra.mxu0 %v3363_v8  ;;  %v9360_v33 = vld [vmem:[#allocation6] ss:$0 sm:$0xff]  ;;  %v11729_v8 = vld [vmem:[#allocation31_spill] sm:$0xff] }
 0x533   : > { %v3721_v26 = vpop.permute.xlu0 %3720  ;;  %vm1372_vm3 = vcmp.eq.s32.totalorder %v9105_v7, %v9360_v33  ;;  %vm1373_vm4 = vcmp.eq.s32.totalorder %v8965_v31, %v9360_v33  ;;  %vm1374_vm5 = vcmp.eq.s32.totalorder %v9060_v19, %v9360_v33  ;;  %v3484_v31 = vsel %vm2396_vm2, %v9178_v50, 0 }
 0x534   : > { %vm1375_vm6 = vcmp.eq.s32.totalorder %v9129_v35, %v9360_v33  ;;  %vm1376_vm7 = vcmp.eq.s32.totalorder %v9149_v44, %v9360_v33  ;;  %vm1377_vm8 = vcmp.eq.s32.totalorder %v11726_v39, %v9360_v33  ;;  %vm1379_vm10 = vcmp.eq.s32.totalorder %v11729_v8, %v9360_v33  ;;  %v11740_v39 = vld [vmem:[#allocation46_spill] sm:$0xff]  ;;  %v11742_v8 = vld [vmem:[#allocation49_spill] sm:$0xff] }
 0x535   : > { %vm1380_vm11 = vcmp.eq.s32.totalorder %v9276_v21, %v9360_v33  ;;  %vm1382_vm13 = vcmp.eq.s32.totalorder %v9264_v32, %v9360_v33  ;;  %vm1386_vm0 = vcmp.eq.s32.totalorder %v11740_v39, %v9360_v33 }
 0x536   : > { %3028 = vmatpush.bf16.msrb.mxu2 %v3007_v61 }
 0x537   : > { %2797 = vmatpush.bf16.xpose.msrb.mxu1 %v2771_v42  ;;  %3156 = vmatpush.bf16.xpose.msrb.mxu3 %v3142_v62 }
 0x53a   : > { %3029 = vmatpush.bf16.msrb.mxu2 %v9258_v22 }
 0x53b   : > { %6386 = vmatmul.msk.bf16.gmra.mxu3 %vm2396_vm2, %v9037_v11  ;;  %v3136_v11 = vsel %vm2396_vm2, %v9198_v47, 0  ;;  %v1388_v47 = vld [vmem:[#allocation3] sm:$0x1] }
 0x53c   : > { %v6284_v9 = vadd.f32 -1.0, %v1388_v47 }
 0x53e   : > { %3030 = vmatpush.bf16.msrb.mxu2 %v3003_v40 }
 0x53f   : > { %2798 = vmatpush.bf16.xpose.msrb.mxu1 %v2768_v10  ;;  %3157 = vmatpush.bf16.xpose.msrb.mxu3 %v3139_v29 }
 0x542   : > { %3031 = vmatpush.bf16.msrb.mxu2 %v3001_v30  ;;  %v3130_v30 = vsel %vm2396_vm2, %v9076_v37, 0  ;;  %v1390_v37 = vmul.f32 1e+09, %v6284_v9 }
 0x544   : > { %v9369_v41 = vperm.slane %v1390_v37, 0 }
 0x546   : > { %3732 = vmatpush.bf16.msra.mxu2 %v3723_v2  ;;  %6389 = vmatmul.msk.bf16.vlgmr.msrb.gmra.mxu1 %vm2396_vm2, %v9015_v20  ;;  %v3499_v20 = vsel %vm2396_vm2, %v9266_v18, 0 }
 0x547   : > { %3507 = vmatpush.bf16.xpose.msra.mxu1 %v3505_v23  ;;  %3158 = vmatpush.bf16.xpose.msrb.mxu3 %v3136_v11  ;;  %v11730_v23 = vld [vmem:[#allocation41_spill] sm:$0xff]  ;;  %v2718_v11 = vpop.permute.xlu0 %2717 }
 0x548   : > { %vm1381_vm12 = vcmp.eq.s32.totalorder %v11730_v23, %v9360_v33 }
 0x54a   : > { %3733 = vmatpush.bf16.msra.mxu2 %v3721_v26 }
 0x54b   : > { %6387 = vmatmul.msk.bf16.gmra.mxu3 %vm2396_vm2, %v9176_v4  ;;  %v3496_v4 = vsel %vm2396_vm2, %v9205_v24, 0  ;;  %v7847_v24 = vmov -1e+09  }
 0x54c   : > { %v1392_v18 = vsel %vm1373_vm4, 0.0, %v7847_v24  ;;  %v1393_v61 = vsel %vm1374_vm5, 0.0, %v7847_v24  ;;  %v1394_v50 = vsel %vm1375_vm6, 0.0, %v7847_v24  ;;  %v1395_v35 = vsel %vm1376_vm7, 0.0, %v7847_v24 }
 0x54d   : > { %v9412_v27 = vadd.f32 %v9369_v41, %v1394_v50  ;;  %v1396_v44 = vsel %vm1377_vm8, 0.0, %v7847_v24  ;;  %v1398_v16 = vsel %vm1379_vm10, 0.0, %v7847_v24  ;;  %v1399_v62 = vsel %vm1380_vm11, 0.0, %v7847_v24 }
 0x54e   : > { %3734 = vmatpush.bf16.msra.mxu2 %v9270_v12  ;;  %v9436_v51 = vadd.f32 %v9369_v41, %v1396_v44  ;;  %v9460_v55 = vadd.f32 %v9369_v41, %v1398_v16  ;;  %v9474_v10 = vadd.f32 %v9369_v41, %v1399_v62  ;;  %v1400_v21 = vsel %vm1381_vm12, 0.0, %v7847_v24 }
 0x54f   : > { %3508 = vmatpush.bf16.xpose.msra.mxu1 %v3502_v43  ;;  %3159 = vmatpush.bf16.xpose.msrb.mxu3 %v3133_v25  ;;  %v9484_v26 = vadd.f32 %v9369_v41, %v1400_v21  ;;  %v1401_v25 = vsel %vm1382_vm13, 0.0, %v7847_v24  ;;  %vm3989_vm4 = vcmask 523264   ;;  %vm4006_vm5 = vcmask 785408  }
 0x552   : > { %3735 = vmatpush.bf16.msra.mxu2 %v9274_v53  ;;  %v9402_v53 = vadd.f32 %v9369_v41, %v1393_v61 }
 0x556   : > { %3736 = vmatpush.bf16.msra.mxu2 %v3715_v52  ;;  %6390 = vmatmul.msk.bf16.gmra.mxu1 %vm2396_vm2, %v9145_v28  ;;  %v3490_v28 = vsel %vm2396_vm2, %v9107_v14, 0  ;;  %v3487_v14 = vsel %vm2396_vm2, %v9043_v34, 0  ;;  %v9426_v52 = vadd.f32 %v9369_v41, %v1395_v35 }
 0x557   : > { %3509 = vmatpush.bf16.xpose.msra.mxu1 %v3499_v20  ;;  %3160 = vmatpush.bf16.xpose.msrb.mxu3 %v3130_v30  ;;  %v9497_v20 = vadd.f32 %v9369_v41, %v1401_v25 }
 0x559   : > { %11731 = vst [vmem:[#allocation29_spill] sm:$0xff] %v9497_v20 }
 0x55b   : > { %6388 = vmatmul.msk.bf16.gmra.mxu3 %vm2396_vm2, %v9220_v45  ;;  %v1391_v45 = vsel %vm1372_vm3, 0.0, %v7847_v24  ;;  %vm1387_vm3 = vcmp.eq.s32.totalorder %v11742_v8, %v9360_v33 }
 0x55c   : > { %v9374_v22 = vadd.f32 %v9369_v41, %v1391_v45  ;;  %v1406_v62 = vsel %vm1387_vm3, 0.0, %v7847_v24 }
 0x55d   : > { %v9562_v21 = vadd.f32 %v9369_v41, %v1406_v62 }
 0x55f   : > { %3510 = vmatpush.bf16.xpose.msra.mxu1 %v3496_v4  ;;  %v11732_v4 = vld [vmem:[#allocation45_spill] sm:$0xff] }
 0x560   : > { %vm1383_vm14 = vcmp.eq.s32.totalorder %v11732_v4, %v9360_v33  ;;  %11743 = vst [vmem:[#allocation45_spill] sm:$0xff] %v9562_v21 }
 0x561   : > { %v1402_v32 = vsel %vm1383_vm14, 0.0, %v7847_v24 }
 0x562   : > { %v9507_v9 = vadd.f32 %v9369_v41, %v1402_v32 }
 0x566   : > { %6391 = vmatmul.msk.bf16.gmra.mxu1 %vm2396_vm2, %v9186_v1 }
 0x567   : > { %3511 = vmatpush.bf16.xpose.msra.mxu1 %v3493_v36 }
 0x56b   : > { %6397 = vmatmul.msk.bf16.vlgmr.msrb.gmra.mxu3 %vm2396_vm2, %v9027_v13  ;;  %v9386_v13 = vadd.f32 %v9369_v41, %v1392_v18 }
 0x56e   : > { %v2454_v1 = vpop.f32.mrf.mxu3 }
 0x56f   : > { %3512 = vmatpush.bf16.xpose.msra.mxu1 %v3490_v28  ;;  %v9379_v7 = vadd.f32 %v2454_v1, %v9374_v22  ;;  %v11735_v28 = vld [vmem:[#allocation48_spill] sm:$0xff] }
 0x570   : > { %vm1384_vm15 = vcmp.eq.s32.totalorder %v11735_v28, %v9360_v33 }
 0x571   : > { %2494 = vmax.xlane.f32.xlu2 %v9379_v7  ;;  %v1403_v1 = vsel %vm1384_vm15, 0.0, %v7847_v24 }
 0x572   : > { %v9521_v18 = vadd.f32 %v9369_v41, %v1403_v1 }
 0x574   : > { %11736 = vst [vmem:[#allocation38_spill] sm:$0xff] %v9521_v18 }
 0x576   : > { %v2456_v12 = vpop.f32.mrf.mxu3  ;;  %6392 = vmatmul.msk.bf16.gmra.mxu1 %vm2396_vm2, %v9147_v46 }
 0x577   : > { %3513 = vmatpush.bf16.xpose.msra.mxu1 %v3487_v14  ;;  %v9395_v34 = vadd.f32 %v2456_v12, %v9386_v13 }
 0x579   : > { %2496 = vmax.xlane.f32.xlu1 %v9395_v34 }
 0x57b   : > { %6398 = vmatmul.msk.bf16.gmra.mxu3 %vm2396_vm2, %v9174_v5 }
 0x57e   : > { %v2459_v46 = vpop.f32.mrf.mxu3 }
 0x57f   : > { %3514 = vmatpush.bf16.xpose.msra.mxu1 %v3484_v31  ;;  %v9407_v19 = vadd.f32 %v2459_v46, %v9402_v53  ;;  %v11737_v31 = vld [vmem:[#allocation44_spill] sm:$0xff] }
 0x580   : > { %vm1385_vm1 = vcmp.eq.s32.totalorder %v11737_v31, %v9360_v33  ;;  %v11745_v31 = vld [vmem:[#allocation39_spill] sm:$0xff] }
 0x581   : > { %2498 = vmax.xlane.f32.xlu0 %v9407_v19  ;;  %v1404_v50 = vsel %vm1385_vm1, 0.0, %v7847_v24 }
 0x586   : > { %v2461_v40 = vpop.f32.mrf.mxu3  ;;  %6393 = vmatmul.msk.bf16.gmra.mxu1 %vm2396_vm2, %v9243_v48 }
 0x587   : > { %v9419_v5 = vadd.f32 %v2461_v40, %v9412_v27  ;;  %v9535_v40 = vadd.f32 %v9369_v41, %v1404_v50 }
 0x589   : > { %2500 = vmax.xlane.f32.xlu1 %v9419_v5  ;;  %11738 = vst [vmem:[#allocation31_spill] sm:$0xff] %v9535_v40 }
 0x58b   : > { %6399 = vmatmul.msk.bf16.gmra.mxu3 %vm2396_vm2, %v9131_v3  ;;  %v11727_v3 = vld [vmem:[#allocation30_spill] sm:$0xff] }
 0x58c   : > { %vm1378_vm9 = vcmp.eq.s32.totalorder %v11727_v3, %v9360_v33  ;;  %11733 = vst [vmem:[#allocation30_spill] sm:$0xff] %v9507_v9  ;;  %v3088_v3 = vpop.permute.xlu0 %3087 }
 0x58d   : > { %v1397_v49 = vsel %vm1378_vm9, 0.0, %v7847_v24 }
 0x58e   : > { %v2464_v60 = vpop.f32.mrf.mxu3  ;;  %v9450_v57 = vadd.f32 %v9369_v41, %v1397_v49 }
 0x58f   : > { %v9431_v48 = vadd.f32 %v2464_v60, %v9426_v52  ;;  %v11739_v60 = vld [vmem:[#allocation32_spill] sm:$0xff] }
 0x591   : > { %2502 = vmax.xlane.f32.xlu0 %v9431_v48 }
 0x596   : > { %v2466_v2 = vpop.f32.mrf.mxu3  ;;  %6394 = vmatmul.msk.bf16.gmra.mxu1 %vm2396_vm2, %v9252_v17 }
 0x597   : > { %v9443_v54 = vadd.f32 %v2466_v2, %v9436_v51  ;;  %v1405_v2 = vsel %vm1386_vm0, 0.0, %v7847_v24 }
 0x599   : > { %2504 = vmax.xlane.f32.xlu1 %v9443_v54 }
 0x59b   : > { %6400 = vmatmul.msk.bf16.gmra.mxu3 %vm2396_vm2, %v11728_v56  ;;  %v9548_v56 = vadd.f32 %v9369_v41, %v1405_v2 }
 0x59d   : > { %11741 = vst [vmem:[#allocation41_spill] sm:$0xff] %v9548_v56 }
 0x59e   : > { %v2469_v63 = vpop.f32.mrf.mxu3 }
 0x59f   : > { %v9455_v17 = vadd.f32 %v2469_v63, %v9450_v57 }
 0x5a1   : > { %2506 = vmax.xlane.f32.xlu2 %v9455_v17 }
 0x5a6   : > { %v2471_v0 = vpop.f32.mrf.mxu3  ;;  %6395 = vmatmul.msk.bf16.gmra.mxu1 %vm2396_vm2, %v9286_v38 }
 0x5a7   : > { %v9467_v42 = vadd.f32 %v2471_v0, %v9460_v55 }
 0x5a9   : > { %2508 = vmax.xlane.f32.xlu0 %v9467_v42 }
 0x5ab   : > { %6401 = vmatmul.msk.bf16.gmra.mxu3 %vm2396_vm2, %v9255_v59 }
 0x5ae   : > { %v2474_v29 = vpop.f32.mrf.mxu3 }
 0x5af   : > { %v9479_v38 = vadd.f32 %v2474_v29, %v9474_v10 }
 0x5b1   : > { %2510 = vmax.xlane.f32.xlu2 %v9479_v38 }
 0x5b6   : > { %v2476_v43 = vpop.f32.mrf.mxu3  ;;  %6396 = vmatmul.msk.bf16.gmra.mxu1 %vm2396_vm2, %v2718_v11 }
 0x5b7   : > { %v9490_v59 = vadd.f32 %v2476_v43, %v9484_v26  ;;  %v11744_v43 = vld [vmem:[#allocation40_spill] sm:$0xff] }
 0x5b9   : > { %2512 = vmax.xlane.f32.xlu1 %v9490_v59 }
 0x5bb   : > { %6402 = vmatmul.msk.bf16.gmra.mxu3 %vm2396_vm2, %v9284_v15  ;;  %v11734_v15 = vld [vmem:[#allocation34_spill] sm:$0xff] }
 0x5be   : > { %v2479_v30 = vpop.f32.mrf.mxu3 }
 0x5bf   : > { %v9502_v36 = vadd.f32 %v2479_v30, %v9497_v20 }
 0x5c1   : > { %2514 = vmax.xlane.f32.xlu0 %v9502_v36 }
 0x5c3   : > { %v2800_v47 = vpop.f32.mrf.mxu1 }
 0x5c4   : > { %v9526_v61 = vadd.f32 %v2800_v47, %v9374_v22 }
 0x5c6   : > { %v2481_v37 = vpop.f32.mrf.mxu3  ;;  %6405 = vmatmul.msk.bf16.vlgmr.msra.gmra.mxu1 %vm2396_vm2, %v11734_v15 }
 0x5c7   : > { %v9514_v45 = vadd.f32 %v2481_v37, %v9507_v9 }
 0x5c9   : > { %2516 = vmax.xlane.f32.xlu1 %v9514_v45 }
 0x5cb   : > { %v2802_v14 = vpop.f32.mrf.mxu1  ;;  %6403 = vmatmul.msk.bf16.gmra.mxu3 %vm2396_vm2, %v9330_v58 }
 0x5cc   : > { %v9556_v0 = vadd.f32 %v2802_v14, %v9386_v13 }
 0x5ce   : > { %v2484_v12 = vpop.f32.mrf.mxu3 }
 0x5cf   : > { %v9529_v46 = vadd.f32 %v2484_v12, %v9521_v18 }
 0x5d1   : > { %2840 = vmax.xlane.f32.xlu1 %v9526_v61  ;;  %2518 = vmax.xlane.f32.xlu2 %v9529_v46 }
 0x5d3   : > { %v2805_v58 = vpop.f32.mrf.mxu1 }
 0x5d4   : > { %v9568_v25 = vadd.f32 %v2805_v58, %v9402_v53 }
 0x5d6   : > { %v2486_v35 = vpop.f32.mrf.mxu3  ;;  %6406 = vmatmul.msk.bf16.gmra.mxu1 %vm2396_vm2, %v11739_v60 }
 0x5d7   : > { %v9542_v44 = vadd.f32 %v2486_v35, %v9535_v40 }
 0x5d9   : > { %2520 = vmax.xlane.f32.xlu0 %v9542_v44 }
 0x5db   : > { %v2807_v49 = vpop.f32.mrf.mxu1  ;;  %6404 = vmatmul.msk.bf16.gmra.mxu3 %vm2396_vm2, %v3088_v3 }
 0x5dc   : > { %v9591_v50 = vadd.f32 %v2807_v49, %v9412_v27 }
 0x5de   : > { %v2489_v63 = vpop.f32.mrf.mxu3 }
 0x5df   : > { %v9553_v16 = vadd.f32 %v2489_v63, %v9548_v56 }
 0x5e1   : > { %2842 = vmax.xlane.f32.xlu0 %v9556_v0  ;;  %2522 = vmax.xlane.f32.xlu1 %v9553_v16 }
 0x5e3   : > { %v2810_v29 = vpop.f32.mrf.mxu1 }
 0x5e4   : > { %v2495_v23 = vpop.xlane.xlu2 %2494  ;;  %v9579_v37 = vadd.f32 %v2810_v29, %v9426_v52 }
 0x5e5   : > { %v2526_v11 = vsub.f32 %v9379_v7, %v2495_v23 }
 0x5e6   : > { %v2491_v33 = vpop.f32.mrf.mxu3  ;;  %6407 = vmatmul.msk.bf16.gmra.mxu1 %vm2396_vm2, %v11744_v43 }
 0x5e7   : > { %v2542_v30 = vmul.f32 1.442695, %v2526_v11  ;;  %v9571_v4 = vadd.f32 %v2491_v33, %v9562_v21  ;;  %v11746_v11 = vld [vmem:[#allocation42_spill] sm:$0xff] }
 0x5e9   : > { %7014 = vpow2.f32 %v2542_v30  ;;  %2844 = vmax.xlane.f32.xlu0 %v9568_v25  ;;  %2524 = vmax.xlane.f32.xlu2 %v9571_v4 }
 0x5eb   : > { %v2812_v24 = vpop.f32.mrf.mxu1 }
 0x5ec   : > { %v2497_v41 = vpop.xlane.xlu1 %2496 }
 0x5ed   : > { %v2527_v7 = vsub.f32 %v9395_v34, %v2497_v41  ;;  %v9618_v41 = vadd.f32 %v2812_v24, %v9436_v51 }
 0x5ee   : > { %v3162_v32 = vpop.f32.mrf.mxu3 }
 0x5ef   : > { %v9576_v47 = vpop.eup %7014  ;;  %v2544_v15 = vmul.f32 1.442695, %v2527_v7  ;;  %v9582_v28 = vadd.f32 %v3162_v32, %v9374_v22 }
 0x5f0   : > { %2574 = vadd.xlane.f32.xlu1 %v9576_v47 }
 0x5f1   : > { %7016 = vpow2.f32 %v2544_v15  ;;  %3202 = vmax.xlane.f32.xlu0 %v9582_v28  ;;  %2848 = vmax.xlane.f32.xlu2 %v9579_v37 }
 0x5f3   : > { %v2815_v1 = vpop.f32.mrf.mxu1 }
 0x5f4   : > { %v2499_v14 = vpop.xlane.xlu0 %2498  ;;  %v9615_v43 = vadd.f32 %v2815_v1, %v9450_v57 }
 0x5f5   : > { %v2528_v34 = vsub.f32 %v9407_v19, %v2499_v14 }
 0x5f6   : > { %v3164_v12 = vpop.f32.mrf.mxu3  ;;  %6408 = vmatmul.msk.bf16.gmra.mxu1 %vm2396_vm2, %v11745_v31 }
 0x5f7   : > { %v9593_v58 = vpop.eup %7016  ;;  %v2546_v35 = vmul.f32 1.442695, %v2528_v34  ;;  %v9599_v3 = vadd.f32 %v3164_v12, %v9386_v13 }
 0x5f8   : > { %2846 = vmax.xlane.f32.xlu1 %v9591_v50 }
 0x5f9   : > { %7018 = vpow2.f32 %v2546_v35  ;;  %2576 = vadd.xlane.f32.xlu0 %v9593_v58 }
 0x5fb   : > { %v2817_v60 = vpop.f32.mrf.mxu1 }
 0x5fc   : > { %v2501_v39 = vpop.xlane.xlu1 %2500 }
 0x5fd   : > { %v2529_v2 = vsub.f32 %v9419_v5, %v2501_v39 }
 0x5fe   : > { %v3167_v19 = vpop.f32.mrf.mxu3 }
 0x5ff   : > { %v9601_v63 = vpop.eup %7018  ;;  %v2548_v49 = vmul.f32 1.442695, %v2529_v2  ;;  %v9604_v8 = vadd.f32 %v3167_v19, %v9402_v53  ;;  %v11748_v2 = vld [vmem:[#allocation43_spill] sm:$0xff]  ;;  %v9639_v19 = vadd.f32 %v2817_v60, %v9460_v55 }
 0x600   : > { %3204 = vmax.xlane.f32.xlu1 %v9599_v3 }
 0x601   : > { %7020 = vpow2.f32 %v2548_v49  ;;  %3206 = vmax.xlane.f32.xlu2 %v9604_v8  ;;  %2578 = vadd.xlane.f32.xlu0 %v9601_v63 }
 0x603   : > { %v2820_v62 = vpop.f32.mrf.mxu1 }
 0x604   : > { %v2503_v29 = vpop.xlane.xlu0 %2502 }
 0x605   : > { %v2530_v5 = vsub.f32 %v9431_v48, %v2503_v29 }
 0x606   : > { %v3169_v23 = vpop.f32.mrf.mxu3  ;;  %6409 = vmatmul.msk.bf16.gmra.mxu1 %vm2396_vm2, %v11746_v11 }
 0x607   : > { %v9612_v33 = vpop.eup %7020  ;;  %v2550_v30 = vmul.f32 1.442695, %v2530_v5  ;;  %v9629_v1 = vadd.f32 %v3169_v23, %v9412_v27 }
 0x608   : > { %2580 = vadd.xlane.f32.xlu1 %v9612_v33 }
 0x609   : > { %7022 = vpow2.f32 %v2550_v30  ;;  %2852 = vmax.xlane.f32.xlu2 %v9615_v43  ;;  %2850 = vmax.xlane.f32.xlu0 %v9618_v41 }
 0x60b   : > { %v2822_v48 = vpop.f32.mrf.mxu1 }
 0x60c   : > { %v2505_v15 = vpop.xlane.xlu1 %2504 }
 0x60d   : > { %v2531_v24 = vsub.f32 %v9443_v54, %v2505_v15  ;;  %v9645_v54 = vadd.f32 %v2820_v62, %v9474_v10  ;;  %v9656_v62 = vadd.f32 %v2822_v48, %v9484_v26 }
 0x60e   : > { %v3172_v7 = vpop.f32.mrf.mxu3 }
 0x60f   : > { %v9623_v32 = vpop.eup %7022  ;;  %v9626_v14 = vadd.f32 %v3172_v7, %v9426_v52  ;;  %v2552_v35 = vmul.f32 1.442695, %v2531_v24 }
 0x611   : > { %11747 = vst [vmem:[#allocation34_spill] sm:$0xff] %v9626_v14  ;;  %3210 = vmax.xlane.f32.xlu1 %v9626_v14  ;;  %3208 = vmax.xlane.f32.xlu0 %v9629_v1 }
 0x612   : > { %2582 = vadd.xlane.f32.xlu2 %v9623_v32 }
 0x613   : > { %v2825_v12 = vpop.f32.mrf.mxu1 }
 0x614   : > { %v2507_v34 = vpop.xlane.xlu2 %2506 }
 0x615   : > { %v2532_v31 = vsub.f32 %v9455_v17, %v2507_v34 }
 0x616   : > { %v3174_v39 = vpop.f32.mrf.mxu3  ;;  %6410 = vmatmul.msk.bf16.gmra.mxu1 %vm2396_vm2, %v11748_v2 }
 0x617   : > { %v2554_v49 = vmul.f32 1.442695, %v2532_v31  ;;  %v9642_v29 = vadd.f32 %v3174_v39, %v9436_v51 }
 0x619   : > { %11749 = vst [vmem:[#allocation48_spill] sm:$0xff] %v9642_v29  ;;  %7024 = vpow2.f32 %v2554_v49  ;;  %3212 = vmax.xlane.f32.xlu1 %v9642_v29  ;;  %2854 = vmax.xlane.f32.xlu0 %v9639_v19  ;;  %v9671_v49 = vadd.f32 %v2825_v12, %v9497_v20 }
 0x61a   : > { %7026 = vpow2.f32 %v2552_v35  ;;  %2856 = vmax.xlane.f32.xlu2 %v9645_v54 }
 0x61b   : > { %v2827_v23 = vpop.f32.mrf.mxu1 }
 0x61c   : > { %v2509_v17 = vpop.xlane.xlu0 %2508 }
 0x61d   : > { %v2533_v5 = vsub.f32 %v9467_v42, %v2509_v17  ;;  %v11750_v42 = vld [vmem:[#allocation47_spill] sm:$0xff] }
 0x61f   : > { %v9651_v60 = vpop.eup %7024  ;;  %v2556_v11 = vmul.f32 1.442695, %v2533_v5 }
 0x620   : > { %v9653_v30 = vpop.eup %7026 }
 0x621   : > { %7028 = vpow2.f32 %v2556_v11  ;;  %2586 = vadd.xlane.f32.xlu1 %v9651_v60  ;;  %2584 = vadd.xlane.f32.xlu0 %v9653_v30  ;;  %v9677_v11 = vadd.f32 %v2827_v23, %v9507_v9 }
 0x622   : > { %2858 = vmax.xlane.f32.xlu2 %v9656_v62 }
 0x623   : > { %v2830_v31 = vpop.f32.mrf.mxu1 }
 0x624   : > { %v2511_v7 = vpop.xlane.xlu2 %2510 }
 0x625   : > { %v2534_v15 = vsub.f32 %v9479_v38, %v2511_v7 }
 0x626   : > { %6411 = vmatmul.msk.bf16.gmra.mxu1 %vm2396_vm2, %v11750_v42 }
 0x627   : > { %v9664_v24 = vpop.eup %7028  ;;  %v2558_v34 = vmul.f32 1.442695, %v2534_v15 }
 0x629   : > { %7030 = vpow2.f32 %v2558_v34 }
 0x62a   : > { %2588 = vadd.xlane.f32.xlu2 %v9664_v24 }
 0x62b   : > { %v2832_v38 = vpop.f32.mrf.mxu1 }
 0x62c   : > { %v2513_v48 = vpop.xlane.xlu1 %2512 }
 0x62d   : > { %v2535_v35 = vsub.f32 %v9490_v59, %v2513_v48 }
 0x62f   : > { %v9668_v39 = vpop.eup %7030  ;;  %v2560_v2 = vmul.f32 1.442695, %v2535_v35 }
 0x630   : > { %2590 = vadd.xlane.f32.xlu0 %v9668_v39 }
 0x631   : > { %7032 = vpow2.f32 %v2560_v2  ;;  %v9695_v2 = vadd.f32 %v2832_v38, %v9535_v40 }
 0x632   : > { %2860 = vmax.xlane.f32.xlu2 %v9671_v49 }
 0x633   : > { %v2835_v15 = vpop.f32.mrf.mxu1 }
 0x634   : > { %v2515_v17 = vpop.xlane.xlu0 %2514 }
 0x635   : > { %v2536_v5 = vsub.f32 %v9502_v36, %v2515_v17  ;;  %v9687_v36 = vadd.f32 %v2830_v31, %v9521_v18 }
 0x636   : > { %6412 = vmatmul.msk.bf16.gmra.mxu1 %vm2396_vm2, %v9304_v6 }
 0x637   : > { %v9681_v59 = vpop.eup %7032  ;;  %v2562_v7 = vmul.f32 1.442695, %v2536_v5 }
 0x638   : > { %2592 = vadd.xlane.f32.xlu1 %v9681_v59  ;;  %2862 = vmax.xlane.f32.xlu0 %v9677_v11 }
 0x639   : > { %7034 = vpow2.f32 %v2562_v7 }
 0x63c   : > { %v2517_v12 = vpop.xlane.xlu1 %2516 }
 0x63d   : > { %v2537_v42 = vsub.f32 %v9514_v45, %v2517_v12  ;;  %v2837_v45 = vpop.f32.mrf.mxu1 }
 0x63f   : > { %v9689_v23 = vpop.eup %7034  ;;  %v2564_v34 = vmul.f32 1.442695, %v2537_v42 }
 0x640   : > { %2864 = vmax.xlane.f32.xlu1 %v9687_v36  ;;  %2594 = vadd.xlane.f32.xlu2 %v9689_v23 }
 0x641   : > { %7036 = vpow2.f32 %v2564_v34 }
 0x644   : > { %v2519_v6 = vpop.xlane.xlu2 %2518  ;;  %v2841_v48 = vpop.xlane.xlu1 %2840 }
 0x645   : > { %v2538_v35 = vsub.f32 %v9529_v46, %v2519_v6  ;;  %v2872_v5 = vsub.f32 %v9526_v61, %v2841_v48  ;;  %v9704_v46 = vadd.f32 %v2835_v15, %v9548_v56  ;;  %v3516_v6 = vpop.f32.mrf.mxu1  ;;  %v9716_v15 = vadd.f32 %v2837_v45, %v9562_v21 }
 0x647   : > { %v9697_v17 = vpop.eup %7036  ;;  %v2566_v31 = vmul.f32 1.442695, %v2538_v35  ;;  %v2888_v7 = vmul.f32 1.442695, %v2872_v5 }
 0x648   : > { %2596 = vadd.xlane.f32.xlu0 %v9697_v17  ;;  %2866 = vmax.xlane.f32.xlu2 %v9695_v2 }
 0x649   : > { %7038 = vpow2.f32 %v2566_v31 }
 0x64a   : > { %7040 = vpow2.f32 %v2888_v7 }
 0x64c   : > { %v2521_v12 = vpop.xlane.xlu0 %2520 }
 0x64d   : > { %v2539_v42 = vsub.f32 %v9542_v44, %v2521_v12  ;;  %v3518_v12 = vpop.f32.mrf.mxu1 }
 0x64e   : > { %v9729_v45 = vadd.f32 %v3518_v12, %v9386_v13 }
 0x64f   : > { %v2568_v38 = vmul.f32 1.442695, %v2539_v42  ;;  %v9706_v34 = vpop.eup %7038 }
 0x650   : > { %2868 = vmax.xlane.f32.xlu0 %v9704_v46  ;;  %2598 = vadd.xlane.f32.xlu1 %v9706_v34  ;;  %v9711_v31 = vpop.eup %7040 }
 0x651   : > { %7042 = vpow2.f32 %v2568_v38 }
 0x654   : > { %v2523_v61 = vpop.xlane.xlu1 %2522  ;;  %v2843_v48 = vpop.xlane.xlu0 %2842 }
 0x655   : > { %v2540_v35 = vsub.f32 %v9553_v16, %v2523_v61  ;;  %v2873_v7 = vsub.f32 %v9556_v0, %v2843_v48  ;;  %v9726_v61 = vadd.f32 %v3516_v6, %v9374_v22  ;;  %v3177_v0 = vpop.f32.mrf.mxu3  ;;  %v9741_v13 = vpop.f32.mrf.mxu1 }
 0x656   : > { %v9739_v22 = vadd.f32 %v3177_v0, %v9450_v57 }
 0x657   : > { %v9713_v44 = vpop.eup %7042  ;;  %v2570_v5 = vmul.f32 1.442695, %v2540_v35  ;;  %11751 = vst [vmem:[#allocation44_spill] sm:$0xff] %v9726_v61  ;;  %v2890_v35 = vmul.f32 1.442695, %v2873_v7 }
 0x658   : > { %2920 = vadd.xlane.f32.xlu0 %v9711_v31  ;;  %2600 = vadd.xlane.f32.xlu2 %v9713_v44  ;;  %11752 = vst [vmem:[#allocation32_spill] sm:$0xff] %v9739_v22 }
 0x659   : > { %7044 = vpow2.f32 %v2570_v5  ;;  %2870 = vmax.xlane.f32.xlu1 %v9716_v15 }
 0x65c   : > { %v2525_v42 = vpop.xlane.xlu2 %2524  ;;  %v9722_v16 = vpop.xlane.xlu0 %2844 }
 0x65d   : > { %v2541_v38 = vsub.f32 %v9571_v4, %v2525_v42  ;;  %v3179_v12 = vpop.f32.mrf.mxu3  ;;  %v9756_v18 = vpop.f32.mrf.mxu1 }
 0x65e   : > { %v9754_v0 = vadd.f32 %v3179_v12, %v9460_v55 }
 0x65f   : > { %v9731_v21 = vpop.eup %7044  ;;  %v2572_v5 = vmul.f32 1.442695, %v2541_v38 }
 0x660   : > { %3558 = vmax.xlane.f32.xlu0 %v9729_v45  ;;  %3556 = vmax.xlane.f32.xlu2 %v9726_v61  ;;  %11753 = vst [vmem:[#allocation46_spill] sm:$0xff] %v9754_v0 }
 0x661   : > { %7046 = vpow2.f32 %v2572_v5  ;;  %2602 = vadd.xlane.f32.xlu1 %v9731_v21 }
 0x662   : > { %7048 = vpow2.f32 %v2890_v35 }
 0x663   : > { %v2575_v4 = vpop.xlane.xlu1 %2574 }
 0x664   : > { %v9736_v48 = vpop.xlane.xlu0 %3202  ;;  %7050 = vrcp.f32 %v2575_v4  ;;  %v9750_v38 = vpop.xlane.xlu2 %2848 }
 0x667   : > { %v9743_v6 = vpop.eup %7046 }
 0x668   : > { %v9745_v7 = vpop.eup %7048  ;;  %2604 = vadd.xlane.f32.xlu0 %v9743_v6  ;;  %3214 = vmax.xlane.f32.xlu2 %v9739_v22 }
 0x669   : > { %2922 = vadd.xlane.f32.xlu1 %v9745_v7 }
 0x66a   : > { %v7051_v22 = vpop.eup %7050 }
 0x66b   : > { %v2847_v42 = vpop.xlane.xlu1 %2846  ;;  %v2622_v9 = vmul.f32 %v7051_v22, %v9576_v47  ;;  %v11755_v22 = vld [vmem:[#allocation36_spill] sm:$0xff] }
 0x66c   : > { %v2875_v35 = vsub.f32 %v9591_v50, %v2847_v42  ;;  %v2577_v5 = vpop.xlane.xlu0 %2576 }
 0x66d   : > { %7052 = vrcp.f32 %v2577_v5 }
 0x66e   : > { %v2894_v56 = vmul.f32 1.442695, %v2875_v35  ;;  %v3526_v35 = vpop.f32.mrf.mxu1 }
 0x66f   : > { %v9767_v20 = vadd.f32 %v3526_v35, %v9426_v52 }
 0x670   : > { %7054 = vpow2.f32 %v2894_v56  ;;  %3216 = vmax.xlane.f32.xlu2 %v9754_v0 }
 0x671   : > { %11754 = vst [vmem:[#allocation49_spill] sm:$0xff] %v9767_v20 }
 0x673   : > { %v7053_v40 = vpop.eup %7052  ;;  %v3205_v61 = vpop.xlane.xlu1 %3204 }
 0x674   : > { %v9759_v4 = vpop.xlane.xlu2 %3206  ;;  %v2579_v29 = vpop.xlane.xlu0 %2578  ;;  %v2623_v50 = vmul.f32 %v7053_v40, %v9593_v58 }
 0x675   : > { %7056 = vrcp.f32 %v2579_v29 }
 0x676   : > { %v9763_v42 = vpop.eup %7054  ;;  %v2638_v12 = vpack.c.bf16 %v2623_v50, %v2622_v9  ;;  %v3235_v9 = vsub.f32 %v9599_v3, %v3205_v61  ;;  %v11757_v3 = vld [vmem:[#allocation33_spill] sm:$0xff] }
 0x677   : > { %2926 = vadd.xlane.f32.xlu0 %v9763_v42 }
 0x678   : > { %2654 = vmatmul.bf16.vlgmr.msrb.gmra.mxu0 %v2638_v12  ;;  %v3252_v52 = vmul.f32 1.442695, %v3235_v9 }
 0x67b   : > { %v2581_v56 = vpop.xlane.xlu1 %2580  ;;  %v7057_v40 = vpop.eup %7056 }
 0x67c   : > { %7058 = vrcp.f32 %v2581_v56  ;;  %v2853_v5 = vpop.xlane.xlu2 %2852  ;;  %v2851_v0 = vpop.xlane.xlu0 %2850  ;;  %v2624_v29 = vmul.f32 %v7057_v40, %v9601_v63 }
 0x67d   : > { %v2878_v14 = vsub.f32 %v9615_v43, %v2853_v5 }
 0x67f   : > { %v2900_v47 = vmul.f32 1.442695, %v2878_v14  ;;  %3564 = vmax.xlane.f32.xlu0 %v9767_v20 }
 0x681   : > { %7060 = vpow2.f32 %v2900_v47 }
 0x682   : > { %v7059_v58 = vpop.eup %7058  ;;  %3712 = vrot.lane.b32.xlu1 %v11755_v22, %s7846_s19  ;;  %7062 = vpow2.f32 %v3252_v52  ;;  %v2874_v52 = vsub.f32 %v9568_v25, %v9722_v16 }
 0x683   : > { %v2625_v50 = vmul.f32 %v7059_v58, %v9612_v33 }
 0x684   : > { %v9776_v12 = vpop.xlane.xlu0 %3208  ;;  %v9785_v56 = vpop.xlane.xlu1 %3210 }
 0x685   : > { %v2583_v35 = vpop.xlane.xlu2 %2582  ;;  %v2639_v43 = vpack.c.bf16 %v2625_v50, %v2624_v29 }
 0x686   : > { %7064 = vrcp.f32 %v2583_v35 }
 0x687   : > { %v9778_v14 = vpop.eup %7060 }
 0x688   : > { %11756 = vst [vmem:[#allocation40_spill] sm:$0xff] %v9778_v14  ;;  %2932 = vadd.xlane.f32.xlu0 %v9778_v14  ;;  %3360 = vrot.lane.b32.xlu2 %v11757_v3, %s7844_s11  ;;  %v9789_v33 = vpop.eup %7062  ;;  %v2892_v14 = vmul.f32 1.442695, %v2874_v52 }
 0x689   : > { %2659 = vmatmul.bf16.gmra.mxu0 %v2639_v43  ;;  %11758 = vst [vmem:[#allocation39_spill] sm:$0xff] %v9789_v33 }
 0x68c   : > { %v9783_v61 = vpop.xlane.xlu0 %2854  ;;  %v9793_v9 = vpop.xlane.xlu1 %3212 }
 0x68d   : > { %v9787_v63 = vpop.xlane.xlu2 %2856  ;;  %v7065_v29 = vpop.eup %7064 }
 0x68e   : > { %v2626_v43 = vmul.f32 %v7065_v29, %v9623_v32 }
 0x690   : > { %3284 = vadd.xlane.f32.xlu0 %v9789_v33 }
 0x694   : > { %v2585_v5 = vpop.xlane.xlu0 %2584 }
 0x695   : > { %v2859_v47 = vpop.xlane.xlu2 %2858  ;;  %7066 = vrcp.f32 %v2585_v5 }
 0x696   : > { %v2881_v40 = vsub.f32 %v9656_v62, %v2859_v47  ;;  %v2587_v62 = vpop.xlane.xlu1 %2586  ;;  %v2877_v47 = vsub.f32 %v9618_v41, %v2851_v0 }
 0x698   : > { %v2906_v58 = vmul.f32 1.442695, %v2881_v40  ;;  %v2898_v29 = vmul.f32 1.442695, %v2877_v47 }
 0x69a   : > { %7068 = vpow2.f32 %v2906_v58  ;;  %v2876_v58 = vsub.f32 %v9579_v37, %v9750_v38  ;;  %v3528_v37 = vpop.f32.mrf.mxu1 }
 0x69b   : > { %v7067_v50 = vpop.eup %7066 }
 0x69c   : > { %v2627_v3 = vmul.f32 %v7067_v50, %v9653_v30  ;;  %v2896_v0 = vmul.f32 1.442695, %v2876_v58 }
 0x69d   : > { %v2589_v20 = vpop.xlane.xlu2 %2588 }
 0x69e   : > { %v2640_v35 = vpack.c.bf16 %v2627_v3, %v2626_v43  ;;  %7070 = vrcp.f32 %v2589_v20 }
 0x69f   : > { %7072 = vrcp.f32 %v2587_v62 }
 0x6a0   : > { %v9799_v33 = vpop.eup %7068  ;;  %2664 = vmatmul.bf16.gmra.mxu0 %v2640_v35  ;;  %7074 = vpow2.f32 %v2892_v14  ;;  %v9812_v14 = vadd.f32 %v9756_v18, %v9412_v27 }
 0x6a1   : > { %2938 = vadd.xlane.f32.xlu0 %v9799_v33  ;;  %7076 = vpow2.f32 %v2898_v29 }
 0x6a3   : > { %v2591_v25 = vpop.xlane.xlu0 %2590 }
 0x6a4   : > { %v7071_v5 = vpop.eup %7070 }
 0x6a5   : > { %v7073_v16 = vpop.eup %7072  ;;  %v2629_v40 = vmul.f32 %v7071_v5, %v9664_v24  ;;  %v9814_v50 = vpop.xlane.xlu2 %2860  ;;  %v9819_v24 = vadd.f32 %v9741_v13, %v9402_v53 }
 0x6a6   : > { %v9803_v32 = vpop.eup %7074  ;;  %v2628_v20 = vmul.f32 %v7073_v16, %v9651_v60  ;;  %v3531_v5 = vpop.f32.mrf.mxu1 }
 0x6a7   : > { %v9825_v52 = vpop.eup %7076  ;;  %v9838_v16 = vadd.f32 %v3531_v5, %v9450_v57 }
 0x6a8   : > { %v2641_v41 = vpack.c.bf16 %v2629_v40, %v2628_v20 }
 0x6ab   : > { %v2593_v30 = vpop.xlane.xlu1 %2592  ;;  %v9821_v38 = vpop.xlane.xlu0 %2862 }
 0x6ac   : > { %2924 = vadd.xlane.f32.xlu1 %v9803_v32  ;;  %7078 = vrcp.f32 %v2593_v30 }
 0x6ad   : > { %7080 = vrcp.f32 %v2591_v25 }
 0x6ae   : > { %7082 = vpow2.f32 %v2896_v0 }
 0x6b0   : > { %2669 = vmatmul.bf16.gmra.mxu0 %v2641_v41 }
 0x6b1   : > { %3562 = vmax.xlane.f32.xlu2 %v9812_v14 }
 0x6b2   : > { %v7079_v43 = vpop.eup %7078 }
 0x6b3   : > { %v2865_v60 = vpop.xlane.xlu1 %2864  ;;  %v2595_v3 = vpop.xlane.xlu2 %2594  ;;  %v2631_v62 = vmul.f32 %v7079_v43, %v9681_v59  ;;  %v9843_v59 = vadd.f32 %v3528_v37, %v9436_v51 }
 0x6b4   : > { %v2884_v27 = vsub.f32 %v9687_v36, %v2865_v60  ;;  %3560 = vmax.xlane.f32.xlu1 %v9819_v24  ;;  %v7081_v53 = vpop.eup %7080  ;;  %v2879_v36 = vsub.f32 %v9639_v19, %v9783_v61  ;;  %v3234_v61 = vsub.f32 %v9582_v28, %v9736_v48 }
 0x6b5   : > { %v9828_v13 = vpop.eup %7082  ;;  %v2630_v47 = vmul.f32 %v7081_v53, %v9668_v39 }
 0x6b6   : > { %v2912_v18 = vmul.f32 1.442695, %v2884_v27  ;;  %v2902_v40 = vmul.f32 1.442695, %v2879_v36  ;;  %v3250_v41 = vmul.f32 1.442695, %v3234_v61 }
 0x6b7   : > { %v2642_v30 = vpack.c.bf16 %v2631_v62, %v2630_v47  ;;  %v11759_v36 = vld [vmem:[#allocation35_spill] sm:$0xff] }
 0x6b8   : > { %7084 = vpow2.f32 %v2912_v18 }
 0x6b9   : > { %2930 = vadd.xlane.f32.xlu2 %v9825_v52 }
 0x6bb   : > { %v2597_v35 = vpop.xlane.xlu0 %2596  ;;  %v2867_v58 = vpop.xlane.xlu2 %2866 }
 0x6bc   : > { %2928 = vadd.xlane.f32.xlu1 %v9828_v13  ;;  %7086 = vrcp.f32 %v2597_v35 }
 0x6bd   : > { %7088 = vrcp.f32 %v2595_v3 }
 0x6be   : > { %v9835_v25 = vpop.eup %7084  ;;  %7090 = vpow2.f32 %v2902_v40 }
 0x6bf   : > { %2944 = vadd.xlane.f32.xlu0 %v9835_v25 }
 0x6c0   : > { %2674 = vmatmul.bf16.gmra.mxu0 %v2642_v30 }
 0x6c1   : > { %3568 = vmax.xlane.f32.xlu2 %v9838_v16 }
 0x6c2   : > { %v7087_v20 = vpop.eup %7086 }
 0x6c3   : > { %v2869_v19 = vpop.xlane.xlu0 %2868  ;;  %v2599_v39 = vpop.xlane.xlu1 %2598  ;;  %v2633_v27 = vmul.f32 %v7087_v20, %v9697_v17  ;;  %v2882_v17 = vsub.f32 %v9671_v49, %v9814_v50 }
 0x6c4   : > { %3566 = vmax.xlane.f32.xlu1 %v9843_v59  ;;  %v2886_v57 = vsub.f32 %v9704_v46, %v2869_v19  ;;  %v7089_v0 = vpop.eup %7088  ;;  %v2885_v19 = vsub.f32 %v9695_v2, %v2867_v58 }
 0x6c5   : > { %v9849_v51 = vpop.eup %7090  ;;  %v2632_v46 = vmul.f32 %v7089_v0, %v9689_v23  ;;  %v3533_v23 = vpop.f32.mrf.mxu1  ;;  %v2908_v5 = vmul.f32 1.442695, %v2882_v17 }
 0x6c6   : > { %v2916_v29 = vmul.f32 1.442695, %v2886_v57  ;;  %v9867_v30 = vadd.f32 %v3533_v23, %v9460_v55  ;;  %v2914_v20 = vmul.f32 1.442695, %v2885_v19  ;;  %v2880_v23 = vsub.f32 %v9645_v54, %v9787_v63 }
 0x6c7   : > { %v2643_v28 = vpack.c.bf16 %v2633_v27, %v2632_v46 }
 0x6c8   : > { %7092 = vpow2.f32 %v2916_v29 }
 0x6c9   : > { %7094 = vpow2.f32 %v3250_v41 }
 0x6cb   : > { %v2601_v37 = vpop.xlane.xlu2 %2600  ;;  %v2921_v60 = vpop.xlane.xlu0 %2920 }
 0x6cc   : > { %v2871_v18 = vpop.xlane.xlu1 %2870  ;;  %2934 = vadd.xlane.f32.xlu1 %v9849_v51  ;;  %7096 = vrcp.f32 %v2601_v37 }
 0x6cd   : > { %7098 = vrcp.f32 %v2599_v39 }
 0x6ce   : > { %v9854_v43 = vpop.eup %7092  ;;  %7100 = vrcp.f32 %v2921_v60 }
 0x6cf   : > { %2948 = vadd.xlane.f32.xlu0 %v9854_v43  ;;  %v9857_v48 = vpop.eup %7094  ;;  %7102 = vpow2.f32 %v2908_v5 }
 0x6d0   : > { %2679 = vmatmul.bf16.gmra.mxu0 %v2643_v28 }
 0x6d2   : > { %v7097_v62 = vpop.eup %7096 }
 0x6d3   : > { %v9859_v3 = vpop.xlane.xlu2 %3556  ;;  %v3559_v35 = vpop.xlane.xlu0 %3558  ;;  %v2635_v49 = vmul.f32 %v7097_v62, %v9713_v44 }
 0x6d4   : > { %v2603_v53 = vpop.xlane.xlu1 %2602  ;;  %3282 = vadd.xlane.f32.xlu1 %v9857_v48  ;;  %v7099_v47 = vpop.eup %7098 }
 0x6d5   : > { %v2634_v39 = vmul.f32 %v7099_v47, %v9706_v34  ;;  %v7101_v29 = vpop.eup %7100 }
 0x6d6   : > { %v9875_v55 = vpop.eup %7102  ;;  %v2968_v2 = vmul.f32 %v7101_v29, %v9711_v31  ;;  %v3536_v31 = vpop.f32.mrf.mxu1 }
 0x6d7   : > { %v2644_v61 = vpack.c.bf16 %v2635_v49, %v2634_v39  ;;  %v3237_v39 = vsub.f32 %v9629_v1, %v9776_v12  ;;  %v11761_v12 = vld [vmem:[#allocation29_spill] sm:$0xff] }
 0x6d9   : > { %3710 = vrot.lane.b32.xlu2 %v11759_v36, %s7846_s19 }
 0x6db   : > { %v9869_v40 = vpop.xlane.xlu2 %3214  ;;  %v2605_v57 = vpop.xlane.xlu0 %2604 }
 0x6dc   : > { %v2923_v50 = vpop.xlane.xlu1 %2922  ;;  %3570 = vmax.xlane.f32.xlu1 %v9867_v30 }
 0x6dd   : > { %7104 = vrcp.f32 %v2923_v50 }
 0x6de   : > { %7106 = vrcp.f32 %v2605_v57 }
 0x6df   : > { %7108 = vrcp.f32 %v2603_v53  ;;  %v9891_v53 = vadd.f32 %v3536_v31, %v9474_v10 }
 0x6e0   : > { %2684 = vmatmul.bf16.gmra.mxu0 %v2644_v61  ;;  %7110 = vpow2.f32 %v2914_v20  ;;  %v11760_v61 = vld [vmem:[#allocation34_spill] sm:$0xff] }
 0x6e1   : > { %v3238_v29 = vsub.f32 %v11760_v61, %v9785_v56 }
 0x6e3   : > { %v7105_v41 = vpop.eup %7104  ;;  %v9877_v0 = vpop.xlane.xlu2 %3216  ;;  %3358 = vrot.lane.b32.xlu0 %v11755_v22, %s7844_s11  ;;  %v2887_v22 = vsub.f32 %v9716_v15, %v2871_v18  ;;  %v3589_v18 = vsub.f32 %v9729_v45, %v3559_v35 }
 0x6e4   : > { %2940 = vadd.xlane.f32.xlu1 %v9875_v55  ;;  %v2969_v34 = vmul.f32 %v7105_v41, %v9745_v7  ;;  %v7107_v58 = vpop.eup %7106  ;;  %v3182_v15 = vpop.f32.mrf.mxu3 }
 0x6e5   : > { %v7109_v37 = vpop.eup %7108  ;;  %v2637_v46 = vmul.f32 %v7107_v58, %v9743_v6  ;;  %v2918_v7 = vmul.f32 1.442695, %v2887_v22  ;;  %v2904_v6 = vmul.f32 1.442695, %v2880_v23  ;;  %v9905_v54 = vadd.f32 %v3182_v15, %v9474_v10  ;;  %v3538_v10 = vpop.f32.mrf.mxu1  ;;  %v11762_v58 = vld [vmem:[#allocation30_spill] sm:$0xff] }
 0x6e6   : > { %v2984_v44 = vpack.c.bf16 %v2969_v34, %v2968_v2  ;;  %v9884_v60 = vpop.eup %7110  ;;  %v2636_v28 = vmul.f32 %v7109_v37, %v9731_v21  ;;  %v2883_v21 = vsub.f32 %v9677_v11, %v9821_v38  ;;  %v3606_v63 = vmul.f32 1.442695, %v3589_v18 }
 0x6e7   : > { %7112 = vpow2.f32 %v2918_v7  ;;  %v3236_v11 = vsub.f32 %v9604_v8, %v9759_v4  ;;  %v3256_v8 = vmul.f32 1.442695, %v3237_v39  ;;  %v9926_v57 = vadd.f32 %v3538_v10, %v9484_v26 }
 0x6e8   : > { %3032 = vmatmul.bf16.vlgmr.msrb.gmra.mxu2 %v2984_v44  ;;  %v2645_v17 = vpack.c.bf16 %v2637_v46, %v2636_v28  ;;  %7114 = vpow2.f32 %v2904_v6  ;;  %v2910_v47 = vmul.f32 1.442695, %v2883_v21  ;;  %v3258_v2 = vmul.f32 1.442695, %v3238_v29 }
 0x6e9   : > { %v3254_v45 = vmul.f32 1.442695, %v3236_v11 }
 0x6ea   : > { %7116 = vpow2.f32 %v2910_v47  ;;  %v2927_v41 = vpop.xlane.xlu0 %2926 }
 0x6eb   : > { %v3361_v27 = vpop.permute.xlu2 %3360  ;;  %7118 = vpow2.f32 %v3606_v63 }
 0x6ec   : > { %2946 = vadd.xlane.f32.xlu1 %v9884_v60  ;;  %3382 = vmatpush.bf16.msra.mxu0 %v3361_v27  ;;  %v3184_v38 = vpop.f32.mrf.mxu3  ;;  %7120 = vpow2.f32 %v3254_v45  ;;  %v11763_v27 = vld [vmem:[#allocation37_spill] sm:$0xff] }
 0x6ed   : > { %v9896_v5 = vpop.eup %7112  ;;  %v9914_v35 = vadd.f32 %v3184_v38, %v9484_v26  ;;  %7122 = vpow2.f32 %v3256_v8  ;;  %v3541_v20 = vpop.f32.mrf.mxu1 }
 0x6ee   : > { %v9902_v49 = vpop.eup %7114  ;;  %v9935_v34 = vadd.f32 %v3541_v20, %v11761_v12  ;;  %7124 = vpow2.f32 %v3258_v2 }
 0x6ef   : > { %7126 = vrcp.f32 %v2927_v41 }
 0x6f0   : > { %2689 = vmatmul.bf16.gmra.mxu0 %v2645_v17  ;;  %v9911_v50 = vpop.eup %7116 }
 0x6f1   : > { %v9917_v19 = vpop.eup %7118 }
 0x6f2   : > { %v9923_v4 = vpop.eup %7120  ;;  %v9939_v56 = vpop.xlane.xlu0 %3564 }
 0x6f3   : > { %v9932_v1 = vpop.eup %7122 }
 0x6f4   : > { %v3713_v62 = vpop.permute.xlu1 %3712  ;;  %3572 = vmax.xlane.f32.xlu1 %v9891_v53  ;;  %v9946_v46 = vpop.eup %7124 }
 0x6f5   : > { %3737 = vmatpush.bf16.msra.mxu2 %v3713_v62  ;;  %v3543_v26 = vpop.f32.mrf.mxu1  ;;  %v7127_v22 = vpop.eup %7126 }
 0x6f6   : > { %v9942_v37 = vadd.f32 %v3543_v26, %v11762_v58  ;;  %v3187_v17 = vpop.f32.mrf.mxu3  ;;  %v2971_v62 = vmul.f32 %v7127_v22, %v9763_v42  ;;  %v11764_v42 = vld [vmem:[#allocation48_spill] sm:$0xff] }
 0x6f7   : > { %v9968_v41 = vadd.f32 %v3187_v17, %v11761_v12 }
 0x6fb   : > { %v2933_v18 = vpop.xlane.xlu0 %2932 }
 0x6fc   : > { %2950 = vadd.xlane.f32.xlu1 %v9896_v5 }
 0x6fe   : > { %v9957_v11 = vpop.f32.mrf.mxu3 }
 0x702   : > { %2936 = vadd.xlane.f32.xlu2 %v9902_v49 }
 0x703   : > { %v3285_v10 = vpop.xlane.xlu0 %3284 }
 0x704   : > { %3218 = vmax.xlane.f32.xlu1 %v9905_v54 }
 0x70a   : > { %2942 = vadd.xlane.f32.xlu2 %v9911_v50 }
 0x70c   : > { %3220 = vmax.xlane.f32.xlu1 %v9914_v35 }
 0x70d   : > { %3638 = vadd.xlane.f32.xlu0 %v9917_v19 }
 0x714   : > { %3286 = vadd.xlane.f32.xlu1 %v9923_v4 }
 0x715   : > { %3574 = vmax.xlane.f32.xlu0 %v9926_v57 }
 0x71c   : > { %3288 = vadd.xlane.f32.xlu1 %v9932_v1 }
 0x71d   : > { %3576 = vmax.xlane.f32.xlu0 %v9935_v34 }
 0x71f   : > { %v2925_v44 = vpop.xlane.xlu1 %2924 }
 0x720   : > { %7128 = vrcp.f32 %v2925_v44  ;;  %v9971_v44 = vpop.f32.mrf.mxu1 }
 0x722   : > { %3708 = vrot.lane.b32.xlu2 %v11763_v27, %s7846_s19 }
 0x724   : > { %3578 = vmax.xlane.f32.xlu1 %v9942_v37  ;;  %v9949_v28 = vpop.xlane.xlu2 %3562 }
 0x725   : > { %3290 = vadd.xlane.f32.xlu0 %v9946_v46 }
 0x726   : > { %v7129_v31 = vpop.eup %7128 }
 0x727   : > { %v3561_v7 = vpop.xlane.xlu1 %3560  ;;  %v2970_v23 = vmul.f32 %v7129_v31, %v9803_v32  ;;  %v3239_v32 = vsub.f32 %v11764_v42, %v9793_v9  ;;  %v3192_v9 = vpop.f32.mrf.mxu3 }
 0x728   : > { %v3590_v6 = vsub.f32 %v9819_v24, %v3561_v7  ;;  %v9973_v31 = vpop.xlane.xlu0 %2938  ;;  %v11765_v7 = vld [vmem:[#allocation44_spill] sm:$0xff] }
 0x729   : > { %v2985_v21 = vpack.c.bf16 %v2971_v62, %v2970_v23  ;;  %v3260_v39 = vmul.f32 1.442695, %v3239_v32  ;;  %v3588_v23 = vsub.f32 %v11765_v7, %v9859_v3 }
 0x72a   : > { %v3608_v15 = vmul.f32 1.442695, %v3590_v6  ;;  %3356 = vrot.lane.b32.xlu2 %v11759_v36, %s7844_s11 }
 0x72b   : > { %3037 = vmatmul.bf16.gmra.mxu2 %v2985_v21  ;;  %v3604_v3 = vmul.f32 1.442695, %v3588_v23 }
 0x72c   : > { %7130 = vpow2.f32 %v3608_v15  ;;  %v2931_v47 = vpop.xlane.xlu2 %2930  ;;  %v3548_v15 = vpop.f32.mrf.mxu1 }
 0x72d   : > { %7132 = vrcp.f32 %v2931_v47  ;;  %v11766_v47 = vld [vmem:[#allocation40_spill] sm:$0xff] }
 0x72f   : > { %v2929_v63 = vpop.xlane.xlu1 %2928  ;;  %v3194_v21 = vpop.f32.mrf.mxu3 }
 0x730   : > { %7134 = vrcp.f32 %v2929_v63 }
 0x731   : > { %7136 = vpow2.f32 %v3260_v39  ;;  %v11768_v39 = vld [vmem:[#allocation46_spill] sm:$0xff] }
 0x732   : > { %v9959_v38 = vpop.eup %7130  ;;  %v9984_v62 = vpop.xlane.xlu0 %2944 }
 0x733   : > { %3640 = vadd.xlane.f32.xlu1 %v9959_v38  ;;  %v7133_v24 = vpop.eup %7132 }
 0x734   : > { %v3569_v45 = vpop.xlane.xlu2 %3568  ;;  %v2973_v29 = vmul.f32 %v7133_v24, %v9825_v52  ;;  %v11767_v24 = vld [vmem:[#allocation31_spill] sm:$0xff]  ;;  %v3551_v23 = vpop.f32.mrf.mxu1 }
 0x735   : > { %v3594_v17 = vsub.f32 %v9838_v16, %v3569_v45  ;;  %v9992_v16 = vadd.f32 %v3548_v15, %v11767_v24 }
 0x736   : > { %v7135_v36 = vpop.eup %7134 }
 0x737   : > { %v3567_v8 = vpop.xlane.xlu1 %3566  ;;  %v2972_v61 = vmul.f32 %v7135_v36, %v9828_v13  ;;  %v9975_v13 = vpop.eup %7136  ;;  %v3616_v32 = vmul.f32 1.442695, %v3594_v17  ;;  %v9989_v36 = vadd.f32 %v3194_v21, %v11767_v24 }
 0x738   : > { %v3593_v20 = vsub.f32 %v9843_v59, %v3567_v8  ;;  %v3241_v8 = vsub.f32 %v11768_v39, %v9877_v0 }
 0x739   : > { %v2986_v2 = vpack.c.bf16 %v2973_v29, %v2972_v61  ;;  %v11769_v29 = vld [vmem:[#allocation39_spill] sm:$0xff] }
 0x73a   : > { %v3614_v26 = vmul.f32 1.442695, %v3593_v20 }
 0x73b   : > { %3222 = vmax.xlane.f32.xlu1 %v9968_v41  ;;  %3042 = vmatmul.bf16.gmra.mxu2 %v2986_v2 }
 0x73c   : > { %7138 = vpow2.f32 %v3614_v26  ;;  %v3711_v22 = vpop.permute.xlu2 %3710 }
 0x73d   : > { %3738 = vmatpush.bf16.msra.mxu2 %v3711_v22  ;;  %7140 = vrcp.f32 %v2933_v18  ;;  %v3264_v22 = vmul.f32 1.442695, %v3241_v8 }
 0x73f   : > { %v2935_v52 = vpop.xlane.xlu1 %2934 }
 0x740   : > { %7142 = vrcp.f32 %v2935_v52  ;;  %v11770_v52 = vld [vmem:[#allocation38_spill] sm:$0xff] }
 0x741   : > { %7144 = vrcp.f32 %v3285_v10 }
 0x742   : > { %v9977_v59 = vpop.eup %7138 }
 0x743   : > { %3292 = vadd.xlane.f32.xlu1 %v9975_v13  ;;  %3646 = vadd.xlane.f32.xlu0 %v9977_v59  ;;  %v7141_v12 = vpop.eup %7140 }
 0x744   : > { %v2974_v63 = vmul.f32 %v7141_v12, %v11766_v47  ;;  %v10009_v12 = vadd.f32 %v3192_v9, %v11770_v52  ;;  %v11772_v9 = vld [vmem:[#allocation41_spill] sm:$0xff] }
 0x745   : > { %v10021_v21 = vadd.f32 %v3551_v23, %v11772_v9 }
 0x746   : > { %v7143_v6 = vpop.eup %7142 }
 0x747   : > { %v3283_v18 = vpop.xlane.xlu1 %3282  ;;  %v2975_v42 = vmul.f32 %v7143_v6, %v9849_v51  ;;  %v7145_v10 = vpop.eup %7144 }
 0x748   : > { %7146 = vrcp.f32 %v3283_v18  ;;  %v9998_v51 = vpop.xlane.xlu0 %2948  ;;  %v10001_v20 = vmul.f32 %v7145_v10, %v11769_v29 }
 0x749   : > { %v2987_v45 = vpack.c.bf16 %v2975_v42, %v2974_v63  ;;  %7148 = vpow2.f32 %v3616_v32  ;;  %v10028_v32 = vpop.f32.mrf.mxu3 }
 0x74a   : > { %7150 = vpow2.f32 %v3604_v3 }
 0x74b   : > { %3228 = vmax.xlane.f32.xlu1 %v9989_v36  ;;  %3582 = vmax.xlane.f32.xlu0 %v9992_v16  ;;  %7152 = vpow2.f32 %v3264_v22 }
 0x74c   : > { %3047 = vmatmul.bf16.gmra.mxu2 %v2987_v45 }
 0x74e   : > { %v7147_v61 = vpop.eup %7146 }
 0x74f   : > { %v10004_v2 = vmul.f32 %v7147_v61, %v9857_v48  ;;  %v10006_v26 = vpop.xlane.xlu1 %3570  ;;  %v10013_v17 = vpop.eup %7148 }
 0x750   : > { %11771 = vst [vmem:[#allocation42_spill] sm:$0xff] %v10013_v17  ;;  %v10015_v7 = vpop.eup %7150 }
 0x751   : > { %v10023_v15 = vpop.eup %7152  ;;  %v3199_v10 = vpop.f32.mrf.mxu3 }
 0x753   : > { %3648 = vadd.xlane.f32.xlu1 %v10013_v17  ;;  %3226 = vmax.xlane.f32.xlu0 %v10009_v12 }
 0x754   : > { %3636 = vadd.xlane.f32.xlu2 %v10015_v7 }
 0x755   : > { %v3359_v48 = vpop.permute.xlu0 %3358 }
 0x756   : > { %3383 = vmatpush.bf16.msra.mxu0 %v3359_v48 }
 0x757   : > { %v2941_v6 = vpop.xlane.xlu1 %2940 }
 0x75b   : > { %3584 = vmax.xlane.f32.xlu1 %v10021_v21  ;;  %3296 = vadd.xlane.f32.xlu0 %v10023_v15 }
 0x75f   : > { %v2947_v18 = vpop.xlane.xlu1 %2946 }
 0x767   : > { %v3573_v47 = vpop.xlane.xlu1 %3572 }
 0x768   : > { %v3596_v63 = vsub.f32 %v9891_v53, %v3573_v47  ;;  %v11774_v53 = vld [vmem:[#allocation45_spill] sm:$0xff] }
 0x769   : > { %v10039_v8 = vadd.f32 %v3199_v10, %v11774_v53 }
 0x76a   : > { %v3620_v42 = vmul.f32 1.442695, %v3596_v63 }
 0x76c   : > { %7154 = vpow2.f32 %v3620_v42  ;;  %3354 = vrot.lane.b32.xlu2 %v11763_v27, %s7844_s11 }
 0x76d   : > { %7156 = vrcp.f32 %v9973_v31 }
 0x76f   : > { %v10032_v24 = vpop.xlane.xlu1 %2950 }
 0x772   : > { %v10034_v3 = vpop.eup %7154 }
 0x773   : > { %11773 = vst [vmem:[#allocation43_spill] sm:$0xff] %v10034_v3  ;;  %3652 = vadd.xlane.f32.xlu0 %v10034_v3  ;;  %v7157_v61 = vpop.eup %7156 }
 0x774   : > { %v2977_v48 = vmul.f32 %v7157_v61, %v9799_v33 }
 0x775   : > { %v2937_v45 = vpop.xlane.xlu2 %2936 }
 0x776   : > { %7158 = vrcp.f32 %v2937_v45 }
 0x777   : > { %v3219_v39 = vpop.xlane.xlu1 %3218 }
 0x778   : > { %v3242_v33 = vsub.f32 %v9905_v54, %v3219_v39 }
 0x77b   : > { %3232 = vmax.xlane.f32.xlu0 %v10039_v8 }
 0x77c   : > { %v7159_v29 = vpop.eup %7158 }
 0x77d   : > { %v2943_v27 = vpop.xlane.xlu2 %2942  ;;  %v2976_v22 = vmul.f32 %v7159_v29, %v9902_v49 }
 0x77e   : > { %7160 = vrcp.f32 %v2943_v27 }
 0x77f   : > { %v10044_v23 = vpop.xlane.xlu1 %3220  ;;  %v2988_v47 = vpack.c.bf16 %v2977_v48, %v2976_v22  ;;  %7162 = vrcp.f32 %v2941_v6  ;;  %v3591_v6 = vsub.f32 %v9812_v14, %v9949_v28  ;;  %v3266_v48 = vmul.f32 1.442695, %v3242_v33 }
 0x780   : > { %v10046_v31 = vpop.xlane.xlu0 %3638 }
 0x781   : > { %3052 = vmatmul.bf16.gmra.mxu2 %v2988_v47 }
 0x784   : > { %v7161_v45 = vpop.eup %7160 }
 0x785   : > { %v3709_v63 = vpop.permute.xlu2 %3708  ;;  %v7163_v3 = vpop.eup %7162  ;;  %v2979_v49 = vmul.f32 %v7161_v45, %v9911_v50  ;;  %v3610_v50 = vmul.f32 1.442695, %v3591_v6 }
 0x786   : > { %3739 = vmatpush.bf16.msra.mxu2 %v3709_v63  ;;  %v2978_v29 = vmul.f32 %v7163_v3, %v9875_v55  ;;  %v10059_v55 = vadd.f32 %v9957_v11, %v11762_v58 }
 0x787   : > { %v3287_v42 = vpop.xlane.xlu1 %3286 }
 0x788   : > { %v3575_v10 = vpop.xlane.xlu0 %3574  ;;  %v2989_v22 = vpack.c.bf16 %v2979_v49, %v2978_v29 }
 0x789   : > { %v3597_v0 = vsub.f32 %v9926_v57, %v3575_v10 }
 0x78b   : > { %v3622_v17 = vmul.f32 1.442695, %v3597_v0 }
 0x78d   : > { %7164 = vpow2.f32 %v3622_v17  ;;  %v3357_v61 = vpop.permute.xlu2 %3356 }
 0x78e   : > { %7166 = vrcp.f32 %v3287_v42  ;;  %3384 = vmatpush.bf16.msra.mxu0 %v3357_v61  ;;  %v10091_v61 = vadd.f32 %v9971_v44, %v11770_v52 }
 0x78f   : > { %v3289_v27 = vpop.xlane.xlu1 %3288 }
 0x790   : > { %7168 = vrcp.f32 %v3289_v27  ;;  %v3577_v57 = vpop.xlane.xlu0 %3576 }
 0x791   : > { %v3598_v0 = vsub.f32 %v9935_v34, %v3577_v57  ;;  %3057 = vmatmul.bf16.gmra.mxu2 %v2989_v22  ;;  %7170 = vrcp.f32 %v2947_v18 }
 0x792   : > { %7172 = vrcp.f32 %v9984_v62 }
 0x793   : > { %v10055_v54 = vpop.eup %7164  ;;  %v3624_v14 = vmul.f32 1.442695, %v3598_v0  ;;  %7174 = vpow2.f32 %v3266_v48 }
 0x794   : > { %v7167_v28 = vpop.eup %7166  ;;  %3654 = vadd.xlane.f32.xlu1 %v10055_v54 }
 0x795   : > { %7176 = vpow2.f32 %v3624_v14  ;;  %3224 = vmax.xlane.f32.xlu2 %v10059_v55  ;;  %v10065_v18 = vmul.f32 %v7167_v28, %v9923_v4  ;;  %v10114_v28 = vpop.f32.mrf.mxu2 }
 0x796   : > { %v7169_v34 = vpop.eup %7168  ;;  %7178 = vpow2.f32 %v3610_v50  ;;  %v10109_v50 = vpop.f32.mrf.mxu0 }
 0x797   : > { %v3579_v17 = vpop.xlane.xlu1 %3578  ;;  %v10068_v3 = vmul.f32 %v7169_v34, %v9932_v1  ;;  %v7171_v58 = vpop.eup %7170  ;;  %v11775_v1 = vld [vmem:[#allocation49_spill] sm:$0xff] }
 0x798   : > { %v3599_v11 = vsub.f32 %v9942_v37, %v3579_v17  ;;  %v7173_v62 = vpop.eup %7172  ;;  %v2981_v45 = vmul.f32 %v7171_v58, %v9884_v60  ;;  %v3592_v37 = vsub.f32 %v11775_v1, %v9939_v56 }
 0x799   : > { %v3347_v39 = vpack.c.bf16 %v10068_v3, %v10065_v18  ;;  %v10073_v47 = vpop.eup %7174  ;;  %v2980_v4 = vmul.f32 %v7173_v62, %v9835_v25  ;;  %v11776_v25 = vld [vmem:[#allocation32_spill] sm:$0xff] }
 0x79a   : > { %v3626_v63 = vmul.f32 1.442695, %v3599_v11  ;;  %v3612_v33 = vmul.f32 1.442695, %v3592_v37  ;;  %v3240_v56 = vsub.f32 %v11776_v25, %v9869_v40  ;;  %v3243_v11 = vsub.f32 %v9914_v35, %v10044_v23 }
 0x79b   : > { %v10075_v42 = vpop.eup %7176  ;;  %v2990_v49 = vpack.c.bf16 %v2981_v45, %v2980_v4 }
 0x79c   : > { %v10078_v10 = vpop.eup %7178  ;;  %3298 = vadd.xlane.f32.xlu1 %v10073_v47  ;;  %3656 = vadd.xlane.f32.xlu0 %v10075_v42  ;;  %7180 = vpow2.f32 %v3626_v63  ;;  %v3262_v27 = vmul.f32 1.442695, %v3240_v56  ;;  %v3268_v4 = vmul.f32 1.442695, %v3243_v11 }
 0x79d   : > { %3642 = vadd.xlane.f32.xlu2 %v10078_v10  ;;  %7182 = vrcp.f32 %v10032_v24  ;;  %v10125_v58 = vpop.f32.mrf.mxu2 }
 0x79e   : > { %7184 = vrcp.f32 %v9998_v51  ;;  %v3595_v51 = vsub.f32 %v9867_v30, %v10006_v26  ;;  %v10117_v30 = vpop.f32.mrf.mxu0  ;;  %v3553_v26 = vpop.f32.mrf.mxu1 }
 0x79f   : > { %7186 = vpow2.f32 %v3612_v33  ;;  %v10122_v17 = vadd.f32 %v3553_v26, %v11774_v53  ;;  %v10136_v53 = vadd.f32 %v10028_v32, %v11772_v9 }
 0x7a0   : > { %7188 = vpow2.f32 %v3262_v27  ;;  %v3618_v40 = vmul.f32 1.442695, %v3595_v51 }
 0x7a1   : > { %3062 = vmatmul.bf16.gmra.mxu2 %v2990_v49 }
 0x7a2   : > { %v10087_v60 = vpop.eup %7180  ;;  %7190 = vpow2.f32 %v3618_v40 }
 0x7a3   : > { %v7183_v29 = vpop.eup %7182  ;;  %7192 = vrcp.f32 %v10046_v31 }
 0x7a4   : > { %3658 = vadd.xlane.f32.xlu1 %v10087_v60  ;;  %v7185_v24 = vpop.eup %7184  ;;  %v2983_v22 = vmul.f32 %v7183_v29, %v9896_v5  ;;  %v3291_v5 = vpop.xlane.xlu0 %3290 }
 0x7a5   : > { %3580 = vmax.xlane.f32.xlu2 %v10091_v61  ;;  %v10101_v48 = vpop.eup %7186  ;;  %v2982_v44 = vmul.f32 %v7185_v24, %v9854_v43 }
 0x7a6   : > { %v10098_v6 = vpop.xlane.xlu1 %3640  ;;  %v10107_v0 = vpop.eup %7188 }
 0x7a7   : > { %v2991_v52 = vpack.c.bf16 %v2983_v22, %v2982_v44  ;;  %v10132_v45 = vpop.f32.mrf.mxu0 }
 0x7a8   : > { %v10112_v14 = vpop.eup %7190 }
 0x7a9   : > { %v7193_v37 = vpop.eup %7192 }
 0x7aa   : > { %v3685_v31 = vmul.f32 %v7193_v37, %v9917_v19 }
 0x7ad   : > { %3644 = vadd.xlane.f32.xlu2 %v10101_v48 }
 0x7ae   : > { %v3223_v57 = vpop.xlane.xlu1 %3222  ;;  %v10140_v23 = vpop.f32.mrf.mxu2 }
 0x7af   : > { %v3244_v35 = vsub.f32 %v9968_v41, %v3223_v57  ;;  %v10146_v32 = vpop.f32.mrf.mxu0  ;;  %v11777_v41 = vpack.c.bf16 %v10001_v20, %v10004_v2 }
 0x7b1   : > { %3067 = vmatmul.bf16.gmra.mxu2 %v2991_v52  ;;  %v3270_v9 = vmul.f32 1.442695, %v3244_v35 }
 0x7b5   : > { %3294 = vadd.xlane.f32.xlu2 %v10107_v0 }
 0x7b6   : > { %v3293_v43 = vpop.xlane.xlu1 %3292  ;;  %v10119_v34 = vpop.xlane.xlu0 %3646 }
 0x7b7   : > { %v10157_v44 = vpop.f32.mrf.mxu0 }
 0x7bd   : > { %3650 = vadd.xlane.f32.xlu2 %v10112_v14 }
 0x7be   : > { %v10130_v62 = vpop.xlane.xlu1 %3228  ;;  %v3583_v1 = vpop.xlane.xlu0 %3582 }
 0x7bf   : > { %v3601_v19 = vsub.f32 %v9992_v16, %v3583_v1  ;;  %v10172_v16 = vpop.f32.mrf.mxu0 }
 0x7c1   : > { %v3630_v22 = vmul.f32 1.442695, %v3601_v19 }
 0x7c5   : > { %3586 = vmax.xlane.f32.xlu2 %v10122_v17 }
 0x7c6   : > { %v10144_v56 = vpop.xlane.xlu1 %3648  ;;  %v3227_v27 = vpop.xlane.xlu0 %3226 }
 0x7c7   : > { %v3637_v63 = vpop.xlane.xlu2 %3636  ;;  %v10183_v3 = vpop.f32.mrf.mxu0  ;;  %v3246_v19 = vsub.f32 %v10009_v12, %v3227_v27 }
 0x7c8   : > { %7194 = vrcp.f32 %v3637_v63 }
 0x7c9   : > { %7196 = vpow2.f32 %v3268_v4 }
 0x7ca   : > { %7198 = vpow2.f32 %v3270_v9 }
 0x7cb   : > { %7200 = vpow2.f32 %v3630_v22 }
 0x7cc   : > { %7202 = vrcp.f32 %v3293_v43 }
 0x7cd   : > { %3230 = vmax.xlane.f32.xlu2 %v10136_v53 }
 0x7ce   : > { %v7195_v49 = vpop.eup %7194  ;;  %v3585_v51 = vpop.xlane.xlu1 %3584 }
 0x7cf   : > { %v3684_v33 = vmul.f32 %v7195_v49, %v10015_v7  ;;  %v3355_v25 = vpop.permute.xlu2 %3354  ;;  %v10148_v24 = vpop.eup %7196  ;;  %v3602_v40 = vsub.f32 %v10021_v21, %v3585_v51  ;;  %v3274_v51 = vmul.f32 1.442695, %v3246_v19 }
 0x7d0   : > { %3385 = vmatpush.bf16.msra.mxu0 %v3355_v25  ;;  %v10155_v7 = vpop.f32.mrf.mxu2  ;;  %v10159_v52 = vpop.eup %7198 }
 0x7d1   : > { %v3700_v29 = vpack.c.bf16 %v3685_v31, %v3684_v33  ;;  %v10163_v20 = vpop.xlane.xlu0 %3296  ;;  %v3632_v57 = vmul.f32 1.442695, %v3602_v40  ;;  %v10167_v26 = vpop.eup %7200 }
 0x7d2   : > { %v7203_v21 = vpop.eup %7202  ;;  %v10191_v33 = vpop.f32.mrf.mxu0 }
 0x7d3   : > { %3740 = vmatmul.bf16.vlgmr.msra.gmra.mxu2 %v3700_v29  ;;  %3386 = vmatmul.bf16.vlgmr.msra.gmra.mxu0 %v11777_v41  ;;  %7204 = vpow2.f32 %v3632_v57  ;;  %v3335_v18 = vmul.f32 %v7203_v21, %v9975_v13 }
 0x7d4   : > { %7206 = vrcp.f32 %v3291_v5 }
 0x7d5   : > { %3300 = vadd.xlane.f32.xlu2 %v10148_v24 }
 0x7d8   : > { %v10165_v2 = vpop.f32.mrf.mxu2 }
 0x7d9   : > { %v10177_v63 = vpop.eup %7204 }
 0x7da   : > { %v7207_v1 = vpop.eup %7206  ;;  %v10196_v13 = vpop.f32.mrf.mxu0 }
 0x7db   : > { %v3334_v43 = vmul.f32 %v7207_v1, %v9946_v46 }
 0x7dd   : > { %3302 = vadd.xlane.f32.xlu2 %v10159_v52  ;;  %v3348_v35 = vpack.c.bf16 %v3335_v18, %v3334_v43 }
 0x7e0   : > { %v10179_v4 = vpop.f32.mrf.mxu2 }
 0x7e2   : > { %v10201_v41 = vpop.f32.mrf.mxu0 }
 0x7e3   : > { %3391 = vmatmul.bf16.gmra.mxu0 %v3347_v39 }
 0x7e5   : > { %3662 = vadd.xlane.f32.xlu2 %v10167_v26 }
 0x7e6   : > { %v10175_v11 = vpop.xlane.xlu0 %3652 }
 0x7e8   : > { %v10187_v5 = vpop.f32.mrf.mxu2 }
 0x7ea   : > { %v10210_v1 = vpop.f32.mrf.mxu0 }
 0x7ed   : > { %3664 = vadd.xlane.f32.xlu2 %v10177_v63 }
 0x7ee   : > { %v3233_v37 = vpop.xlane.xlu0 %3232 }
 0x7ef   : > { %v3249_v39 = vsub.f32 %v10039_v8, %v3233_v37 }
 0x7f0   : > { %v10194_v25 = vpop.f32.mrf.mxu2 }
 0x7f1   : > { %v3280_v49 = vmul.f32 1.442695, %v3249_v39 }
 0x7f3   : > { %7208 = vpow2.f32 %v3280_v49  ;;  %3396 = vmatmul.bf16.gmra.mxu0 %v3348_v35  ;;  %v3247_v35 = vsub.f32 %v9989_v36, %v10130_v62 }
 0x7f9   : > { %v10189_v31 = vpop.eup %7208 }
 0x7fa   : > { %3312 = vadd.xlane.f32.xlu2 %v10189_v31 }
 0x804   : > { %v10198_v29 = vpop.f32.mrf.mxu2 }
 0x808   : > { %v3225_v8 = vpop.xlane.xlu2 %3224 }
 0x809   : > { %v3245_v46 = vsub.f32 %v10059_v55, %v3225_v8  ;;  %v10223_v8 = vpop.f32.mrf.mxu0 }
 0x80b   : > { %v3272_v9 = vmul.f32 1.442695, %v3245_v46 }
 0x80c   : > { %v10205_v40 = vpop.f32.mrf.mxu2 }
 0x80d   : > { %7210 = vpow2.f32 %v3272_v9 }
 0x80e   : > { %7212 = vrcp.f32 %v10098_v6 }
 0x810   : > { %v3643_v22 = vpop.xlane.xlu2 %3642 }
 0x811   : > { %7214 = vrcp.f32 %v3643_v22 }
 0x812   : > { %7216 = vpow2.f32 %v3274_v51 }
 0x813   : > { %v10207_v57 = vpop.eup %7210 }
 0x814   : > { %3304 = vadd.xlane.f32.xlu0 %v10207_v57  ;;  %v7213_v21 = vpop.eup %7212  ;;  %v10217_v49 = vpop.f32.mrf.mxu2 }
 0x815   : > { %v3686_v12 = vmul.f32 %v7213_v21, %v9959_v38  ;;  %v10235_v21 = vpop.f32.mrf.mxu0 }
 0x817   : > { %v7215_v55 = vpop.eup %7214 }
 0x818   : > { %v3581_v37 = vpop.xlane.xlu2 %3580  ;;  %v3687_v27 = vmul.f32 %v7215_v55, %v10078_v10  ;;  %v10215_v39 = vpop.eup %7216  ;;  %v3276_v10 = vmul.f32 1.442695, %v3247_v35 }
 0x819   : > { %v3600_v6 = vsub.f32 %v10091_v61, %v3581_v37 }
 0x81a   : > { %v3701_v18 = vpack.c.bf16 %v3687_v27, %v3686_v12 }
 0x81b   : > { %v3628_v43 = vmul.f32 1.442695, %v3600_v6 }
 0x81c   : > { %3745 = vmatmul.bf16.gmra.mxu2 %v3701_v18  ;;  %3306 = vadd.xlane.f32.xlu0 %v10215_v39  ;;  %v10228_v9 = vpop.f32.mrf.mxu2 }
 0x81d   : > { %7218 = vpow2.f32 %v3628_v43  ;;  %v10243_v18 = vpop.f32.mrf.mxu0  ;;  %v3655_v43 = vpop.xlane.xlu1 %3654 }
 0x81e   : > { %7220 = vrcp.f32 %v10119_v34 }
 0x820   : > { %v3645_v38 = vpop.xlane.xlu2 %3644 }
 0x821   : > { %7222 = vrcp.f32 %v3645_v38 }
 0x822   : > { %7224 = vpow2.f32 %v3276_v10  ;;  %v11778_v10 = vld [vmem:[#allocation42_spill] sm:$0xff] }
 0x823   : > { %v10225_v61 = vpop.eup %7218  ;;  %7226 = vrcp.f32 %v10163_v20 }
 0x824   : > { %3660 = vadd.xlane.f32.xlu1 %v10225_v61  ;;  %v7221_v46 = vpop.eup %7220  ;;  %v10239_v12 = vpop.f32.mrf.mxu2 }
 0x825   : > { %v3689_v34 = vmul.f32 %v7221_v46, %v9977_v59 }
 0x827   : > { %v7223_v19 = vpop.eup %7222 }
 0x828   : > { %v3295_v36 = vpop.xlane.xlu2 %3294  ;;  %v3688_v62 = vmul.f32 %v7223_v19, %v10101_v48  ;;  %v10233_v51 = vpop.eup %7224 }
 0x829   : > { %7228 = vrcp.f32 %v3295_v36  ;;  %v7227_v55 = vpop.eup %7226 }
 0x82a   : > { %v3702_v22 = vpack.c.bf16 %v3689_v34, %v3688_v62  ;;  %7230 = vrcp.f32 %v10144_v56  ;;  %v3337_v59 = vmul.f32 %v7227_v55, %v10023_v15  ;;  %v10250_v15 = vpop.f32.mrf.mxu0  ;;  %v3299_v34 = vpop.xlane.xlu1 %3298 }
 0x82c   : > { %3308 = vadd.xlane.f32.xlu1 %v10233_v51  ;;  %3750 = vmatmul.bf16.gmra.mxu2 %v3702_v22  ;;  %v10248_v36 = vpop.f32.mrf.mxu2 }
 0x82f   : > { %v7229_v37 = vpop.eup %7228 }
 0x830   : > { %v3651_v20 = vpop.xlane.xlu2 %3650  ;;  %v3336_v48 = vmul.f32 %v7229_v37, %v10107_v0  ;;  %v7231_v6 = vpop.eup %7230 }
 0x831   : > { %7232 = vrcp.f32 %v3651_v20  ;;  %v3690_v46 = vmul.f32 %v7231_v6, %v11778_v10  ;;  %v11779_v6 = vld [vmem:[#allocation43_spill] sm:$0xff]  ;;  %v3657_v10 = vpop.xlane.xlu0 %3656 }
 0x832   : > { %v3349_v27 = vpack.c.bf16 %v3337_v59, %v3336_v48  ;;  %7234 = vrcp.f32 %v3655_v43  ;;  %v10261_v43 = vpop.f32.mrf.mxu0 }
 0x834   : > { %3401 = vmatmul.bf16.gmra.mxu0 %v3349_v27 }
 0x837   : > { %v7233_v35 = vpop.eup %7232 }
 0x838   : > { %v3587_v38 = vpop.xlane.xlu2 %3586  ;;  %v3691_v56 = vmul.f32 %v7233_v35, %v10112_v14  ;;  %v7235_v37 = vpop.eup %7234 }
 0x839   : > { %v3603_v19 = vsub.f32 %v10122_v17, %v3587_v38  ;;  %v10256_v17 = vpop.f32.mrf.mxu2  ;;  %v3693_v59 = vmul.f32 %v7235_v37, %v10055_v54  ;;  %v6821_v37 = vpack.i.bf16 %v10125_v58, %v10114_v28  ;;  %v6613_v28 = vld [vmem:[%s8232_s20 + $0x38] sm:$0xff] }
 0x83a   : > { %v3703_v0 = vpack.c.bf16 %v3691_v56, %v3690_v46  ;;  %4095 = vmatpush.bf16.msra.mxu3 %v6613_v28 }
 0x83b   : > { %v3634_v62 = vmul.f32 1.442695, %v3603_v19 }
 0x83c   : > { %3755 = vmatmul.bf16.gmra.mxu2 %v3703_v0 }
 0x83d   : > { %7236 = vpow2.f32 %v3634_v62 }
 0x83e   : > { %7238 = vrcp.f32 %v10175_v11 }
 0x840   : > { %v3231_v22 = vpop.xlane.xlu2 %3230 }
 0x841   : > { %v3248_v55 = vsub.f32 %v10136_v53, %v3231_v22  ;;  %v3659_v53 = vpop.xlane.xlu1 %3658  ;;  %v3070_v56 = vpop.f32.mrf.mxu2 }
 0x843   : > { %v10254_v20 = vpop.eup %7236  ;;  %v3278_v14 = vmul.f32 1.442695, %v3248_v55 }
 0x844   : > { %3666 = vadd.xlane.f32.xlu0 %v10254_v20  ;;  %v7239_v48 = vpop.eup %7238 }
 0x845   : > { %7240 = vpow2.f32 %v3278_v14  ;;  %v3692_v11 = vmul.f32 %v7239_v48, %v11779_v6 }
 0x846   : > { %7242 = vrcp.f32 %v3299_v34 }
 0x847   : > { %v3704_v35 = vpack.c.bf16 %v3693_v59, %v3692_v11 }
 0x848   : > { %v3301_v27 = vpop.xlane.xlu2 %3300 }
 0x849   : > { %7244 = vrcp.f32 %v3301_v27 }
 0x84a   : > { %7246 = vrcp.f32 %v3659_v53 }
 0x84b   : > { %v10263_v38 = vpop.eup %7240  ;;  %7248 = vrcp.f32 %v3657_v10  ;;  %v6612_v10 = vld [vmem:[%s8232_s20 + $0x30] sm:$0xff] }
 0x84c   : > { %3310 = vadd.xlane.f32.xlu1 %v10263_v38  ;;  %3760 = vmatmul.bf16.gmra.mxu2 %v3704_v35  ;;  %v7243_v46 = vpop.eup %7242 }
 0x84d   : > { %v3338_v54 = vmul.f32 %v7243_v46, %v10073_v47  ;;  %4096 = vmatpush.bf16.msra.mxu3 %v6612_v10  ;;  %v6881_v46 = vpack.i.bf16 %v10205_v40, %v10198_v29 }
 0x84f   : > { %v7245_v19 = vpop.eup %7244 }
 0x850   : > { %v3339_v0 = vmul.f32 %v7245_v19, %v10148_v24  ;;  %v3387_v62 = vpop.f32.mrf.mxu0  ;;  %v7247_v22 = vpop.eup %7246  ;;  %v6836_v24 = vpack.i.bf16 %v10155_v7, %v10140_v23  ;;  %v6866_v7 = vpack.i.bf16 %v10194_v25, %v10187_v5  ;;  %v6611_v25 = vld [vmem:[%s8232_s20 + $0x28] sm:$0xff] }
 0x851   : > { %v7249_v55 = vpop.eup %7248  ;;  %v3695_v48 = vmul.f32 %v7247_v22, %v10087_v60  ;;  %v3303_v5 = vpop.xlane.xlu2 %3302  ;;  %4097 = vmatpush.bf16.msra.mxu3 %v6611_v25  ;;  %v6610_v22 = vld [vmem:[%s8232_s20 + $0x20] sm:$0xff] }
 0x852   : > { %v3350_v34 = vpack.c.bf16 %v3339_v0, %v3338_v54  ;;  %v3694_v59 = vmul.f32 %v7249_v55, %v10075_v42  ;;  %v6851_v42 = vpack.i.bf16 %v10179_v4, %v10165_v2  ;;  %v6896_v4 = vpack.i.bf16 %v10228_v9, %v10217_v49 }
 0x853   : > { %7250 = vrcp.f32 %v3303_v5  ;;  %v6911_v54 = vpack.i.bf16 %v10248_v36, %v10239_v12 }
 0x854   : > { %3406 = vmatmul.bf16.gmra.mxu0 %v3350_v34  ;;  %v3705_v47 = vpack.c.bf16 %v3695_v48, %v3694_v59 }
 0x855   : > { %4098 = vmatpush.bf16.msra.mxu3 %v6610_v22 }
 0x856   : > { %v3741_v14 = vpop.f32.mrf.mxu2 }
 0x858   : > { %6822 = vrot.lane.b32.xlu0 %v6821_v37, %s7846_s19  ;;  %v3389_v27 = vpop.f32.mrf.mxu0 }
 0x859   : > { %v6826_v60 = vpack.i.bf16 %v3389_v27, %v3387_v62  ;;  %v7251_v40 = vpop.eup %7250  ;;  %v6926_v62 = vpack.i.bf16 %v3070_v56, %v10256_v17  ;;  %v3663_v55 = vpop.xlane.xlu2 %3662 }
 0x85a   : > { %v3340_v49 = vmul.f32 %v7251_v40, %v10159_v52 }
 0x85c   : > { %3765 = vmatmul.bf16.gmra.mxu2 %v3705_v47  ;;  %v6609_v47 = vld [vmem:[%s8232_s20 + $0x18] sm:$0xff] }
 0x85d   : > { %4099 = vmatpush.bf16.msra.mxu3 %v6609_v47 }
 0x85e   : > { %v3743_v6 = vpop.f32.mrf.mxu2 }
 0x85f   : > { %v6831_v11 = vpack.i.bf16 %v3743_v6, %v3741_v14 }
 0x860   : > { %6837 = vrot.lane.b32.xlu0 %v6836_v24, %s7846_s19  ;;  %v3392_v53 = vpop.f32.mrf.mxu0 }
 0x861   : > { %6832 = vrot.lane.b32.xlu2 %v6831_v11, %s7845_s30 }
 0x865   : > { %6827 = vrot.lane.b32.xlu1 %v6826_v60, %s7844_s11  ;;  %v3665_v60 = vpop.xlane.xlu2 %3664 }
 0x868   : > { %v3394_v58 = vpop.f32.mrf.mxu0 }
 0x869   : > { %6852 = vrot.lane.b32.xlu2 %v6851_v42, %s7846_s19  ;;  %v6841_v23 = vpack.i.bf16 %v3394_v58, %v3392_v53  ;;  %v6608_v42 = vld [vmem:[%s8232_s20 + $0x10] sm:$0xff] }
 0x86a   : > { %4100 = vmatpush.bf16.msra.mxu3 %v6608_v42 }
 0x86b   : > { %6842 = vrot.lane.b32.xlu0 %v6841_v23, %s7844_s11 }
 0x86d   : > { %v3313_v10 = vpop.xlane.xlu2 %3312 }
 0x870   : > { %v3397_v35 = vpop.f32.mrf.mxu0 }
 0x871   : > { %6867 = vrot.lane.b32.xlu2 %v6866_v7, %s7846_s19  ;;  %v6607_v7 = vld [vmem:[%s8232_s20 + $0x8] sm:$0xff] }
 0x872   : > { %4101 = vmatpush.bf16.msra.mxu3 %v6607_v7 }
 0x878   : > { %v3399_v19 = vpop.f32.mrf.mxu0 }
 0x879   : > { %6882 = vrot.lane.b32.xlu2 %v6881_v46, %s7846_s19  ;;  %v6856_v2 = vpack.i.bf16 %v3399_v19, %v3397_v35  ;;  %v6606_v19 = vld [vmem:[%s8232_s20] sm:$0xff] }
 0x87a   : > { %4102 = vmatpush.bf16.msra.mxu3 %v6606_v19 }
 0x87b   : > { %6857 = vrot.lane.b32.xlu0 %v6856_v2, %s7844_s11 }
 0x881   : > { %6897 = vrot.lane.b32.xlu2 %v6896_v4, %s7846_s19 }
 0x887   : > { %v3305_v29 = vpop.xlane.xlu0 %3304 }
 0x888   : > { %7252 = vrcp.f32 %v3305_v29 }
 0x889   : > { %6912 = vrot.lane.b32.xlu2 %v6911_v54, %s7846_s19  ;;  %7254 = vrcp.f32 %v3663_v55 }
 0x88e   : > { %v7253_v0 = vpop.eup %7252 }
 0x88f   : > { %v3341_v9 = vmul.f32 %v7253_v0, %v10207_v57  ;;  %v3307_v36 = vpop.xlane.xlu0 %3306  ;;  %v7255_v37 = vpop.eup %7254 }
 0x890   : > { %v3697_v57 = vmul.f32 %v7255_v37, %v10167_v26 }
 0x891   : > { %6927 = vrot.lane.b32.xlu2 %v6926_v62, %s7846_s19  ;;  %v3351_v34 = vpack.c.bf16 %v3341_v9, %v3340_v49 }
 0x893   : > { %3411 = vmatmul.bf16.gmra.mxu0 %v3351_v34 }
 0x897   : > { %v3661_v12 = vpop.xlane.xlu1 %3660 }
 0x898   : > { %7256 = vrcp.f32 %v3661_v12 }
 0x899   : > { %7258 = vrcp.f32 %v3307_v36 }
 0x89e   : > { %v7257_v14 = vpop.eup %7256 }
 0x89f   : > { %v3746_v17 = vpop.f32.mrf.mxu2  ;;  %v3309_v56 = vpop.xlane.xlu1 %3308  ;;  %v3696_v52 = vmul.f32 %v7257_v14, %v10225_v61 }
 0x8a0   : > { %7260 = vrcp.f32 %v3309_v56  ;;  %v7259_v59 = vpop.eup %7258 }
 0x8a1   : > { %v3706_v48 = vpack.c.bf16 %v3697_v57, %v3696_v52  ;;  %v3342_v6 = vmul.f32 %v7259_v59, %v10215_v39  ;;  %7262 = vrcp.f32 %v3665_v60 }
 0x8a3   : > { %3770 = vmatmul.bf16.gmra.mxu2 %v3706_v48 }
 0x8a6   : > { %v7261_v27 = vpop.eup %7260 }
 0x8a7   : > { %v3748_v24 = vpop.f32.mrf.mxu2  ;;  %v3343_v11 = vmul.f32 %v7261_v27, %v10233_v51  ;;  %v7263_v46 = vpop.eup %7262 }
 0x8a8   : > { %v6846_v53 = vpack.i.bf16 %v3748_v24, %v3746_v17  ;;  %v3698_v25 = vmul.f32 %v7263_v46, %v10177_v63 }
 0x8a9   : > { %v3352_v28 = vpack.c.bf16 %v3343_v11, %v3342_v6 }
 0x8aa   : > { %6847 = vrot.lane.b32.xlu1 %v6846_v53, %s7845_s30 }
 0x8ab   : > { %3416 = vmatmul.bf16.gmra.mxu0 %v3352_v28 }
 0x8af   : > { %v3751_v26 = vpop.f32.mrf.mxu2 }
 0x8b1   : > { %v3402_v61 = vpop.f32.mrf.mxu0 }
 0x8b7   : > { %v3753_v58 = vpop.f32.mrf.mxu2  ;;  %v3667_v23 = vpop.xlane.xlu0 %3666 }
 0x8b8   : > { %v6861_v35 = vpack.i.bf16 %v3753_v58, %v3751_v26  ;;  %7264 = vrcp.f32 %v3667_v23 }
 0x8b9   : > { %v3404_v39 = vpop.f32.mrf.mxu0  ;;  %7266 = vrcp.f32 %v3313_v10 }
 0x8ba   : > { %v6871_v51 = vpack.i.bf16 %v3404_v39, %v3402_v61  ;;  %6862 = vrot.lane.b32.xlu1 %v6861_v35, %s7845_s30 }
 0x8bb   : > { %v6833_v37 = vpop.permute.xlu2 %6832 }
 0x8bc   : > { %6872 = vrot.lane.b32.xlu0 %v6871_v51, %s7844_s11  ;;  %v6835_v57 = vunpack.i.h.bf16 %v6833_v37 }
 0x8be   : > { %v7265_v2 = vpop.eup %7264 }
 0x8bf   : > { %v3311_v4 = vpop.xlane.xlu1 %3310  ;;  %v3756_v5 = vpop.f32.mrf.mxu2  ;;  %v3699_v54 = vmul.f32 %v7265_v2, %v10254_v20 }
 0x8c0   : > { %7268 = vrcp.f32 %v3311_v4  ;;  %v7267_v40 = vpop.eup %7266 }
 0x8c1   : > { %v3707_v29 = vpack.c.bf16 %v3699_v54, %v3698_v25  ;;  %v3345_v9 = vmul.f32 %v7267_v40, %v10189_v31  ;;  %v6834_v31 = vunpack.i.l.bf16 %v6833_v37 }
 0x8c3   : > { %3775 = vmatmul.bf16.gmra.mxu2 %v3707_v29 }
 0x8c6   : > { %v7269_v0 = vpop.eup %7268 }
 0x8c7   : > { %v3758_v62 = vpop.f32.mrf.mxu2  ;;  %v3344_v49 = vmul.f32 %v7269_v0, %v10263_v38  ;;  %v6853_v0 = vpop.permute.xlu2 %6852 }
 0x8c8   : > { %v6876_v34 = vpack.i.bf16 %v3758_v62, %v3756_v5 }
 0x8c9   : > { %v3353_v22 = vpack.c.bf16 %v3345_v9, %v3344_v49 }
 0x8ca   : > { %6877 = vrot.lane.b32.xlu1 %v6876_v34, %s7845_s30  ;;  %v6823_v12 = vpop.permute.xlu0 %6822  ;;  %v6855_v34 = vunpack.i.h.bf16 %v6853_v0 }
 0x8cb   : > { %3421 = vmatmul.bf16.gmra.mxu0 %v3353_v22  ;;  %v6825_v20 = vunpack.i.h.bf16 %v6823_v12  ;;  %v6824_v36 = vunpack.i.l.bf16 %v6823_v12 }
 0x8cd   : > { %v3974_v48 = vsel %vm2396_vm2, %v10117_v30, %v6825_v20  ;;  %v3973_v59 = vsel %vm2396_vm2, %v10109_v50, %v6824_v36  ;;  %v3978_v36 = vsel %vm2396_vm2, %v10172_v16, %v6855_v34 }
 0x8cf   : > { %v3761_v55 = vpop.f32.mrf.mxu2 }
 0x8d1   : > { %v3407_v63 = vpop.f32.mrf.mxu0 }
 0x8d2   : > { %v6838_v50 = vpop.permute.xlu0 %6837 }
 0x8d3   : > { %v6840_v23 = vunpack.i.h.bf16 %v6838_v50  ;;  %v6839_v7 = vunpack.i.l.bf16 %v6838_v50 }
 0x8d5   : > { %v3976_v46 = vsel %vm2396_vm2, %v10146_v32, %v6840_v23  ;;  %v3975_v19 = vsel %vm2396_vm2, %v10132_v45, %v6839_v7  ;;  %v6854_v32 = vunpack.i.l.bf16 %v6853_v0 }
 0x8d7   : > { %v6828_v14 = vpop.permute.xlu1 %6827  ;;  %v3763_v17 = vpop.f32.mrf.mxu2 }
 0x8d8   : > { %v6830_v56 = vunpack.i.h.bf16 %v6828_v14  ;;  %v6829_v52 = vunpack.i.l.bf16 %v6828_v14  ;;  %v6891_v38 = vpack.i.bf16 %v3763_v17, %v3761_v55 }
 0x8d9   : > { %v3409_v27 = vpop.f32.mrf.mxu0 }
 0x8da   : > { %v3990_v47 = vsel %vm3989_vm4, %v3973_v59, %v6829_v52  ;;  %v3991_v24 = vsel %vm3989_vm4, %v3974_v48, %v6830_v56  ;;  %v6886_v6 = vpack.i.bf16 %v3409_v27, %v3407_v63  ;;  %6892 = vrot.lane.b32.xlu1 %v6891_v38, %s7845_s30  ;;  %v3977_v63 = vsel %vm2396_vm2, %v10157_v44, %v6854_v32  ;;  %v6868_v48 = vpop.permute.xlu2 %6867  ;;  %v7336_v32 = vld [vmem:[#allocation2 + $0x30] sm:$0xff] }
 0x8db   : > { %v4007_v11 = vsel %vm4006_vm5, %v3990_v47, %v6834_v31  ;;  %v4008_v53 = vsel %vm4006_vm5, %v3991_v24, %v6835_v57  ;;  %v6870_v59 = vunpack.i.h.bf16 %v6868_v48  ;;  %v6869_v27 = vunpack.i.l.bf16 %v6868_v48 }
 0x8dc   : > { %v4023_v28 = vpack.c.bf16 %v4008_v53, %v4007_v11  ;;  %6887 = vrot.lane.b32.xlu0 %v6886_v6, %s7844_s11 }
 0x8dd   : > { %v6843_v42 = vpop.permute.xlu0 %6842  ;;  %v3980_v11 = vsel %vm2396_vm2, %v10191_v33, %v6870_v59  ;;  %v3979_v53 = vsel %vm2396_vm2, %v10183_v3, %v6869_v27 }
 0x8de   : > { %4103 = vmatmul.bf16.vlgmr.msra.gmra.mxu3 %v4023_v28  ;;  %v6845_v39 = vunpack.i.h.bf16 %v6843_v42  ;;  %v6844_v51 = vunpack.i.l.bf16 %v6843_v42 }
 0x8df   : > { %v3766_v30 = vpop.f32.mrf.mxu2 }
 0x8e0   : > { %v3992_v5 = vsel %vm3989_vm4, %v3975_v19, %v6844_v51  ;;  %v3993_v25 = vsel %vm3989_vm4, %v3976_v46, %v6845_v39 }
 0x8e2   : > { %v6883_v7 = vpop.permute.xlu2 %6882 }
 0x8e3   : > { %v6884_v33 = vunpack.i.l.bf16 %v6883_v7 }
 0x8e7   : > { %v3768_v26 = vpop.f32.mrf.mxu2 }
 0x8e8   : > { %v6906_v61 = vpack.i.bf16 %v3768_v26, %v3766_v30 }
 0x8ea   : > { %6907 = vrot.lane.b32.xlu1 %v6906_v61, %s7845_s30 }
 0x8ed   : > { %v6858_v49 = vpop.permute.xlu0 %6857 }
 0x8ee   : > { %v6859_v22 = vunpack.i.l.bf16 %v6858_v49  ;;  %v6860_v45 = vunpack.i.h.bf16 %v6858_v49 }
 0x8f0   : > { %v3994_v37 = vsel %vm3989_vm4, %v3977_v63, %v6859_v22  ;;  %v3995_v17 = vsel %vm3989_vm4, %v3978_v36, %v6860_v45 }
 0x910   : > { %v3412_v60 = vpop.f32.mrf.mxu0 }
 0x918   : > { %v3414_v58 = vpop.f32.mrf.mxu0 }
 0x919   : > { %v6901_v35 = vpack.i.bf16 %v3414_v58, %v3412_v60 }
 0x91b   : > { %6902 = vrot.lane.b32.xlu0 %v6901_v35, %s7844_s11  ;;  %v6885_v35 = vunpack.i.h.bf16 %v6883_v7 }
 0x91c   : > { %v6848_v10 = vpop.permute.xlu1 %6847 }
 0x91d   : > { %v6850_v2 = vunpack.i.h.bf16 %v6848_v10  ;;  %v6849_v4 = vunpack.i.l.bf16 %v6848_v10 }
 0x91f   : > { %v4009_v54 = vsel %vm4006_vm5, %v3992_v5, %v6849_v4  ;;  %v4010_v29 = vsel %vm4006_vm5, %v3993_v25, %v6850_v2  ;;  %v3982_v2 = vsel %vm2396_vm2, %v10201_v41, %v6885_v35  ;;  %v3981_v4 = vsel %vm2396_vm2, %v10196_v13, %v6884_v33  ;;  %v10372_v13 = vld [vmem:[%s11781_s8] ss:$0 sm:$0xff] }
 0x920   : > { %v4024_v40 = vpack.c.bf16 %v4010_v29, %v4009_v54 }
 0x922   : > { %4108 = vmatmul.bf16.gmra.mxu3 %v4024_v40 }
 0x926   : > { %v3771_v62 = vpop.f32.mrf.mxu2 }
 0x928   : > { %v3417_v9 = vpop.f32.mrf.mxu0 }
 0x92c   : > { %v6863_v55 = vpop.permute.xlu1 %6862 }
 0x92d   : > { %v6865_v12 = vunpack.i.h.bf16 %v6863_v55  ;;  %v6864_v20 = vunpack.i.l.bf16 %v6863_v55  ;;  %v7337_v55 = vld [vmem:[#allocation2] sm:$0xff] }
 0x92e   : > { %v3773_v14 = vpop.f32.mrf.mxu2  ;;  %v6873_v16 = vpop.permute.xlu0 %6872 }
 0x92f   : > { %v6921_v56 = vpack.i.bf16 %v3773_v14, %v3771_v62  ;;  %v4011_v52 = vsel %vm4006_vm5, %v3994_v37, %v6864_v20  ;;  %v4012_v57 = vsel %vm4006_vm5, %v3995_v17, %v6865_v12  ;;  %v6875_v47 = vunpack.i.h.bf16 %v6873_v16  ;;  %v6898_v20 = vpop.permute.xlu2 %6897 }
 0x930   : > { %v3419_v38 = vpop.f32.mrf.mxu0  ;;  %v4025_v44 = vpack.c.bf16 %v4012_v57, %v4011_v52  ;;  %v6874_v24 = vunpack.i.l.bf16 %v6873_v16  ;;  %v6900_v36 = vunpack.i.h.bf16 %v6898_v20  ;;  %v6899_v37 = vunpack.i.l.bf16 %v6898_v20 }
 0x931   : > { %v6916_v31 = vpack.i.bf16 %v3419_v38, %v3417_v9  ;;  %6922 = vrot.lane.b32.xlu1 %v6921_v56, %s7845_s30  ;;  %v3997_v26 = vsel %vm3989_vm4, %v3980_v11, %v6875_v47 }
 0x932   : > { %4113 = vmatmul.bf16.gmra.mxu3 %v4025_v44  ;;  %v3996_v61 = vsel %vm3989_vm4, %v3979_v53, %v6874_v24  ;;  %v3984_v38 = vsel %vm2396_vm2, %v10223_v8, %v6900_v36  ;;  %v3983_v57 = vsel %vm2396_vm2, %v10210_v1, %v6899_v37  ;;  %v7342_v36 = vld [vmem:[#allocation2 + $0x8] sm:$0xff] }
 0x933   : > { %6917 = vrot.lane.b32.xlu0 %v6916_v31, %s7844_s11 }
 0x937   : > { %v6913_v24 = vpop.permute.xlu2 %6912 }
 0x938   : > { %v6914_v11 = vunpack.i.l.bf16 %v6913_v24 }
 0x93c   : > { %v6878_v6 = vpop.permute.xlu1 %6877 }
 0x93d   : > { %v6880_v28 = vunpack.i.h.bf16 %v6878_v6  ;;  %v6879_v30 = vunpack.i.l.bf16 %v6878_v6  ;;  %v6915_v6 = vunpack.i.h.bf16 %v6913_v24 }
 0x93f   : > { %v4013_v50 = vsel %vm4006_vm5, %v3996_v61, %v6879_v30  ;;  %v4014_v60 = vsel %vm4006_vm5, %v3997_v26, %v6880_v28  ;;  %v7338_v26 = vld [vmem:[#allocation2 + $0x58] sm:$0xff] }
 0x940   : > { %v4026_v42 = vpack.c.bf16 %v4014_v60, %v4013_v50  ;;  %v3986_v50 = vsel %vm2396_vm2, %v10243_v18, %v6915_v6  ;;  %v3985_v60 = vsel %vm2396_vm2, %v10235_v21, %v6914_v11  ;;  %v7344_v6 = vld [vmem:[#allocation2 + $0x40] sm:$0xff] }
 0x942   : > { %4118 = vmatmul.bf16.gmra.mxu3 %v4026_v42 }
 0x946   : > { %v3776_v58 = vpop.f32.mrf.mxu2 }
 0x948   : > { %v3422_v23 = vpop.f32.mrf.mxu0 }
 0x94c   : > { %v6893_v39 = vpop.permute.xlu1 %6892 }
 0x94d   : > { %v6895_v5 = vunpack.i.h.bf16 %v6893_v39  ;;  %v6894_v25 = vunpack.i.l.bf16 %v6893_v39 }
 0x94e   : > { %v3778_v51 = vpop.f32.mrf.mxu2  ;;  %v6888_v3 = vpop.permute.xlu0 %6887 }
 0x94f   : > { %v6936_v10 = vpack.i.bf16 %v3778_v51, %v3776_v58  ;;  %v6890_v46 = vunpack.i.h.bf16 %v6888_v3  ;;  %v6889_v19 = vunpack.i.l.bf16 %v6888_v3  ;;  %v7339_v3 = vld [vmem:[#allocation2 + $0x18] sm:$0xff] }
 0x950   : > { %v3424_v54 = vpop.f32.mrf.mxu0 }
 0x951   : > { %v3999_v29 = vsel %vm3989_vm4, %v3982_v2, %v6890_v46  ;;  %v3998_v40 = vsel %vm3989_vm4, %v3981_v4, %v6889_v19  ;;  %v6931_v0 = vpack.i.bf16 %v3424_v54, %v3422_v23  ;;  %6937 = vrot.lane.b32.xlu1 %v6936_v10, %s7845_s30  ;;  %v7340_v19 = vld [vmem:[#allocation2 + $0x50] sm:$0xff]  ;;  %v7341_v54 = vld [vmem:[#allocation2 + $0x68] sm:$0xff] }
 0x952   : > { %v4015_v62 = vsel %vm4006_vm5, %v3998_v40, %v6894_v25  ;;  %v4016_v49 = vsel %vm4006_vm5, %v3999_v29, %v6895_v5  ;;  %v6928_v25 = vpop.permute.xlu2 %6927 }
 0x953   : > { %6932 = vrot.lane.b32.xlu0 %v6931_v0, %s7844_s11  ;;  %v4027_v41 = vpack.c.bf16 %v4016_v49, %v4015_v62  ;;  %v6930_v0 = vunpack.i.h.bf16 %v6928_v25  ;;  %v6929_v62 = vunpack.i.l.bf16 %v6928_v25 }
 0x955   : > { %4123 = vmatmul.bf16.gmra.mxu3 %v4027_v41 }
 0x95c   : > { %v6908_v14 = vpop.permute.xlu1 %6907 }
 0x95d   : > { %v6910_v31 = vunpack.i.h.bf16 %v6908_v14  ;;  %v6909_v44 = vunpack.i.l.bf16 %v6908_v14 }
 0x961   : > { %v4104_v9 = vpop.f32.mrf.mxu3 }
 0x962   : > { %v4144_v34 = vadd.f32 %v7336_v32, %v4104_v9  ;;  %v3988_v9 = vsel %vm2396_vm2, %v10261_v43, %v6930_v0 }
 0x964   : > { %v10375_v22 = vadd.f32 %v10372_v13, %v4144_v34 }
 0x966   : > { %4182 = vadd.xlane.f32.xlu2 %v10375_v22 }
 0x969   : > { %v4106_v45 = vpop.f32.mrf.mxu3 }
 0x96a   : > { %v4145_v63 = vadd.f32 %v7337_v55, %v4106_v45  ;;  %v3987_v55 = vsel %vm2396_vm2, %v10250_v15, %v6929_v62  ;;  %v7347_v62 = vld [vmem:[#allocation2 + $0x38] sm:$0xff] }
 0x96c   : > { %v10379_v12 = vadd.f32 %v10372_v13, %v4145_v63 }
 0x97d   : > { %4184 = vadd.xlane.f32.xlu0 %v10379_v12 }
 0x98d   : > { %v6903_v17 = vpop.permute.xlu0 %6902 }
 0x98e   : > { %v6905_v56 = vunpack.i.h.bf16 %v6903_v17  ;;  %v6904_v52 = vunpack.i.l.bf16 %v6903_v17 }
 0x990   : > { %v4001_v48 = vsel %vm3989_vm4, %v3984_v38, %v6905_v56  ;;  %v4000_v16 = vsel %vm3989_vm4, %v3983_v57, %v6904_v52  ;;  %v11782_v57 = vld [vmem:[#allocation28_spill] sm:$0xff] }
 0x991   : > { %v4017_v59 = vsel %vm4006_vm5, %v4000_v16, %v6909_v44  ;;  %v4018_v27 = vsel %vm4006_vm5, %v4001_v48, %v6910_v31 }
 0x992   : > { %v4028_v47 = vpack.c.bf16 %v4018_v27, %v4017_v59  ;;  %v7343_v59 = vld [vmem:[#allocation2 + $0x48] sm:$0xff] }
 0x994   : > { %4128 = vmatmul.bf16.gmra.mxu3 %v4028_v47 }
 0x9a3   : > { %v6923_v53 = vpop.permute.xlu1 %6922 }
 0x9a4   : > { %v6925_v42 = vunpack.i.h.bf16 %v6923_v53  ;;  %v6924_v58 = vunpack.i.l.bf16 %v6923_v53 }
 0x9a5   : > { %v6918_v8 = vpop.permute.xlu0 %6917  ;;  %v4109_v28 = vpop.f32.mrf.mxu3 }
 0x9a6   : > { %v6920_v30 = vunpack.i.h.bf16 %v6918_v8  ;;  %v6919_v1 = vunpack.i.l.bf16 %v6918_v8  ;;  %v4146_v61 = vadd.f32 %v7338_v26, %v4109_v28 }
 0x9a8   : > { %v4003_v23 = vsel %vm3989_vm4, %v3986_v50, %v6920_v30  ;;  %v4002_v7 = vsel %vm3989_vm4, %v3985_v60, %v6919_v1  ;;  %v10397_v35 = vadd.f32 %v10372_v13, %v4146_v61 }
 0x9a9   : > { %v4019_v33 = vsel %vm4006_vm5, %v4002_v7, %v6924_v58  ;;  %v4020_v39 = vsel %vm4006_vm5, %v4003_v23, %v6925_v42  ;;  %v7345_v23 = vld [vmem:[#allocation2 + $0x20] sm:$0xff] }
 0x9aa   : > { %4186 = vadd.xlane.f32.xlu1 %v10397_v35  ;;  %v4029_v51 = vpack.c.bf16 %v4020_v39, %v4019_v33 }
 0x9ac   : > { %4133 = vmatmul.bf16.gmra.mxu3 %v4029_v51 }
 0x9ad   : > { %v4111_v18 = vpop.f32.mrf.mxu3 }
 0x9ae   : > { %v4147_v21 = vadd.f32 %v7339_v3, %v4111_v18 }
 0x9b0   : > { %v10403_v10 = vadd.f32 %v10372_v13, %v4147_v21  ;;  %v7346_v21 = vld [vmem:[#allocation2 + $0x10] sm:$0xff] }
 0x9b2   : > { %4188 = vadd.xlane.f32.xlu2 %v10403_v10 }
 0x9b5   : > { %v4114_v46 = vpop.f32.mrf.mxu3 }
 0x9b6   : > { %v4148_v2 = vadd.f32 %v7340_v19, %v4114_v46 }
 0x9b8   : > { %v10407_v4 = vadd.f32 %v10372_v13, %v4148_v2 }
 0x9ba   : > { %4190 = vadd.xlane.f32.xlu0 %v10407_v4 }
 0x9bd   : > { %v4116_v5 = vpop.f32.mrf.mxu3 }
 0x9be   : > { %v4149_v29 = vadd.f32 %v7341_v54, %v4116_v5 }
 0x9c0   : > { %v10411_v40 = vadd.f32 %v10372_v13, %v4149_v29 }
 0x9c2   : > { %4192 = vadd.xlane.f32.xlu1 %v10411_v40 }
 0x9c3   : > { %v6938_v49 = vpop.permute.xlu1 %6937 }
 0x9c4   : > { %v6940_v63 = vunpack.i.h.bf16 %v6938_v49  ;;  %v6939_v20 = vunpack.i.l.bf16 %v6938_v49 }
 0x9c5   : > { %v6933_v41 = vpop.permute.xlu0 %6932  ;;  %v4119_v45 = vpop.f32.mrf.mxu3 }
 0x9c6   : > { %v6935_v32 = vunpack.i.h.bf16 %v6933_v41  ;;  %v6934_v34 = vunpack.i.l.bf16 %v6933_v41  ;;  %v4150_v37 = vadd.f32 %v7342_v36, %v4119_v45 }
 0x9c8   : > { %v4005_v14 = vsel %vm3989_vm4, %v3988_v9, %v6935_v32  ;;  %v4004_v17 = vsel %vm3989_vm4, %v3987_v55, %v6934_v34  ;;  %v10421_v56 = vadd.f32 %v10372_v13, %v4150_v37 }
 0x9c9   : > { %v4021_v52 = vsel %vm4006_vm5, %v4004_v17, %v6939_v20  ;;  %v4022_v43 = vsel %vm4006_vm5, %v4005_v14, %v6940_v63  ;;  %v7348_v63 = vld [vmem:[#allocation2 + $0x60] sm:$0xff] }
 0x9ca   : > { %v4030_v38 = vpack.c.bf16 %v4022_v43, %v4021_v52  ;;  %4194 = vadd.xlane.f32.xlu1 %v10421_v56  ;;  %v7349_v43 = vld [vmem:[#allocation2 + $0x70] sm:$0xff] }
 0x9cc   : > { %4138 = vmatmul.bf16.gmra.mxu3 %v4030_v38 }
 0x9cd   : > { %v4121_v16 = vpop.f32.mrf.mxu3 }
 0x9ce   : > { %v4151_v27 = vadd.f32 %v7343_v59, %v4121_v16 }
 0x9d0   : > { %v10433_v47 = vadd.f32 %v10372_v13, %v4151_v27 }
 0x9d8   : > { %v4124_v24 = vpop.f32.mrf.mxu3 }
 0x9d9   : > { %v4183_v15 = vpop.xlane.xlu2 %4182  ;;  %v4152_v11 = vadd.f32 %v7344_v6, %v4124_v24 }
 0x9da   : > { %v4214_v31 = vmul.f32 %v4183_v15, %v11782_v57 }
 0x9db   : > { %v10437_v53 = vadd.f32 %v10372_v13, %v4152_v11 }
 0x9dc   : > { %v10428_v44 = vsub.f32 %v10375_v22, %v4214_v31 }
 0x9de   : > { %v4246_v48 = vmul.f32 %v10428_v44, %v10428_v44 }
 0x9e0   : > { %4262 = vadd.xlane.f32.xlu2 %v4246_v48  ;;  %v4126_v50 = vpop.f32.mrf.mxu3  ;;  %v7350_v48 = vld [vmem:[#allocation2 + $0x78] sm:$0xff] }
 0x9e1   : > { %v4153_v7 = vadd.f32 %v7345_v23, %v4126_v50 }
 0x9e3   : > { %v10457_v18 = vadd.f32 %v10372_v13, %v4153_v7  ;;  %v6628_v7 = vld [vmem:[%s8218_s14 + $0x74] sm:$0xf] }
 0x9e8   : > { %4196 = vadd.xlane.f32.xlu2 %v10433_v47 }
 0x9f0   : > { %v4185_v8 = vpop.xlane.xlu0 %4184  ;;  %4198 = vadd.xlane.f32.xlu2 %v10437_v53 }
 0x9f1   : > { %v4215_v28 = vmul.f32 %v4185_v8, %v11782_v57 }
 0x9f3   : > { %v10442_v30 = vsub.f32 %v10379_v12, %v4215_v28 }
 0x9f5   : > { %v4247_v1 = vmul.f32 %v10442_v30, %v10442_v30 }
 0x9f7   : > { %4264 = vadd.xlane.f32.xlu0 %v4247_v1 }
 0xa17   : > { %v4129_v39 = vpop.f32.mrf.mxu3 }
 0xa18   : > { %v4154_v46 = vadd.f32 %v7346_v21, %v4129_v39 }
 0xa1a   : > { %v10467_v25 = vadd.f32 %v10372_v13, %v4154_v46 }
 0xa1d   : > { %v4187_v26 = vpop.xlane.xlu1 %4186 }
 0xa1e   : > { %v4216_v61 = vmul.f32 %v4187_v26, %v11782_v57 }
 0xa1f   : > { %v4131_v54 = vpop.f32.mrf.mxu3 }
 0xa20   : > { %v10448_v60 = vsub.f32 %v10397_v35, %v4216_v61  ;;  %v4155_v49 = vadd.f32 %v7347_v62, %v4131_v54  ;;  %v6627_v54 = vld [vmem:[%s8218_s14 + $0x64] sm:$0xf0] }
 0xa22   : > { %v4248_v42 = vmul.f32 %v10448_v60, %v10448_v60  ;;  %v10477_v34 = vadd.f32 %v10372_v13, %v4155_v49  ;;  %v6497_v49 = vld [vmem:[%s8218_s14 + $0x68] sm:$0xf0] }
 0xa24   : > { %4266 = vadd.xlane.f32.xlu0 %v4248_v42  ;;  %v6503_v42 = vld [vmem:[%s8218_s14 + $0x70] sm:$0xf] }
 0xa25   : > { %v4189_v58 = vpop.xlane.xlu2 %4188 }
 0xa26   : > { %v4217_v33 = vmul.f32 %v4189_v58, %v11782_v57  ;;  %v6629_v58 = vld [vmem:[%s8218_s14 + $0x74] sm:$0xf0] }
 0xa27   : > { %v6504_v23 = vor.u32 %v6629_v58, %v6503_v42  ;;  %v6471_v42 = vld [vmem:[%s8218_s14 + $0x30] sm:$0xf]  ;;  %v6621_v58 = vld [vmem:[%s8218_s14 + $0x34] sm:$0xf0] }
 0xa28   : > { %v10454_v51 = vsub.f32 %v10403_v10, %v4217_v33  ;;  %v6505_v33 = vld [vmem:[%s8218_s14 + $0x78] sm:$0xf0] }
 0xa29   : > { %v6508_v21 = vor.u32 %v6628_v7, %v6505_v33  ;;  %4906 = vmatpush.bf16.msrb.mxu0 %v6504_v23  ;;  %v6620_v23 = vld [vmem:[%s8218_s14 + $0x34] sm:$0xf]  ;;  %v6473_v7 = vld [vmem:[%s8218_s14 + $0x38] sm:$0xf0] }
 0xa2a   : > { %v4249_v3 = vmul.f32 %v10454_v51, %v10454_v51 }
 0xa2b   : > { %4955 = vmatpush.bf16.msrb.mxu1 %v6508_v21  ;;  %v6476_v21 = vor.u32 %v6620_v23, %v6473_v7 }
 0xa2c   : > { %4268 = vadd.xlane.f32.xlu1 %v4249_v3  ;;  %4200 = vadd.xlane.f32.xlu0 %v10457_v18 }
 0xa2d   : > { %v4191_v19 = vpop.xlane.xlu0 %4190 }
 0xa2e   : > { %v4218_v2 = vmul.f32 %v4191_v19, %v11782_v57 }
 0xa2f   : > { %v4134_v32 = vpop.f32.mrf.mxu3 }
 0xa30   : > { %v10464_v5 = vsub.f32 %v10407_v4, %v4218_v2  ;;  %v4156_v20 = vadd.f32 %v7348_v63, %v4134_v32  ;;  %v6495_v2 = vld [vmem:[%s8218_s14 + $0x60] sm:$0xf]  ;;  %v6625_v32 = vld [vmem:[%s8218_s14 + $0x54] sm:$0xf0]  ;;  %v6489_v63 = vld [vmem:[%s8218_s14 + $0x58] sm:$0xf0] }
 0xa31   : > { %v6496_v62 = vor.u32 %v6627_v54, %v6495_v2  ;;  %v6465_v54 = vld [vmem:[%s8218_s14 + $0x28] sm:$0xf0] }
 0xa32   : > { %v4250_v29 = vmul.f32 %v10464_v5, %v10464_v5  ;;  %v10487_v14 = vadd.f32 %v10372_v13, %v4156_v20 }
 0xa33   : > { %4907 = vmatpush.bf16.msrb.mxu0 %v6496_v62 }
 0xa34   : > { %4202 = vadd.xlane.f32.xlu0 %v10467_v25  ;;  %4270 = vadd.xlane.f32.xlu1 %v4250_v29  ;;  %v6626_v29 = vld [vmem:[%s8218_s14 + $0x64] sm:$0xf] }
 0xa35   : > { %v4193_v0 = vpop.xlane.xlu1 %4192 }
 0xa36   : > { %v4219_v41 = vmul.f32 %v4193_v0, %v11782_v57 }
 0xa37   : > { %v4136_v52 = vpop.f32.mrf.mxu3 }
 0xa38   : > { %v10474_v9 = vsub.f32 %v10411_v40, %v4219_v41  ;;  %v4157_v38 = vadd.f32 %v7349_v43, %v4136_v52  ;;  %v6487_v41 = vld [vmem:[%s8218_s14 + $0x50] sm:$0xf] }
 0xa3a   : > { %v4251_v45 = vmul.f32 %v10474_v9, %v10474_v9  ;;  %v10493_v15 = vadd.f32 %v10372_v13, %v4157_v38  ;;  %v6479_v38 = vld [vmem:[%s8218_s14 + $0x40] sm:$0xf] }
 0xa3c   : > { %4272 = vadd.xlane.f32.xlu2 %v4251_v45  ;;  %4204 = vadd.xlane.f32.xlu1 %v10477_v34  ;;  %v6500_v45 = vor.u32 %v6626_v29, %v6497_v49 }
 0xa3d   : > { %v4195_v55 = vpop.xlane.xlu1 %4194 }
 0xa3e   : > { %v4220_v36 = vmul.f32 %v4195_v55, %v11782_v57  ;;  %v6624_v55 = vld [vmem:[%s8218_s14 + $0x54] sm:$0xf]  ;;  %4956 = vmatpush.bf16.msrb.mxu1 %v6500_v45 }
 0xa3f   : > { %v6492_v43 = vor.u32 %v6624_v55, %v6489_v63  ;;  %v6616_v45 = vld [vmem:[%s8218_s14 + $0x14] sm:$0xf]  ;;  %v6457_v55 = vld [vmem:[%s8218_s14 + $0x18] sm:$0xf0] }
 0xa40   : > { %v10484_v37 = vsub.f32 %v10421_v56, %v4220_v36 }
 0xa42   : > { %v4252_v17 = vmul.f32 %v10484_v37, %v10484_v37  ;;  %4957 = vmatpush.bf16.msrb.mxu1 %v6492_v43 }
 0xa44   : > { %4274 = vadd.xlane.f32.xlu2 %v4252_v17  ;;  %4206 = vadd.xlane.f32.xlu1 %v10487_v14  ;;  %v6488_v17 = vor.u32 %v6625_v32, %v6487_v41  ;;  %v6455_v41 = vld [vmem:[%s8218_s14 + $0x10] sm:$0xf]  ;;  %v6617_v32 = vld [vmem:[%s8218_s14 + $0x14] sm:$0xf0] }
 0xa46   : > { %4908 = vmatpush.bf16.msrb.mxu0 %v6488_v17  ;;  %v6460_v17 = vor.u32 %v6616_v45, %v6457_v55 }
 0xa4c   : > { %4208 = vadd.xlane.f32.xlu2 %v10493_v15 }
 0xa4f   : > { %v4139_v31 = vpop.f32.mrf.mxu3 }
 0xa50   : > { %v4158_v16 = vadd.f32 %v7350_v48, %v4139_v31  ;;  %v6623_v31 = vld [vmem:[%s8218_s14 + $0x44] sm:$0xf0] }
 0xa52   : > { %v10497_v59 = vadd.f32 %v10372_v13, %v4158_v16  ;;  %v6622_v16 = vld [vmem:[%s8218_s14 + $0x44] sm:$0xf] }
 0xa53   : > { %v4263_v27 = vpop.xlane.xlu2 %4262 }
 0xa54   : > { %v10499_v24 = vmul.f32 0.007874016, %v4263_v27  ;;  %4210 = vadd.xlane.f32.xlu2 %v10497_v59  ;;  %v6481_v27 = vld [vmem:[%s8218_s14 + $0x48] sm:$0xf0] }
 0xa56   : > { %7270 = vrsqrt.f32 %v10499_v24  ;;  %vm4336_vm2 = vcmp.eq.f32.partialorder %v10499_v24, inf  ;;  %vm4338_vm6 = vcmp.eq.f32.partialorder %v10499_v24, 0.0 }
 0xa57   : > { %v4141_v52 = vpop.f32.mrf.mxu3 }
 0xa5b   : > { %v4197_v6 = vpop.xlane.xlu2 %4196 }
 0xa5c   : > { %v7271_v11 = vpop.eup %7270  ;;  %v4221_v8 = vmul.f32 %v4197_v6, %v11782_v57 }
 0xa5d   : > { %v4330_v28 = vmul.f32 %v7271_v11, %v10499_v24 }
 0xa5e   : > { %v10506_v1 = vsub.f32 %v10433_v47, %v4221_v8  ;;  %v7351_v8 = vld [vmem:[#allocation2 + $0x28] sm:$0xff] }
 0xa5f   : > { %v4331_v26 = vmul.f32 %v7271_v11, %v4330_v28  ;;  %v4159_v28 = vadd.f32 %v7351_v8, %v4141_v52 }
 0xa60   : > { %v4253_v61 = vmul.f32 %v10506_v1, %v10506_v1 }
 0xa61   : > { %v4332_v50 = vmul.f32 0.5, %v4331_v26  ;;  %v6480_v26 = vor.u32 %v6623_v31, %v6479_v38  ;;  %v6447_v31 = vld [vmem:[%s8218_s14] sm:$0xf] }
 0xa62   : > { %4276 = vadd.xlane.f32.xlu0 %v4253_v61  ;;  %v4339_v61 = vand.u32 2147483648, %v10499_v24 }
 0xa63   : > { %v4333_v39 = vsub.f32 1.5, %v4332_v50  ;;  %v4199_v3 = vpop.xlane.xlu2 %4198  ;;  %v6484_v50 = vor.u32 %v6622_v16, %v6481_v27  ;;  %4909 = vmatpush.bf16.msrb.mxu0 %v6480_v26  ;;  %v6614_v16 = vld [vmem:[%s8218_s14 + $0x4] sm:$0xf] }
 0xa64   : > { %v4222_v46 = vmul.f32 %v4199_v3, %v11782_v57  ;;  %v6472_v3 = vor.u32 %v6621_v58, %v6471_v42 }
 0xa65   : > { %v4334_v19 = vmul.f32 %v7271_v11, %v4333_v39  ;;  %v10545_v39 = vadd.f32 %v10372_v13, %v4159_v28  ;;  %4958 = vmatpush.bf16.msrb.mxu1 %v6484_v50 }
 0xa66   : > { %v10519_v0 = vsub.f32 %v10437_v53, %v4222_v46  ;;  %v6463_v46 = vld [vmem:[%s8218_s14 + $0x20] sm:$0xf] }
 0xa67   : > { %v4335_v20 = vmul.f32 %v4334_v19, %v10499_v24  ;;  %v6619_v19 = vld [vmem:[%s8218_s14 + $0x24] sm:$0xf0]  ;;  %4910 = vmatpush.bf16.msrb.mxu0 %v6472_v3 }
 0xa68   : > { %v4254_v36 = vmul.f32 %v10519_v0, %v10519_v0  ;;  %v6464_v62 = vor.u32 %v6619_v19, %v6463_v46 }
 0xa69   : > { %v4337_v11 = vsel %vm4336_vm2, %v10499_v24, %v4335_v20  ;;  %v6618_v24 = vld [vmem:[%s8218_s14 + $0x24] sm:$0xf]  ;;  %4959 = vmatpush.bf16.msrb.mxu1 %v6476_v21  ;;  %v6456_v20 = vor.u32 %v6617_v32, %v6455_v41 }
 0xa6a   : > { %v4265_v48 = vpop.xlane.xlu0 %4264  ;;  %4278 = vadd.xlane.f32.xlu0 %v4254_v36  ;;  %v4340_v33 = vsel %vm4338_vm6, %v4339_v61, %v4337_v11  ;;  %v6468_v49 = vor.u32 %v6618_v24, %v6465_v54  ;;  %v6449_v11 = vld [vmem:[%s8218_s14 + $0x8] sm:$0xf0]  ;;  %v10568_v54 = vld [vmem:[%s850_s3] ss:$0 sm:$0xff] }
 0xa6b   : > { %v10534_v6 = vmul.f32 0.007874016, %v4265_v48  ;;  %v4521_v2 = vadd.f32 1e-06, %v4340_v33  ;;  %4911 = vmatpush.bf16.msrb.mxu0 %v6464_v62  ;;  %v6615_v48 = vld [vmem:[%s8218_s14 + $0x4] sm:$0xf0]  ;;  %v6452_v28 = vor.u32 %v6614_v16, %v6449_v11  ;;  %v4313_v45 = vmul.f32 %v10568_v54, %v10428_v44 }
 0xa6c   : > { %v6448_v27 = vor.u32 %v6615_v48, %v6447_v31  ;;  %v4314_v55 = vmul.f32 %v10568_v54, %v10442_v30 }
 0xa6d   : > { %7272 = vrsqrt.f32 %v10534_v6  ;;  %4960 = vmatpush.bf16.msrb.mxu1 %v6468_v49  ;;  %vm4348_vm7 = vcmp.eq.f32.partialorder %v10534_v6, inf  ;;  %v4351_v61 = vand.u32 2147483648, %v10534_v6  ;;  %vm4350_vm8 = vcmp.eq.f32.partialorder %v10534_v6, 0.0 }
 0xa6e   : > { %7274 = vrcp.f32 %v4521_v2  ;;  %v4548_v21 = vand.u32 2147483648, %v4521_v2  ;;  %vm4542_vm10 = vweird.f32 %v4521_v2  ;;  %v4546_v19 = vand.u32 2147483647, %v4521_v2 }
 0xa6f   : > { %4912 = vmatpush.bf16.msrb.mxu0 %v6456_v20 }
 0xa70   : > { %v4549_v62 = vor.u32 1.1754944e-38, %v4548_v21  ;;  %vm4547_vm13 = vcmp.eq.f32.partialorder %v4546_v19, 8.507059e+37 }
 0xa71   : > { %4961 = vmatpush.bf16.msrb.mxu1 %v6460_v17  ;;  %v10576_v17 = vld [vmem:[%s859_s27] ss:$0 sm:$0xff] }
 0xa72   : > { %4212 = vadd.xlane.f32.xlu0 %v10545_v39 }
 0xa73   : > { %v7273_v29 = vpop.eup %7272  ;;  %4913 = vmatpush.bf16.msrb.mxu0 %v6448_v27 }
 0xa74   : > { %v4342_v13 = vmul.f32 %v7273_v29, %v10534_v6  ;;  %v7275_v43 = vpop.eup %7274 }
 0xa75   : > { %v4538_v26 = vmul.f32 %v7275_v43, %v4521_v2  ;;  %4962 = vmatpush.bf16.msrb.mxu1 %v6452_v28  ;;  %vm4543_vm9 = vweird.f32 %v7275_v43 }
 0xa76   : > { %v4343_v63 = vmul.f32 %v7273_v29, %v4342_v13  ;;  %vm4544_vm11 = vmor %vm4542_vm10, %vm4543_vm9 }
 0xa77   : > { %v4539_v23 = vsub.f32 1.0, %v4538_v26 }
 0xa78   : > { %v4344_v36 = vmul.f32 0.5, %v4343_v63 }
 0xa79   : > { %v4540_v7 = vmul.f32 %v7275_v43, %v4539_v23 }
 0xa7a   : > { %v4345_v52 = vsub.f32 1.5, %v4344_v36 }
 0xa7b   : > { %v4541_v3 = vadd.f32 %v7275_v43, %v4540_v7 }
 0xa7c   : > { %v4346_v38 = vmul.f32 %v7273_v29, %v4345_v52 }
 0xa7e   : > { %v4347_v8 = vmul.f32 %v4346_v38, %v10534_v6 }
 0xa80   : > { %v4349_v50 = vsel %vm4348_vm7, %v10534_v6, %v4347_v8  ;;  %v4545_v6 = vsel %vm4544_vm11, %v7275_v43, %v4541_v3 }
 0xa81   : > { %v4352_v42 = vsel %vm4350_vm8, %v4351_v61, %v4349_v50  ;;  %v4550_v41 = vsel %vm4547_vm13, %v4549_v62, %v4545_v6 }
 0xa82   : > { %v4522_v58 = vadd.f32 1e-06, %v4352_v42  ;;  %v4551_v20 = vmul.f32 %v4550_v41, %v4313_v45 }
 0xa84   : > { %7276 = vrcp.f32 %v4522_v58  ;;  %v4563_v29 = vand.u32 2147483648, %v4522_v58  ;;  %v4561_v49 = vand.u32 2147483647, %v4522_v58  ;;  %vm4557_vm14 = vweird.f32 %v4522_v58 }
 0xa85   : > { %v4780_v48 = vadd.f32 %v10576_v17, %v4551_v20 }
 0xa86   : > { %v4564_v2 = vor.u32 1.1754944e-38, %v4563_v29  ;;  %vm4562_vm1 = vcmp.eq.f32.partialorder %v4561_v49, 8.507059e+37 }
 0xa8a   : > { %v7277_v33 = vpop.eup %7276 }
 0xa8b   : > { %v4553_v46 = vmul.f32 %v7277_v33, %v4522_v58  ;;  %vm4558_vm12 = vweird.f32 %v7277_v33 }
 0xa8c   : > { %vm4559_vm15 = vmor %vm4557_vm14, %vm4558_vm12 }
 0xa8d   : > { %v4554_v24 = vsub.f32 1.0, %v4553_v46 }
 0xa8f   : > { %v4555_v13 = vmul.f32 %v7277_v33, %v4554_v24 }
 0xa91   : > { %v4556_v32 = vadd.f32 %v7277_v33, %v4555_v13 }
 0xa93   : > { %v4560_v63 = vsel %vm4559_vm15, %v7277_v33, %v4556_v32 }
 0xa94   : > { %v4565_v36 = vsel %vm4562_vm1, %v4564_v2, %v4560_v63 }
 0xa95   : > { %v4566_v52 = vmul.f32 %v4565_v36, %v4314_v55 }
 0xa97   : > { %v4267_v43 = vpop.xlane.xlu0 %4266  ;;  %v4781_v31 = vadd.f32 %v10576_v17, %v4566_v52 }
 0xa98   : > { %v4296_v38 = vmul.f32 0.007874016, %v4267_v43 }
 0xa99   : > { %v4796_v44 = vpack.c.bf16 %v4781_v31, %v4780_v48 }
 0xa9a   : > { %7278 = vrsqrt.f32 %v4296_v38  ;;  %vm4360_vm0 = vcmp.eq.f32.partialorder %v4296_v38, inf  ;;  %v4363_v62 = vand.u32 2147483648, %v4296_v38  ;;  %vm4362_vm3 = vcmp.eq.f32.partialorder %v4296_v38, 0.0 }
 0xa9b   : > { %4914 = vmatmul.bf16.vlgmr.msrb.gmra.mxu0 %v4796_v44  ;;  %4963 = vmatmul.bf16.vlgmr.msrb.gmra.mxu1 %v4796_v44 }
 0xa9f   : > { %v4269_v16 = vpop.xlane.xlu1 %4268  ;;  %v4201_v30 = vpop.xlane.xlu0 %4200 }
 0xaa0   : > { %v7279_v27 = vpop.eup %7278  ;;  %v4297_v11 = vmul.f32 0.007874016, %v4269_v16  ;;  %v4223_v8 = vmul.f32 %v4201_v30, %v11782_v57 }
 0xaa1   : > { %v4354_v28 = vmul.f32 %v7279_v27, %v4296_v38 }
 0xaa2   : > { %7280 = vrsqrt.f32 %v4297_v11  ;;  %v10582_v61 = vsub.f32 %v10457_v18, %v4223_v8  ;;  %vm4372_vm4 = vcmp.eq.f32.partialorder %v4297_v11, inf  ;;  %vm4374_vm5 = vcmp.eq.f32.partialorder %v4297_v11, 0.0 }
 0xaa3   : > { %v4355_v26 = vmul.f32 %v7279_v27, %v4354_v28 }
 0xaa4   : > { %v4255_v42 = vmul.f32 %v10582_v61, %v10582_v61 }
 0xaa5   : > { %v4356_v50 = vmul.f32 0.5, %v4355_v26 }
 0xaa6   : > { %4280 = vadd.xlane.f32.xlu1 %v4255_v42 }
 0xaa7   : > { %v4357_v58 = vsub.f32 1.5, %v4356_v50  ;;  %v4203_v23 = vpop.xlane.xlu0 %4202  ;;  %v4271_v33 = vpop.xlane.xlu1 %4270 }
 0xaa8   : > { %v7281_v7 = vpop.eup %7280  ;;  %v4224_v3 = vmul.f32 %v4203_v23, %v11782_v57  ;;  %v10587_v19 = vmul.f32 0.007874016, %v4271_v33 }
 0xaa9   : > { %v4358_v21 = vmul.f32 %v7279_v27, %v4357_v58  ;;  %v4366_v46 = vmul.f32 %v7281_v7, %v4297_v11 }
 0xaaa   : > { %v10590_v24 = vsub.f32 %v10467_v25, %v4224_v3  ;;  %7282 = vrsqrt.f32 %v10587_v19  ;;  %vm4384_vm2 = vcmp.eq.f32.partialorder %v10587_v19, inf  ;;  %vm4386_vm6 = vcmp.eq.f32.partialorder %v10587_v19, 0.0 }
 0xaab   : > { %v4359_v6 = vmul.f32 %v4358_v21, %v4296_v38  ;;  %v4367_v29 = vmul.f32 %v7281_v7, %v4366_v46 }
 0xaac   : > { %v4256_v13 = vmul.f32 %v10590_v24, %v10590_v24 }
 0xaad   : > { %v4361_v49 = vsel %vm4360_vm0, %v4296_v38, %v4359_v6  ;;  %v4368_v41 = vmul.f32 0.5, %v4367_v29  ;;  %v4375_v38 = vand.u32 2147483648, %v4297_v11 }
 0xaae   : > { %v4364_v32 = vsel %vm4362_vm3, %v4363_v62, %v4361_v49  ;;  %4282 = vadd.xlane.f32.xlu1 %v4256_v13 }
 0xaaf   : > { %v4369_v45 = vsub.f32 1.5, %v4368_v41  ;;  %v10595_v2 = vadd.f32 1e-06, %v4364_v32  ;;  %v4273_v55 = vpop.xlane.xlu2 %4272  ;;  %v4205_v63 = vpop.xlane.xlu1 %4204  ;;  %v4387_v41 = vand.u32 2147483648, %v10587_v19 }
 0xab0   : > { %v7283_v20 = vpop.eup %7282  ;;  %v10597_v52 = vmul.f32 0.007874016, %v4273_v55  ;;  %v4225_v43 = vmul.f32 %v4205_v63, %v11782_v57 }
 0xab1   : > { %v4370_v36 = vmul.f32 %v7281_v7, %v4369_v45  ;;  %7284 = vrcp.f32 %v10595_v2  ;;  %v4378_v31 = vmul.f32 %v7283_v20, %v10587_v19  ;;  %v4576_v32 = vand.u32 2147483647, %v10595_v2 }
 0xab2   : > { %7286 = vrsqrt.f32 %v10597_v52  ;;  %v10604_v16 = vsub.f32 %v10477_v34, %v4225_v43  ;;  %v4578_v45 = vand.u32 2147483648, %v10595_v2  ;;  %v4315_v43 = vmul.f32 %v10568_v54, %v10448_v60 }
 0xab3   : > { %v4371_v48 = vmul.f32 %v4370_v36, %v4297_v11  ;;  %v4379_v44 = vmul.f32 %v7283_v20, %v4378_v31  ;;  %vm4572_vm8 = vweird.f32 %v10595_v2  ;;  %vm4396_vm9 = vcmp.eq.f32.partialorder %v10597_v52, inf }
 0xab4   : > { %v4257_v8 = vmul.f32 %v10604_v16, %v10604_v16  ;;  %vm10641_vm11 = vcmp.eq.f32.partialorder %v4576_v32, 8.507059e+37  ;;  %vm4398_vm13 = vcmp.eq.f32.partialorder %v10597_v52, 0.0 }
 0xab5   : > { %v4373_v30 = vsel %vm4372_vm4, %v4297_v11, %v4371_v48  ;;  %v4380_v27 = vmul.f32 0.5, %v4379_v44 }
 0xab6   : > { %v4376_v28 = vsel %vm4374_vm5, %v4375_v38, %v4373_v30  ;;  %4284 = vadd.xlane.f32.xlu2 %v4257_v8 }
 0xab7   : > { %v7285_v26 = vpop.eup %7284  ;;  %v10608_v50 = vadd.f32 1e-06, %v4376_v28  ;;  %v4381_v42 = vsub.f32 1.5, %v4380_v27  ;;  %v4275_v58 = vpop.xlane.xlu2 %4274 }
 0xab8   : > { %v4207_v23 = vpop.xlane.xlu1 %4206  ;;  %v4568_v7 = vmul.f32 %v7285_v26, %v10595_v2  ;;  %v7287_v33 = vpop.eup %7286  ;;  %v10611_v3 = vmul.f32 0.007874016, %v4275_v58  ;;  %vm4573_vm7 = vweird.f32 %v7285_v26 }
 0xab9   : > { %v4226_v21 = vmul.f32 %v4207_v23, %v11782_v57  ;;  %7288 = vrcp.f32 %v10608_v50  ;;  %v4382_v11 = vmul.f32 %v7283_v20, %v4381_v42  ;;  %v4390_v46 = vmul.f32 %v7287_v33, %v10597_v52  ;;  %vm10637_vm10 = vmor %vm4572_vm8, %vm4573_vm7 }
 0xaba   : > { %v4569_v6 = vsub.f32 1.0, %v4568_v7  ;;  %7290 = vrsqrt.f32 %v10611_v3  ;;  %v4579_v42 = vor.u32 1.1754944e-38, %v4578_v45  ;;  %vm4587_vm14 = vweird.f32 %v10608_v50 }
 0xabb   : > { %v4383_v29 = vmul.f32 %v4382_v11, %v10587_v19  ;;  %v4391_v62 = vmul.f32 %v7287_v33, %v4390_v46  ;;  %v10620_v13 = vsub.f32 %v10487_v14, %v4226_v21  ;;  %v4591_v11 = vand.u32 2147483647, %v10608_v50 }
 0xabc   : > { %v4570_v49 = vmul.f32 %v7285_v26, %v4569_v6  ;;  %v4593_v46 = vand.u32 2147483648, %v10608_v50  ;;  %vm4408_vm4 = vcmp.eq.f32.partialorder %v10611_v3, inf }
 0xabd   : > { %v4385_v55 = vsel %vm4384_vm2, %v10587_v19, %v4383_v29  ;;  %v4392_v63 = vmul.f32 0.5, %v4391_v62  ;;  %v4258_v20 = vmul.f32 %v10620_v13, %v10620_v13  ;;  %vm4592_vm1 = vcmp.eq.f32.partialorder %v4591_v11, 8.507059e+37 }
 0xabe   : > { %v4571_v31 = vadd.f32 %v7285_v26, %v4570_v49  ;;  %v4388_v48 = vsel %vm4386_vm6, %v4387_v41, %v4385_v55  ;;  %v4316_v55 = vmul.f32 %v10568_v54, %v10454_v51  ;;  %vm4410_vm2 = vcmp.eq.f32.partialorder %v10611_v3, 0.0 }
 0xabf   : > { %v7289_v36 = vpop.eup %7288  ;;  %v4393_v38 = vsub.f32 1.5, %v4392_v63  ;;  %4286 = vadd.xlane.f32.xlu0 %v4258_v20  ;;  %v4209_v44 = vpop.xlane.xlu2 %4208  ;;  %v10633_v27 = vadd.f32 1e-06, %v4388_v48  ;;  %v4594_v63 = vor.u32 1.1754944e-38, %v4593_v46 }
 0xac0   : > { %v4583_v30 = vmul.f32 %v7289_v36, %v10608_v50  ;;  %v7291_v19 = vpop.eup %7290  ;;  %v4227_v8 = vmul.f32 %v4209_v44, %v11782_v57  ;;  %v4575_v23 = vsel %vm10637_vm10, %v7285_v26, %v4571_v31  ;;  %vm4588_vm12 = vweird.f32 %v7289_v36 }
 0xac1   : > { %v4394_v58 = vmul.f32 %v7287_v33, %v4393_v38  ;;  %v4402_v2 = vmul.f32 %v7291_v19, %v10611_v3  ;;  %7292 = vrcp.f32 %v10633_v27  ;;  %v4399_v33 = vand.u32 2147483648, %v10597_v52  ;;  %vm4589_vm15 = vmor %vm4587_vm14, %vm4588_vm12 }
 0xac2   : > { %v4584_v7 = vsub.f32 1.0, %v4583_v30  ;;  %v10649_v21 = vsub.f32 %v10493_v15, %v4227_v8  ;;  %v4580_v49 = vsel %vm10641_vm11, %v4579_v42, %v4575_v23  ;;  %vm4602_vm3 = vweird.f32 %v10633_v27 }
 0xac3   : > { %v4395_v6 = vmul.f32 %v4394_v58, %v10597_v52  ;;  %v4403_v29 = vmul.f32 %v7291_v19, %v4402_v2  ;;  %v4581_v48 = vmul.f32 %v4580_v49, %v4315_v43 }
 0xac4   : > { %v4585_v62 = vmul.f32 %v7289_v36, %v4584_v7  ;;  %v4259_v26 = vmul.f32 %v10649_v21, %v10649_v21 }
 0xac5   : > { %v4397_v41 = vsel %vm4396_vm9, %v10597_v52, %v4395_v6  ;;  %v4404_v32 = vmul.f32 0.5, %v4403_v29  ;;  %v4782_v51 = vadd.f32 %v10576_v17, %v4581_v48  ;;  %v4608_v29 = vand.u32 2147483648, %v10633_v27 }
 0xac6   : > { %v4586_v45 = vadd.f32 %v7289_v36, %v4585_v62  ;;  %4288 = vadd.xlane.f32.xlu1 %v4259_v26  ;;  %v4400_v20 = vsel %vm4398_vm13, %v4399_v33, %v4397_v41  ;;  %v4411_v41 = vand.u32 2147483648, %v10611_v3 }
 0xac7   : > { %v4211_v31 = vpop.xlane.xlu2 %4210  ;;  %v4526_v44 = vadd.f32 1e-06, %v4400_v20  ;;  %v7293_v30 = vpop.eup %7292  ;;  %v4405_v8 = vsub.f32 1.5, %v4404_v32 }
 0xac8   : > { %v4590_v38 = vsel %vm4589_vm15, %v7289_v36, %v4586_v45  ;;  %v4228_v52 = vmul.f32 %v4211_v31, %v11782_v57  ;;  %v4598_v50 = vmul.f32 %v7293_v30, %v10633_v27  ;;  %vm4603_vm0 = vweird.f32 %v7293_v30 }
 0xac9   : > { %v4595_v28 = vsel %vm4592_vm1, %v4594_v63, %v4590_v38  ;;  %7294 = vrcp.f32 %v4526_v44  ;;  %v4406_v36 = vmul.f32 %v7291_v19, %v4405_v8  ;;  %v4606_v19 = vand.u32 2147483647, %v10633_v27  ;;  %vm10681_vm5 = vmor %vm4602_vm3, %vm4603_vm0 }
 0xaca   : > { %v4596_v60 = vmul.f32 %v4595_v28, %v4316_v55  ;;  %v10670_v42 = vsub.f32 %v10497_v59, %v4228_v52  ;;  %v4599_v43 = vsub.f32 1.0, %v4598_v50  ;;  %v4609_v63 = vor.u32 1.1754944e-38, %v4608_v29 }
 0xacb   : > { %v4407_v46 = vmul.f32 %v4406_v36, %v10611_v3  ;;  %v4623_v31 = vand.u32 2147483648, %v4526_v44  ;;  %vm4607_vm6 = vcmp.eq.f32.partialorder %v4606_v19, 8.507059e+37  ;;  %v4621_v27 = vand.u32 2147483647, %v4526_v44 }
 0xacc   : > { %v4783_v58 = vadd.f32 %v10576_v17, %v4596_v60  ;;  %v4260_v2 = vmul.f32 %v10670_v42, %v10670_v42  ;;  %v4600_v7 = vmul.f32 %v7293_v30, %v4599_v43  ;;  %v4317_v8 = vmul.f32 %v10568_v54, %v10464_v5 }
 0xacd   : > { %v4409_v49 = vsel %vm4408_vm4, %v10611_v3, %v4407_v46  ;;  %vm4617_vm8 = vweird.f32 %v4526_v44  ;;  %v4624_v28 = vor.u32 1.1754944e-38, %v4623_v31  ;;  %vm4622_vm10 = vcmp.eq.f32.partialorder %v4621_v27, 8.507059e+37  ;;  %v6635_v31 = vld [vmem:[%s8236_s24 + $0x28] sm:$0xff] }
 0xace   : > { %v4797_v23 = vpack.c.bf16 %v4783_v58, %v4782_v51  ;;  %4290 = vadd.xlane.f32.xlu2 %v4260_v2  ;;  %v4601_v6 = vadd.f32 %v7293_v30, %v4600_v7  ;;  %v4412_v38 = vsel %vm4410_vm2, %v4411_v41, %v4409_v49  ;;  %v6636_v49 = vld [vmem:[%s8236_s24 + $0x30] sm:$0xff] }
 0xacf   : > { %v7295_v11 = vpop.eup %7294  ;;  %v4527_v3 = vadd.f32 1e-06, %v4412_v38  ;;  %v6634_v38 = vld [vmem:[%s8236_s24 + $0x20] sm:$0xff] }
 0xad0   : > { %4919 = vmatmul.bf16.gmra.mxu0 %v4797_v23  ;;  %4968 = vmatmul.bf16.gmra.mxu1 %v4797_v23  ;;  %v4613_v62 = vmul.f32 %v7295_v11, %v4526_v44  ;;  %v4605_v45 = vsel %vm10681_vm5, %v7293_v30, %v4601_v6  ;;  %vm4618_vm7 = vweird.f32 %v7295_v11  ;;  %v4318_v30 = vmul.f32 %v10568_v54, %v10474_v9 }
 0xad1   : > { %v4610_v48 = vsel %vm4607_vm6, %v4609_v63, %v4605_v45  ;;  %vm4619_vm9 = vmor %vm4617_vm8, %vm4618_vm7  ;;  %vm4632_vm14 = vweird.f32 %v4527_v3 }
 0xad2   : > { %v4614_v26 = vsub.f32 1.0, %v4613_v62  ;;  %v4611_v60 = vmul.f32 %v4610_v48, %v4317_v8  ;;  %v6637_v62 = vld [vmem:[%s8236_s24 + $0x38] sm:$0xff] }
 0xad3   : > { %5180 = vmatpush.bf16.msrb.mxu2 %v6637_v62 }
 0xad4   : > { %v4615_v20 = vmul.f32 %v7295_v11, %v4614_v26  ;;  %v4784_v23 = vadd.f32 %v10576_v17, %v4611_v60  ;;  %v4636_v60 = vand.u32 2147483647, %v4527_v3 }
 0xad5   : > { %v4277_v32 = vpop.xlane.xlu0 %4276 }
 0xad6   : > { %v4301_v55 = vmul.f32 0.007874016, %v4277_v32  ;;  %v4616_v52 = vadd.f32 %v7295_v11, %v4615_v20  ;;  %vm4637_vm1 = vcmp.eq.f32.partialorder %v4636_v60, 8.507059e+37 }
 0xad7   : > { %5181 = vmatpush.bf16.msrb.mxu2 %v6636_v49  ;;  %v6632_v49 = vld [vmem:[%s8236_s24 + $0x10] sm:$0xff] }
 0xad8   : > { %7296 = vrsqrt.f32 %v4301_v55  ;;  %v4620_v50 = vsel %vm4619_vm9, %v7295_v11, %v4616_v52  ;;  %vm4420_vm11 = vcmp.eq.f32.partialorder %v4301_v55, inf  ;;  %v4423_v32 = vand.u32 2147483648, %v4301_v55 }
 0xad9   : > { %v4625_v51 = vsel %vm4622_vm10, %v4624_v28, %v4620_v50  ;;  %7298 = vrcp.f32 %v4527_v3  ;;  %vm4422_vm12 = vcmp.eq.f32.partialorder %v4301_v55, 0.0  ;;  %v4638_v28 = vand.u32 2147483648, %v4527_v3 }
 0xada   : > { %v4626_v43 = vmul.f32 %v4625_v51, %v4318_v30 }
 0xadb   : > { %5182 = vmatpush.bf16.msrb.mxu2 %v6635_v31 }
 0xadc   : > { %v4785_v5 = vadd.f32 %v10576_v17, %v4626_v43  ;;  %v4639_v43 = vor.u32 1.1754944e-38, %v4638_v28 }
 0xadd   : > { %v4279_v58 = vpop.xlane.xlu0 %4278 }
 0xade   : > { %v7297_v36 = vpop.eup %7296  ;;  %v4798_v9 = vpack.c.bf16 %v4785_v5, %v4784_v23  ;;  %v4302_v30 = vmul.f32 0.007874016, %v4279_v58 }
 0xadf   : > { %v4414_v2 = vmul.f32 %v7297_v36, %v4301_v55  ;;  %v7299_v11 = vpop.eup %7298  ;;  %5183 = vmatpush.bf16.msrb.mxu2 %v6634_v38 }
 0xae0   : > { %4924 = vmatmul.bf16.gmra.mxu0 %v4798_v9  ;;  %4973 = vmatmul.bf16.gmra.mxu1 %v4798_v9  ;;  %v4628_v26 = vmul.f32 %v7299_v11, %v4527_v3  ;;  %vm4633_vm13 = vweird.f32 %v7299_v11  ;;  %v6633_v9 = vld [vmem:[%s8236_s24 + $0x18] sm:$0xff]  ;;  %vm4432_vm2 = vcmp.eq.f32.partialorder %v4302_v30, inf  ;;  %vm4434_vm6 = vcmp.eq.f32.partialorder %v4302_v30, 0.0 }
 0xae1   : > { %v4415_v44 = vmul.f32 %v7297_v36, %v4414_v2  ;;  %vm4634_vm15 = vmor %vm4632_vm14, %vm4633_vm13 }
 0xae2   : > { %v4629_v20 = vsub.f32 1.0, %v4628_v26 }
 0xae3   : > { %v4416_v7 = vmul.f32 0.5, %v4415_v44  ;;  %v4319_v44 = vmul.f32 %v10568_v54, %v10484_v37  ;;  %5184 = vmatpush.bf16.msrb.mxu2 %v6633_v9 }
 0xae4   : > { %v4630_v48 = vmul.f32 %v7299_v11, %v4629_v20 }
 0xae5   : > { %v4417_v46 = vsub.f32 1.5, %v4416_v7  ;;  %v4213_v6 = vpop.xlane.xlu0 %4212  ;;  %v4320_v7 = vmul.f32 %v10568_v54, %v10506_v1  ;;  %v6631_v1 = vld [vmem:[%s8236_s24 + $0x8] sm:$0xff] }
 0xae6   : > { %v4229_v29 = vmul.f32 %v4213_v6, %v11782_v57  ;;  %v4631_v8 = vadd.f32 %v7299_v11, %v4630_v48 }
 0xae7   : > { %v4418_v19 = vmul.f32 %v7297_v36, %v4417_v46  ;;  %5185 = vmatpush.bf16.msrb.mxu2 %v6632_v49  ;;  %v6644_v49 = vld [vmem:[%s8236_s24 + $0x70] sm:$0xff] }
 0xae8   : > { %v10699_v33 = vsub.f32 %v10545_v39, %v4229_v29 }
 0xae9   : > { %v4419_v41 = vmul.f32 %v4418_v19, %v4301_v55 }
 0xaea   : > { %v4261_v45 = vmul.f32 %v10699_v33, %v10699_v33 }
 0xaeb   : > { %v4421_v63 = vsel %vm4420_vm11, %v4301_v55, %v4419_v41  ;;  %v4635_v55 = vsel %vm4634_vm15, %v7299_v11, %v4631_v8  ;;  %5186 = vmatpush.bf16.msrb.mxu2 %v6631_v1 }
 0xaec   : > { %4292 = vadd.xlane.f32.xlu0 %v4261_v45  ;;  %v4424_v57 = vsel %vm4422_vm12, %v4423_v32, %v4421_v63  ;;  %v4640_v5 = vsel %vm4637_vm1, %v4639_v43, %v4635_v55  ;;  %v6630_v63 = vld [vmem:[%s8236_s24] sm:$0xff] }
 0xaed   : > { %v4528_v27 = vadd.f32 1e-06, %v4424_v57  ;;  %v4641_v11 = vmul.f32 %v4640_v5, %v4319_v44 }
 0xaef   : > { %7300 = vrcp.f32 %v4528_v27  ;;  %v4653_v36 = vand.u32 2147483648, %v4528_v27  ;;  %v4651_v23 = vand.u32 2147483647, %v4528_v27  ;;  %vm4647_vm3 = vweird.f32 %v4528_v27  ;;  %5187 = vmatpush.bf16.msrb.mxu2 %v6630_v63  ;;  %v6643_v63 = vld [vmem:[%s8236_s24 + $0x68] sm:$0xff] }
 0xaf0   : > { %7302 = vrsqrt.f32 %v4302_v30  ;;  %v4786_v37 = vadd.f32 %v10576_v17, %v4641_v11 }
 0xaf1   : > { %v4654_v3 = vor.u32 1.1754944e-38, %v4653_v36  ;;  %vm4652_vm5 = vcmp.eq.f32.partialorder %v4651_v23, 8.507059e+37 }
 0xaf5   : > { %v7301_v52 = vpop.eup %7300 }
 0xaf6   : > { %v4643_v50 = vmul.f32 %v7301_v52, %v4528_v27  ;;  %vm4648_vm0 = vweird.f32 %v7301_v52  ;;  %v7303_v6 = vpop.eup %7302  ;;  %v4820_v27 = vld [vmem:[%s8223_s5] sm:$0x3] }
 0xaf7   : > { %vm4649_vm4 = vmor %vm4647_vm3, %vm4648_vm0  ;;  %v4426_v19 = vmul.f32 %v7303_v6, %v4302_v30  ;;  %v10717_v60 = vperm.slane %v4820_v27, 0  ;;  %v10719_v55 = vperm.slane %v4820_v27, 1 }
 0xaf8   : > { %v4644_v51 = vsub.f32 1.0, %v4643_v50 }
 0xaf9   : > { %v4427_v32 = vmul.f32 %v7303_v6, %v4426_v19 }
 0xafa   : > { %v4645_v2 = vmul.f32 %v7301_v52, %v4644_v51 }
 0xafb   : > { %v4428_v45 = vmul.f32 0.5, %v4427_v32 }
 0xafc   : > { %v4646_v58 = vadd.f32 %v7301_v52, %v4645_v2 }
 0xafd   : > { %v4429_v57 = vsub.f32 1.5, %v4428_v45 }
 0xafe   : > { %v4650_v46 = vsel %vm4649_vm4, %v7301_v52, %v4646_v58  ;;  %v4435_v52 = vand.u32 2147483648, %v4302_v30 }
 0xaff   : > { %v4655_v29 = vsel %vm4652_vm5, %v4654_v3, %v4650_v46  ;;  %v4430_v20 = vmul.f32 %v7303_v6, %v4429_v57  ;;  %v6645_v3 = vld [vmem:[%s8236_s24 + $0x78] sm:$0xff] }
 0xb00   : > { %v4656_v62 = vmul.f32 %v4655_v29, %v4320_v7  ;;  %6670 = vmatpush.bf16.msrb.mxu3 %v6645_v3  ;;  %5229 = vmatpush.bf16.msra.mxu0 %v6645_v3 }
 0xb01   : > { %v4431_v31 = vmul.f32 %v4430_v20, %v4302_v30 }
 0xb02   : > { %v4787_v26 = vadd.f32 %v10576_v17, %v4656_v62 }
 0xb03   : > { %v4433_v48 = vsel %vm4432_vm2, %v4302_v30, %v4431_v31 }
 0xb04   : > { %v4799_v41 = vpack.c.bf16 %v4787_v26, %v4786_v37  ;;  %v4436_v51 = vsel %vm4434_vm6, %v4435_v52, %v4433_v48  ;;  %6671 = vmatpush.bf16.msrb.mxu3 %v6644_v49  ;;  %5230 = vmatpush.bf16.msra.mxu0 %v6644_v49 }
 0xb05   : > { %v10722_v36 = vadd.f32 1e-06, %v4436_v51 }
 0xb06   : > { %4929 = vmatmul.bf16.gmra.mxu0 %v4799_v41  ;;  %4978 = vmatmul.bf16.gmra.mxu1 %v4799_v41 }
 0xb07   : > { %vm4662_vm12 = vweird.f32 %v10722_v36 }
 0xb08   : > { %6672 = vmatpush.bf16.msrb.mxu3 %v6643_v63  ;;  %5231 = vmatpush.bf16.msra.mxu0 %v6643_v63  ;;  %v6639_v63 = vld [vmem:[%s8236_s24 + $0x48] sm:$0xff] }
 0xb18   : > { %v4915_v38 = vpop.f32.mrf.mxu0  ;;  %v4964_v8 = vpop.f32.mrf.mxu1 }
 0xb19   : > { %v4281_v28 = vpop.xlane.xlu1 %4280  ;;  %v4916_v43 = vadd.f32 %v4915_v38, %v10717_v60  ;;  %v4965_v2 = vadd.f32 %v4964_v8, %v10719_v55  ;;  %v6642_v8 = vld [vmem:[%s8236_s24 + $0x60] sm:$0xff] }
 0xb1a   : > { %v4303_v50 = vmul.f32 0.007874016, %v4281_v28  ;;  %6673 = vmatpush.bf16.msrb.mxu3 %v6642_v8  ;;  %5232 = vmatpush.bf16.msra.mxu0 %v6642_v8 }
 0xb1b   : > { %v5004_v7 = vmax.f32 %v4916_v43, 0.0  ;;  %v5005_v46 = vmax.f32 %v4965_v2, 0.0 }
 0xb1c   : > { %7304 = vrsqrt.f32 %v4303_v50  ;;  %vm4444_vm7 = vcmp.eq.f32.partialorder %v4303_v50, inf  ;;  %v4447_v28 = vand.u32 2147483648, %v4303_v50  ;;  %vm4446_vm8 = vcmp.eq.f32.partialorder %v4303_v50, 0.0 }
 0xb1d   : > { %7306 = vrcp.f32 %v10722_v36 }
 0xb20   : > { %v4917_v23 = vpop.f32.mrf.mxu0  ;;  %v4966_v5 = vpop.f32.mrf.mxu1 }
 0xb21   : > { %v4918_v44 = vadd.f32 %v4917_v23, %v10717_v60  ;;  %v4967_v58 = vadd.f32 %v4966_v5, %v10719_v55  ;;  %v4283_v30 = vpop.xlane.xlu1 %4282 }
 0xb22   : > { %v7305_v9 = vpop.eup %7304  ;;  %v10728_v11 = vmul.f32 0.007874016, %v4283_v30  ;;  %v6641_v30 = vld [vmem:[%s8236_s24 + $0x58] sm:$0xff] }
 0xb23   : > { %v4438_v6 = vmul.f32 %v7305_v9, %v4303_v50  ;;  %v5006_v29 = vmax.f32 %v4918_v44, 0.0  ;;  %v5007_v62 = vmax.f32 %v4967_v58, 0.0  ;;  %v10735_v32 = vpop.eup %7306  ;;  %6674 = vmatpush.bf16.msrb.mxu3 %v6641_v30  ;;  %5233 = vmatpush.bf16.msra.mxu0 %v6641_v30 }
 0xb24   : > { %7308 = vrsqrt.f32 %v10728_v11  ;;  %v4658_v52 = vmul.f32 %v10735_v32, %v10722_v36  ;;  %vm4456_vm9 = vcmp.eq.f32.partialorder %v10728_v11, inf  ;;  %vm4458_vm10 = vcmp.eq.f32.partialorder %v10728_v11, 0.0 }
 0xb25   : > { %v4439_v19 = vmul.f32 %v7305_v9, %v4438_v6  ;;  %v5036_v37 = vpack.c.bf16 %v5006_v29, %v5004_v7  ;;  %v10732_v26 = vpack.c.bf16 %v5007_v62, %v5005_v46  ;;  %v6640_v62 = vld [vmem:[%s8236_s24 + $0x50] sm:$0xff]  ;;  %vm4663_vm11 = vweird.f32 %v10735_v32 }
 0xb26   : > { %v4659_v58 = vsub.f32 1.0, %v4658_v52  ;;  %vm10776_vm13 = vmor %vm4662_vm12, %vm4663_vm11 }
 0xb27   : > { %v4440_v41 = vmul.f32 0.5, %v4439_v19  ;;  %5188 = vmatmul.bf16.vlgmr.msrb.gmra.mxu2 %v5036_v37  ;;  %v4459_v19 = vand.u32 2147483648, %v10728_v11  ;;  %6675 = vmatpush.bf16.msrb.mxu3 %v6640_v62 }
 0xb28   : > { %v4660_v29 = vmul.f32 %v10735_v32, %v4659_v58  ;;  %5234 = vmatpush.bf16.msra.mxu0 %v6640_v62 }
 0xb29   : > { %v4441_v1 = vsub.f32 1.5, %v4440_v41  ;;  %v4285_v45 = vpop.xlane.xlu2 %4284 }
 0xb2a   : > { %v7309_v57 = vpop.eup %7308  ;;  %v10738_v20 = vmul.f32 0.007874016, %v4285_v45  ;;  %v4668_v45 = vand.u32 2147483648, %v10722_v36 }
 0xb2b   : > { %v4442_v31 = vmul.f32 %v7305_v9, %v4441_v1  ;;  %v4450_v27 = vmul.f32 %v7309_v57, %v10728_v11  ;;  %v4666_v1 = vand.u32 2147483647, %v10722_v36  ;;  %6676 = vmatpush.bf16.msrb.mxu3 %v6639_v63 }
 0xb2c   : > { %7310 = vrsqrt.f32 %v10738_v20  ;;  %5235 = vmatpush.bf16.msra.mxu0 %v6639_v63  ;;  %vm4468_vm15 = vcmp.eq.f32.partialorder %v10738_v20, inf  ;;  %vm4470_vm0 = vcmp.eq.f32.partialorder %v10738_v20, 0.0 }
 0xb2d   : > { %v4443_v48 = vmul.f32 %v4442_v31, %v4303_v50  ;;  %v4451_v38 = vmul.f32 %v7309_v57, %v4450_v27  ;;  %vm10780_vm14 = vcmp.eq.f32.partialorder %v4666_v1, 8.507059e+37  ;;  %v4321_v1 = vmul.f32 %v10568_v54, %v10519_v0 }
 0xb2f   : > { %v4445_v51 = vsel %vm4444_vm7, %v4303_v50, %v4443_v48  ;;  %v4452_v43 = vmul.f32 0.5, %v4451_v38  ;;  %v4661_v38 = vadd.f32 %v10735_v32, %v4660_v29 }
 0xb30   : > { %v4448_v2 = vsel %vm4446_vm8, %v4447_v28, %v4445_v51 }
 0xb31   : > { %v4453_v23 = vsub.f32 1.5, %v4452_v43  ;;  %v10745_v44 = vadd.f32 1e-06, %v4448_v2  ;;  %v6638_v43 = vld [vmem:[%s8236_s24 + $0x40] sm:$0xff] }
 0xb32   : > { %v4287_v5 = vpop.xlane.xlu0 %4286  ;;  %v7311_v3 = vpop.eup %7310  ;;  %6677 = vmatpush.bf16.msrb.mxu3 %v6638_v43  ;;  %5236 = vmatpush.bf16.msra.mxu0 %v6638_v43 }
 0xb33   : > { %v10748_v9 = vmul.f32 0.007874016, %v4287_v5  ;;  %v4454_v7 = vmul.f32 %v7309_v57, %v4453_v23  ;;  %v4462_v46 = vmul.f32 %v7311_v3, %v10738_v20  ;;  %7312 = vrcp.f32 %v10745_v44 }
 0xb34   : > { %v4669_v5 = vor.u32 1.1754944e-38, %v4668_v45  ;;  %v4681_v62 = vand.u32 2147483647, %v10745_v44  ;;  %vm4677_vm3 = vweird.f32 %v10745_v44 }
 0xb35   : > { %7314 = vrsqrt.f32 %v10748_v9  ;;  %v4455_v50 = vmul.f32 %v4454_v7, %v10728_v11  ;;  %v4463_v6 = vmul.f32 %v7311_v3, %v4462_v46  ;;  %v4471_v7 = vand.u32 2147483648, %v10738_v20 }
 0xb36   : > { %vm4682_vm5 = vcmp.eq.f32.partialorder %v4681_v62, 8.507059e+37  ;;  %vm4480_vm2 = vcmp.eq.f32.partialorder %v10748_v9, inf  ;;  %vm4482_vm6 = vcmp.eq.f32.partialorder %v10748_v9, 0.0 }
 0xb37   : > { %v4457_v37 = vsel %vm4456_vm9, %v10728_v11, %v4455_v50  ;;  %v4464_v49 = vmul.f32 0.5, %v4463_v6  ;;  %v4683_v50 = vand.u32 2147483648, %v10745_v44 }
 0xb38   : > { %v4460_v57 = vsel %vm4458_vm10, %v4459_v19, %v4457_v37 }
 0xb39   : > { %v4289_v41 = vpop.xlane.xlu1 %4288  ;;  %v7313_v31 = vpop.eup %7312  ;;  %v4465_v27 = vsub.f32 1.5, %v4464_v49  ;;  %v10767_v11 = vadd.f32 1e-06, %v4460_v57 }
 0xb3a   : > { %v10764_v48 = vmul.f32 0.007874016, %v4289_v41  ;;  %v4673_v52 = vmul.f32 %v7313_v31, %v10745_v44  ;;  %vm4678_vm1 = vweird.f32 %v7313_v31 }
 0xb3b   : > { %v7315_v8 = vpop.eup %7314  ;;  %v4466_v28 = vmul.f32 %v7311_v3, %v4465_v27  ;;  %v4665_v3 = vsel %vm10776_vm13, %v10735_v32, %v4661_v38  ;;  %vm4679_vm4 = vmor %vm4677_vm3, %vm4678_vm1  ;;  %v4322_v27 = vmul.f32 %v10568_v54, %v10582_v61  ;;  %v4483_v61 = vand.u32 2147483648, %v10748_v9 }
 0xb3c   : > { %v4474_v51 = vmul.f32 %v7315_v8, %v10748_v9  ;;  %7316 = vrsqrt.f32 %v10764_v48  ;;  %v4674_v58 = vsub.f32 1.0, %v4673_v52  ;;  %v4670_v37 = vsel %vm10780_vm14, %v4669_v5, %v4665_v3 }
 0xb3d   : > { %7318 = vrcp.f32 %v10767_v11  ;;  %v4467_v30 = vmul.f32 %v4466_v28, %v10738_v20  ;;  %v4684_v52 = vor.u32 1.1754944e-38, %v4683_v50  ;;  %v4671_v0 = vmul.f32 %v4670_v37, %v4321_v1 }
 0xb3e   : > { %v4475_v36 = vmul.f32 %v7315_v8, %v4474_v51  ;;  %v4675_v46 = vmul.f32 %v7313_v31, %v4674_v58  ;;  %vm4492_vm8 = vcmp.eq.f32.partialorder %v10764_v48, inf  ;;  %vm4692_vm9 = vweird.f32 %v10767_v11 }
 0xb3f   : > { %v4469_v6 = vsel %vm4468_vm15, %v10738_v20, %v4467_v30  ;;  %v4788_v30 = vadd.f32 %v10576_v17, %v4671_v0  ;;  %vm4494_vm10 = vcmp.eq.f32.partialorder %v10764_v48, 0.0  ;;  %v10868_v0 = vld [vmem:[%s859_s27] ss:$0 sm:$0xff] }
 0xb40   : > { %v4476_v29 = vmul.f32 0.5, %v4475_v36  ;;  %v4676_v49 = vadd.f32 %v7313_v31, %v4675_v46  ;;  %v4472_v32 = vsel %vm4470_vm0, %v4471_v7, %v4469_v6 }
 0xb41   : > { %v4291_v19 = vpop.xlane.xlu2 %4290  ;;  %v10803_v20 = vadd.f32 1e-06, %v4472_v32 }
 0xb42   : > { %v7317_v41 = vpop.eup %7316  ;;  %v4477_v45 = vsub.f32 1.5, %v4476_v29  ;;  %v10800_v63 = vmul.f32 0.007874016, %v4291_v19  ;;  %v4680_v38 = vsel %vm4679_vm4, %v7313_v31, %v4676_v49 }
 0xb43   : > { %v10805_v57 = vpop.eup %7318  ;;  %v4486_v44 = vmul.f32 %v7317_v41, %v10764_v48  ;;  %v4685_v43 = vsel %vm4682_vm5, %v4684_v52, %v4680_v38  ;;  %v4323_v38 = vmul.f32 %v10568_v54, %v10590_v24  ;;  %vm4707_vm14 = vweird.f32 %v10803_v20 }
 0xb44   : > { %v4478_v28 = vmul.f32 %v7315_v8, %v4477_v45  ;;  %7320 = vrsqrt.f32 %v10800_v63  ;;  %v4688_v2 = vmul.f32 %v10805_v57, %v10767_v11  ;;  %v4686_v5 = vmul.f32 %v4685_v43, %v4322_v27 }
 0xb45   : > { %v4487_v51 = vmul.f32 %v7317_v41, %v4486_v44  ;;  %7322 = vrcp.f32 %v10803_v20  ;;  %vm4693_vm7 = vweird.f32 %v10805_v57  ;;  %v4696_v45 = vand.u32 2147483647, %v10767_v11 }
 0xb46   : > { %v4479_v23 = vmul.f32 %v4478_v28, %v10748_v9  ;;  %v4689_v8 = vsub.f32 1.0, %v4688_v2  ;;  %v4789_v36 = vadd.f32 %v10576_v17, %v4686_v5  ;;  %v4495_v27 = vand.u32 2147483648, %v10764_v48  ;;  %vm10839_vm11 = vmor %vm4692_vm9, %vm4693_vm7 }
 0xb47   : > { %v4488_v31 = vmul.f32 0.5, %v4487_v51  ;;  %vm4697_vm12 = vcmp.eq.f32.partialorder %v4696_v45, 8.507059e+37  ;;  %vm4504_vm4 = vcmp.eq.f32.partialorder %v10800_v63, inf }
 0xb48   : > { %v4481_v58 = vsel %vm4480_vm2, %v10748_v9, %v4479_v23  ;;  %v4690_v7 = vmul.f32 %v10805_v57, %v4689_v8  ;;  %v4800_v6 = vpack.c.bf16 %v4789_v36, %v4788_v30  ;;  %v4711_v8 = vand.u32 2147483647, %v10803_v20 }
 0xb49   : > { %v4489_v3 = vsub.f32 1.5, %v4488_v31  ;;  %v4484_v46 = vsel %vm4482_vm6, %v4483_v61, %v4481_v58  ;;  %vm4506_vm2 = vcmp.eq.f32.partialorder %v10800_v63, 0.0 }
 0xb4a   : > { %v7321_v50 = vpop.eup %7320  ;;  %v10822_v29 = vadd.f32 1e-06, %v4484_v46  ;;  %4934 = vmatmul.bf16.gmra.mxu0 %v4800_v6  ;;  %4983 = vmatmul.bf16.gmra.mxu1 %v4800_v6  ;;  %v4691_v32 = vadd.f32 %v10805_v57, %v4690_v7  ;;  %vm4712_vm1 = vcmp.eq.f32.partialorder %v4711_v8, 8.507059e+37 }
 0xb4b   : > { %v4490_v62 = vmul.f32 %v7317_v41, %v4489_v3  ;;  %v4498_v19 = vmul.f32 %v7321_v50, %v10800_v63  ;;  %v7323_v37 = vpop.eup %7322  ;;  %v4698_v41 = vand.u32 2147483648, %v10767_v11  ;;  %v4713_v11 = vand.u32 2147483648, %v10803_v20 }
 0xb4c   : > { %7324 = vrcp.f32 %v10822_v29  ;;  %v4703_v44 = vmul.f32 %v7323_v37, %v10803_v20  ;;  %v4695_v51 = vsel %vm10839_vm11, %v10805_v57, %v4691_v32  ;;  %vm4708_vm13 = vweird.f32 %v7323_v37 }
 0xb4d   : > { %v4920_v49 = vpop.f32.mrf.mxu0  ;;  %v4969_v9 = vpop.f32.mrf.mxu1  ;;  %v4491_v17 = vmul.f32 %v4490_v62, %v10764_v48  ;;  %v4499_v1 = vmul.f32 %v7321_v50, %v4498_v19  ;;  %v4699_v24 = vor.u32 1.1754944e-38, %v4698_v41  ;;  %v4324_v57 = vmul.f32 %v10568_v54, %v10604_v16  ;;  %vm4709_vm15 = vmor %vm4707_vm14, %vm4708_vm13 }
 0xb4e   : > { %v4704_v43 = vsub.f32 1.0, %v4703_v44  ;;  %v4970_v58 = vadd.f32 %v4969_v9, %v10719_v55  ;;  %v4714_v6 = vor.u32 1.1754944e-38, %v4713_v11  ;;  %vm4722_vm3 = vweird.f32 %v10822_v29 }
 0xb4f   : > { %v4493_v52 = vsel %vm4492_vm8, %v10764_v48, %v4491_v17  ;;  %v4500_v28 = vmul.f32 0.5, %v4499_v1  ;;  %v4921_v48 = vadd.f32 %v4920_v49, %v10717_v60  ;;  %v4700_v30 = vsel %vm4697_vm12, %v4699_v24, %v4695_v51 }
 0xb50   : > { %v4496_v2 = vsel %vm4494_vm10, %v4495_v27, %v4493_v52  ;;  %v4705_v31 = vmul.f32 %v7323_v37, %v4704_v43  ;;  %v4701_v9 = vmul.f32 %v4700_v30, %v4323_v38  ;;  %v5009_v17 = vmax.f32 %v4970_v58, 0.0 }
 0xb51   : > { %v4501_v23 = vsub.f32 1.5, %v4500_v28  ;;  %v10847_v5 = vadd.f32 1e-06, %v4496_v2  ;;  %v5008_v16 = vmax.f32 %v4921_v48, 0.0  ;;  %v4728_v43 = vand.u32 2147483648, %v10822_v29 }
 0xb52   : > { %v10849_v61 = vpop.eup %7324  ;;  %v4706_v46 = vadd.f32 %v7323_v37, %v4705_v31  ;;  %v4726_v11 = vand.u32 2147483647, %v10822_v29 }
 0xb53   : > { %v4718_v36 = vmul.f32 %v10849_v61, %v10822_v29  ;;  %7326 = vrcp.f32 %v10847_v5  ;;  %v4502_v62 = vmul.f32 %v7321_v50, %v4501_v23  ;;  %vm4723_vm0 = vweird.f32 %v10849_v61 }
 0xb54   : > { %v4710_v32 = vsel %vm4709_vm15, %v7323_v37, %v4706_v46  ;;  %v4790_v37 = vadd.f32 %v10868_v0, %v4701_v9  ;;  %vm10878_vm5 = vmor %vm4722_vm3, %vm4723_vm0  ;;  %v4507_v29 = vand.u32 2147483648, %v10800_v63  ;;  %v4729_v58 = vor.u32 1.1754944e-38, %v4728_v43 }
 0xb55   : > { %v4922_v3 = vpop.f32.mrf.mxu0  ;;  %v4971_v7 = vpop.f32.mrf.mxu1  ;;  %v4719_v54 = vsub.f32 1.0, %v4718_v36  ;;  %v4715_v20 = vsel %vm4712_vm1, %v4714_v6, %v4710_v32  ;;  %v4503_v50 = vmul.f32 %v4502_v62, %v10800_v63  ;;  %vm4727_vm6 = vcmp.eq.f32.partialorder %v4726_v11, 8.507059e+37 }
 0xb56   : > { %v4923_v19 = vadd.f32 %v4922_v3, %v10717_v60  ;;  %v4972_v49 = vadd.f32 %v4971_v7, %v10719_v55  ;;  %v4716_v41 = vmul.f32 %v4715_v20, %v4324_v57  ;;  %v4743_v46 = vand.u32 2147483648, %v10847_v5 }
 0xb57   : > { %v4720_v27 = vmul.f32 %v10849_v61, %v4719_v54  ;;  %v4505_v48 = vsel %vm4504_vm4, %v10800_v63, %v4503_v50  ;;  %vm4737_vm8 = vweird.f32 %v10847_v5 }
 0xb58   : > { %v5010_v1 = vmax.f32 %v4923_v19, 0.0  ;;  %v5011_v45 = vmax.f32 %v4972_v49, 0.0  ;;  %v4791_v38 = vadd.f32 %v10868_v0, %v4716_v41  ;;  %v4508_v62 = vsel %vm4506_vm2, %v4507_v29, %v4505_v48  ;;  %v10892_v19 = vld [vmem:[%s850_s3] ss:$0 sm:$0xff] }
 0xb59   : > { %v7327_v28 = vpop.eup %7326  ;;  %v4721_v51 = vadd.f32 %v10849_v61, %v4720_v27  ;;  %v4325_v63 = vmul.f32 %v10892_v19, %v10620_v13  ;;  %v4535_v9 = vadd.f32 1e-06, %v4508_v62  ;;  %v4326_v32 = vmul.f32 %v10892_v19, %v10649_v21 }
 0xb5a   : > { %v5038_v44 = vpack.c.bf16 %v5010_v1, %v5008_v16  ;;  %v5039_v52 = vpack.c.bf16 %v5011_v45, %v5009_v17  ;;  %v4733_v2 = vmul.f32 %v7327_v28, %v10847_v5  ;;  %v4801_v23 = vpack.c.bf16 %v4791_v38, %v4790_v37 }
 0xb5b   : > { %v4725_v31 = vsel %vm10878_vm5, %v10849_v61, %v4721_v51  ;;  %vm4738_vm7 = vweird.f32 %v7327_v28  ;;  %v4741_v61 = vand.u32 2147483647, %v10847_v5  ;;  %v4744_v16 = vor.u32 1.1754944e-38, %v4743_v46 }
 0xb5c   : > { %5193 = vmatmul.bf16.gmra.mxu2 %v5038_v44  ;;  %5242 = vmatmul.bf16.vlgmr.msrb.gmra.mxu3 %v5039_v52  ;;  %v4734_v8 = vsub.f32 1.0, %v4733_v2  ;;  %v4730_v6 = vsel %vm4727_vm6, %v4729_v58, %v4725_v31  ;;  %vm4739_vm9 = vmor %vm4737_vm8, %vm4738_vm7  ;;  %vm4752_vm14 = vweird.f32 %v4535_v9 }
 0xb5d   : > { %4939 = vmatmul.bf16.gmra.mxu0 %v4801_v23  ;;  %4988 = vmatmul.bf16.gmra.mxu1 %v4801_v23  ;;  %v4925_v30 = vpop.f32.mrf.mxu0  ;;  %v4974_v36 = vpop.f32.mrf.mxu1  ;;  %v4731_v54 = vmul.f32 %v4730_v6, %v4325_v63  ;;  %vm4742_vm10 = vcmp.eq.f32.partialorder %v4741_v61, 8.507059e+37 }
 0xb5e   : > { %v4735_v7 = vmul.f32 %v7327_v28, %v4734_v8  ;;  %v4926_v1 = vadd.f32 %v4925_v30, %v10717_v60  ;;  %v4975_v45 = vadd.f32 %v4974_v36, %v10719_v55 }
 0xb5f   : > { %v4293_v57 = vpop.xlane.xlu0 %4292  ;;  %v4792_v5 = vadd.f32 %v10868_v0, %v4731_v54  ;;  %v4756_v54 = vand.u32 2147483647, %v4535_v9 }
 0xb60   : > { %v4309_v3 = vmul.f32 0.007874016, %v4293_v57  ;;  %v4736_v49 = vadd.f32 %v7327_v28, %v4735_v7  ;;  %v5013_v38 = vmax.f32 %v4975_v45, 0.0 }
 0xb61   : > { %vm4757_vm1 = vcmp.eq.f32.partialorder %v4756_v54, 8.507059e+37 }
 0xb62   : > { %7328 = vrsqrt.f32 %v4309_v3  ;;  %v4740_v17 = vsel %vm4739_vm9, %v7327_v28, %v4736_v49  ;;  %v5012_v28 = vmax.f32 %v4926_v1, 0.0  ;;  %vm4516_vm11 = vcmp.eq.f32.partialorder %v4309_v3, inf }
 0xb63   : > { %v4745_v20 = vsel %vm4742_vm10, %v4744_v16, %v4740_v17  ;;  %7330 = vrcp.f32 %v4535_v9  ;;  %v4519_v30 = vand.u32 2147483648, %v4309_v3  ;;  %vm4518_vm12 = vcmp.eq.f32.partialorder %v4309_v3, 0.0 }
 0xb64   : > { %v4746_v41 = vmul.f32 %v4745_v20, %v4326_v32  ;;  %v4758_v49 = vand.u32 2147483648, %v4535_v9 }
 0xb65   : > { %v4927_v27 = vpop.f32.mrf.mxu0  ;;  %v4976_v50 = vpop.f32.mrf.mxu1 }
 0xb66   : > { %v4928_v52 = vadd.f32 %v4927_v27, %v10717_v60  ;;  %v4977_v37 = vadd.f32 %v4976_v50, %v10719_v55  ;;  %v4793_v21 = vadd.f32 %v10868_v0, %v4746_v41  ;;  %v4759_v20 = vor.u32 1.1754944e-38, %v4758_v49 }
 0xb67   : > { %v4327_v50 = vmul.f32 %v10892_v19, %v10670_v42 }
 0xb68   : > { %v7329_v13 = vpop.eup %7328  ;;  %v5014_v43 = vmax.f32 %v4928_v52, 0.0  ;;  %v5015_v11 = vmax.f32 %v4977_v37, 0.0  ;;  %v4802_v2 = vpack.c.bf16 %v4793_v21, %v4792_v5 }
 0xb69   : > { %v4510_v44 = vmul.f32 %v7329_v13, %v4309_v3  ;;  %v7331_v31 = vpop.eup %7330 }
 0xb6a   : > { %v5040_v24 = vpack.c.bf16 %v5014_v43, %v5012_v28  ;;  %v5041_v48 = vpack.c.bf16 %v5015_v11, %v5013_v38  ;;  %v4748_v57 = vmul.f32 %v7331_v31, %v4535_v9  ;;  %vm4753_vm13 = vweird.f32 %v7331_v31 }
 0xb6b   : > { %v4511_v51 = vmul.f32 %v7329_v13, %v4510_v44  ;;  %vm4754_vm15 = vmor %vm4752_vm14, %vm4753_vm13  ;;  %v4328_v44 = vmul.f32 %v10892_v19, %v10699_v33 }
 0xb6c   : > { %5198 = vmatmul.bf16.gmra.mxu2 %v5040_v24  ;;  %5247 = vmatmul.bf16.gmra.mxu3 %v5041_v48  ;;  %v4749_v46 = vsub.f32 1.0, %v4748_v57 }
 0xb6d   : > { %v4512_v23 = vmul.f32 0.5, %v4511_v51  ;;  %4944 = vmatmul.bf16.gmra.mxu0 %v4802_v2  ;;  %4993 = vmatmul.bf16.gmra.mxu1 %v4802_v2 }
 0xb6e   : > { %v4750_v61 = vmul.f32 %v7331_v31, %v4749_v46 }
 0xb6f   : > { %v4513_v8 = vsub.f32 1.5, %v4512_v23 }
 0xb70   : > { %v4751_v62 = vadd.f32 %v7331_v31, %v4750_v61 }
 0xb71   : > { %v4514_v29 = vmul.f32 %v7329_v13, %v4513_v8 }
 0xb72   : > { %v4755_v32 = vsel %vm4754_vm15, %v7331_v31, %v4751_v62 }
 0xb73   : > { %v4515_v58 = vmul.f32 %v4514_v29, %v4309_v3  ;;  %v4760_v27 = vsel %vm4757_vm1, %v4759_v20, %v4755_v32 }
 0xb74   : > { %v4761_v52 = vmul.f32 %v4760_v27, %v4327_v50 }
 0xb75   : > { %v4517_v36 = vsel %vm4516_vm11, %v4309_v3, %v4515_v58 }
 0xb76   : > { %v4520_v7 = vsel %vm4518_vm12, %v4519_v30, %v4517_v36  ;;  %v4794_v23 = vadd.f32 %v10868_v0, %v4761_v52 }
 0xb77   : > { %v4536_v6 = vadd.f32 1e-06, %v4520_v7 }
 0xb79   : > { %7332 = vrcp.f32 %v4536_v6  ;;  %v4773_v41 = vand.u32 2147483648, %v4536_v6  ;;  %v4771_v13 = vand.u32 2147483647, %v4536_v6  ;;  %vm4767_vm3 = vweird.f32 %v4536_v6 }
 0xb7b   : > { %v4774_v9 = vor.u32 1.1754944e-38, %v4773_v41  ;;  %vm4772_vm5 = vcmp.eq.f32.partialorder %v4771_v13, 8.507059e+37  ;;  %v10929_v13 = vld [vmem:[%s985_s28] ss:$0 sm:$0xff] }
 0xb7f   : > { %v7333_v63 = vpop.eup %7332 }
 0xb80   : > { %v4763_v16 = vmul.f32 %v7333_v63, %v4536_v6  ;;  %vm4768_vm0 = vweird.f32 %v7333_v63 }
 0xb81   : > { %vm4769_vm4 = vmor %vm4767_vm3, %vm4768_vm0 }
 0xb82   : > { %v4764_v17 = vsub.f32 1.0, %v4763_v16 }
 0xb83   : > { %v4930_v1 = vpop.f32.mrf.mxu0  ;;  %v4979_v45 = vpop.f32.mrf.mxu1 }
 0xb84   : > { %v4765_v3 = vmul.f32 %v7333_v63, %v4764_v17  ;;  %v4931_v21 = vadd.f32 %v4930_v1, %v10717_v60  ;;  %v4980_v38 = vadd.f32 %v4979_v45, %v10719_v55 }
 0xb86   : > { %v4766_v5 = vadd.f32 %v7333_v63, %v4765_v3  ;;  %v5016_v33 = vmax.f32 %v4931_v21, 0.0  ;;  %v5017_v19 = vmax.f32 %v4980_v38, 0.0 }
 0xb88   : > { %v4770_v37 = vsel %vm4769_vm4, %v7333_v63, %v4766_v5 }
 0xb89   : > { %v4775_v28 = vsel %vm4772_vm5, %v4774_v9, %v4770_v37 }
 0xb8a   : > { %v4776_v51 = vmul.f32 %v4775_v28, %v4328_v44 }
 0xb8b   : > { %v4932_v43 = vpop.f32.mrf.mxu0  ;;  %v4981_v11 = vpop.f32.mrf.mxu1 }
 0xb8c   : > { %v4933_v42 = vadd.f32 %v4932_v43, %v10717_v60  ;;  %v4982_v2 = vadd.f32 %v4981_v11, %v10719_v55  ;;  %v4795_v24 = vadd.f32 %v10868_v0, %v4776_v51 }
 0xb8e   : > { %v5018_v48 = vmax.f32 %v4933_v42, 0.0  ;;  %v5019_v31 = vmax.f32 %v4982_v2, 0.0  ;;  %v4803_v8 = vpack.c.bf16 %v4795_v24, %v4794_v23 }
 0xb90   : > { %v5042_v29 = vpack.c.bf16 %v5018_v48, %v5016_v33  ;;  %v5043_v57 = vpack.c.bf16 %v5019_v31, %v5017_v19  ;;  %4949 = vmatmul.bf16.gmra.mxu0 %v4803_v8  ;;  %4998 = vmatmul.bf16.gmra.mxu1 %v4803_v8 }
 0xb92   : > { %5203 = vmatmul.bf16.gmra.mxu2 %v5042_v29  ;;  %5252 = vmatmul.bf16.gmra.mxu3 %v5043_v57 }
 0xba0   : > { %5237 = vmatmul.bf16.vlgmr.msra.gmra.mxu0 %v10732_v26 }
 0xbaa   : > { %v10916_v36 = vpop.f32.mrf.mxu2 }
 0xbb2   : > { %v10922_v26 = vpop.f32.mrf.mxu2 }
 0xbc7   : > { %v4935_v58 = vpop.f32.mrf.mxu0  ;;  %v4984_v30 = vpop.f32.mrf.mxu1 }
 0xbc8   : > { %v4936_v7 = vadd.f32 %v4935_v58, %v10717_v60  ;;  %v4985_v0 = vadd.f32 %v4984_v30, %v10719_v55 }
 0xbca   : > { %v5020_v63 = vmax.f32 %v4936_v7, 0.0  ;;  %v5021_v49 = vmax.f32 %v4985_v0, 0.0 }
 0xbcf   : > { %v4937_v46 = vpop.f32.mrf.mxu0  ;;  %v4986_v6 = vpop.f32.mrf.mxu1 }
 0xbd0   : > { %v4938_v61 = vadd.f32 %v4937_v46, %v10717_v60  ;;  %v4987_v62 = vadd.f32 %v4986_v6, %v10719_v55 }
 0xbd2   : > { %v5022_v54 = vmax.f32 %v4938_v61, 0.0  ;;  %v5023_v16 = vmax.f32 %v4987_v62, 0.0 }
 0xbd4   : > { %v5044_v32 = vpack.c.bf16 %v5022_v54, %v5020_v63  ;;  %v5045_v17 = vpack.c.bf16 %v5023_v16, %v5021_v49 }
 0xbd6   : > { %5208 = vmatmul.bf16.gmra.mxu2 %v5044_v32  ;;  %5257 = vmatmul.bf16.gmra.mxu3 %v5045_v17 }
 0xbda   : > { %v4940_v1 = vpop.f32.mrf.mxu0  ;;  %v4989_v45 = vpop.f32.mrf.mxu1 }
 0xbdb   : > { %v4941_v50 = vadd.f32 %v4940_v1, %v10717_v60  ;;  %v4990_v5 = vadd.f32 %v4989_v45, %v10719_v55 }
 0xbdd   : > { %v5024_v28 = vmax.f32 %v4941_v50, 0.0  ;;  %v5025_v38 = vmax.f32 %v4990_v5, 0.0 }
 0xbdf   : > { %v5194_v20 = vpop.f32.mrf.mxu2  ;;  %v5243_v41 = vpop.f32.mrf.mxu3 }
 0xbe0   : > { %v5244_v3 = vadd.f32 %v5243_v41, %v5194_v20 }
 0xbe2   : > { %v5280_v27 = vadd.f32 %v5244_v3, %v10397_v35  ;;  %v4942_v9 = vpop.f32.mrf.mxu0  ;;  %v4991_v44 = vpop.f32.mrf.mxu1 }
 0xbe3   : > { %v4943_v37 = vadd.f32 %v4942_v9, %v10717_v60  ;;  %v4992_v21 = vadd.f32 %v4991_v44, %v10719_v55 }
 0xbe4   : > { %v10935_v52 = vadd.f32 %v10929_v13, %v5280_v27 }
 0xbe5   : > { %v5026_v51 = vmax.f32 %v4943_v37, 0.0  ;;  %v5027_v43 = vmax.f32 %v4992_v21, 0.0 }
 0xbe7   : > { %v5196_v11 = vpop.f32.mrf.mxu2  ;;  %v5245_v42 = vpop.f32.mrf.mxu3  ;;  %v5046_v2 = vpack.c.bf16 %v5026_v51, %v5024_v28  ;;  %v5047_v23 = vpack.c.bf16 %v5027_v43, %v5025_v38 }
 0xbe8   : > { %v5246_v35 = vadd.f32 %v5245_v42, %v5196_v11 }
 0xbe9   : > { %5213 = vmatmul.bf16.gmra.mxu2 %v5046_v2  ;;  %5262 = vmatmul.bf16.gmra.mxu3 %v5047_v23 }
 0xbea   : > { %v5281_v24 = vadd.f32 %v5246_v35, %v10403_v10  ;;  %v4945_v33 = vpop.f32.mrf.mxu0  ;;  %v4994_v19 = vpop.f32.mrf.mxu1 }
 0xbeb   : > { %v4946_v31 = vadd.f32 %v4945_v33, %v10717_v60  ;;  %v4995_v8 = vadd.f32 %v4994_v19, %v10719_v55 }
 0xbec   : > { %v10941_v48 = vadd.f32 %v10929_v13, %v5281_v24 }
 0xbed   : > { %v5028_v6 = vmax.f32 %v4946_v31, 0.0  ;;  %v5029_v61 = vmax.f32 %v4995_v8, 0.0 }
 0xbef   : > { %v5199_v29 = vpop.f32.mrf.mxu2  ;;  %v5248_v57 = vpop.f32.mrf.mxu3 }
 0xbf0   : > { %v5249_v7 = vadd.f32 %v5248_v57, %v5199_v29 }
 0xbf2   : > { %v4947_v58 = vpop.f32.mrf.mxu0  ;;  %v4996_v30 = vpop.f32.mrf.mxu1  ;;  %v5282_v46 = vadd.f32 %v5249_v7, %v10407_v4 }
 0xbf3   : > { %v4948_v0 = vadd.f32 %v4947_v58, %v10717_v60  ;;  %v4997_v10 = vadd.f32 %v4996_v30, %v10719_v55 }
 0xbf4   : > { %v10949_v49 = vadd.f32 %v10929_v13, %v5282_v46 }
 0xbf5   : > { %v5030_v62 = vmax.f32 %v4948_v0, 0.0  ;;  %v5031_v63 = vmax.f32 %v4997_v10, 0.0 }
 0xbf7   : > { %v5048_v54 = vpack.c.bf16 %v5030_v62, %v5028_v6  ;;  %v5049_v16 = vpack.c.bf16 %v5031_v63, %v5029_v61  ;;  %v5201_v32 = vpop.f32.mrf.mxu2  ;;  %v5250_v17 = vpop.f32.mrf.mxu3 }
 0xbf8   : > { %v5251_v1 = vadd.f32 %v5250_v17, %v5201_v32 }
 0xbf9   : > { %5218 = vmatmul.bf16.gmra.mxu2 %v5048_v54  ;;  %5267 = vmatmul.bf16.gmra.mxu3 %v5049_v16 }
 0xbfa   : > { %v5283_v45 = vadd.f32 %v5251_v1, %v10411_v40 }
 0xbfc   : > { %v10953_v20 = vadd.f32 %v10929_v13, %v5283_v45 }
 0xc0d   : > { %v4950_v4 = vpop.f32.mrf.mxu0  ;;  %v4999_v41 = vpop.f32.mrf.mxu1 }
 0xc0e   : > { %v4951_v3 = vadd.f32 %v4950_v4, %v10717_v60  ;;  %v5000_v27 = vadd.f32 %v4999_v41, %v10719_v55 }
 0xc10   : > { %v5032_v38 = vmax.f32 %v4951_v3, 0.0  ;;  %v5033_v40 = vmax.f32 %v5000_v27, 0.0 }
 0xc15   : > { %v4952_v50 = vpop.f32.mrf.mxu0  ;;  %v5001_v5 = vpop.f32.mrf.mxu1 }
 0xc16   : > { %v4953_v9 = vadd.f32 %v4952_v50, %v10717_v60  ;;  %v5002_v44 = vadd.f32 %v5001_v5, %v10719_v55  ;;  %v5204_v37 = vpop.f32.mrf.mxu2  ;;  %v5253_v21 = vpop.f32.mrf.mxu3 }
 0xc17   : > { %v5254_v28 = vadd.f32 %v5253_v21, %v5204_v37 }
 0xc18   : > { %v5034_v51 = vmax.f32 %v4953_v9, 0.0  ;;  %v5035_v43 = vmax.f32 %v5002_v44, 0.0 }
 0xc19   : > { %v5284_v11 = vadd.f32 %v5254_v28, %v10421_v56 }
 0xc1a   : > { %v5050_v42 = vpack.c.bf16 %v5034_v51, %v5032_v38  ;;  %v5051_v35 = vpack.c.bf16 %v5035_v43, %v5033_v40 }
 0xc1b   : > { %v10961_v2 = vadd.f32 %v10929_v13, %v5284_v11 }
 0xc1c   : > { %5223 = vmatmul.bf16.gmra.mxu2 %v5050_v42  ;;  %5272 = vmatmul.bf16.gmra.mxu3 %v5051_v35 }
 0xc1d   : > { %v5238_v23 = vpop.f32.mrf.mxu0 }
 0xc1e   : > { %v5206_v60 = vpop.f32.mrf.mxu2  ;;  %v5239_v55 = vadd.f32 %v5238_v23, %v10916_v36  ;;  %v5255_v24 = vpop.f32.mrf.mxu3 }
 0xc1f   : > { %v5256_v33 = vadd.f32 %v5255_v24, %v5206_v60 }
 0xc20   : > { %v5278_v19 = vadd.f32 %v5239_v55, %v10375_v22 }
 0xc21   : > { %v5285_v31 = vadd.f32 %v5256_v33, %v10433_v47 }
 0xc22   : > { %v10967_v8 = vadd.f32 %v10929_v13, %v5278_v19 }
 0xc23   : > { %v10970_v56 = vadd.f32 %v10929_v13, %v5285_v31 }
 0xc25   : > { %v5240_v29 = vpop.f32.mrf.mxu0 }
 0xc26   : > { %v5241_v57 = vadd.f32 %v5240_v29, %v10922_v26 }
 0xc28   : > { %v5279_v58 = vadd.f32 %v5241_v57, %v10379_v12 }
 0xc2a   : > { %v10975_v30 = vadd.f32 %v10929_v13, %v5279_v58 }
 0xc59   : > { %v5209_v36 = vpop.f32.mrf.mxu2  ;;  %v5258_v7 = vpop.f32.mrf.mxu3 }
 0xc5a   : > { %v5259_v0 = vadd.f32 %v5258_v7, %v5209_v36 }
 0xc5c   : > { %v5286_v22 = vadd.f32 %v5259_v0, %v10437_v53 }
 0xc5e   : > { %v10979_v47 = vadd.f32 %v10929_v13, %v5286_v22 }
 0xc61   : > { %v5211_v10 = vpop.f32.mrf.mxu2  ;;  %v5260_v46 = vpop.f32.mrf.mxu3 }
 0xc62   : > { %v5261_v6 = vadd.f32 %v5260_v46, %v5211_v10 }
 0xc64   : > { %v5287_v61 = vadd.f32 %v5261_v6, %v10457_v18 }
 0xc66   : > { %v10983_v26 = vadd.f32 %v10929_v13, %v5287_v61 }
 0xc6c   : > { %v5214_v12 = vpop.f32.mrf.mxu2  ;;  %v5263_v62 = vpop.f32.mrf.mxu3 }
 0xc6d   : > { %v5264_v63 = vadd.f32 %v5263_v62, %v5214_v12 }
 0xc6f   : > { %v5288_v54 = vadd.f32 %v5264_v63, %v10467_v25 }
 0xc71   : > { %v10987_v16 = vadd.f32 %v10929_v13, %v5288_v54 }
 0xc74   : > { %v5216_v53 = vpop.f32.mrf.mxu2  ;;  %v5265_v32 = vpop.f32.mrf.mxu3 }
 0xc75   : > { %v5266_v17 = vadd.f32 %v5265_v32, %v5216_v53 }
 0xc77   : > { %v5289_v1 = vadd.f32 %v5266_v17, %v10477_v34 }
 0xc79   : > { %v10991_v45 = vadd.f32 %v10929_v13, %v5289_v1 }
 0xc7c   : > { %v5219_v18 = vpop.f32.mrf.mxu2  ;;  %v5268_v4 = vpop.f32.mrf.mxu3 }
 0xc7d   : > { %v5269_v41 = vadd.f32 %v5268_v4, %v5219_v18 }
 0xc7f   : > { %v5290_v3 = vadd.f32 %v5269_v41, %v10487_v14 }
 0xc81   : > { %v10995_v27 = vadd.f32 %v10929_v13, %v5290_v3 }
 0xc84   : > { %v5221_v25 = vpop.f32.mrf.mxu2  ;;  %v5270_v50 = vpop.f32.mrf.mxu3 }
 0xc85   : > { %v5271_v5 = vadd.f32 %v5270_v50, %v5221_v25 }
 0xc87   : > { %v5291_v9 = vadd.f32 %v5271_v5, %v10493_v15 }
 0xc89   : > { %v10999_v44 = vadd.f32 %v10929_v13, %v5291_v9 }
 0xc9f   : > { %v5224_v34 = vpop.f32.mrf.mxu2  ;;  %v5273_v37 = vpop.f32.mrf.mxu3 }
 0xca0   : > { %v5274_v21 = vadd.f32 %v5273_v37, %v5224_v34 }
 0xca2   : > { %v5292_v28 = vadd.f32 %v5274_v21, %v10497_v59 }
 0xca4   : > { %v11003_v38 = vadd.f32 %v10929_v13, %v5292_v28 }
 0xca7   : > { %v5226_v14 = vpop.f32.mrf.mxu2  ;;  %v5275_v40 = vpop.f32.mrf.mxu3 }
 0xca8   : > { %v5276_v51 = vadd.f32 %v5275_v40, %v5226_v14  ;;  %5317 = sbr.rel (%p6573_p8) target bundleno = 3261 (0xcbd), region = 152 }
 0xcaa   : > { %v5293_v43 = vadd.f32 %v5276_v51, %v10545_v39 }
 0xcac   : > { %v11007_v11 = vadd.f32 %v10929_v13, %v5293_v43 }
 0xcad   : > { %5318 = vst [vmem:[#allocation2 + $0x30] sm:$0xff] %v10967_v8 }
 0xcae   : > { %5319 = vst [vmem:[#allocation2] sm:$0xff] %v10975_v30 }
 0xcaf   : > { %5320 = vst [vmem:[#allocation2 + $0x58] sm:$0xff] %v10935_v52 }
 0xcb0   : > { %5321 = vst [vmem:[#allocation2 + $0x18] sm:$0xff] %v10941_v48 }
 0xcb1   : > { %5322 = vst [vmem:[#allocation2 + $0x50] sm:$0xff] %v10949_v49 }
 0xcb2   : > { %5323 = vst [vmem:[#allocation2 + $0x68] sm:$0xff] %v10953_v20 }
 0xcb3   : > { %5324 = vst [vmem:[#allocation2 + $0x8] sm:$0xff] %v10961_v2 }
 0xcb4   : > { %5325 = vst [vmem:[#allocation2 + $0x48] sm:$0xff] %v10970_v56 }
 0xcb5   : > { %5326 = vst [vmem:[#allocation2 + $0x40] sm:$0xff] %v10979_v47 }
 0xcb6   : > { %5327 = vst [vmem:[#allocation2 + $0x20] sm:$0xff] %v10983_v26 }
 0xcb7   : > { %5328 = vst [vmem:[#allocation2 + $0x10] sm:$0xff] %v10987_v16 }
 0xcb8   : > { %5329 = vst [vmem:[#allocation2 + $0x38] sm:$0xff] %v10991_v45 }
 0xcb9   : > { %5330 = vst [vmem:[#allocation2 + $0x60] sm:$0xff] %v10995_v27 }
 0xcba   : > { %5331 = vst [vmem:[#allocation2 + $0x70] sm:$0xff] %v10999_v44 }
 0xcbb   : > { %5332 = vst [vmem:[#allocation2 + $0x78] sm:$0xff] %v11003_v38 }
 0xcbc   : > { %5333 = vst [vmem:[#allocation2 + $0x28] sm:$0xff] %v11007_v11 }
 0xcbd PF: > { %p6574_p9 = scmp.ne.s32.totalorder %s7975_s2, 1 }
 0xcbe   : > { %s11799_s3 = sld [smem:[#allocation65_spill]] (!%p6574_p9) }
 0xcbf   : > { %5337 = sbr.rel (%p6574_p9) target bundleno = 3657 (0xe49), region = 156  ;;  %s11804_s11 = sld [smem:[#allocation66_spill]] (!%p6574_p9) }
 0xcc4   : > { %5348 = vadd.xlane.f32.xlu2 %v10949_v49  ;;  %5344 = vadd.xlane.f32.xlu1 %v10935_v52  ;;  %v11798_v39 = vld [vmem:[#allocation28_spill] sm:$0xff]  ;;  %v11101_v41 = vld [vmem:[%s11799_s3] ss:$0 sm:$0xff] }
 0xcc5   : > { %5340 = vadd.xlane.f32.xlu0 %v10967_v8 }
 0xccc   : > { %5350 = vadd.xlane.f32.xlu2 %v10953_v20  ;;  %5346 = vadd.xlane.f32.xlu1 %v10941_v48 }
 0xccd   : > { %5342 = vadd.xlane.f32.xlu0 %v10975_v30 }
 0xcd4   : > { %5356 = vadd.xlane.f32.xlu2 %v10979_v47  ;;  %5354 = vadd.xlane.f32.xlu1 %v10970_v56 }
 0xcd5   : > { %5352 = vadd.xlane.f32.xlu0 %v10961_v2 }
 0xcdc   : > { %5362 = vadd.xlane.f32.xlu2 %v10991_v45  ;;  %5360 = vadd.xlane.f32.xlu1 %v10987_v16 }
 0xcdd   : > { %5358 = vadd.xlane.f32.xlu0 %v10983_v26 }
 0xce4   : > { %5368 = vadd.xlane.f32.xlu2 %v11003_v38  ;;  %5366 = vadd.xlane.f32.xlu1 %v10999_v44 }
 0xce5   : > { %5364 = vadd.xlane.f32.xlu0 %v10995_v27 }
 0xced   : > { %5370 = vadd.xlane.f32.xlu0 %v11007_v11 }
 0xd37   : > { %v5349_v15 = vpop.xlane.xlu2 %5348  ;;  %v5345_v59 = vpop.xlane.xlu1 %5344 }
 0xd38   : > { %v5374_v13 = vmul.f32 %v5345_v59, %v11798_v39  ;;  %v5341_v42 = vpop.xlane.xlu0 %5340  ;;  %v5376_v22 = vmul.f32 %v5349_v15, %v11798_v39 }
 0xd39   : > { %v5372_v35 = vmul.f32 %v5341_v42, %v11798_v39 }
 0xd3a   : > { %v11046_v23 = vsub.f32 %v10935_v52, %v5374_v13  ;;  %v11076_v6 = vsub.f32 %v10949_v49, %v5376_v22 }
 0xd3b   : > { %v11049_v60 = vsub.f32 %v10967_v8, %v5372_v35 }
 0xd3c   : > { %v5406_v55 = vmul.f32 %v11046_v23, %v11046_v23  ;;  %v5408_v53 = vmul.f32 %v11076_v6, %v11076_v6 }
 0xd3d   : > { %v5404_v24 = vmul.f32 %v11049_v60, %v11049_v60 }
 0xd3e   : > { %5424 = vadd.xlane.f32.xlu0 %v5406_v55 }
 0xd3f   : > { %5420 = vadd.xlane.f32.xlu1 %v5404_v24  ;;  %v5351_v33 = vpop.xlane.xlu2 %5350  ;;  %v5347_v19 = vpop.xlane.xlu1 %5346 }
 0xd40   : > { %v5377_v31 = vmul.f32 %v5351_v33, %v11798_v39  ;;  %v5375_v29 = vmul.f32 %v5347_v19, %v11798_v39  ;;  %v5343_v57 = vpop.xlane.xlu0 %5342 }
 0xd41   : > { %v5373_v52 = vmul.f32 %v5343_v57, %v11798_v39 }
 0xd42   : > { %v11059_v8 = vsub.f32 %v10953_v20, %v5377_v31  ;;  %v11062_v58 = vsub.f32 %v10941_v48, %v5375_v29 }
 0xd43   : > { %v11065_v36 = vsub.f32 %v10975_v30, %v5373_v52 }
 0xd44   : > { %v5409_v7 = vmul.f32 %v11059_v8, %v11059_v8  ;;  %v5407_v0 = vmul.f32 %v11062_v58, %v11062_v58 }
 0xd45   : > { %v5405_v10 = vmul.f32 %v11065_v36, %v11065_v36 }
 0xd46   : > { %5430 = vadd.xlane.f32.xlu0 %v5409_v7 }
 0xd47   : > { %5426 = vadd.xlane.f32.xlu1 %v5407_v0  ;;  %5422 = vadd.xlane.f32.xlu2 %v5405_v10  ;;  %v5357_v20 = vpop.xlane.xlu2 %5356  ;;  %v5355_v48 = vpop.xlane.xlu1 %5354 }
 0xd48   : > { %v5380_v46 = vmul.f32 %v5357_v20, %v11798_v39  ;;  %v5353_v30 = vpop.xlane.xlu0 %5352  ;;  %v5379_v63 = vmul.f32 %v5355_v48, %v11798_v39 }
 0xd49   : > { %v5378_v61 = vmul.f32 %v5353_v30, %v11798_v39 }
 0xd4a   : > { %v11080_v12 = vsub.f32 %v10979_v47, %v5380_v46  ;;  %v11093_v47 = vsub.f32 %v10970_v56, %v5379_v63 }
 0xd4b   : > { %v11083_v62 = vsub.f32 %v10961_v2, %v5378_v61 }
 0xd4c   : > { %v5412_v54 = vmul.f32 %v11080_v12, %v11080_v12  ;;  %v5411_v50 = vmul.f32 %v11093_v47, %v11093_v47 }
 0xd4d   : > { %v5410_v49 = vmul.f32 %v11083_v62, %v11083_v62 }
 0xd4e   : > { %5436 = vadd.xlane.f32.xlu0 %v5412_v54 }
 0xd4f   : > { %5428 = vadd.xlane.f32.xlu2 %v5408_v53  ;;  %5432 = vadd.xlane.f32.xlu1 %v5410_v49  ;;  %v5363_v32 = vpop.xlane.xlu2 %5362  ;;  %v5361_v2 = vpop.xlane.xlu1 %5360  ;;  %v11150_v53 = vmul.f32 %v11101_v41, %v11076_v6  ;;  %v11154_v49 = vmul.f32 %v11101_v41, %v11046_v23 }
 0xd50   : > { %v5383_v17 = vmul.f32 %v5363_v32, %v11798_v39  ;;  %v5359_v1 = vpop.xlane.xlu0 %5358  ;;  %v5382_v18 = vmul.f32 %v5361_v2, %v11798_v39  ;;  %v11158_v32 = vmul.f32 %v11101_v41, %v11049_v60 }
 0xd51   : > { %v5381_v4 = vmul.f32 %v5359_v1, %v11798_v39  ;;  %v11162_v1 = vmul.f32 %v11101_v41, %v11059_v8 }
 0xd52   : > { %v11104_v3 = vsub.f32 %v10991_v45, %v5383_v17  ;;  %v5398_v25 = vsub.f32 %v10987_v16, %v5382_v18  ;;  %v11166_v18 = vmul.f32 %v11101_v41, %v11062_v58 }
 0xd53   : > { %v11108_v56 = vsub.f32 %v10983_v26, %v5381_v4 }
 0xd54   : > { %v5415_v5 = vmul.f32 %v11104_v3, %v11104_v3  ;;  %v11115_v9 = vmul.f32 %v11101_v41, %v5398_v25  ;;  %v5414_v43 = vmul.f32 %v5398_v25, %v5398_v25 }
 0xd55   : > { %v5413_v34 = vmul.f32 %v11108_v56, %v11108_v56 }
 0xd56   : > { %5442 = vadd.xlane.f32.xlu0 %v5415_v5 }
 0xd57   : > { %5434 = vadd.xlane.f32.xlu2 %v5411_v50  ;;  %5438 = vadd.xlane.f32.xlu1 %v5413_v34  ;;  %v5369_v45 = vpop.xlane.xlu2 %5368  ;;  %v5367_v16 = vpop.xlane.xlu1 %5366 }
 0xd58   : > { %v5386_v26 = vmul.f32 %v5369_v45, %v11798_v39  ;;  %v5365_v37 = vpop.xlane.xlu0 %5364  ;;  %v5385_v21 = vmul.f32 %v5367_v16, %v11798_v39 }
 0xd59   : > { %v5384_v28 = vmul.f32 %v5365_v37, %v11798_v39 }
 0xd5a   : > { %v5402_v14 = vsub.f32 %v11003_v38, %v5386_v26  ;;  %v5401_v40 = vsub.f32 %v10999_v44, %v5385_v21 }
 0xd5b   : > { %v5400_v51 = vsub.f32 %v10995_v27, %v5384_v28 }
 0xd5c   : > { %v11126_v15 = vmul.f32 %v11101_v41, %v5402_v14  ;;  %v5418_v59 = vmul.f32 %v5402_v14, %v5402_v14  ;;  %v11129_v13 = vmul.f32 %v11101_v41, %v5401_v40  ;;  %v5417_v55 = vmul.f32 %v5401_v40, %v5401_v40 }
 0xd5d   : > { %v11132_v42 = vmul.f32 %v11101_v41, %v5400_v51  ;;  %v5416_v35 = vmul.f32 %v5400_v51, %v5400_v51 }
 0xd5e   : > { %5448 = vadd.xlane.f32.xlu0 %v5418_v59 }
 0xd5f   : > { %5440 = vadd.xlane.f32.xlu2 %v5414_v43  ;;  %5444 = vadd.xlane.f32.xlu1 %v5416_v35 }
 0xd60   : > { %v5371_v38 = vpop.xlane.xlu0 %5370 }
 0xd61   : > { %v5387_v44 = vmul.f32 %v5371_v38, %v11798_v39 }
 0xd63   : > { %v5403_v27 = vsub.f32 %v11007_v11, %v5387_v44 }
 0xd65   : > { %v11137_v24 = vmul.f32 %v11101_v41, %v5403_v27  ;;  %v5419_v33 = vmul.f32 %v5403_v27, %v5403_v27 }
 0xd67   : > { %5446 = vadd.xlane.f32.xlu2 %v5417_v55  ;;  %5450 = vadd.xlane.f32.xlu1 %v5419_v33  ;;  %v11181_v55 = vmul.f32 %v11101_v41, %v11065_v36 }
 0xdb1   : > { %v5425_v19 = vpop.xlane.xlu0 %5424 }
 0xdb2   : > { %v5421_v31 = vpop.xlane.xlu1 %5420  ;;  %v5454_v29 = vmul.f32 0.007874016, %v5425_v19 }
 0xdb3   : > { %v5452_v57 = vmul.f32 0.007874016, %v5421_v31 }
 0xdb4   : > { %7356 = vrsqrt.f32 %v5454_v29  ;;  %vm5518_vm2 = vcmp.eq.f32.partialorder %v5454_v29, inf  ;;  %vm5520_vm6 = vcmp.eq.f32.partialorder %v5454_v29, 0.0  ;;  %v5521_v16 = vand.u32 2147483648, %v5454_v29 }
 0xdb5   : > { %7358 = vrsqrt.f32 %v5452_v57  ;;  %vm5494_vm7 = vcmp.eq.f32.partialorder %v5452_v57, inf  ;;  %vm5496_vm8 = vcmp.eq.f32.partialorder %v5452_v57, 0.0  ;;  %v5497_v40 = vand.u32 2147483648, %v5452_v57 }
 0xdb9   : > { %v5431_v52 = vpop.xlane.xlu0 %5430 }
 0xdba   : > { %v7357_v7 = vpop.eup %7356  ;;  %v5427_v0 = vpop.xlane.xlu1 %5426  ;;  %v11139_v39 = vmul.f32 0.007874016, %v5431_v52 }
 0xdbb   : > { %v5423_v22 = vpop.xlane.xlu2 %5422  ;;  %v7359_v11 = vpop.eup %7358  ;;  %v5512_v10 = vmul.f32 %v7357_v7, %v5454_v29  ;;  %v11141_v20 = vmul.f32 0.007874016, %v5427_v0 }
 0xdbc   : > { %v11143_v48 = vmul.f32 0.007874016, %v5423_v22  ;;  %v5488_v46 = vmul.f32 %v7359_v11, %v5452_v57  ;;  %7360 = vrsqrt.f32 %v11139_v39  ;;  %vm5554_vm10 = vcmp.eq.f32.partialorder %v11139_v39, inf }
 0xdbd   : > { %v5513_v30 = vmul.f32 %v7357_v7, %v5512_v10  ;;  %7362 = vrsqrt.f32 %v11141_v20  ;;  %vm5530_vm9 = vcmp.eq.f32.partialorder %v11141_v20, inf  ;;  %vm5556_vm11 = vcmp.eq.f32.partialorder %v11139_v39, 0.0 }
 0xdbe   : > { %v5489_v61 = vmul.f32 %v7359_v11, %v5488_v46  ;;  %7364 = vrsqrt.f32 %v11143_v48  ;;  %vm5532_vm12 = vcmp.eq.f32.partialorder %v11141_v20, 0.0  ;;  %v5533_v36 = vand.u32 2147483648, %v11141_v20 }
 0xdbf   : > { %v5514_v63 = vmul.f32 0.5, %v5513_v30  ;;  %vm5506_vm13 = vcmp.eq.f32.partialorder %v11143_v48, inf  ;;  %vm5508_vm14 = vcmp.eq.f32.partialorder %v11143_v48, 0.0  ;;  %v5509_v10 = vand.u32 2147483648, %v11143_v48 }
 0xdc0   : > { %v5490_v54 = vmul.f32 0.5, %v5489_v61  ;;  %v5557_v61 = vand.u32 2147483648, %v11139_v39 }
 0xdc1   : > { %v5515_v2 = vsub.f32 1.5, %v5514_v63  ;;  %v5437_v35 = vpop.xlane.xlu0 %5436 }
 0xdc2   : > { %v7361_v17 = vpop.eup %7360  ;;  %v5491_v6 = vsub.f32 1.5, %v5490_v54  ;;  %v5433_v25 = vpop.xlane.xlu1 %5432  ;;  %v11187_v22 = vmul.f32 0.007874016, %v5437_v35 }
 0xdc3   : > { %v5429_v4 = vpop.xlane.xlu2 %5428  ;;  %v7363_v23 = vpop.eup %7362  ;;  %v5516_v50 = vmul.f32 %v7357_v7, %v5515_v2  ;;  %v5548_v60 = vmul.f32 %v7361_v17, %v11139_v39  ;;  %v11172_v26 = vmul.f32 0.007874016, %v5433_v25 }
 0xdc4   : > { %v11169_v5 = vmul.f32 0.007874016, %v5429_v4  ;;  %v7365_v34 = vpop.eup %7364  ;;  %v5492_v45 = vmul.f32 %v7359_v11, %v5491_v6  ;;  %v5524_v8 = vmul.f32 %v7363_v23, %v11141_v20 }
 0xdc5   : > { %v5517_v58 = vmul.f32 %v5516_v50, %v5454_v29  ;;  %v5500_v37 = vmul.f32 %v7365_v34, %v11143_v48  ;;  %v5549_v21 = vmul.f32 %v7361_v17, %v5548_v60 }
 0xdc6   : > { %7366 = vrsqrt.f32 %v11169_v5  ;;  %v5493_v28 = vmul.f32 %v5492_v45, %v5452_v57  ;;  %v5525_v14 = vmul.f32 %v7363_v23, %v5524_v8  ;;  %v5545_v4 = vand.u32 2147483648, %v11169_v5 }
 0xdc7   : > { %v5519_v51 = vsel %vm5518_vm2, %v5454_v29, %v5517_v58  ;;  %v5501_v43 = vmul.f32 %v7365_v34, %v5500_v37  ;;  %v5550_v59 = vmul.f32 0.5, %v5549_v21  ;;  %7368 = vrsqrt.f32 %v11172_v26 }
 0xdc8   : > { %v5495_v38 = vsel %vm5494_vm7, %v5452_v57, %v5493_v28  ;;  %v5522_v44 = vsel %vm5520_vm6, %v5521_v16, %v5519_v51  ;;  %v5526_v27 = vmul.f32 0.5, %v5525_v14  ;;  %vm5542_vm2 = vcmp.eq.f32.partialorder %v11169_v5, inf }
 0xdc9   : > { %v5498_v33 = vsel %vm5496_vm8, %v5497_v40, %v5495_v38  ;;  %v11183_v19 = vadd.f32 1e-06, %v5522_v44  ;;  %v5502_v31 = vmul.f32 0.5, %v5501_v43  ;;  %v5551_v0 = vsub.f32 1.5, %v5550_v59 }
 0xdca   : > { %v11185_v52 = vadd.f32 1e-06, %v5498_v33  ;;  %v5527_v7 = vsub.f32 1.5, %v5526_v27  ;;  %vm5544_vm7 = vcmp.eq.f32.partialorder %v11169_v5, 0.0 }
 0xdcb   : > { %7370 = vrcp.f32 %v11183_v19  ;;  %v5503_v11 = vsub.f32 1.5, %v5502_v31  ;;  %v5552_v30 = vmul.f32 %v7361_v17, %v5551_v0  ;;  %v5734_v54 = vand.u32 2147483647, %v11183_v19 }
 0xdcc   : > { %v11189_v57 = vpop.eup %7366  ;;  %7372 = vrcp.f32 %v11185_v52  ;;  %v5528_v29 = vmul.f32 %v7363_v23, %v5527_v7  ;;  %v5704_v25 = vand.u32 2147483647, %v11185_v52  ;;  %vm5730_vm15 = vweird.f32 %v11183_v19 }
 0xdcd   : > { %v11201_v46 = vpop.eup %7368  ;;  %v5536_v63 = vmul.f32 %v11189_v57, %v11169_v5  ;;  %7374 = vrsqrt.f32 %v11187_v22  ;;  %v5504_v6 = vmul.f32 %v7365_v34, %v5503_v11  ;;  %v5736_v17 = vand.u32 2147483648, %v11183_v19 }
 0xdce   : > { %v5529_v2 = vmul.f32 %v5528_v29, %v11141_v20  ;;  %v5553_v23 = vmul.f32 %v5552_v30, %v11139_v39  ;;  %vm5700_vm1 = vweird.f32 %v11185_v52  ;;  %v5560_v16 = vmul.f32 %v11201_v46, %v11172_v26 }
 0xdcf   : > { %v5505_v45 = vmul.f32 %v5504_v6, %v11143_v48  ;;  %v5537_v34 = vmul.f32 %v11189_v57, %v5536_v63  ;;  %v5706_v58 = vand.u32 2147483648, %v11185_v52  ;;  %vm11230_vm0 = vcmp.eq.f32.partialorder %v5734_v54, 8.507059e+37 }
 0xdd0   : > { %v5531_v60 = vsel %vm5530_vm9, %v11141_v20, %v5529_v2  ;;  %v5555_v28 = vsel %vm5554_vm10, %v11139_v39, %v5553_v23  ;;  %v5737_v35 = vor.u32 1.1754944e-38, %v5736_v17  ;;  %v5561_v31 = vmul.f32 %v11201_v46, %v5560_v16  ;;  %v11269_v2 = vld [vmem:[%s11804_s11] ss:$0 sm:$0xff] }
 0xdd1   : > { %v7371_v50 = vpop.eup %7370  ;;  %v5534_v21 = vsel %vm5532_vm12, %v5533_v36, %v5531_v60  ;;  %v5507_v43 = vsel %vm5506_vm13, %v11143_v48, %v5505_v45  ;;  %v5558_v44 = vsel %vm5556_vm11, %v5557_v61, %v5555_v28  ;;  %v5538_v33 = vmul.f32 0.5, %v5537_v34 }
 0xdd2   : > { %v7373_v8 = vpop.eup %7372  ;;  %v5726_v37 = vmul.f32 %v7371_v50, %v11183_v19  ;;  %v11234_v51 = vadd.f32 1e-06, %v5534_v21  ;;  %v5510_v38 = vsel %vm5508_vm14, %v5509_v10, %v5507_v43  ;;  %vm5731_vm3 = vweird.f32 %v7371_v50 }
 0xdd3   : > { %v5696_v14 = vmul.f32 %v7373_v8, %v11185_v52  ;;  %v11239_v59 = vpop.eup %7374  ;;  %v11247_v0 = vadd.f32 1e-06, %v5510_v38  ;;  %v11249_v36 = vadd.f32 1e-06, %v5558_v44  ;;  %vm5701_vm4 = vweird.f32 %v7373_v8  ;;  %vm5732_vm6 = vmor %vm5730_vm15, %vm5731_vm3  ;;  %v5435_v38 = vpop.xlane.xlu2 %5434 }
 0xdd4   : > { %v5727_v20 = vsub.f32 1.0, %v5726_v37  ;;  %7376 = vrcp.f32 %v11234_v51  ;;  %vm11251_vm5 = vcmp.eq.f32.partialorder %v5704_v25, 8.507059e+37  ;;  %v5751_v39 = vand.u32 2147483648, %v11234_v51  ;;  %vm5702_vm8 = vmor %vm5700_vm1, %vm5701_vm4 }
 0xdd5   : > { %v5697_v27 = vsub.f32 1.0, %v5696_v14  ;;  %v5707_v11 = vor.u32 1.1754944e-38, %v5706_v58  ;;  %v5749_v30 = vand.u32 2147483647, %v11234_v51  ;;  %7378 = vrcp.f32 %v11247_v0 }
 0xdd6   : > { %v5728_v7 = vmul.f32 %v7371_v50, %v5727_v20  ;;  %7380 = vrcp.f32 %v11249_v36  ;;  %v5539_v63 = vsub.f32 1.5, %v5538_v33  ;;  %v5569_v54 = vand.u32 2147483648, %v11172_v26 }
 0xdd7   : > { %v5698_v29 = vmul.f32 %v7373_v8, %v5697_v27  ;;  %vm5745_vm9 = vweird.f32 %v11234_v51  ;;  %v5562_v19 = vmul.f32 0.5, %v5561_v31  ;;  %v5584_v25 = vmul.f32 %v11239_v59, %v11187_v22 }
 0xdd8   : > { %v5729_v10 = vadd.f32 %v7371_v50, %v5728_v7  ;;  %v5752_v45 = vor.u32 1.1754944e-38, %v5751_v39  ;;  %v5719_v52 = vand.u32 2147483647, %v11247_v0  ;;  %vm5566_vm10 = vcmp.eq.f32.partialorder %v11172_v26, inf }
 0xdd9   : > { %v5699_v61 = vadd.f32 %v7373_v8, %v5698_v29  ;;  %vm11282_vm11 = vcmp.eq.f32.partialorder %v5749_v30, 8.507059e+37  ;;  %vm5715_vm12 = vweird.f32 %v11247_v0  ;;  %v5779_v21 = vand.u32 2147483647, %v11249_v36 }
 0xdda   : > { %v5733_v6 = vsel %vm5732_vm6, %v7371_v50, %v5729_v10  ;;  %v7377_v17 = vpop.eup %7376  ;;  %v5781_v28 = vand.u32 2147483648, %v11249_v36  ;;  %v5540_v14 = vmul.f32 %v11189_v57, %v5539_v63  ;;  %v5563_v20 = vsub.f32 1.5, %v5562_v19 }
 0xddb   : > { %v5703_v23 = vsel %vm5702_vm8, %v7373_v8, %v5699_v61  ;;  %v5738_v60 = vsel %vm11230_vm0, %v5737_v35, %v5733_v6  ;;  %v5741_v16 = vmul.f32 %v7377_v17, %v11234_v51  ;;  %v5721_v8 = vand.u32 2147483648, %v11247_v0  ;;  %v7379_v40 = vpop.eup %7378 }
 0xddc   : > { %v5708_v34 = vsel %vm11251_vm5, %v5707_v11, %v5703_v23  ;;  %v5739_v50 = vmul.f32 %v5738_v60, %v11154_v49  ;;  %vm5568_vm13 = vcmp.eq.f32.partialorder %v11172_v26, 0.0  ;;  %v5585_v35 = vmul.f32 %v11239_v59, %v5584_v25  ;;  %v7381_v44 = vpop.eup %7380 }
 0xddd   : > { %v5709_v37 = vmul.f32 %v5708_v34, %v11158_v32  ;;  %v5742_v43 = vsub.f32 1.0, %v5741_v16  ;;  %vm5746_vm14 = vweird.f32 %v7377_v17  ;;  %v5711_v27 = vmul.f32 %v7379_v40, %v11247_v0  ;;  %v5439_v0 = vpop.xlane.xlu1 %5438 }
 0xdde   : > { %v5940_v49 = vadd.f32 %v11269_v2, %v5739_v50  ;;  %v5541_v33 = vmul.f32 %v5540_v14, %v11169_v5  ;;  %vm5716_vm15 = vweird.f32 %v7379_v40  ;;  %v5771_v31 = vmul.f32 %v7381_v44, %v11249_v36  ;;  %vm5747_vm1 = vmor %vm5745_vm9, %vm5746_vm14 }
 0xddf   : > { %v5938_v32 = vadd.f32 %v11269_v2, %v5709_v37  ;;  %v5743_v57 = vmul.f32 %v7377_v17, %v5742_v43  ;;  %v5564_v7 = vmul.f32 %v11201_v46, %v5563_v20  ;;  %v5712_v29 = vsub.f32 1.0, %v5711_v27  ;;  %vm5717_vm4 = vmor %vm5715_vm12, %vm5716_vm15 }
 0xde0   : > { %5956 = vst [vmem:[#allocation18 + $0x10] sm:$0xff] %v5940_v49  ;;  %v5543_v48 = vsel %vm5542_vm2, %v11169_v5, %v5541_v33  ;;  %v5586_v39 = vmul.f32 0.5, %v5585_v35  ;;  %v11303_v11 = vmul.f32 0.007874016, %v5435_v38  ;;  %v5772_v30 = vsub.f32 1.0, %v5771_v31 }
 0xde1   : > { %5954 = vst [vmem:[#allocation18] sm:$0xff] %v5938_v32  ;;  %v5744_v10 = vadd.f32 %v7377_v17, %v5743_v57  ;;  %v5546_v61 = vsel %vm5544_vm7, %v5545_v4, %v5543_v48  ;;  %v5565_v63 = vmul.f32 %v5564_v7, %v11172_v26  ;;  %v5713_v46 = vmul.f32 %v7379_v40, %v5712_v29 }
 0xde2   : > { %v11313_v6 = vadd.f32 1e-06, %v5546_v61  ;;  %v5587_v19 = vsub.f32 1.5, %v5586_v39  ;;  %7382 = vrsqrt.f32 %v11303_v11  ;;  %v5773_v23 = vmul.f32 %v7381_v44, %v5772_v30 }
 0xde3   : > { %v5748_v25 = vsel %vm5747_vm1, %v7377_v17, %v5744_v10  ;;  %vm5776_vm0 = vweird.f32 %v7381_v44  ;;  %v5567_v5 = vsel %vm5566_vm10, %v11172_v26, %v5565_v63  ;;  %v5714_v60 = vadd.f32 %v7379_v40, %v5713_v46 }
 0xde4   : > { %v5753_v4 = vsel %vm11282_vm11, %v5752_v45, %v5748_v25  ;;  %vm5775_vm3 = vweird.f32 %v11249_v36  ;;  %7384 = vrcp.f32 %v11313_v6  ;;  %vm5720_vm5 = vcmp.eq.f32.partialorder %v5719_v52, 8.507059e+37 }
 0xde5   : > { %v5754_v51 = vmul.f32 %v5753_v4, %v11166_v18  ;;  %v5722_v17 = vor.u32 1.1754944e-38, %v5721_v8  ;;  %v5774_v34 = vadd.f32 %v7381_v44, %v5773_v23  ;;  %v5718_v50 = vsel %vm5717_vm4, %v7379_v40, %v5714_v60  ;;  %vm5777_vm2 = vmor %vm5775_vm3, %vm5776_vm0 }
 0xde6   : > { %v5782_v16 = vor.u32 1.1754944e-38, %v5781_v28  ;;  %v5570_v45 = vsel %vm5568_vm13, %v5569_v54, %v5567_v5  ;;  %v5588_v36 = vmul.f32 %v11239_v59, %v5587_v19  ;;  %vm5780_vm6 = vcmp.eq.f32.partialorder %v5779_v21, 8.507059e+37 }
 0xde7   : > { %v5941_v58 = vadd.f32 %v11269_v2, %v5754_v51  ;;  %v5723_v18 = vsel %vm5720_vm5, %v5722_v17, %v5718_v50  ;;  %v5778_v37 = vsel %vm5777_vm2, %v7381_v44, %v5774_v34  ;;  %v11335_v52 = vmul.f32 %v11101_v41, %v11080_v12 }
 0xde8   : > { %v7383_v14 = vpop.eup %7382  ;;  %v5724_v8 = vmul.f32 %v5723_v18, %v11181_v55  ;;  %v5783_v28 = vsel %vm5780_vm6, %v5782_v16, %v5778_v37  ;;  %v11338_v40 = vadd.f32 1e-06, %v5570_v45  ;;  %v11342_v26 = vmul.f32 %v11101_v41, %v11093_v47  ;;  %v5443_v47 = vpop.xlane.xlu0 %5442 }
 0xde9   : > { %5957 = vst [vmem:[#allocation18 + $0x18] sm:$0xff] %v5941_v58  ;;  %v5784_v59 = vmul.f32 %v5783_v28, %v11162_v1  ;;  %v5589_v54 = vmul.f32 %v5588_v36, %v11187_v22  ;;  %v5572_v21 = vmul.f32 %v7383_v14, %v11303_v11  ;;  %v11349_v12 = vmul.f32 %v11101_v41, %v11083_v62 }
 0xdea   : > { %v7385_v49 = vpop.eup %7384  ;;  %v11353_v55 = vmul.f32 %v11101_v41, %v11104_v3  ;;  %v5939_v43 = vadd.f32 %v11269_v2, %v5724_v8  ;;  %7386 = vrcp.f32 %v11338_v40  ;;  %vm5590_vm7 = vcmp.eq.f32.partialorder %v11187_v22, inf }
 0xdeb   : > { %v5943_v1 = vadd.f32 %v11269_v2, %v5784_v59  ;;  %v5756_v20 = vmul.f32 %v7385_v49, %v11313_v6  ;;  %v5593_v35 = vand.u32 2147483648, %v11187_v22  ;;  %v5591_v62 = vsel %vm5590_vm7, %v11187_v22, %v5589_v54 }
 0xdec   : > { %5955 = vst [vmem:[#allocation18 + $0x8] sm:$0xff] %v5939_v43  ;;  %vm5592_vm8 = vcmp.eq.f32.partialorder %v11187_v22, 0.0  ;;  %v5573_v3 = vmul.f32 %v7383_v14, %v5572_v21  ;;  %v11363_v38 = vmul.f32 0.007874016, %v5439_v0  ;;  %v5764_v32 = vand.u32 2147483647, %v11313_v6 }
 0xded   : > { %5959 = vst [vmem:[#allocation18 + $0x28] sm:$0xff] %v5943_v1  ;;  %v5757_v44 = vsub.f32 1.0, %v5756_v20  ;;  %v5594_v27 = vsel %vm5592_vm8, %v5593_v35, %v5591_v62  ;;  %v11366_v33 = vmul.f32 0.007874016, %v5443_v47  ;;  %v5766_v57 = vand.u32 2147483648, %v11313_v6 }
 0xdee   : > { %v11369_v31 = vadd.f32 1e-06, %v5594_v27  ;;  %v5574_v7 = vmul.f32 0.5, %v5573_v3  ;;  %7388 = vrsqrt.f32 %v11363_v38  ;;  %v11374_v22 = vmul.f32 %v11101_v41, %v11108_v56  ;;  %v5441_v41 = vpop.xlane.xlu2 %5440  ;;  %v5445_v56 = vpop.xlane.xlu1 %5444 }
 0xdef   : > { %v5758_v29 = vmul.f32 %v7385_v49, %v5757_v44  ;;  %vm5761_vm9 = vweird.f32 %v7385_v49  ;;  %7390 = vrsqrt.f32 %v11366_v33  ;;  %vm5760_vm10 = vweird.f32 %v11313_v6 }
 0xdf0   : > { %v7387_v48 = vpop.eup %7386  ;;  %7392 = vrcp.f32 %v11369_v31  ;;  %vm5578_vm11 = vcmp.eq.f32.partialorder %v11303_v11, inf  ;;  %vm5580_vm12 = vcmp.eq.f32.partialorder %v11303_v11, 0.0  ;;  %vm5765_vm13 = vcmp.eq.f32.partialorder %v5764_v32, 8.507059e+37  ;;  %vm5762_vm14 = vmor %vm5760_vm10, %vm5761_vm9 }
 0xdf1   : > { %v5759_v39 = vadd.f32 %v7385_v49, %v5758_v29  ;;  %v5786_v10 = vmul.f32 %v7387_v48, %v11338_v40  ;;  %v5575_v30 = vsub.f32 1.5, %v5574_v7  ;;  %v5767_v61 = vor.u32 1.1754944e-38, %v5766_v57 }
 0xdf2   : > { %v5794_v63 = vand.u32 2147483647, %v11338_v40  ;;  %v5796_v46 = vand.u32 2147483648, %v11338_v40  ;;  %v5581_v6 = vand.u32 2147483648, %v11303_v11  ;;  %vm5790_vm15 = vweird.f32 %v11338_v40 }
 0xdf3   : > { %v5763_v19 = vsel %vm5762_vm14, %v7385_v49, %v5759_v39  ;;  %v5787_v25 = vsub.f32 1.0, %v5786_v10  ;;  %v5576_v23 = vmul.f32 %v7383_v14, %v5575_v30  ;;  %vm5791_vm1 = vweird.f32 %v7387_v48  ;;  %v5449_v49 = vpop.xlane.xlu0 %5448 }
 0xdf4   : > { %v7389_v5 = vpop.eup %7388  ;;  %v5768_v4 = vsel %vm5765_vm13, %v5767_v61, %v5763_v19  ;;  %v11386_v60 = vmul.f32 0.007874016, %v5441_v41  ;;  %v11388_v51 = vmul.f32 0.007874016, %v5445_v56  ;;  %vm11393_vm0 = vcmp.eq.f32.partialorder %v5794_v63, 8.507059e+37  ;;  %vm5792_vm3 = vmor %vm5790_vm15, %vm5791_vm1 }
 0xdf5   : > { %v7391_v17 = vpop.eup %7390  ;;  %v5769_v34 = vmul.f32 %v5768_v4, %v11150_v53  ;;  %v5788_v50 = vmul.f32 %v7387_v48, %v5787_v25  ;;  %v5577_v16 = vmul.f32 %v5576_v23, %v11303_v11  ;;  %v5596_v45 = vmul.f32 %v7389_v5, %v11363_v38 }
 0xdf6   : > { %v7393_v36 = vpop.eup %7392  ;;  %v5797_v18 = vor.u32 1.1754944e-38, %v5796_v46  ;;  %v5620_v37 = vmul.f32 %v7391_v17, %v11366_v33  ;;  %7394 = vrsqrt.f32 %v11386_v60  ;;  %v5824_v8 = vand.u32 2147483647, %v11369_v31  ;;  %v5447_v56 = vpop.xlane.xlu2 %5446 }
 0xdf7   : > { %v5942_v0 = vadd.f32 %v11269_v2, %v5769_v34  ;;  %v5789_v14 = vadd.f32 %v7387_v48, %v5788_v50  ;;  %v5816_v53 = vmul.f32 %v7393_v36, %v11369_v31  ;;  %v5826_v28 = vand.u32 2147483648, %v11369_v31 }
 0xdf8   : > { %v5579_v59 = vsel %vm5578_vm11, %v11303_v11, %v5577_v16  ;;  %v5597_v54 = vmul.f32 %v7389_v5, %v5596_v45  ;;  %v5621_v21 = vmul.f32 %v7391_v17, %v5620_v37  ;;  %7396 = vrsqrt.f32 %v11388_v51 }
 0xdf9   : > { %5958 = vst [vmem:[#allocation18 + $0x20] sm:$0xff] %v5942_v0  ;;  %v5793_v43 = vsel %vm5792_vm3, %v7387_v48, %v5789_v14  ;;  %v5817_v47 = vsub.f32 1.0, %v5816_v53  ;;  %v5582_v1 = vsel %vm5580_vm12, %v5581_v6, %v5579_v59  ;;  %vm5821_vm4 = vweird.f32 %v7393_v36 }
 0xdfa   : > { %v5798_v40 = vsel %vm11393_vm0, %v5797_v18, %v5793_v43  ;;  %v11414_v20 = vadd.f32 1e-06, %v5582_v1  ;;  %v5598_v35 = vmul.f32 0.5, %v5597_v54  ;;  %v5622_v62 = vmul.f32 0.5, %v5621_v21 }
 0xdfb   : > { %v5799_v3 = vmul.f32 %v5798_v40, %v11349_v12  ;;  %v5818_v44 = vmul.f32 %v7393_v36, %v5817_v47  ;;  %v11417_v32 = vmul.f32 0.007874016, %v5449_v49  ;;  %vm5820_vm5 = vweird.f32 %v11369_v31 }
 0xdfc   : > { %v7395_v27 = vpop.eup %7394  ;;  %7398 = vrcp.f32 %v11414_v20  ;;  %vm5602_vm2 = vcmp.eq.f32.partialorder %v11363_v38, inf  ;;  %vm5604_vm6 = vcmp.eq.f32.partialorder %v11363_v38, 0.0  ;;  %v5599_v7 = vsub.f32 1.5, %v5598_v35  ;;  %vm5822_vm7 = vmor %vm5820_vm5, %vm5821_vm4 }
 0xdfd   : > { %v5944_v11 = vadd.f32 %v11269_v2, %v5799_v3  ;;  %v5819_v57 = vadd.f32 %v7393_v36, %v5818_v44  ;;  %v5623_v29 = vsub.f32 1.5, %v5622_v62  ;;  %vm5825_vm8 = vcmp.eq.f32.partialorder %v5824_v8, 8.507059e+37 }
 0xdfe   : > { %v5827_v12 = vor.u32 1.1754944e-38, %v5826_v28  ;;  %v5605_v48 = vand.u32 2147483648, %v11363_v38  ;;  %v5608_v39 = vmul.f32 %v7395_v27, %v11386_v60  ;;  %v7397_v10 = vpop.eup %7396  ;;  %v5600_v30 = vmul.f32 %v7389_v5, %v5599_v7 }
 0xdff   : > { %5960 = vst [vmem:[#allocation18 + $0x30] sm:$0xff] %v5944_v11  ;;  %v5823_v31 = vsel %vm5822_vm7, %v7393_v36, %v5819_v57  ;;  %v5624_v41 = vmul.f32 %v7391_v17, %v5623_v29  ;;  %7400 = vrsqrt.f32 %v11417_v32  ;;  %vm5626_vm9 = vcmp.eq.f32.partialorder %v11366_v33, inf }
 0xe00   : > { %v5828_v61 = vsel %vm5825_vm8, %v5827_v12, %v5823_v31  ;;  %v5609_v63 = vmul.f32 %v7395_v27, %v5608_v39  ;;  %v5632_v46 = vmul.f32 %v7397_v10, %v11388_v51  ;;  %v5601_v19 = vmul.f32 %v5600_v30, %v11363_v38 }
 0xe01   : > { %v5829_v6 = vmul.f32 %v5828_v61, %v11335_v52  ;;  %v5625_v25 = vmul.f32 %v5624_v41, %v11366_v33  ;;  %vm5628_vm10 = vcmp.eq.f32.partialorder %v11366_v33, 0.0  ;;  %v5629_v5 = vand.u32 2147483648, %v11366_v33 }
 0xe02   : > { %v7399_v23 = vpop.eup %7398  ;;  %v5610_v4 = vmul.f32 0.5, %v5609_v63  ;;  %v5633_v17 = vmul.f32 %v7397_v10, %v5632_v46  ;;  %v11434_v34 = vmul.f32 0.007874016, %v5447_v56  ;;  %v5811_v45 = vand.u32 2147483648, %v11414_v20 }
 0xe03   : > { %v5946_v50 = vadd.f32 %v11269_v2, %v5829_v6  ;;  %v5801_v16 = vmul.f32 %v7399_v23, %v11414_v20  ;;  %v5603_v52 = vsel %vm5602_vm2, %v11363_v38, %v5601_v19  ;;  %v5627_v58 = vsel %vm5626_vm9, %v11366_v33, %v5625_v25 }
 0xe04   : > { %v5606_v36 = vsel %vm5604_vm6, %v5605_v48, %v5603_v52  ;;  %v5611_v18 = vsub.f32 1.5, %v5610_v4  ;;  %v5634_v37 = vmul.f32 0.5, %v5633_v17  ;;  %v5630_v8 = vsel %vm5628_vm10, %v5629_v5, %v5627_v58 }
 0xe05   : > { %v7401_v0 = vpop.eup %7400  ;;  %5962 = vst [vmem:[#allocation18 + $0x40] sm:$0xff] %v5946_v50  ;;  %v5802_v14 = vsub.f32 1.0, %v5801_v16  ;;  %v11447_v53 = vadd.f32 1e-06, %v5606_v36  ;;  %7402 = vrsqrt.f32 %v11434_v34  ;;  %v11452_v28 = vadd.f32 1e-06, %v5630_v8 }
 0xe06   : > { %v5612_v38 = vmul.f32 %v7395_v27, %v5611_v18  ;;  %v5635_v59 = vsub.f32 1.5, %v5634_v37  ;;  %v5656_v54 = vmul.f32 %v7401_v0, %v11417_v32  ;;  %vm5806_vm11 = vweird.f32 %v7399_v23 }
 0xe07   : > { %v5803_v21 = vmul.f32 %v7399_v23, %v5802_v14  ;;  %v5809_v49 = vand.u32 2147483647, %v11414_v20  ;;  %7404 = vrcp.f32 %v11447_v53  ;;  %vm5614_vm12 = vcmp.eq.f32.partialorder %v11386_v60, inf }
 0xe08   : > { %7406 = vrcp.f32 %v11452_v28  ;;  %vm5616_vm13 = vcmp.eq.f32.partialorder %v11386_v60, 0.0  ;;  %v5617_v33 = vand.u32 2147483648, %v11386_v60  ;;  %vm5805_vm14 = vweird.f32 %v11414_v20 }
 0xe09   : > { %v5804_v43 = vadd.f32 %v7399_v23, %v5803_v21  ;;  %v5613_v47 = vmul.f32 %v5612_v38, %v11386_v60  ;;  %vm5638_vm15 = vcmp.eq.f32.partialorder %v11388_v51, inf  ;;  %vm5807_vm1 = vmor %vm5805_vm14, %vm5806_vm11  ;;  %v5812_v1 = vor.u32 1.1754944e-38, %v5811_v45 }
 0xe0a   : > { %v5636_v40 = vmul.f32 %v7397_v10, %v5635_v59  ;;  %vm5640_vm0 = vcmp.eq.f32.partialorder %v11388_v51, 0.0  ;;  %v5657_v35 = vmul.f32 %v7401_v0, %v5656_v54  ;;  %vm5810_vm3 = vcmp.eq.f32.partialorder %v5809_v49, 8.507059e+37 }
 0xe0b   : > { %v11465_v62 = vpop.eup %7402  ;;  %v5808_v3 = vsel %vm5807_vm1, %v7399_v23, %v5804_v43  ;;  %v5615_v44 = vsel %vm5614_vm12, %v11386_v60, %v5613_v47  ;;  %v5641_v27 = vand.u32 2147483648, %v11388_v51  ;;  %vm5662_vm4 = vcmp.eq.f32.partialorder %v11417_v32, inf }
 0xe0c   : > { %v5813_v11 = vsel %vm5810_vm3, %v5812_v1, %v5808_v3  ;;  %v5618_v20 = vsel %vm5616_vm13, %v5617_v33, %v5615_v44  ;;  %v5637_v57 = vmul.f32 %v5636_v40, %v11388_v51  ;;  %v5658_v7 = vmul.f32 0.5, %v5657_v35 }
 0xe0d   : > { %v7405_v29 = vpop.eup %7404  ;;  %v5814_v12 = vmul.f32 %v5813_v11, %v11342_v26  ;;  %v11473_v48 = vadd.f32 1e-06, %v5618_v20  ;;  %v5644_v39 = vmul.f32 %v11465_v62, %v11434_v34  ;;  %vm5664_vm5 = vcmp.eq.f32.partialorder %v11417_v32, 0.0 }
 0xe0e   : > { %v7407_v10 = vpop.eup %7406  ;;  %v5831_v31 = vmul.f32 %v7405_v29, %v11447_v53  ;;  %v5639_v60 = vsel %vm5638_vm15, %v11388_v51, %v5637_v57  ;;  %v5659_v30 = vsub.f32 1.5, %v5658_v7  ;;  %v5665_v41 = vand.u32 2147483648, %v11417_v32 }
 0xe0f   : > { %v5945_v26 = vadd.f32 %v11269_v2, %v5814_v12  ;;  %vm5835_vm2 = vweird.f32 %v11447_v53  ;;  %v5861_v56 = vmul.f32 %v7407_v10, %v11452_v28  ;;  %7408 = vrcp.f32 %v11473_v48 }
 0xe10   : > { %v5832_v61 = vsub.f32 1.0, %v5831_v31  ;;  %v5839_v63 = vand.u32 2147483647, %v11447_v53  ;;  %v5841_v46 = vand.u32 2147483648, %v11447_v53  ;;  %v5869_v6 = vand.u32 2147483647, %v11452_v28 }
 0xe11   : > { %5961 = vst [vmem:[#allocation18 + $0x38] sm:$0xff] %v5945_v26  ;;  %v5862_v19 = vsub.f32 1.0, %v5861_v56  ;;  %v5642_v25 = vsel %vm5640_vm0, %v5641_v27, %v5639_v60  ;;  %v5660_v23 = vmul.f32 %v7401_v0, %v5659_v30  ;;  %v5645_v5 = vmul.f32 %v11465_v62, %v5644_v39 }
 0xe12   : > { %v5833_v4 = vmul.f32 %v7405_v29, %v5832_v61  ;;  %vm5836_vm6 = vweird.f32 %v7405_v29  ;;  %v5871_v17 = vand.u32 2147483648, %v11452_v28  ;;  %v11495_v50 = vadd.f32 1e-06, %v5642_v25 }
 0xe13   : > { %v5863_v16 = vmul.f32 %v7407_v10, %v5862_v19  ;;  %vm5866_vm7 = vweird.f32 %v7407_v10  ;;  %v5661_v45 = vmul.f32 %v5660_v23, %v11417_v32  ;;  %v5646_v52 = vmul.f32 0.5, %v5645_v5  ;;  %vm5837_vm10 = vmor %vm5835_vm2, %vm5836_vm6 }
 0xe14   : > { %v5834_v36 = vadd.f32 %v7405_v29, %v5833_v4  ;;  %vm5840_vm8 = vcmp.eq.f32.partialorder %v5839_v63, 8.507059e+37  ;;  %vm5865_vm9 = vweird.f32 %v11452_v28  ;;  %7410 = vrcp.f32 %v11495_v50  ;;  %v5451_v28 = vpop.xlane.xlu1 %5450 }
 0xe15   : > { %v7409_v51 = vpop.eup %7408  ;;  %v5842_v58 = vor.u32 1.1754944e-38, %v5841_v46  ;;  %v5864_v18 = vadd.f32 %v7407_v10, %v5863_v16  ;;  %v5663_v37 = vsel %vm5662_vm4, %v11417_v32, %v5661_v45  ;;  %v5647_v0 = vsub.f32 1.5, %v5646_v52  ;;  %vm5867_vm11 = vmor %vm5865_vm9, %vm5866_vm7 }
 0xe16   : > { %v5838_v14 = vsel %vm5837_vm10, %v7405_v29, %v5834_v36  ;;  %vm5870_vm12 = vcmp.eq.f32.partialorder %v5869_v6, 8.507059e+37  ;;  %v5872_v8 = vor.u32 1.1754944e-38, %v5871_v17  ;;  %v5846_v38 = vmul.f32 %v7409_v51, %v11473_v48 }
 0xe17   : > { %v5843_v59 = vsel %vm5840_vm8, %v5842_v58, %v5838_v14  ;;  %v5868_v54 = vsel %vm5867_vm11, %v7407_v10, %v5864_v18  ;;  %v5854_v21 = vand.u32 2147483647, %v11473_v48  ;;  %v5666_v53 = vsel %vm5664_vm5, %v5665_v41, %v5663_v37 }
 0xe18   : > { %v5844_v49 = vmul.f32 %v5843_v59, %v11374_v22  ;;  %v5873_v33 = vsel %vm5870_vm12, %v5872_v8, %v5868_v54  ;;  %v5847_v43 = vsub.f32 1.0, %v5846_v38  ;;  %v11510_v47 = vadd.f32 1e-06, %v5666_v53 }
 0xe19   : > { %v5874_v1 = vmul.f32 %v5873_v33, %v11353_v55  ;;  %v5856_v40 = vand.u32 2147483648, %v11473_v48  ;;  %v5648_v35 = vmul.f32 %v11465_v62, %v5647_v0  ;;  %v11515_v3 = vmul.f32 0.007874016, %v5451_v28 }
 0xe1a   : > { %v7411_v44 = vpop.eup %7410  ;;  %v5947_v27 = vadd.f32 %v11269_v2, %v5844_v49  ;;  %v5848_v11 = vmul.f32 %v7409_v51, %v5847_v43  ;;  %vm5851_vm13 = vweird.f32 %v7409_v51  ;;  %7412 = vrcp.f32 %v11510_v47 }
 0xe1b   : > { %v5949_v22 = vadd.f32 %v11269_v2, %v5874_v1  ;;  %v5876_v32 = vmul.f32 %v7411_v44, %v11495_v50  ;;  %vm5650_vm14 = vcmp.eq.f32.partialorder %v11434_v34, inf  ;;  %vm5652_vm15 = vcmp.eq.f32.partialorder %v11434_v34, 0.0 }
 0xe1c   : > { %5963 = vst [vmem:[#allocation18 + $0x48] sm:$0xff] %v5947_v27  ;;  %v5849_v55 = vadd.f32 %v7409_v51, %v5848_v11  ;;  %vm5850_vm1 = vweird.f32 %v11473_v48  ;;  %v5649_v62 = vmul.f32 %v5648_v35, %v11434_v34  ;;  %7414 = vrsqrt.f32 %v11515_v3 }
 0xe1d   : > { %5965 = vst [vmem:[#allocation18 + $0x58] sm:$0xff] %v5949_v22  ;;  %vm5852_vm0 = vmor %vm5850_vm1, %vm5851_vm13  ;;  %vm5855_vm3 = vcmp.eq.f32.partialorder %v5854_v21, 8.507059e+37  ;;  %v5857_v20 = vor.u32 1.1754944e-38, %v5856_v40  ;;  %v5877_v57 = vsub.f32 1.0, %v5876_v32  ;;  %v5653_v7 = vand.u32 2147483648, %v11434_v34 }
 0xe1e   : > { %v5853_v29 = vsel %vm5852_vm0, %v7409_v51, %v5849_v55  ;;  %v5884_v12 = vand.u32 2147483647, %v11495_v50  ;;  %v5886_v39 = vand.u32 2147483648, %v11495_v50  ;;  %v5651_v48 = vsel %vm5650_vm14, %v11434_v34, %v5649_v62 }
 0xe1f   : > { %v5858_v10 = vsel %vm5855_vm3, %v5857_v20, %v5853_v29  ;;  %v5878_v31 = vmul.f32 %v7411_v44, %v5877_v57  ;;  %vm5881_vm4 = vweird.f32 %v7411_v44  ;;  %v5654_v60 = vsel %vm5652_vm15, %v5653_v7, %v5651_v48 }
 0xe20   : > { %v7413_v30 = vpop.eup %7412  ;;  %v5859_v41 = vmul.f32 %v5858_v10, %v11115_v9  ;;  %v5692_v26 = vadd.f32 1e-06, %v5654_v60  ;;  %vm5880_vm5 = vweird.f32 %v11495_v50  ;;  %v5887_v6 = vor.u32 1.1754944e-38, %v5886_v39 }
 0xe21   : > { %v5879_v56 = vadd.f32 %v7411_v44, %v5878_v31  ;;  %v5906_v61 = vmul.f32 %v7413_v30, %v11510_v47  ;;  %vm5882_vm2 = vmor %vm5880_vm5, %vm5881_vm4  ;;  %vm5885_vm6 = vcmp.eq.f32.partialorder %v5884_v12, 8.507059e+37  ;;  %v5914_v9 = vand.u32 2147483647, %v11510_v47 }
 0xe22   : > { %v7415_v63 = vpop.eup %7414  ;;  %v5948_v46 = vadd.f32 %v11269_v2, %v5859_v41  ;;  %7416 = vrcp.f32 %v5692_v26  ;;  %v5916_v5 = vand.u32 2147483648, %v11510_v47  ;;  %vm5911_vm7 = vweird.f32 %v7413_v30 }
 0xe23   : > { %v5883_v19 = vsel %vm5882_vm2, %v7411_v44, %v5879_v56  ;;  %v5907_v25 = vsub.f32 1.0, %v5906_v61  ;;  %v5668_v34 = vmul.f32 %v7415_v63, %v11515_v3  ;;  %vm5910_vm8 = vweird.f32 %v11510_v47 }
 0xe24   : > { %5964 = vst [vmem:[#allocation18 + $0x50] sm:$0xff] %v5948_v46  ;;  %v5888_v23 = vsel %vm5885_vm6, %v5887_v6, %v5883_v19  ;;  %vm5912_vm9 = vmor %vm5910_vm8, %vm5911_vm7  ;;  %v5917_v51 = vor.u32 1.1754944e-38, %v5916_v5  ;;  %vm5915_vm10 = vcmp.eq.f32.partialorder %v5914_v9, 8.507059e+37  ;;  %v5899_v38 = vand.u32 2147483647, %v5692_v26 }
 0xe25   : > { %v5889_v4 = vmul.f32 %v5888_v23, %v11132_v42  ;;  %v5908_v17 = vmul.f32 %v7413_v30, %v5907_v25  ;;  %v5669_v50 = vmul.f32 %v7415_v63, %v5668_v34  ;;  %v5901_v28 = vand.u32 2147483648, %v5692_v26 }
 0xe26   : > { %vm5674_vm12 = vcmp.eq.f32.partialorder %v11515_v3, inf  ;;  %v5677_v53 = vand.u32 2147483648, %v11515_v3  ;;  %vm5895_vm13 = vweird.f32 %v5692_v26  ;;  %vm5676_vm14 = vcmp.eq.f32.partialorder %v11515_v3, 0.0 }
 0xe27   : > { %v5950_v16 = vadd.f32 %v11269_v2, %v5889_v4  ;;  %v5909_v45 = vadd.f32 %v7413_v30, %v5908_v17  ;;  %v5670_v52 = vmul.f32 0.5, %v5669_v50  ;;  %vm5900_vm1 = vcmp.eq.f32.partialorder %v5899_v38, 8.507059e+37 }
 0xe28   : > { %v7417_v36 = vpop.eup %7416 }
 0xe29   : > { %5966 = vst [vmem:[#allocation18 + $0x60] sm:$0xff] %v5950_v16  ;;  %v5913_v58 = vsel %vm5912_vm9, %v7413_v30, %v5909_v45  ;;  %v5891_v18 = vmul.f32 %v7417_v36, %v5692_v26  ;;  %v5671_v37 = vsub.f32 1.5, %v5670_v52  ;;  %vm5896_vm11 = vweird.f32 %v7417_v36 }
 0xe2a   : > { %v5918_v0 = vsel %vm5915_vm10, %v5917_v51, %v5913_v58  ;;  %vm5897_vm15 = vmor %vm5895_vm13, %vm5896_vm11 }
 0xe2b   : > { %v5919_v42 = vmul.f32 %v5918_v0, %v11126_v15  ;;  %v5892_v14 = vsub.f32 1.0, %v5891_v18  ;;  %v5672_v8 = vmul.f32 %v7415_v63, %v5671_v37  ;;  %v5902_v15 = vor.u32 1.1754944e-38, %v5901_v28 }
 0xe2d   : > { %v5952_v59 = vadd.f32 %v11269_v2, %v5919_v42  ;;  %v5893_v54 = vmul.f32 %v7417_v36, %v5892_v14  ;;  %v5673_v21 = vmul.f32 %v5672_v8, %v11515_v3 }
 0xe2f   : > { %5968 = vst [vmem:[#allocation18 + $0x70] sm:$0xff] %v5952_v59  ;;  %v5894_v49 = vadd.f32 %v7417_v36, %v5893_v54  ;;  %v5675_v33 = vsel %vm5674_vm12, %v11515_v3, %v5673_v21 }
 0xe30   : > { %v5678_v43 = vsel %vm5676_vm14, %v5677_v53, %v5675_v33 }
 0xe31   : > { %v5898_v47 = vsel %vm5897_vm15, %v7417_v36, %v5894_v49  ;;  %v5694_v1 = vadd.f32 1e-06, %v5678_v43 }
 0xe32   : > { %v5903_v40 = vsel %vm5900_vm1, %v5902_v15, %v5898_v47 }
 0xe33   : > { %v5904_v35 = vmul.f32 %v5903_v40, %v11129_v13  ;;  %7418 = vrcp.f32 %v5694_v1  ;;  %v5931_v32 = vand.u32 2147483648, %v5694_v1  ;;  %v5929_v3 = vand.u32 2147483647, %v5694_v1 }
 0xe34   : > { %vm5925_vm3 = vweird.f32 %v5694_v1 }
 0xe35   : > { %v5951_v44 = vadd.f32 %v11269_v2, %v5904_v35  ;;  %v5932_v20 = vor.u32 1.1754944e-38, %v5931_v32  ;;  %vm5930_vm5 = vcmp.eq.f32.partialorder %v5929_v3, 8.507059e+37 }
 0xe37   : > { %5967 = vst [vmem:[#allocation18 + $0x68] sm:$0xff] %v5951_v44 }
 0xe39   : > { %v7419_v27 = vpop.eup %7418 }
 0xe3a   : > { %v5921_v11 = vmul.f32 %v7419_v27, %v5694_v1  ;;  %vm5926_vm0 = vweird.f32 %v7419_v27 }
 0xe3b   : > { %vm5927_vm4 = vmor %vm5925_vm3, %vm5926_vm0 }
 0xe3c   : > { %v5922_v22 = vsub.f32 1.0, %v5921_v11 }
 0xe3e   : > { %v5923_v55 = vmul.f32 %v7419_v27, %v5922_v22 }
 0xe40   : > { %v5924_v62 = vadd.f32 %v7419_v27, %v5923_v55 }
 0xe42   : > { %v5928_v57 = vsel %vm5927_vm4, %v7419_v27, %v5924_v62 }
 0xe43   : > { %v5933_v7 = vsel %vm5930_vm5, %v5932_v20, %v5928_v57 }
 0xe44   : > { %v5934_v13 = vmul.f32 %v5933_v7, %v11137_v24 }
 0xe46   : > { %v5953_v29 = vadd.f32 %v11269_v2, %v5934_v13 }
 0xe48   : > { %5969 = vst [vmem:[#allocation18 + $0x78] sm:$0xff] %v5953_v29 }
 0xe49 PF: > { %p6760_p10 = scmp.eq.s32.totalorder %s7975_s2, 1  ;;  %s7848_s30 = smov [#allocation18]  }
 0xe4a   : > { %s5975_s15 = sshll.u32 %s7848_s30, 4  ;;  %s11809_s26 = sld [smem:[#allocation67_spill]]  ;;  %s5976_s15 = int_to_ptr.vmem [resolvable:$true] %s5975_s15 }
 0xe4b   : > { %s7849_s25 = smov 128   ;;  %s7850_s1 = smov 8  }
 0xe50   : > { %s5977_s23 = sshll.u32 %s11809_s26, 4  ;;  %s5978_s23 = int_to_ptr.hbm [resolvable:$true] %s5977_s23 }
 0xe51   : > { %6713 = dma.vmem_to_hbm [thread:$0]  (%p6760_p10), %s5976_s15, 2048, %s5978_s23, [#allocation5], %s7849_s25, %s7849_s25, %s7850_s1  }
 0xe52   : > { %7811 = dma.done.wait (%p6760_p10), [#allocation5], 2048  }
 0xe53   : > { %7813 = vsyncadd (%p6760_p10), [#allocation5], 4294965248 }
 0xe54 PF: > { %s11810_s24 = sld [smem:[#allocation25_spill]]  ;;  %s11813_s1 = smov %s7820_s22 }
 0xe55   : > { %s11811_s0 = sld [smem:[#allocation24_spill]] }
 0xe56   : > { %s11812_s23 = sld [smem:[#allocation26_spill]] }
 0xe5a   : > { %p31_p0 = scmp.ge.s32.totalorder %s11810_s24, 4  }
 0xe5b   : > { %s11814_s22 = smov %s11811_s0 }
 0xe5c   :  { %33 = sbr.rel (!%p31_p0) target bundleno = 24 (0x18), region = 245 }
 0xe61   :  { %5994 = vsyncpa [#allocation4], 1 }
 0xe62   :  { %5996 = vsyncpa [#allocation4 + $0x1], 1 }
 0xe63   :  { %5997 = vsyncpa [#allocation7], 1 }
 0xe64   :  { %5998 = vsyncpa [#allocation10], 1 }
 0xe65   :  { %5999 = vsyncpa [#allocation5], 1 }
 0xe66   :  { %6001 = vsyncpa [#allocation5 + $0x1], 1 }

</bundles_post_ra>
